<compile_context>
chip_gen: v6e
topology: v6e:2x2x1
jax: 0.10.0
libtpu: 0.0.40
codegen_flags: <defaults>
</compile_context>

<pallas_src>
import functools

import jax
import jax.numpy as jnp
from jax.experimental import pallas as pl
from jax.experimental.pallas import tpu as pltpu

_SMALL_TOTAL = 64 * 1024  # below this, plain jnp beats kernel launch overhead


@functools.lru_cache(maxsize=1)
def _tile_bytes_and_vmem_limit():
    """Per-generation tile size: 2 MiB on v5e, 4 MiB on v6e/v7x."""
    try:
        kind = jax.devices()[0].device_kind.lower()
    except Exception:  # pragma: no cover - defensive, e.g. no backend yet
        kind = ""
    if "v5" in kind:
        # v5e: default scoped VMEM is only 16 MiB; 2 MiB tiles -> 8 MiB double-buffered.
        return 2 * 1024 * 1024, 32 * 1024 * 1024
    # v6e / v7x: 4 MiB tiles -> 16 MiB with in+out double-buffering, well under the
    # 32 MiB scoped limit (leaves headroom for internal scratch on v7x).
    return 4 * 1024 * 1024, 32 * 1024 * 1024


def _wn_conv1x1_kernel(v_ref, g_ref, b_ref, x_ref, o_ref):
    # Scalars live in SMEM; weight-norm re-parameterization on the scalar unit.
    v = v_ref[0]
    g = g_ref[0]
    b = b_ref[0]
    w = g * v / jnp.abs(v)  # ||v|| over dims (1,2) of a (1,1,1) tensor == |v|
    o_ref[...] = (x_ref[...] * w + b).astype(o_ref.dtype)  # 1x1 Conv1d == scale + bias


def weight_normed_conv1d(x, v, g, b):
    """x: (N, 1, L); v: (1,1,1); g: (1,1,1); b: (1,).  Returns (N, 1, L)."""
    n, c, l = x.shape
    assert c == 1
    dtype = x.dtype
    total = n * l
    itemsize = jnp.dtype(dtype).itemsize

    # --- tiny-input fallback: launch + re-layout cost would dominate -------------
    if total < _SMALL_TOTAL:
        v_s = v.reshape(())
        g_s = g.reshape(())
        b_s = b.reshape(())
        w = g_s * v_s / jnp.abs(v_s)
        return (x * w + b_s).astype(dtype)

    # --- adaptive lane-dense re-layout (wrapper plumbing only, no compute) -------
    # Largest of {512, 256, 128} dividing total -> no pad, no output slice.
    lanes = None
    for cand in (512, 256, 128):
        if total % cand == 0:
            lanes = cand
            break
    if lanes is None:
        lanes = 128
        padded = pl.cdiv(total, lanes) * lanes  # rare path: pad <= 127 elements
    else:
        padded = total
    rows = padded // lanes

    tile_bytes, vmem_limit = _tile_bytes_and_vmem_limit()
    block_rows = max(8, tile_bytes // (lanes * itemsize))  # multiple of 8 by design
    if rows <= block_rows:
        block_rows = rows  # single full-slab tile (block dim == full array dim)
    grid = (pl.cdiv(rows, block_rows),)  # ragged last tile is masked by Pallas

    flat = x.reshape(total)
    if padded != total:
        flat = jnp.pad(flat, (0, padded - total))
    x2d = flat.reshape(rows, lanes)

    out2d = pl.pallas_call(
        _wn_conv1x1_kernel,
        out_shape=jax.ShapeDtypeStruct((rows, lanes), dtype),
        grid=grid,
        in_specs=[
            pl.BlockSpec(memory_space=pltpu.MemorySpace.SMEM),     # v
            pl.BlockSpec(memory_space=pltpu.MemorySpace.SMEM),     # g
            pl.BlockSpec(memory_space=pltpu.MemorySpace.SMEM),     # b
            pl.BlockSpec((block_rows, lanes), lambda i: (i, 0)),   # x tile
        ],
        out_specs=pl.BlockSpec((block_rows, lanes), lambda i: (i, 0)),
        compiler_params=pltpu.CompilerParams(
            dimension_semantics=("parallel",),  # v7x: shard row tiles over 2 TCs
            vmem_limit_bytes=vmem_limit,
        ),
        cost_estimate=pl.CostEstimate(
            flops=2 * padded,                   # one mul + one add per element
            transcendentals=0,
            bytes_accessed=2 * padded * itemsize,
        ),
    )(v.reshape(1), g.reshape(1), b.reshape(1), x2d)

    out_flat = out2d.reshape(padded)
    if padded != total:
        out_flat = out_flat[:total]
    return out_flat.reshape(n, 1, l)


def _reference(x, v, g, b):
    w_eff = g * v / jnp.sqrt(jnp.sum(v * v, axis=(1, 2), keepdims=True))
    return x * w_eff[0, 0, 0] + b[0]


if __name__ == "__main__":
    key = jax.random.PRNGKey(0)
    k_x, k_v, k_g, k_b, k_x2, k_x3 = jax.random.split(key, 6)

    # Conv1d(1,1,1) + weight_norm parameter shapes: v (1,1,1), g (1,1,1), b (1,)
    v = jax.random.normal(k_v, (1, 1, 1), dtype=jnp.float32)
    g = jax.random.normal(k_g, (1, 1, 1), dtype=jnp.float32)
    b = jax.random.normal(k_b, (1,), dtype=jnp.float32)

    # Small NCL input consistent with the module's forward: (batch=2, C=1, L=16).
    # This hits the tiny-input fallback.
    x = jax.random.normal(k_x, (2, 1, 16), dtype=jnp.float32)
    y = jax.block_until_ready(weight_normed_conv1d(x, v, g, b))
    assert jnp.allclose(y, _reference(x, v, g, b), atol=1e-5, rtol=1e-5)

    # Divisible-by-512 input: no-pad / no-slice fast path, multi-tile pipelined grid.
    x_big = jax.random.normal(k_x2, (2, 1, 1_048_576), dtype=jnp.float32)
    y_big = jax.block_until_ready(weight_normed_conv1d(x_big, v, g, b))
    assert jnp.allclose(y_big, _reference(x_big, v, g, b), atol=1e-5, rtol=1e-5)

    # Ragged input: exercises the <=127-element pad path + masked final grid tile.
    x_rag = jax.random.normal(k_x3, (3, 1, 200_000), dtype=jnp.float32)
    y_rag = jax.block_until_ready(weight_normed_conv1d(x_rag, v, g, b))
    assert jnp.allclose(y_rag, _reference(x_rag, v, g, b), atol=1e-5, rtol=1e-5)

    print("KERNEL_OK")
</pallas_src>

<mosaic_0001>
module attributes {stable_mosaic.version = 11 : i64} {
  func.func @_wn_conv1x1_kernel(%arg0: i32, %arg1: memref<1xf32, #tpu.memory_space<smem>>, %arg2: memref<1xf32, #tpu.memory_space<smem>>, %arg3: memref<1xf32, #tpu.memory_space<smem>>, %arg4: memref<2048x512xf32, #tpu.memory_space<vmem>>, %arg5: memref<2048x512xf32, #tpu.memory_space<vmem>>) attributes {dimension_semantics = [#tpu.dimension_semantics<parallel>], iteration_bounds = array<i64: 2>, scalar_prefetch = 0 : i64, scratch_operands = 0 : i64, tpu.core_type = #tpu.core_type<tc>, window_params = [{transform_indices = @transform_0, window_bounds = array<i64: 1>}, {transform_indices = @transform_1, window_bounds = array<i64: 1>}, {transform_indices = @transform_2, window_bounds = array<i64: 1>}, {transform_indices = @transform_3, window_bounds = array<i64: 2048, 512>}, {transform_indices = @transform_4, window_bounds = array<i64: 2048, 512>}]} {
    %c0 = arith.constant 0 : index
    %0 = memref.load %arg1[%c0] : memref<1xf32, #tpu.memory_space<smem>>
    %c0_0 = arith.constant 0 : index
    %1 = memref.load %arg2[%c0_0] : memref<1xf32, #tpu.memory_space<smem>>
    %c0_1 = arith.constant 0 : index
    %2 = memref.load %arg3[%c0_1] : memref<1xf32, #tpu.memory_space<smem>>
    %3 = arith.mulf %1, %0 : f32
    %4 = math.absf %0 : f32
    %5 = arith.divf %3, %4 : f32
    %c0_2 = arith.constant 0 : index
    %c0_3 = arith.constant 0 : index
    %6 = vector.load %arg4[%c0_2, %c0_3] : memref<2048x512xf32, #tpu.memory_space<vmem>>, vector<2048x512xf32>
    %7 = vector.broadcast %5 : f32 to vector<2048x512xf32>
    %8 = arith.mulf %6, %7 : vector<2048x512xf32>
    %9 = vector.broadcast %2 : f32 to vector<2048x512xf32>
    %10 = arith.addf %8, %9 : vector<2048x512xf32>
    %c0_4 = arith.constant 0 : index
    %c0_5 = arith.constant 0 : index
    %11 = vector.load %arg5[%c0_4, %c0_5] : memref<2048x512xf32, #tpu.memory_space<vmem>>, vector<2048x512xf32>
    tpu.vector_store %arg5[%c0_4, %c0_5], %10 {strides = array<i32>} : memref<2048x512xf32, #tpu.memory_space<vmem>>, vector<2048x512xf32>,
    return
  }
  func.func @transform_0(%arg0: i32) -> i32 {
    %c0_i32 = arith.constant 0 : i32
    %c0_i32_0 = arith.constant 0 : i32
    return %c0_i32 : i32
  }
  func.func @transform_1(%arg0: i32) -> i32 {
    %c0_i32 = arith.constant 0 : i32
    %c0_i32_0 = arith.constant 0 : i32
    return %c0_i32 : i32
  }
  func.func @transform_2(%arg0: i32) -> i32 {
    %c0_i32 = arith.constant 0 : i32
    %c0_i32_0 = arith.constant 0 : i32
    return %c0_i32 : i32
  }
  func.func @transform_3(%arg0: i32) -> (i32, i32) {
    %c0_i32 = arith.constant 0 : i32
    %c0_i32_0 = arith.constant 0 : i32
    return %arg0, %c0_i32 : i32, i32
  }
  func.func @transform_4(%arg0: i32) -> (i32, i32) {
    %c0_i32 = arith.constant 0 : i32
    %c0_i32_0 = arith.constant 0 : i32
    return %arg0, %c0_i32 : i32, i32
  }
}

</mosaic_0001>

<bundles_post_ra>
// kernel: tpu_custom_call.1
= control target key start
LH: loop header
LB: loop body
LE: loop exit
PB: predicated region body
PF: predicated region fallthrough
CT: control target
= control target key end

     0   :  { %s11963_s0 = inlined_call_operand.<no memory space> [shape: f32[1], index: 0, kind: input, shape index: {}]   ;;  %s11964_s1 = inlined_call_operand.<no memory space> [shape: f32[1], index: 1, kind: input, shape index: {}]   ;;  %s11965_s2 = inlined_call_operand.<no memory space> [shape: f32[1], index: 2, kind: input, shape index: {}]   ;;  %s11966_s3 = inlined_call_operand.hbm [shape: f32[4096,512], index: 3, kind: input, shape index: {}]   ;;  %s11967_s4 = inlined_call_operand.hbm [shape: f32[4096,512], index: 4, kind: output, shape index: {}]  }
   0x1   :  { %9 = sst [smem:[#allocation2]] %s11963_s0 }
   0x2   :  { %10 = sst [smem:[#allocation3]] %s11964_s1 }
   0x3   :  { %11 = sst [smem:[#allocation4]] %s11965_s2 }
   0x4   :  { %12 = vsyncpa [#allocation6], 0 }
   0x5   :  { %14 = vsyncpa [#allocation6 + $0x1], 0 }
   0x6   :  { %15 = vsyncpa [#allocation7], 0 }
   0x7   :  { %17 = vsyncpa [#allocation7 + $0x1], 0  ;;  %s4625_s21 = smov 0   ;;  %s4627_s22 = smov 0  }
   0x8   :  { %s4629_s23 = smov 0   ;;  %s4631_s24 = smov 0  }
   0x9 LB: > { %s4646_s0 = sadd.s32 4294967295, %s4583_s24   ;;  %s4417_s1 = sadd.s32 4294967294, %s4583_s24   ;;  %s4583_s24 = sphi %s4631_s24, %s13918_s24   ;;  %s4579_s23 = sphi %s4629_s23, %s13917_s23   ;;  %s4575_s22 = sphi %s4627_s22, %s13916_s22   ;;  %s4571_s21 = sphi %s4625_s21, %s13915_s21  }
   0xa   : > { %s4650_s2 = sadd.s32 1, %s4583_s24   ;;  %s93_s25 = sadd.s32 1, %s4579_s23 }
   0xb   : > { %s90_s26 = ssub.s32 %s4583_s24, %s4650_s2  ;;  %p100_p0 = scmp.ne.s32.totalorder %s4579_s23, %s4575_s22 }
   0xc   : > { %p91_p1 = scmp.eq.s32.totalorder %s90_s26, 0  ;;  %p101_p2 = scmp.eq.s32.totalorder %s4583_s24, 0 }
   0xd   : > { %p106_p3 = scmp.ne.s32.totalorder %s4575_s22, %s4571_s21  ;;  %p107_p4 = scmp.eq.s32.totalorder %s4646_s0, 0 }
   0xe   : > { %s4662_s27 = scalar_select %p91_p1, %s4579_s23, %s93_s25  }
   0xf   : > { %p4664_p5 = por %p101_p2, %p100_p0  ;;  %p4668_p6 = por %p107_p4, %p106_p3 }
  0x10   : > { %p130_p7 = scmp.eq.s32.totalorder %s4646_s0, 1  ;;  %p136_p8 = scmp.eq.s32.totalorder %s4417_s1, 1 }
  0x11   : > { %s11971_s29 = scalar_select %p4668_p6, 1, 0 }
  0x12   : > { %p4451_p10 = scmp.lt.s32.totalorder %s4583_s24, 2  ;;  %p4675_p11 = por %p130_p7, %p100_p0 }
  0x13   : > { %p4679_p12 = por %p136_p8, %p106_p3  ;;  %s165_s6 = sand.u32 1, %s4579_s23  }
  0x14   : > { %s11972_s30 = scalar_select %p4675_p11, 1, 0 }
  0x15   : > { %s11973_s5 = scalar_select %p4679_p12, 1, 0 }
  0x16   : > { %s4434_s7 = sshll.u32 %s4583_s24, 17  ;;  %s4420_s8 = sshll.u32 %s165_s6, 13 }
  0x17   : > { %s4688_s11 = scalar_lea.hbm %s11966_s3, %s4434_s7  ;;  %s169_s12 = scalar_lea.vmem [#allocation5], %s4420_s8 }
  0x18   : > { %s177_s13 = sshll.u32 %s169_s12, 4  ;;  %p4692_p13 = pnand %p4451_p10, %p4664_p5  ;;  %s4696_s13 = int_to_ptr.vmem [resolvable:$true] %s177_s13 }
  0x19   : > { %s4698_s15 = scalar_lea.sflag [#allocation6], %s165_s6  ;;  %s4491_s16 = scalar_lea.hbm %s4688_s11, 131072 }
  0x1a   : > { %p4492_p0 = scmp.ne.s32.totalorder %s4688_s11, %s4491_s16  ;;  %p4493_p1 = pneg %p4692_p13 }
  0x1b   : > { %s4496_s19 = scalar_lea.hbm %s11966_s3, 262144  ;;  %p4497_p4 = scmp.lt.s32.totalorder %s4688_s11, %s11966_s3 }
  0x1c   : > { %p4494_p2 = pnand %p4493_p1, %p4492_p0  ;;  %p4498_p5 = scmp.lt.s32.totalorder %s4496_s19, %s4491_s16 }
  0x1e   : > { %p4495_p3 = pneg %p4494_p2  ;;  %p4499_p7 = por %p4498_p5, %p4497_p4 }
  0x20   : > { %p4500_p8 = pnand %p4499_p7, %p4495_p3 }
  0x22   : > { %4503 = shalt.err (!%p4500_p8)
}
  0x23   : > { %s4504_s25 = scalar_lea.vmem %s4696_s13, 131072  ;;  %s4585_s26 = smov [#allocation5]  }
  0x24   : > { %p4505_p10 = scmp.ne.s32.totalorder %s4696_s13, %s4504_s25  ;;  %s4509_s28 = sshll.u32 %s4585_s26, 4  ;;  %s4510_s28 = int_to_ptr.vmem [resolvable:$false] %s4509_s28 }
  0x25   : > { %s4511_s6 = scalar_lea.vmem %s4510_s28, 262144  ;;  %p4512_p2 = scmp.lt.s32.totalorder %s4696_s13, %s4510_s28 }
  0x26   : > { %p4507_p9 = pnand %p4505_p10, %p4493_p1  ;;  %p4513_p12 = scmp.lt.s32.totalorder %s4511_s6, %s4504_s25 }
  0x28   : > { %p4508_p0 = pneg %p4507_p9  ;;  %p4514_p11 = por %p4513_p12, %p4512_p2 }
  0x2a   : > { %p4515_p6 = pnand %p4514_p11, %p4508_p0 }
  0x2c   : > { %4518 = shalt.err (!%p4515_p6)
}
  0x2d   : > { %s4586_s7 = smov 512   ;;  %s4587_s8 = smov 32  }
  0x2e   : > { %4446 = dma.hbm_to_vmem [thread:$0]  (!%p4692_p13), %s4688_s11, 131072, %s4696_s13, %s4698_s15, %s4586_s7, %s4586_s7, %s4587_s8  }
  0x2f   : > { %p4424_p9 = scmp.ge.s32.totalorder %s4583_s24, 1  ;;  %p185_p1 = scmp.lt.s32.totalorder %s4583_s24, 3 }
  0x31   : > { %p186_p3 = pnand %p4424_p9, %p185_p1 }
  0x33   : > { %189 = sbr.rel (%p186_p3) target bundleno = 1156 (0x484), region = 36 }
  0x38   : > { %s4722_s9 = sand.u32 1, %s4575_s22   ;;  %p11975_p6 = scmp.ne.s32.totalorder %s11971_s29, 0 }
  0x39   : > { %s4425_s10 = sshll.u32 %s4722_s9, 13  ;;  %s192_s12 = scalar_lea.sflag [#allocation6], %s4722_s9 }
  0x3a   : > { %s4728_s16 = scalar_lea.vmem [#allocation5], %s4425_s10 }
  0x3b   : > { %4562 = dma.done.wait (%p11975_p6), %s192_s12, 131072  }
  0x3c   : > { %4564 = vsyncadd (%p11975_p6), %s192_s12, 4294836224  ;;  %s222_s11 = sld [smem:[#allocation2]]  ;;  %v231_v2 = vld [vmem:[%s4728_s16] sm:$0xff]  ;;  %v232_v3 = vld [vmem:[%s4728_s16 + $0x8] sm:$0xff]  ;;  %s8863_s19 = scalar_lea.vmem [#allocation8], %s4425_s10 }
  0x3d   : > { %s223_s29 = sld [smem:[#allocation3]]  ;;  %v233_v4 = vld [vmem:[%s4728_s16 + $0x10] sm:$0xff]  ;;  %v234_v5 = vld [vmem:[%s4728_s16 + $0x18] sm:$0xff]  ;;  %v235_v6 = vld [vmem:[%s4728_s16 + $0x20] sm:$0xff]  ;;  %s4436_s20 = sshll.u32 %s4646_s0, 17 }
  0x3e   : > { %v236_v7 = vld [vmem:[%s4728_s16 + $0x28] sm:$0xff]  ;;  %v237_v8 = vld [vmem:[%s4728_s16 + $0x30] sm:$0xff]  ;;  %v238_v9 = vld [vmem:[%s4728_s16 + $0x38] sm:$0xff]  ;;  %s8709_s18 = sld [smem:[#allocation4]]  ;;  %s4344_s1 = sshll.u32 %s8863_s19, 4  ;;  %s11900_s1 = int_to_ptr.vmem [resolvable:$true] %s4344_s1 }
  0x3f   : > { %v239_v10 = vld [vmem:[%s4728_s16 + $0x40] sm:$0xff]  ;;  %v240_v11 = vld [vmem:[%s4728_s16 + $0x48] sm:$0xff]  ;;  %v241_v12 = vld [vmem:[%s4728_s16 + $0x50] sm:$0xff]  ;;  %s11898_s26 = scalar_lea.hbm %s11967_s4, %s4436_s20  ;;  %s4330_s28 = scalar_lea.sflag [#allocation7], %s4722_s9 }
  0x40   : > { %v242_v13 = vld [vmem:[%s4728_s16 + $0x58] sm:$0xff]  ;;  %v243_v14 = vld [vmem:[%s4728_s16 + $0x60] sm:$0xff]  ;;  %v244_v15 = vld [vmem:[%s4728_s16 + $0x68] sm:$0xff]  ;;  %s4519_s6 = scalar_lea.vmem %s11900_s1, 131072  ;;  %p13912_p12 = scmp.ne.s32.totalorder %s11972_s30, 0 }
  0x41   : > { %v245_v16 = vld [vmem:[%s4728_s16 + $0x70] sm:$0xff]  ;;  %v246_v17 = vld [vmem:[%s4728_s16 + $0x78] sm:$0xff]  ;;  %v247_v18 = vld [vmem:[%s4728_s16 + $0x80] sm:$0xff]  ;;  %p4520_p11 = scmp.ne.s32.totalorder %s11900_s1, %s4519_s6  ;;  %s4588_s7 = smov [#allocation8]  }
  0x42   : > { %s226_s13 = sand.u32 2147483647, %s222_s11  ;;  %v248_v20 = vld [vmem:[%s4728_s16 + $0x88] sm:$0xff]  ;;  %v249_v21 = vld [vmem:[%s4728_s16 + $0x90] sm:$0xff]  ;;  %v250_v22 = vld [vmem:[%s4728_s16 + $0x98] sm:$0xff]  ;;  %s4523_s8 = sshll.u32 %s4588_s7, 4  ;;  %s4524_s8 = int_to_ptr.vmem [resolvable:$false] %s4523_s8 }
  0x43   : > { %v227_v0 = vstv %s226_s13  ;;  %s225_s14 = smul.f32 %s223_s29, %s222_s11  ;;  %v251_v23 = vld [vmem:[%s4728_s16 + $0xa0] sm:$0xff]  ;;  %v252_v25 = vld [vmem:[%s4728_s16 + $0xa8] sm:$0xff]  ;;  %v253_v26 = vld [vmem:[%s4728_s16 + $0xb0] sm:$0xff]  ;;  %p4521_p13 = pnand %p4520_p11, %p13912_p12 }
  0x44   : > { %4489 = vrcp.f32 %v227_v0  ;;  %v254_v27 = vld [vmem:[%s4728_s16 + $0xb8] sm:$0xff]  ;;  %v255_v28 = vld [vmem:[%s4728_s16 + $0xc0] sm:$0xff]  ;;  %v256_v33 = vld [vmem:[%s4728_s16 + $0xc8] sm:$0xff]  ;;  %s4525_s10 = scalar_lea.vmem %s4524_s8, 262144  ;;  %p4526_p5 = scmp.lt.s32.totalorder %s11900_s1, %s4524_s8 }
  0x45   : > { %v257_v34 = vld [vmem:[%s4728_s16 + $0xd0] sm:$0xff]  ;;  %v258_v35 = vld [vmem:[%s4728_s16 + $0xd8] sm:$0xff]  ;;  %v259_v36 = vld [vmem:[%s4728_s16 + $0xe0] sm:$0xff]  ;;  %p4522_p4 = pneg %p4521_p13  ;;  %p4527_p7 = scmp.lt.s32.totalorder %s4525_s10, %s4519_s6 }
  0x46   : > { %v260_v41 = vld [vmem:[%s4728_s16 + $0xe8] sm:$0xff]  ;;  %v261_v42 = vld [vmem:[%s4728_s16 + $0xf0] sm:$0xff]  ;;  %v262_v43 = vld [vmem:[%s4728_s16 + $0xf8] sm:$0xff] }
  0x47   : > { %v263_v44 = vld [vmem:[%s4728_s16 + $0x100] sm:$0xff]  ;;  %v264_v49 = vld [vmem:[%s4728_s16 + $0x108] sm:$0xff]  ;;  %v265_v50 = vld [vmem:[%s4728_s16 + $0x110] sm:$0xff]  ;;  %p4528_p8 = por %p4527_p7, %p4526_p5 }
  0x48   : > { %v266_v51 = vld [vmem:[%s4728_s16 + $0x118] sm:$0xff]  ;;  %v267_v52 = vld [vmem:[%s4728_s16 + $0x120] sm:$0xff]  ;;  %v268_v57 = vld [vmem:[%s4728_s16 + $0x128] sm:$0xff] }
  0x49   : > { %v269_v58 = vld [vmem:[%s4728_s16 + $0x130] sm:$0xff]  ;;  %v270_v59 = vld [vmem:[%s4728_s16 + $0x138] sm:$0xff]  ;;  %v271_v60 = vld [vmem:[%s4728_s16 + $0x140] sm:$0xff]  ;;  %p4529_p10 = pnand %p4528_p8, %p4522_p4 }
  0x51   : > { %v4490_v1 = vpop.eup %4489 }
  0x52   : > { %4437 = vpush %v4490_v1  ;;  %v272_v1 = vld [vmem:[%s4728_s16 + $0x148] sm:$0xff] }
  0x83   : > { %s4438_s15 = spop %4437 }
  0x84   : > { %s230_s17 = smul.f32 %s4438_s15, %s225_s14 }
  0x86   : > { %v4751_v19 = vstv %s230_s17 }
  0x87   : > { %v4758_v24 = vmul.f32 %v4751_v19, %v231_v2  ;;  %v4765_v29 = vmul.f32 %v4751_v19, %v232_v3  ;;  %v4768_v30 = vmul.f32 %v4751_v19, %v233_v4  ;;  %v4771_v31 = vmul.f32 %v4751_v19, %v234_v5  ;;  %v273_v2 = vld [vmem:[%s4728_s16 + $0x150] sm:$0xff]  ;;  %v274_v3 = vld [vmem:[%s4728_s16 + $0x158] sm:$0xff]  ;;  %v275_v4 = vld [vmem:[%s4728_s16 + $0x160] sm:$0xff] }
  0x88   : > { %v4774_v32 = vmul.f32 %v4751_v19, %v235_v6  ;;  %v4781_v37 = vmul.f32 %v4751_v19, %v236_v7  ;;  %v4784_v38 = vmul.f32 %v4751_v19, %v237_v8  ;;  %v4787_v39 = vmul.f32 %v4751_v19, %v238_v9  ;;  %v276_v9 = vld [vmem:[%s4728_s16 + $0x168] sm:$0xff] }
  0x89   : > { %v4790_v40 = vmul.f32 %v4751_v19, %v239_v10  ;;  %v4797_v45 = vmul.f32 %v4751_v19, %v240_v11  ;;  %v4800_v46 = vmul.f32 %v4751_v19, %v241_v12  ;;  %v4803_v47 = vmul.f32 %v4751_v19, %v242_v13  ;;  %v277_v10 = vld [vmem:[%s4728_s16 + $0x170] sm:$0xff]  ;;  %v278_v11 = vld [vmem:[%s4728_s16 + $0x178] sm:$0xff]  ;;  %v279_v12 = vld [vmem:[%s4728_s16 + $0x180] sm:$0xff] }
  0x8a   : > { %v4806_v48 = vmul.f32 %v4751_v19, %v243_v14  ;;  %v4813_v53 = vmul.f32 %v4751_v19, %v244_v15  ;;  %v4816_v54 = vmul.f32 %v4751_v19, %v245_v16  ;;  %v4819_v55 = vmul.f32 %v4751_v19, %v246_v17  ;;  %v280_v17 = vld [vmem:[%s4728_s16 + $0x188] sm:$0xff] }
  0x8b   : > { %v4822_v56 = vmul.f32 %v4751_v19, %v247_v18  ;;  %v4829_v61 = vmul.f32 %v4751_v19, %v248_v20  ;;  %v4832_v62 = vmul.f32 %v4751_v19, %v249_v21  ;;  %v4835_v63 = vmul.f32 %v4751_v19, %v250_v22  ;;  %v281_v18 = vld [vmem:[%s4728_s16 + $0x190] sm:$0xff]  ;;  %v282_v20 = vld [vmem:[%s4728_s16 + $0x198] sm:$0xff]  ;;  %v283_v21 = vld [vmem:[%s4728_s16 + $0x1a0] sm:$0xff] }
  0x8c   : > { %v4838_v0 = vmul.f32 %v4751_v19, %v251_v23  ;;  %v4845_v5 = vmul.f32 %v4751_v19, %v252_v25  ;;  %v4848_v6 = vmul.f32 %v4751_v19, %v253_v26  ;;  %v4851_v7 = vmul.f32 %v4751_v19, %v254_v27  ;;  %v284_v27 = vld [vmem:[%s4728_s16 + $0x1a8] sm:$0xff] }
  0x8d   : > { %v4854_v8 = vmul.f32 %v4751_v19, %v255_v28  ;;  %v4861_v13 = vmul.f32 %v4751_v19, %v256_v33  ;;  %v4864_v14 = vmul.f32 %v4751_v19, %v257_v34  ;;  %v4867_v15 = vmul.f32 %v4751_v19, %v258_v35  ;;  %v285_v28 = vld [vmem:[%s4728_s16 + $0x1b0] sm:$0xff]  ;;  %v286_v33 = vld [vmem:[%s4728_s16 + $0x1b8] sm:$0xff]  ;;  %v287_v34 = vld [vmem:[%s4728_s16 + $0x1c0] sm:$0xff] }
  0x8e   : > { %v4870_v16 = vmul.f32 %v4751_v19, %v259_v36  ;;  %v4877_v22 = vmul.f32 %v4751_v19, %v260_v41  ;;  %v4880_v23 = vmul.f32 %v4751_v19, %v261_v42  ;;  %v4883_v25 = vmul.f32 %v4751_v19, %v262_v43  ;;  %v288_v43 = vld [vmem:[%s4728_s16 + $0x1c8] sm:$0xff] }
  0x8f   : > { %v4886_v26 = vmul.f32 %v4751_v19, %v263_v44  ;;  %v4893_v35 = vmul.f32 %v4751_v19, %v264_v49  ;;  %v4896_v36 = vmul.f32 %v4751_v19, %v265_v50  ;;  %v4899_v41 = vmul.f32 %v4751_v19, %v266_v51  ;;  %v289_v44 = vld [vmem:[%s4728_s16 + $0x1d0] sm:$0xff] }
  0x90   : > { %11976 = vst [vmem:[#allocation11_spill] sm:$0xff] %v4880_v23  ;;  %11977 = vst [vmem:[#allocation12_spill] sm:$0xff] %v4883_v25  ;;  %v4902_v42 = vmul.f32 %v4751_v19, %v267_v52  ;;  %v291_v25 = vld [vmem:[%s4728_s16 + $0x1e0] sm:$0xff]  ;;  %v4909_v49 = vmul.f32 %v4751_v19, %v268_v57  ;;  %v4912_v50 = vmul.f32 %v4751_v19, %v269_v58 }
  0x91   : > { %11978 = vst [vmem:[#allocation13_spill] sm:$0xff] %v4886_v26  ;;  %11979 = vst [vmem:[#allocation14_spill] sm:$0xff] %v4893_v35  ;;  %v290_v26 = vld [vmem:[%s4728_s16 + $0x1d8] sm:$0xff]  ;;  %v4915_v51 = vmul.f32 %v4751_v19, %v270_v59  ;;  %v4918_v52 = vmul.f32 %v4751_v19, %v271_v60  ;;  %v295_v35 = vld [vmem:[%s4728_s16 + $0x200] sm:$0xff]  ;;  %v4925_v57 = vmul.f32 %v4751_v19, %v272_v1 }
  0x92   : > { %11980 = vst [vmem:[#allocation15_spill] sm:$0xff] %v4896_v36  ;;  %11981 = vst [vmem:[#allocation16_spill] sm:$0xff] %v4899_v41  ;;  %v293_v41 = vld [vmem:[%s4728_s16 + $0x1f0] sm:$0xff]  ;;  %v294_v36 = vld [vmem:[%s4728_s16 + $0x1f8] sm:$0xff]  ;;  %v4928_v58 = vmul.f32 %v4751_v19, %v273_v2  ;;  %v4931_v59 = vmul.f32 %v4751_v19, %v274_v3  ;;  %v4934_v60 = vmul.f32 %v4751_v19, %v275_v4 }
  0x93   : > { %11982 = vst [vmem:[#allocation17_spill] sm:$0xff] %v4902_v42  ;;  %11983 = vst [vmem:[#allocation18_spill] sm:$0xff] %v4909_v49  ;;  %v292_v42 = vld [vmem:[%s4728_s16 + $0x1e8] sm:$0xff]  ;;  %v299_v49 = vld [vmem:[%s4728_s16 + $0x220] sm:$0xff]  ;;  %v4941_v1 = vmul.f32 %v4751_v19, %v276_v9  ;;  %v4944_v2 = vmul.f32 %v4751_v19, %v277_v10  ;;  %v4947_v3 = vmul.f32 %v4751_v19, %v278_v11 }
  0x94   : > { %11984 = vst [vmem:[#allocation19_spill] sm:$0xff] %v4912_v50  ;;  %11985 = vst [vmem:[#allocation20_spill] sm:$0xff] %v4915_v51  ;;  %v297_v51 = vld [vmem:[%s4728_s16 + $0x210] sm:$0xff]  ;;  %v298_v50 = vld [vmem:[%s4728_s16 + $0x218] sm:$0xff]  ;;  %v4950_v4 = vmul.f32 %v4751_v19, %v279_v12  ;;  %v4957_v9 = vmul.f32 %v4751_v19, %v280_v17  ;;  %v4960_v10 = vmul.f32 %v4751_v19, %v281_v18 }
  0x95   : > { %11986 = vst [vmem:[#allocation21_spill] sm:$0xff] %v4918_v52  ;;  %11987 = vst [vmem:[#allocation22_spill] sm:$0xff] %v4925_v57  ;;  %v296_v52 = vld [vmem:[%s4728_s16 + $0x208] sm:$0xff]  ;;  %v303_v57 = vld [vmem:[%s4728_s16 + $0x240] sm:$0xff]  ;;  %v4963_v11 = vmul.f32 %v4751_v19, %v282_v20  ;;  %v4966_v12 = vmul.f32 %v4751_v19, %v283_v21  ;;  %v4973_v17 = vmul.f32 %v4751_v19, %v284_v27 }
  0x96   : > { %11988 = vst [vmem:[#allocation23_spill] sm:$0xff] %v4928_v58  ;;  %11989 = vst [vmem:[#allocation24_spill] sm:$0xff] %v4931_v59  ;;  %v301_v59 = vld [vmem:[%s4728_s16 + $0x230] sm:$0xff]  ;;  %v302_v58 = vld [vmem:[%s4728_s16 + $0x238] sm:$0xff]  ;;  %v4976_v18 = vmul.f32 %v4751_v19, %v285_v28  ;;  %v4979_v20 = vmul.f32 %v4751_v19, %v286_v33  ;;  %v4982_v21 = vmul.f32 %v4751_v19, %v287_v34 }
  0x97   : > { %11990 = vst [vmem:[#allocation25_spill] sm:$0xff] %v4934_v60  ;;  %11991 = vst [vmem:[#allocation26_spill] sm:$0xff] %v4941_v1  ;;  %v300_v60 = vld [vmem:[%s4728_s16 + $0x228] sm:$0xff]  ;;  %v307_v1 = vld [vmem:[%s4728_s16 + $0x260] sm:$0xff]  ;;  %v4989_v27 = vmul.f32 %v4751_v19, %v288_v43  ;;  %v4992_v28 = vmul.f32 %v4751_v19, %v289_v44  ;;  %v4995_v33 = vmul.f32 %v4751_v19, %v290_v26 }
  0x98   : > { %11992 = vst [vmem:[#allocation27_spill] sm:$0xff] %v4944_v2  ;;  %11993 = vst [vmem:[#allocation28_spill] sm:$0xff] %v4947_v3  ;;  %v305_v3 = vld [vmem:[%s4728_s16 + $0x250] sm:$0xff]  ;;  %v306_v2 = vld [vmem:[%s4728_s16 + $0x258] sm:$0xff]  ;;  %v4998_v34 = vmul.f32 %v4751_v19, %v291_v25  ;;  %v5005_v43 = vmul.f32 %v4751_v19, %v292_v42  ;;  %v5008_v44 = vmul.f32 %v4751_v19, %v293_v41 }
  0x99   : > { %11994 = vst [vmem:[#allocation29_spill] sm:$0xff] %v4950_v4  ;;  %11995 = vst [vmem:[#allocation30_spill] sm:$0xff] %v4957_v9  ;;  %v304_v4 = vld [vmem:[%s4728_s16 + $0x248] sm:$0xff]  ;;  %v311_v9 = vld [vmem:[%s4728_s16 + $0x280] sm:$0xff]  ;;  %v5011_v26 = vmul.f32 %v4751_v19, %v294_v36  ;;  %v5014_v25 = vmul.f32 %v4751_v19, %v295_v35  ;;  %v5021_v42 = vmul.f32 %v4751_v19, %v296_v52 }
  0x9a   : > { %11996 = vst [vmem:[#allocation31_spill] sm:$0xff] %v4960_v10  ;;  %11997 = vst [vmem:[#allocation32_spill] sm:$0xff] %v4963_v11  ;;  %v309_v11 = vld [vmem:[%s4728_s16 + $0x270] sm:$0xff]  ;;  %v310_v10 = vld [vmem:[%s4728_s16 + $0x278] sm:$0xff]  ;;  %v5024_v41 = vmul.f32 %v4751_v19, %v297_v51  ;;  %v5027_v36 = vmul.f32 %v4751_v19, %v298_v50  ;;  %v5030_v35 = vmul.f32 %v4751_v19, %v299_v49 }
  0x9b   : > { %11998 = vst [vmem:[#allocation33_spill] sm:$0xff] %v4966_v12  ;;  %11999 = vst [vmem:[#allocation34_spill] sm:$0xff] %v4973_v17  ;;  %v308_v12 = vld [vmem:[%s4728_s16 + $0x268] sm:$0xff]  ;;  %v315_v17 = vld [vmem:[%s4728_s16 + $0x2a0] sm:$0xff]  ;;  %v5037_v52 = vmul.f32 %v4751_v19, %v300_v60  ;;  %v5040_v51 = vmul.f32 %v4751_v19, %v301_v59  ;;  %v5043_v50 = vmul.f32 %v4751_v19, %v302_v58 }
  0x9c   : > { %12000 = vst [vmem:[#allocation35_spill] sm:$0xff] %v4976_v18  ;;  %12001 = vst [vmem:[#allocation36_spill] sm:$0xff] %v4979_v20  ;;  %v313_v20 = vld [vmem:[%s4728_s16 + $0x290] sm:$0xff]  ;;  %v314_v18 = vld [vmem:[%s4728_s16 + $0x298] sm:$0xff]  ;;  %v5046_v49 = vmul.f32 %v4751_v19, %v303_v57  ;;  %v5053_v60 = vmul.f32 %v4751_v19, %v304_v4  ;;  %v5056_v59 = vmul.f32 %v4751_v19, %v305_v3 }
  0x9d   : > { %12002 = vst [vmem:[#allocation37_spill] sm:$0xff] %v4982_v21  ;;  %12003 = vst [vmem:[#allocation38_spill] sm:$0xff] %v4989_v27  ;;  %v312_v21 = vld [vmem:[%s4728_s16 + $0x288] sm:$0xff]  ;;  %v319_v27 = vld [vmem:[%s4728_s16 + $0x2c0] sm:$0xff]  ;;  %v5059_v58 = vmul.f32 %v4751_v19, %v306_v2  ;;  %v5062_v57 = vmul.f32 %v4751_v19, %v307_v1  ;;  %v5069_v4 = vmul.f32 %v4751_v19, %v308_v12 }
  0x9e   : > { %12004 = vst [vmem:[#allocation39_spill] sm:$0xff] %v4992_v28  ;;  %12005 = vst [vmem:[#allocation40_spill] sm:$0xff] %v4995_v33  ;;  %v317_v33 = vld [vmem:[%s4728_s16 + $0x2b0] sm:$0xff]  ;;  %v318_v28 = vld [vmem:[%s4728_s16 + $0x2b8] sm:$0xff]  ;;  %v5072_v3 = vmul.f32 %v4751_v19, %v309_v11  ;;  %v5075_v2 = vmul.f32 %v4751_v19, %v310_v10  ;;  %v5078_v1 = vmul.f32 %v4751_v19, %v311_v9 }
  0x9f   : > { %12006 = vst [vmem:[#allocation41_spill] sm:$0xff] %v4998_v34  ;;  %12007 = vst [vmem:[#allocation42_spill] sm:$0xff] %v5005_v43  ;;  %v316_v34 = vld [vmem:[%s4728_s16 + $0x2a8] sm:$0xff]  ;;  %v323_v43 = vld [vmem:[%s4728_s16 + $0x2e0] sm:$0xff]  ;;  %v5085_v12 = vmul.f32 %v4751_v19, %v312_v21  ;;  %v5088_v11 = vmul.f32 %v4751_v19, %v313_v20  ;;  %v5091_v10 = vmul.f32 %v4751_v19, %v314_v18 }
  0xa0   : > { %12008 = vst [vmem:[#allocation43_spill] sm:$0xff] %v5008_v44  ;;  %12009 = vst [vmem:[#allocation44_spill] sm:$0xff] %v5011_v26  ;;  %v321_v26 = vld [vmem:[%s4728_s16 + $0x2d0] sm:$0xff]  ;;  %v322_v44 = vld [vmem:[%s4728_s16 + $0x2d8] sm:$0xff]  ;;  %v5094_v9 = vmul.f32 %v4751_v19, %v315_v17  ;;  %v5101_v21 = vmul.f32 %v4751_v19, %v316_v34  ;;  %v5104_v20 = vmul.f32 %v4751_v19, %v317_v33 }
  0xa1   : > { %12010 = vst [vmem:[#allocation45_spill] sm:$0xff] %v5014_v25  ;;  %12011 = vst [vmem:[#allocation46_spill] sm:$0xff] %v5021_v42  ;;  %v320_v25 = vld [vmem:[%s4728_s16 + $0x2c8] sm:$0xff]  ;;  %v327_v42 = vld [vmem:[%s4728_s16 + $0x300] sm:$0xff]  ;;  %v5107_v18 = vmul.f32 %v4751_v19, %v318_v28  ;;  %v5110_v17 = vmul.f32 %v4751_v19, %v319_v27  ;;  %v5120_v33 = vmul.f32 %v4751_v19, %v321_v26 }
  0xa2   : > { %12012 = vst [vmem:[#allocation47_spill] sm:$0xff] %v5024_v41  ;;  %12013 = vst [vmem:[#allocation48_spill] sm:$0xff] %v5027_v36  ;;  %v325_v36 = vld [vmem:[%s4728_s16 + $0x2f0] sm:$0xff]  ;;  %v326_v41 = vld [vmem:[%s4728_s16 + $0x2f8] sm:$0xff]  ;;  %v5117_v34 = vmul.f32 %v4751_v19, %v320_v25  ;;  %v5123_v28 = vmul.f32 %v4751_v19, %v322_v44  ;;  %v5126_v27 = vmul.f32 %v4751_v19, %v323_v43 }
  0xa3   : > { %12014 = vst [vmem:[#allocation49_spill] sm:$0xff] %v5030_v35  ;;  %12015 = vst [vmem:[#allocation50_spill] sm:$0xff] %v5037_v52  ;;  %v324_v35 = vld [vmem:[%s4728_s16 + $0x2e8] sm:$0xff]  ;;  %v331_v52 = vld [vmem:[%s4728_s16 + $0x320] sm:$0xff]  ;;  %v5136_v26 = vmul.f32 %v4751_v19, %v325_v36  ;;  %v5139_v44 = vmul.f32 %v4751_v19, %v326_v41  ;;  %v5142_v43 = vmul.f32 %v4751_v19, %v327_v42 }
  0xa4   : > { %12016 = vst [vmem:[#allocation51_spill] sm:$0xff] %v5040_v51  ;;  %12017 = vst [vmem:[#allocation52_spill] sm:$0xff] %v5043_v50  ;;  %v329_v50 = vld [vmem:[%s4728_s16 + $0x310] sm:$0xff]  ;;  %v330_v51 = vld [vmem:[%s4728_s16 + $0x318] sm:$0xff]  ;;  %v5133_v25 = vmul.f32 %v4751_v19, %v324_v35  ;;  %v5158_v42 = vmul.f32 %v4751_v19, %v331_v52 }
  0xa5   : > { %12018 = vst [vmem:[#allocation53_spill] sm:$0xff] %v5046_v49  ;;  %12019 = vst [vmem:[#allocation54_spill] sm:$0xff] %v5053_v60  ;;  %v328_v49 = vld [vmem:[%s4728_s16 + $0x308] sm:$0xff]  ;;  %v335_v60 = vld [vmem:[%s4728_s16 + $0x340] sm:$0xff]  ;;  %v5152_v36 = vmul.f32 %v4751_v19, %v329_v50  ;;  %v5155_v41 = vmul.f32 %v4751_v19, %v330_v51 }
  0xa6   : > { %12020 = vst [vmem:[#allocation55_spill] sm:$0xff] %v5056_v59  ;;  %12021 = vst [vmem:[#allocation56_spill] sm:$0xff] %v5059_v58  ;;  %v333_v58 = vld [vmem:[%s4728_s16 + $0x330] sm:$0xff]  ;;  %v334_v59 = vld [vmem:[%s4728_s16 + $0x338] sm:$0xff]  ;;  %v5149_v35 = vmul.f32 %v4751_v19, %v328_v49  ;;  %v5174_v52 = vmul.f32 %v4751_v19, %v335_v60 }
  0xa7   : > { %12022 = vst [vmem:[#allocation57_spill] sm:$0xff] %v5062_v57  ;;  %12023 = vst [vmem:[#allocation58_spill] sm:$0xff] %v5069_v4  ;;  %v332_v57 = vld [vmem:[%s4728_s16 + $0x328] sm:$0xff]  ;;  %v339_v4 = vld [vmem:[%s4728_s16 + $0x360] sm:$0xff]  ;;  %v5168_v50 = vmul.f32 %v4751_v19, %v333_v58  ;;  %v5171_v51 = vmul.f32 %v4751_v19, %v334_v59 }
  0xa8   : > { %12024 = vst [vmem:[#allocation59_spill] sm:$0xff] %v5072_v3  ;;  %12025 = vst [vmem:[#allocation60_spill] sm:$0xff] %v5075_v2  ;;  %v337_v2 = vld [vmem:[%s4728_s16 + $0x350] sm:$0xff]  ;;  %v338_v3 = vld [vmem:[%s4728_s16 + $0x358] sm:$0xff]  ;;  %v5165_v49 = vmul.f32 %v4751_v19, %v332_v57  ;;  %v5190_v60 = vmul.f32 %v4751_v19, %v339_v4 }
  0xa9   : > { %12026 = vst [vmem:[#allocation61_spill] sm:$0xff] %v5078_v1  ;;  %12027 = vst [vmem:[#allocation62_spill] sm:$0xff] %v5085_v12  ;;  %v336_v1 = vld [vmem:[%s4728_s16 + $0x348] sm:$0xff]  ;;  %v343_v12 = vld [vmem:[%s4728_s16 + $0x380] sm:$0xff]  ;;  %v5184_v58 = vmul.f32 %v4751_v19, %v337_v2  ;;  %v5187_v59 = vmul.f32 %v4751_v19, %v338_v3 }
  0xaa   : > { %12028 = vst [vmem:[#allocation63_spill] sm:$0xff] %v5088_v11  ;;  %12029 = vst [vmem:[#allocation64_spill] sm:$0xff] %v5091_v10  ;;  %v341_v10 = vld [vmem:[%s4728_s16 + $0x370] sm:$0xff]  ;;  %v342_v11 = vld [vmem:[%s4728_s16 + $0x378] sm:$0xff]  ;;  %v5181_v57 = vmul.f32 %v4751_v19, %v336_v1  ;;  %v5206_v4 = vmul.f32 %v4751_v19, %v343_v12 }
  0xab   : > { %12030 = vst [vmem:[#allocation65_spill] sm:$0xff] %v5094_v9  ;;  %12031 = vst [vmem:[#allocation66_spill] sm:$0xff] %v5101_v21  ;;  %v340_v9 = vld [vmem:[%s4728_s16 + $0x368] sm:$0xff]  ;;  %v347_v21 = vld [vmem:[%s4728_s16 + $0x3a0] sm:$0xff]  ;;  %v5200_v2 = vmul.f32 %v4751_v19, %v341_v10  ;;  %v5203_v3 = vmul.f32 %v4751_v19, %v342_v11 }
  0xac   : > { %12032 = vst [vmem:[#allocation67_spill] sm:$0xff] %v5104_v20  ;;  %12033 = vst [vmem:[#allocation68_spill] sm:$0xff] %v5107_v18  ;;  %v345_v18 = vld [vmem:[%s4728_s16 + $0x390] sm:$0xff]  ;;  %v346_v20 = vld [vmem:[%s4728_s16 + $0x398] sm:$0xff]  ;;  %v5197_v1 = vmul.f32 %v4751_v19, %v340_v9  ;;  %v5222_v12 = vmul.f32 %v4751_v19, %v347_v21 }
  0xad   : > { %12034 = vst [vmem:[#allocation69_spill] sm:$0xff] %v5110_v17  ;;  %12035 = vst [vmem:[#allocation70_spill] sm:$0xff] %v5117_v34  ;;  %v344_v17 = vld [vmem:[%s4728_s16 + $0x388] sm:$0xff]  ;;  %v351_v34 = vld [vmem:[%s4728_s16 + $0x3c0] sm:$0xff]  ;;  %v5216_v10 = vmul.f32 %v4751_v19, %v345_v18  ;;  %v5219_v11 = vmul.f32 %v4751_v19, %v346_v20 }
  0xae   : > { %12036 = vst [vmem:[#allocation71_spill] sm:$0xff] %v5120_v33  ;;  %12037 = vst [vmem:[#allocation72_spill] sm:$0xff] %v5123_v28  ;;  %v349_v28 = vld [vmem:[%s4728_s16 + $0x3b0] sm:$0xff]  ;;  %v350_v33 = vld [vmem:[%s4728_s16 + $0x3b8] sm:$0xff]  ;;  %v5213_v9 = vmul.f32 %v4751_v19, %v344_v17  ;;  %v5238_v21 = vmul.f32 %v4751_v19, %v351_v34 }
  0xaf   : > { %12038 = vst [vmem:[#allocation73_spill] sm:$0xff] %v5126_v27  ;;  %12039 = vst [vmem:[#allocation74_spill] sm:$0xff] %v5133_v25  ;;  %v348_v27 = vld [vmem:[%s4728_s16 + $0x3a8] sm:$0xff]  ;;  %v355_v25 = vld [vmem:[%s4728_s16 + $0x3e0] sm:$0xff]  ;;  %v5232_v18 = vmul.f32 %v4751_v19, %v349_v28  ;;  %v5235_v20 = vmul.f32 %v4751_v19, %v350_v33 }
  0xb0   : > { %12040 = vst [vmem:[#allocation75_spill] sm:$0xff] %v5136_v26  ;;  %12041 = vst [vmem:[#allocation76_spill] sm:$0xff] %v5139_v44  ;;  %v353_v44 = vld [vmem:[%s4728_s16 + $0x3d0] sm:$0xff]  ;;  %v354_v26 = vld [vmem:[%s4728_s16 + $0x3d8] sm:$0xff]  ;;  %v5229_v17 = vmul.f32 %v4751_v19, %v348_v27  ;;  %v5254_v34 = vmul.f32 %v4751_v19, %v355_v25 }
  0xb1   : > { %12042 = vst [vmem:[#allocation77_spill] sm:$0xff] %v5142_v43  ;;  %12043 = vst [vmem:[#allocation78_spill] sm:$0xff] %v5149_v35  ;;  %v352_v43 = vld [vmem:[%s4728_s16 + $0x3c8] sm:$0xff]  ;;  %v359_v35 = vld [vmem:[%s4728_s16 + $0x400] sm:$0xff]  ;;  %v5248_v28 = vmul.f32 %v4751_v19, %v353_v44  ;;  %v5251_v33 = vmul.f32 %v4751_v19, %v354_v26 }
  0xb2   : > { %12044 = vst [vmem:[#allocation79_spill] sm:$0xff] %v5152_v36  ;;  %12045 = vst [vmem:[#allocation80_spill] sm:$0xff] %v5155_v41  ;;  %v357_v41 = vld [vmem:[%s4728_s16 + $0x3f0] sm:$0xff]  ;;  %v358_v36 = vld [vmem:[%s4728_s16 + $0x3f8] sm:$0xff]  ;;  %v5245_v27 = vmul.f32 %v4751_v19, %v352_v43  ;;  %v5270_v25 = vmul.f32 %v4751_v19, %v359_v35 }
  0xb3   : > { %12046 = vst [vmem:[#allocation81_spill] sm:$0xff] %v5158_v42  ;;  %12047 = vst [vmem:[#allocation82_spill] sm:$0xff] %v5165_v49  ;;  %v356_v42 = vld [vmem:[%s4728_s16 + $0x3e8] sm:$0xff]  ;;  %v363_v49 = vld [vmem:[%s4728_s16 + $0x420] sm:$0xff]  ;;  %v5264_v44 = vmul.f32 %v4751_v19, %v357_v41  ;;  %v5267_v26 = vmul.f32 %v4751_v19, %v358_v36 }
  0xb4   : > { %12048 = vst [vmem:[#allocation83_spill] sm:$0xff] %v5168_v50  ;;  %12049 = vst [vmem:[#allocation84_spill] sm:$0xff] %v5171_v51  ;;  %v361_v51 = vld [vmem:[%s4728_s16 + $0x410] sm:$0xff]  ;;  %v362_v50 = vld [vmem:[%s4728_s16 + $0x418] sm:$0xff]  ;;  %v5261_v43 = vmul.f32 %v4751_v19, %v356_v42  ;;  %v5286_v35 = vmul.f32 %v4751_v19, %v363_v49 }
  0xb5   : > { %12050 = vst [vmem:[#allocation85_spill] sm:$0xff] %v5174_v52  ;;  %12051 = vst [vmem:[#allocation86_spill] sm:$0xff] %v5181_v57  ;;  %v360_v52 = vld [vmem:[%s4728_s16 + $0x408] sm:$0xff]  ;;  %v367_v57 = vld [vmem:[%s4728_s16 + $0x440] sm:$0xff]  ;;  %v5280_v41 = vmul.f32 %v4751_v19, %v361_v51  ;;  %v5283_v36 = vmul.f32 %v4751_v19, %v362_v50 }
  0xb6   : > { %12052 = vst [vmem:[#allocation87_spill] sm:$0xff] %v5184_v58  ;;  %12053 = vst [vmem:[#allocation88_spill] sm:$0xff] %v5187_v59  ;;  %v365_v59 = vld [vmem:[%s4728_s16 + $0x430] sm:$0xff]  ;;  %v366_v58 = vld [vmem:[%s4728_s16 + $0x438] sm:$0xff]  ;;  %v5277_v42 = vmul.f32 %v4751_v19, %v360_v52  ;;  %v5302_v49 = vmul.f32 %v4751_v19, %v367_v57 }
  0xb7   : > { %12054 = vst [vmem:[#allocation89_spill] sm:$0xff] %v5190_v60  ;;  %12055 = vst [vmem:[#allocation90_spill] sm:$0xff] %v5197_v1  ;;  %v364_v60 = vld [vmem:[%s4728_s16 + $0x428] sm:$0xff]  ;;  %v371_v1 = vld [vmem:[%s4728_s16 + $0x460] sm:$0xff]  ;;  %v5296_v51 = vmul.f32 %v4751_v19, %v365_v59  ;;  %v5299_v50 = vmul.f32 %v4751_v19, %v366_v58 }
  0xb8   : > { %12056 = vst [vmem:[#allocation91_spill] sm:$0xff] %v5200_v2  ;;  %12057 = vst [vmem:[#allocation92_spill] sm:$0xff] %v5203_v3  ;;  %v369_v3 = vld [vmem:[%s4728_s16 + $0x450] sm:$0xff]  ;;  %v370_v2 = vld [vmem:[%s4728_s16 + $0x458] sm:$0xff]  ;;  %v5293_v52 = vmul.f32 %v4751_v19, %v364_v60  ;;  %v5318_v57 = vmul.f32 %v4751_v19, %v371_v1 }
  0xb9   : > { %12058 = vst [vmem:[#allocation93_spill] sm:$0xff] %v5206_v4  ;;  %12059 = vst [vmem:[#allocation94_spill] sm:$0xff] %v5213_v9  ;;  %v368_v4 = vld [vmem:[%s4728_s16 + $0x448] sm:$0xff]  ;;  %v375_v9 = vld [vmem:[%s4728_s16 + $0x480] sm:$0xff]  ;;  %v5312_v59 = vmul.f32 %v4751_v19, %v369_v3  ;;  %v5315_v58 = vmul.f32 %v4751_v19, %v370_v2 }
  0xba   : > { %12060 = vst [vmem:[#allocation95_spill] sm:$0xff] %v5216_v10  ;;  %12061 = vst [vmem:[#allocation96_spill] sm:$0xff] %v5219_v11  ;;  %v373_v11 = vld [vmem:[%s4728_s16 + $0x470] sm:$0xff]  ;;  %v374_v10 = vld [vmem:[%s4728_s16 + $0x478] sm:$0xff]  ;;  %v5309_v60 = vmul.f32 %v4751_v19, %v368_v4  ;;  %v5334_v1 = vmul.f32 %v4751_v19, %v375_v9 }
  0xbb   : > { %12062 = vst [vmem:[#allocation97_spill] sm:$0xff] %v5222_v12  ;;  %12063 = vst [vmem:[#allocation98_spill] sm:$0xff] %v5229_v17  ;;  %v372_v12 = vld [vmem:[%s4728_s16 + $0x468] sm:$0xff]  ;;  %v379_v17 = vld [vmem:[%s4728_s16 + $0x4a0] sm:$0xff]  ;;  %v5328_v3 = vmul.f32 %v4751_v19, %v373_v11  ;;  %v5331_v2 = vmul.f32 %v4751_v19, %v374_v10 }
  0xbc   : > { %12064 = vst [vmem:[#allocation99_spill] sm:$0xff] %v5232_v18  ;;  %12065 = vst [vmem:[#allocation100_spill] sm:$0xff] %v5235_v20  ;;  %v377_v20 = vld [vmem:[%s4728_s16 + $0x490] sm:$0xff]  ;;  %v378_v18 = vld [vmem:[%s4728_s16 + $0x498] sm:$0xff]  ;;  %v5325_v4 = vmul.f32 %v4751_v19, %v372_v12  ;;  %v5350_v9 = vmul.f32 %v4751_v19, %v379_v17 }
  0xbd   : > { %12066 = vst [vmem:[#allocation101_spill] sm:$0xff] %v5238_v21  ;;  %12067 = vst [vmem:[#allocation102_spill] sm:$0xff] %v5245_v27  ;;  %v376_v21 = vld [vmem:[%s4728_s16 + $0x488] sm:$0xff]  ;;  %v383_v27 = vld [vmem:[%s4728_s16 + $0x4c0] sm:$0xff]  ;;  %v5344_v11 = vmul.f32 %v4751_v19, %v377_v20  ;;  %v5347_v10 = vmul.f32 %v4751_v19, %v378_v18 }
  0xbe   : > { %12068 = vst [vmem:[#allocation103_spill] sm:$0xff] %v5248_v28  ;;  %12069 = vst [vmem:[#allocation104_spill] sm:$0xff] %v5251_v33  ;;  %v381_v33 = vld [vmem:[%s4728_s16 + $0x4b0] sm:$0xff]  ;;  %v382_v28 = vld [vmem:[%s4728_s16 + $0x4b8] sm:$0xff]  ;;  %v5341_v12 = vmul.f32 %v4751_v19, %v376_v21  ;;  %v5366_v17 = vmul.f32 %v4751_v19, %v383_v27 }
  0xbf   : > { %12070 = vst [vmem:[#allocation105_spill] sm:$0xff] %v5254_v34  ;;  %12071 = vst [vmem:[#allocation106_spill] sm:$0xff] %v5261_v43  ;;  %v380_v34 = vld [vmem:[%s4728_s16 + $0x4a8] sm:$0xff]  ;;  %v387_v43 = vld [vmem:[%s4728_s16 + $0x4e0] sm:$0xff]  ;;  %v5360_v20 = vmul.f32 %v4751_v19, %v381_v33  ;;  %v5363_v18 = vmul.f32 %v4751_v19, %v382_v28 }
  0xc0   : > { %12072 = vst [vmem:[#allocation107_spill] sm:$0xff] %v5264_v44  ;;  %12073 = vst [vmem:[#allocation108_spill] sm:$0xff] %v5267_v26  ;;  %v385_v26 = vld [vmem:[%s4728_s16 + $0x4d0] sm:$0xff]  ;;  %v386_v44 = vld [vmem:[%s4728_s16 + $0x4d8] sm:$0xff]  ;;  %v5357_v21 = vmul.f32 %v4751_v19, %v380_v34  ;;  %v5382_v27 = vmul.f32 %v4751_v19, %v387_v43 }
  0xc1   : > { %12074 = vst [vmem:[#allocation109_spill] sm:$0xff] %v5270_v25  ;;  %12075 = vst [vmem:[#allocation110_spill] sm:$0xff] %v5277_v42  ;;  %v384_v25 = vld [vmem:[%s4728_s16 + $0x4c8] sm:$0xff]  ;;  %v391_v42 = vld [vmem:[%s4728_s16 + $0x500] sm:$0xff]  ;;  %v5376_v33 = vmul.f32 %v4751_v19, %v385_v26  ;;  %v5379_v28 = vmul.f32 %v4751_v19, %v386_v44 }
  0xc2   : > { %12076 = vst [vmem:[#allocation111_spill] sm:$0xff] %v5280_v41  ;;  %12077 = vst [vmem:[#allocation112_spill] sm:$0xff] %v5283_v36  ;;  %v389_v36 = vld [vmem:[%s4728_s16 + $0x4f0] sm:$0xff]  ;;  %v390_v41 = vld [vmem:[%s4728_s16 + $0x4f8] sm:$0xff]  ;;  %v5373_v34 = vmul.f32 %v4751_v19, %v384_v25  ;;  %v5398_v43 = vmul.f32 %v4751_v19, %v391_v42 }
  0xc3   : > { %12078 = vst [vmem:[#allocation113_spill] sm:$0xff] %v5286_v35  ;;  %12079 = vst [vmem:[#allocation114_spill] sm:$0xff] %v5293_v52  ;;  %v388_v35 = vld [vmem:[%s4728_s16 + $0x4e8] sm:$0xff]  ;;  %v395_v52 = vld [vmem:[%s4728_s16 + $0x520] sm:$0xff]  ;;  %v5392_v26 = vmul.f32 %v4751_v19, %v389_v36  ;;  %v5395_v44 = vmul.f32 %v4751_v19, %v390_v41 }
  0xc4   : > { %12080 = vst [vmem:[#allocation115_spill] sm:$0xff] %v5296_v51  ;;  %12081 = vst [vmem:[#allocation116_spill] sm:$0xff] %v5299_v50  ;;  %v393_v50 = vld [vmem:[%s4728_s16 + $0x510] sm:$0xff]  ;;  %v394_v51 = vld [vmem:[%s4728_s16 + $0x518] sm:$0xff]  ;;  %v5389_v25 = vmul.f32 %v4751_v19, %v388_v35  ;;  %v5414_v42 = vmul.f32 %v4751_v19, %v395_v52 }
  0xc5   : > { %12082 = vst [vmem:[#allocation117_spill] sm:$0xff] %v5302_v49  ;;  %12083 = vst [vmem:[#allocation118_spill] sm:$0xff] %v5309_v60  ;;  %v392_v49 = vld [vmem:[%s4728_s16 + $0x508] sm:$0xff]  ;;  %v399_v60 = vld [vmem:[%s4728_s16 + $0x540] sm:$0xff]  ;;  %v5408_v36 = vmul.f32 %v4751_v19, %v393_v50  ;;  %v5411_v41 = vmul.f32 %v4751_v19, %v394_v51 }
  0xc6   : > { %12084 = vst [vmem:[#allocation119_spill] sm:$0xff] %v5312_v59  ;;  %12085 = vst [vmem:[#allocation120_spill] sm:$0xff] %v5315_v58  ;;  %v397_v58 = vld [vmem:[%s4728_s16 + $0x530] sm:$0xff]  ;;  %v398_v59 = vld [vmem:[%s4728_s16 + $0x538] sm:$0xff]  ;;  %v5405_v35 = vmul.f32 %v4751_v19, %v392_v49  ;;  %v5430_v52 = vmul.f32 %v4751_v19, %v399_v60 }
  0xc7   : > { %12086 = vst [vmem:[#allocation121_spill] sm:$0xff] %v5318_v57  ;;  %12087 = vst [vmem:[#allocation122_spill] sm:$0xff] %v5325_v4  ;;  %v396_v57 = vld [vmem:[%s4728_s16 + $0x528] sm:$0xff]  ;;  %v403_v4 = vld [vmem:[%s4728_s16 + $0x560] sm:$0xff]  ;;  %v5424_v50 = vmul.f32 %v4751_v19, %v397_v58  ;;  %v5427_v51 = vmul.f32 %v4751_v19, %v398_v59 }
  0xc8   : > { %12088 = vst [vmem:[#allocation123_spill] sm:$0xff] %v5328_v3  ;;  %12089 = vst [vmem:[#allocation124_spill] sm:$0xff] %v5331_v2  ;;  %v401_v2 = vld [vmem:[%s4728_s16 + $0x550] sm:$0xff]  ;;  %v402_v3 = vld [vmem:[%s4728_s16 + $0x558] sm:$0xff]  ;;  %v5421_v49 = vmul.f32 %v4751_v19, %v396_v57  ;;  %v5446_v60 = vmul.f32 %v4751_v19, %v403_v4 }
  0xc9   : > { %12090 = vst [vmem:[#allocation125_spill] sm:$0xff] %v5334_v1  ;;  %12091 = vst [vmem:[#allocation126_spill] sm:$0xff] %v5341_v12  ;;  %v400_v1 = vld [vmem:[%s4728_s16 + $0x548] sm:$0xff]  ;;  %v407_v12 = vld [vmem:[%s4728_s16 + $0x580] sm:$0xff]  ;;  %v5440_v58 = vmul.f32 %v4751_v19, %v401_v2  ;;  %v5443_v59 = vmul.f32 %v4751_v19, %v402_v3 }
  0xca   : > { %12092 = vst [vmem:[#allocation127_spill] sm:$0xff] %v5344_v11  ;;  %12093 = vst [vmem:[#allocation128_spill] sm:$0xff] %v5347_v10  ;;  %v405_v10 = vld [vmem:[%s4728_s16 + $0x570] sm:$0xff]  ;;  %v406_v11 = vld [vmem:[%s4728_s16 + $0x578] sm:$0xff]  ;;  %v5437_v57 = vmul.f32 %v4751_v19, %v400_v1  ;;  %v5462_v4 = vmul.f32 %v4751_v19, %v407_v12 }
  0xcb   : > { %12094 = vst [vmem:[#allocation129_spill] sm:$0xff] %v5350_v9  ;;  %12095 = vst [vmem:[#allocation130_spill] sm:$0xff] %v5357_v21  ;;  %v404_v9 = vld [vmem:[%s4728_s16 + $0x568] sm:$0xff]  ;;  %v411_v21 = vld [vmem:[%s4728_s16 + $0x5a0] sm:$0xff]  ;;  %v5456_v2 = vmul.f32 %v4751_v19, %v405_v10  ;;  %v5459_v3 = vmul.f32 %v4751_v19, %v406_v11 }
  0xcc   : > { %12096 = vst [vmem:[#allocation131_spill] sm:$0xff] %v5360_v20  ;;  %12097 = vst [vmem:[#allocation132_spill] sm:$0xff] %v5363_v18  ;;  %v409_v18 = vld [vmem:[%s4728_s16 + $0x590] sm:$0xff]  ;;  %v410_v20 = vld [vmem:[%s4728_s16 + $0x598] sm:$0xff]  ;;  %v5453_v1 = vmul.f32 %v4751_v19, %v404_v9  ;;  %v5478_v12 = vmul.f32 %v4751_v19, %v411_v21 }
  0xcd   : > { %12098 = vst [vmem:[#allocation133_spill] sm:$0xff] %v5366_v17  ;;  %12099 = vst [vmem:[#allocation134_spill] sm:$0xff] %v5373_v34  ;;  %v408_v17 = vld [vmem:[%s4728_s16 + $0x588] sm:$0xff]  ;;  %v415_v34 = vld [vmem:[%s4728_s16 + $0x5c0] sm:$0xff]  ;;  %v5472_v10 = vmul.f32 %v4751_v19, %v409_v18  ;;  %v5475_v11 = vmul.f32 %v4751_v19, %v410_v20 }
  0xce   : > { %12100 = vst [vmem:[#allocation135_spill] sm:$0xff] %v5376_v33  ;;  %12101 = vst [vmem:[#allocation136_spill] sm:$0xff] %v5379_v28  ;;  %v413_v28 = vld [vmem:[%s4728_s16 + $0x5b0] sm:$0xff]  ;;  %v414_v33 = vld [vmem:[%s4728_s16 + $0x5b8] sm:$0xff]  ;;  %v5469_v9 = vmul.f32 %v4751_v19, %v408_v17  ;;  %v5494_v21 = vmul.f32 %v4751_v19, %v415_v34 }
  0xcf   : > { %12102 = vst [vmem:[#allocation137_spill] sm:$0xff] %v5382_v27  ;;  %12103 = vst [vmem:[#allocation138_spill] sm:$0xff] %v5389_v25  ;;  %v412_v27 = vld [vmem:[%s4728_s16 + $0x5a8] sm:$0xff]  ;;  %v419_v25 = vld [vmem:[%s4728_s16 + $0x5e0] sm:$0xff]  ;;  %v5488_v18 = vmul.f32 %v4751_v19, %v413_v28  ;;  %v5491_v20 = vmul.f32 %v4751_v19, %v414_v33 }
  0xd0   : > { %12104 = vst [vmem:[#allocation139_spill] sm:$0xff] %v5392_v26  ;;  %12105 = vst [vmem:[#allocation140_spill] sm:$0xff] %v5395_v44  ;;  %v417_v44 = vld [vmem:[%s4728_s16 + $0x5d0] sm:$0xff]  ;;  %v418_v26 = vld [vmem:[%s4728_s16 + $0x5d8] sm:$0xff]  ;;  %v5485_v17 = vmul.f32 %v4751_v19, %v412_v27  ;;  %v5510_v34 = vmul.f32 %v4751_v19, %v419_v25 }
  0xd1   : > { %12106 = vst [vmem:[#allocation141_spill] sm:$0xff] %v5398_v43  ;;  %12107 = vst [vmem:[#allocation142_spill] sm:$0xff] %v5405_v35  ;;  %v416_v43 = vld [vmem:[%s4728_s16 + $0x5c8] sm:$0xff]  ;;  %v423_v35 = vld [vmem:[%s4728_s16 + $0x600] sm:$0xff]  ;;  %v5504_v28 = vmul.f32 %v4751_v19, %v417_v44  ;;  %v5507_v33 = vmul.f32 %v4751_v19, %v418_v26 }
  0xd2   : > { %12108 = vst [vmem:[#allocation143_spill] sm:$0xff] %v5408_v36  ;;  %12109 = vst [vmem:[#allocation144_spill] sm:$0xff] %v5411_v41  ;;  %v421_v41 = vld [vmem:[%s4728_s16 + $0x5f0] sm:$0xff]  ;;  %v422_v36 = vld [vmem:[%s4728_s16 + $0x5f8] sm:$0xff]  ;;  %v5501_v27 = vmul.f32 %v4751_v19, %v416_v43  ;;  %v5526_v25 = vmul.f32 %v4751_v19, %v423_v35 }
  0xd3   : > { %12110 = vst [vmem:[#allocation145_spill] sm:$0xff] %v5414_v42  ;;  %12111 = vst [vmem:[#allocation146_spill] sm:$0xff] %v5421_v49  ;;  %v420_v42 = vld [vmem:[%s4728_s16 + $0x5e8] sm:$0xff]  ;;  %v427_v49 = vld [vmem:[%s4728_s16 + $0x620] sm:$0xff]  ;;  %v5520_v44 = vmul.f32 %v4751_v19, %v421_v41  ;;  %v5523_v26 = vmul.f32 %v4751_v19, %v422_v36 }
  0xd4   : > { %12112 = vst [vmem:[#allocation147_spill] sm:$0xff] %v5424_v50  ;;  %12113 = vst [vmem:[#allocation148_spill] sm:$0xff] %v5427_v51  ;;  %v425_v51 = vld [vmem:[%s4728_s16 + $0x610] sm:$0xff]  ;;  %v426_v50 = vld [vmem:[%s4728_s16 + $0x618] sm:$0xff]  ;;  %v5517_v43 = vmul.f32 %v4751_v19, %v420_v42  ;;  %v5542_v35 = vmul.f32 %v4751_v19, %v427_v49 }
  0xd5   : > { %12114 = vst [vmem:[#allocation149_spill] sm:$0xff] %v5430_v52  ;;  %12115 = vst [vmem:[#allocation150_spill] sm:$0xff] %v5437_v57  ;;  %v424_v52 = vld [vmem:[%s4728_s16 + $0x608] sm:$0xff]  ;;  %v431_v57 = vld [vmem:[%s4728_s16 + $0x640] sm:$0xff]  ;;  %v5536_v41 = vmul.f32 %v4751_v19, %v425_v51  ;;  %v5539_v36 = vmul.f32 %v4751_v19, %v426_v50 }
  0xd6   : > { %12116 = vst [vmem:[#allocation151_spill] sm:$0xff] %v5440_v58  ;;  %12117 = vst [vmem:[#allocation152_spill] sm:$0xff] %v5443_v59  ;;  %v429_v59 = vld [vmem:[%s4728_s16 + $0x630] sm:$0xff]  ;;  %v430_v58 = vld [vmem:[%s4728_s16 + $0x638] sm:$0xff]  ;;  %v5533_v42 = vmul.f32 %v4751_v19, %v424_v52  ;;  %v5558_v49 = vmul.f32 %v4751_v19, %v431_v57 }
  0xd7   : > { %12118 = vst [vmem:[#allocation153_spill] sm:$0xff] %v5446_v60  ;;  %12119 = vst [vmem:[#allocation154_spill] sm:$0xff] %v5453_v1  ;;  %v428_v60 = vld [vmem:[%s4728_s16 + $0x628] sm:$0xff]  ;;  %v435_v1 = vld [vmem:[%s4728_s16 + $0x660] sm:$0xff]  ;;  %v5552_v51 = vmul.f32 %v4751_v19, %v429_v59  ;;  %v5555_v50 = vmul.f32 %v4751_v19, %v430_v58 }
  0xd8   : > { %12120 = vst [vmem:[#allocation155_spill] sm:$0xff] %v5456_v2  ;;  %12121 = vst [vmem:[#allocation156_spill] sm:$0xff] %v5459_v3  ;;  %v433_v3 = vld [vmem:[%s4728_s16 + $0x650] sm:$0xff]  ;;  %v434_v2 = vld [vmem:[%s4728_s16 + $0x658] sm:$0xff]  ;;  %v5549_v52 = vmul.f32 %v4751_v19, %v428_v60  ;;  %v5574_v57 = vmul.f32 %v4751_v19, %v435_v1 }
  0xd9   : > { %12122 = vst [vmem:[#allocation157_spill] sm:$0xff] %v5462_v4  ;;  %12123 = vst [vmem:[#allocation158_spill] sm:$0xff] %v5469_v9  ;;  %v432_v4 = vld [vmem:[%s4728_s16 + $0x648] sm:$0xff]  ;;  %v439_v9 = vld [vmem:[%s4728_s16 + $0x680] sm:$0xff]  ;;  %v5568_v59 = vmul.f32 %v4751_v19, %v433_v3  ;;  %v5571_v58 = vmul.f32 %v4751_v19, %v434_v2 }
  0xda   : > { %12124 = vst [vmem:[#allocation159_spill] sm:$0xff] %v5472_v10  ;;  %12125 = vst [vmem:[#allocation160_spill] sm:$0xff] %v5475_v11  ;;  %v437_v11 = vld [vmem:[%s4728_s16 + $0x670] sm:$0xff]  ;;  %v438_v10 = vld [vmem:[%s4728_s16 + $0x678] sm:$0xff]  ;;  %v5565_v60 = vmul.f32 %v4751_v19, %v432_v4  ;;  %v5590_v1 = vmul.f32 %v4751_v19, %v439_v9 }
  0xdb   : > { %12126 = vst [vmem:[#allocation161_spill] sm:$0xff] %v5478_v12  ;;  %12127 = vst [vmem:[#allocation162_spill] sm:$0xff] %v5485_v17  ;;  %v436_v12 = vld [vmem:[%s4728_s16 + $0x668] sm:$0xff]  ;;  %v443_v17 = vld [vmem:[%s4728_s16 + $0x6a0] sm:$0xff]  ;;  %v5584_v3 = vmul.f32 %v4751_v19, %v437_v11  ;;  %v5587_v2 = vmul.f32 %v4751_v19, %v438_v10 }
  0xdc   : > { %12128 = vst [vmem:[#allocation163_spill] sm:$0xff] %v5488_v18  ;;  %12129 = vst [vmem:[#allocation164_spill] sm:$0xff] %v5491_v20  ;;  %v441_v20 = vld [vmem:[%s4728_s16 + $0x690] sm:$0xff]  ;;  %v442_v18 = vld [vmem:[%s4728_s16 + $0x698] sm:$0xff]  ;;  %v5581_v4 = vmul.f32 %v4751_v19, %v436_v12  ;;  %v5606_v9 = vmul.f32 %v4751_v19, %v443_v17 }
  0xdd   : > { %12130 = vst [vmem:[#allocation165_spill] sm:$0xff] %v5494_v21  ;;  %12131 = vst [vmem:[#allocation166_spill] sm:$0xff] %v5501_v27  ;;  %v440_v21 = vld [vmem:[%s4728_s16 + $0x688] sm:$0xff]  ;;  %v447_v27 = vld [vmem:[%s4728_s16 + $0x6c0] sm:$0xff]  ;;  %v5600_v11 = vmul.f32 %v4751_v19, %v441_v20  ;;  %v5603_v10 = vmul.f32 %v4751_v19, %v442_v18 }
  0xde   : > { %12132 = vst [vmem:[#allocation167_spill] sm:$0xff] %v5504_v28  ;;  %12133 = vst [vmem:[#allocation168_spill] sm:$0xff] %v5507_v33  ;;  %v445_v33 = vld [vmem:[%s4728_s16 + $0x6b0] sm:$0xff]  ;;  %v446_v28 = vld [vmem:[%s4728_s16 + $0x6b8] sm:$0xff]  ;;  %v5597_v12 = vmul.f32 %v4751_v19, %v440_v21  ;;  %v5622_v17 = vmul.f32 %v4751_v19, %v447_v27 }
  0xdf   : > { %12134 = vst [vmem:[#allocation169_spill] sm:$0xff] %v5510_v34  ;;  %12135 = vst [vmem:[#allocation170_spill] sm:$0xff] %v5517_v43  ;;  %v444_v34 = vld [vmem:[%s4728_s16 + $0x6a8] sm:$0xff]  ;;  %v451_v43 = vld [vmem:[%s4728_s16 + $0x6e0] sm:$0xff]  ;;  %v5616_v20 = vmul.f32 %v4751_v19, %v445_v33  ;;  %v5619_v18 = vmul.f32 %v4751_v19, %v446_v28 }
  0xe0   : > { %12136 = vst [vmem:[#allocation171_spill] sm:$0xff] %v5520_v44  ;;  %12137 = vst [vmem:[#allocation172_spill] sm:$0xff] %v5523_v26  ;;  %v449_v26 = vld [vmem:[%s4728_s16 + $0x6d0] sm:$0xff]  ;;  %v450_v44 = vld [vmem:[%s4728_s16 + $0x6d8] sm:$0xff]  ;;  %v5613_v21 = vmul.f32 %v4751_v19, %v444_v34  ;;  %v5638_v27 = vmul.f32 %v4751_v19, %v451_v43 }
  0xe1   : > { %12138 = vst [vmem:[#allocation173_spill] sm:$0xff] %v5526_v25  ;;  %12139 = vst [vmem:[#allocation174_spill] sm:$0xff] %v5533_v42  ;;  %v448_v25 = vld [vmem:[%s4728_s16 + $0x6c8] sm:$0xff]  ;;  %v455_v42 = vld [vmem:[%s4728_s16 + $0x700] sm:$0xff]  ;;  %v5632_v33 = vmul.f32 %v4751_v19, %v449_v26  ;;  %v5635_v28 = vmul.f32 %v4751_v19, %v450_v44 }
  0xe2   : > { %12140 = vst [vmem:[#allocation175_spill] sm:$0xff] %v5536_v41  ;;  %12141 = vst [vmem:[#allocation176_spill] sm:$0xff] %v5539_v36  ;;  %v453_v36 = vld [vmem:[%s4728_s16 + $0x6f0] sm:$0xff]  ;;  %v454_v41 = vld [vmem:[%s4728_s16 + $0x6f8] sm:$0xff]  ;;  %v5629_v34 = vmul.f32 %v4751_v19, %v448_v25  ;;  %v5654_v43 = vmul.f32 %v4751_v19, %v455_v42 }
  0xe3   : > { %12142 = vst [vmem:[#allocation177_spill] sm:$0xff] %v5542_v35  ;;  %12143 = vst [vmem:[#allocation178_spill] sm:$0xff] %v5549_v52  ;;  %v452_v35 = vld [vmem:[%s4728_s16 + $0x6e8] sm:$0xff]  ;;  %v459_v52 = vld [vmem:[%s4728_s16 + $0x720] sm:$0xff]  ;;  %v5648_v26 = vmul.f32 %v4751_v19, %v453_v36  ;;  %v5651_v44 = vmul.f32 %v4751_v19, %v454_v41 }
  0xe4   : > { %12144 = vst [vmem:[#allocation179_spill] sm:$0xff] %v5552_v51  ;;  %12145 = vst [vmem:[#allocation180_spill] sm:$0xff] %v5555_v50  ;;  %v457_v50 = vld [vmem:[%s4728_s16 + $0x710] sm:$0xff]  ;;  %v458_v51 = vld [vmem:[%s4728_s16 + $0x718] sm:$0xff]  ;;  %v5645_v25 = vmul.f32 %v4751_v19, %v452_v35  ;;  %v5670_v42 = vmul.f32 %v4751_v19, %v459_v52 }
  0xe5   : > { %12146 = vst [vmem:[#allocation181_spill] sm:$0xff] %v5558_v49  ;;  %12147 = vst [vmem:[#allocation182_spill] sm:$0xff] %v5565_v60  ;;  %v456_v49 = vld [vmem:[%s4728_s16 + $0x708] sm:$0xff]  ;;  %v463_v60 = vld [vmem:[%s4728_s16 + $0x740] sm:$0xff]  ;;  %v5664_v36 = vmul.f32 %v4751_v19, %v457_v50  ;;  %v5667_v41 = vmul.f32 %v4751_v19, %v458_v51 }
  0xe6   : > { %12148 = vst [vmem:[#allocation183_spill] sm:$0xff] %v5568_v59  ;;  %12149 = vst [vmem:[#allocation184_spill] sm:$0xff] %v5571_v58  ;;  %v461_v58 = vld [vmem:[%s4728_s16 + $0x730] sm:$0xff]  ;;  %v462_v59 = vld [vmem:[%s4728_s16 + $0x738] sm:$0xff]  ;;  %v5661_v35 = vmul.f32 %v4751_v19, %v456_v49  ;;  %v5686_v52 = vmul.f32 %v4751_v19, %v463_v60 }
  0xe7   : > { %12150 = vst [vmem:[#allocation185_spill] sm:$0xff] %v5574_v57  ;;  %12151 = vst [vmem:[#allocation186_spill] sm:$0xff] %v5581_v4  ;;  %v460_v57 = vld [vmem:[%s4728_s16 + $0x728] sm:$0xff]  ;;  %v467_v4 = vld [vmem:[%s4728_s16 + $0x760] sm:$0xff]  ;;  %v5680_v50 = vmul.f32 %v4751_v19, %v461_v58  ;;  %v5683_v51 = vmul.f32 %v4751_v19, %v462_v59 }
  0xe8   : > { %12152 = vst [vmem:[#allocation187_spill] sm:$0xff] %v5584_v3  ;;  %12153 = vst [vmem:[#allocation188_spill] sm:$0xff] %v5587_v2  ;;  %v465_v2 = vld [vmem:[%s4728_s16 + $0x750] sm:$0xff]  ;;  %v466_v3 = vld [vmem:[%s4728_s16 + $0x758] sm:$0xff]  ;;  %v5677_v49 = vmul.f32 %v4751_v19, %v460_v57  ;;  %v5702_v60 = vmul.f32 %v4751_v19, %v467_v4 }
  0xe9   : > { %12154 = vst [vmem:[#allocation189_spill] sm:$0xff] %v5590_v1  ;;  %12155 = vst [vmem:[#allocation190_spill] sm:$0xff] %v5597_v12  ;;  %v464_v1 = vld [vmem:[%s4728_s16 + $0x748] sm:$0xff]  ;;  %v471_v12 = vld [vmem:[%s4728_s16 + $0x780] sm:$0xff]  ;;  %v5696_v58 = vmul.f32 %v4751_v19, %v465_v2  ;;  %v5699_v59 = vmul.f32 %v4751_v19, %v466_v3 }
  0xea   : > { %12156 = vst [vmem:[#allocation191_spill] sm:$0xff] %v5600_v11  ;;  %12157 = vst [vmem:[#allocation192_spill] sm:$0xff] %v5603_v10  ;;  %v469_v10 = vld [vmem:[%s4728_s16 + $0x770] sm:$0xff]  ;;  %v470_v11 = vld [vmem:[%s4728_s16 + $0x778] sm:$0xff]  ;;  %v5693_v57 = vmul.f32 %v4751_v19, %v464_v1  ;;  %v5718_v4 = vmul.f32 %v4751_v19, %v471_v12 }
  0xeb   : > { %12158 = vst [vmem:[#allocation193_spill] sm:$0xff] %v5606_v9  ;;  %12159 = vst [vmem:[#allocation194_spill] sm:$0xff] %v5613_v21  ;;  %v468_v9 = vld [vmem:[%s4728_s16 + $0x768] sm:$0xff]  ;;  %v475_v21 = vld [vmem:[%s4728_s16 + $0x7a0] sm:$0xff]  ;;  %v5712_v2 = vmul.f32 %v4751_v19, %v469_v10  ;;  %v5715_v3 = vmul.f32 %v4751_v19, %v470_v11 }
  0xec   : > { %12160 = vst [vmem:[#allocation195_spill] sm:$0xff] %v5616_v20  ;;  %12161 = vst [vmem:[#allocation196_spill] sm:$0xff] %v5619_v18  ;;  %v473_v18 = vld [vmem:[%s4728_s16 + $0x790] sm:$0xff]  ;;  %v474_v20 = vld [vmem:[%s4728_s16 + $0x798] sm:$0xff]  ;;  %v5709_v1 = vmul.f32 %v4751_v19, %v468_v9  ;;  %v5734_v12 = vmul.f32 %v4751_v19, %v475_v21 }
  0xed   : > { %12162 = vst [vmem:[#allocation197_spill] sm:$0xff] %v5622_v17  ;;  %12163 = vst [vmem:[#allocation198_spill] sm:$0xff] %v5629_v34  ;;  %v472_v17 = vld [vmem:[%s4728_s16 + $0x788] sm:$0xff]  ;;  %v479_v34 = vld [vmem:[%s4728_s16 + $0x7c0] sm:$0xff]  ;;  %v5728_v10 = vmul.f32 %v4751_v19, %v473_v18  ;;  %v5731_v11 = vmul.f32 %v4751_v19, %v474_v20 }
  0xee   : > { %12164 = vst [vmem:[#allocation199_spill] sm:$0xff] %v5632_v33  ;;  %12165 = vst [vmem:[#allocation200_spill] sm:$0xff] %v5635_v28  ;;  %v477_v28 = vld [vmem:[%s4728_s16 + $0x7b0] sm:$0xff]  ;;  %v478_v33 = vld [vmem:[%s4728_s16 + $0x7b8] sm:$0xff]  ;;  %v5725_v9 = vmul.f32 %v4751_v19, %v472_v17  ;;  %v5750_v21 = vmul.f32 %v4751_v19, %v479_v34 }
  0xef   : > { %12166 = vst [vmem:[#allocation201_spill] sm:$0xff] %v5638_v27  ;;  %12167 = vst [vmem:[#allocation202_spill] sm:$0xff] %v5645_v25  ;;  %v476_v27 = vld [vmem:[%s4728_s16 + $0x7a8] sm:$0xff]  ;;  %v483_v25 = vld [vmem:[%s4728_s16 + $0x7e0] sm:$0xff]  ;;  %v5744_v18 = vmul.f32 %v4751_v19, %v477_v28  ;;  %v5747_v20 = vmul.f32 %v4751_v19, %v478_v33 }
  0xf0   : > { %12168 = vst [vmem:[#allocation203_spill] sm:$0xff] %v5648_v26  ;;  %12169 = vst [vmem:[#allocation204_spill] sm:$0xff] %v5651_v44  ;;  %v481_v44 = vld [vmem:[%s4728_s16 + $0x7d0] sm:$0xff]  ;;  %v482_v26 = vld [vmem:[%s4728_s16 + $0x7d8] sm:$0xff]  ;;  %v5741_v17 = vmul.f32 %v4751_v19, %v476_v27  ;;  %v5766_v34 = vmul.f32 %v4751_v19, %v483_v25 }
  0xf1   : > { %12170 = vst [vmem:[#allocation205_spill] sm:$0xff] %v5654_v43  ;;  %12171 = vst [vmem:[#allocation206_spill] sm:$0xff] %v5661_v35  ;;  %v480_v43 = vld [vmem:[%s4728_s16 + $0x7c8] sm:$0xff]  ;;  %v487_v35 = vld [vmem:[%s4728_s16 + $0x800] sm:$0xff]  ;;  %v5760_v28 = vmul.f32 %v4751_v19, %v481_v44  ;;  %v5763_v33 = vmul.f32 %v4751_v19, %v482_v26 }
  0xf2   : > { %12172 = vst [vmem:[#allocation207_spill] sm:$0xff] %v5664_v36  ;;  %12173 = vst [vmem:[#allocation208_spill] sm:$0xff] %v5667_v41  ;;  %v485_v41 = vld [vmem:[%s4728_s16 + $0x7f0] sm:$0xff]  ;;  %v486_v36 = vld [vmem:[%s4728_s16 + $0x7f8] sm:$0xff]  ;;  %v5757_v27 = vmul.f32 %v4751_v19, %v480_v43  ;;  %v5782_v25 = vmul.f32 %v4751_v19, %v487_v35 }
  0xf3   : > { %12174 = vst [vmem:[#allocation209_spill] sm:$0xff] %v5670_v42  ;;  %12175 = vst [vmem:[#allocation210_spill] sm:$0xff] %v5677_v49  ;;  %v484_v42 = vld [vmem:[%s4728_s16 + $0x7e8] sm:$0xff]  ;;  %v491_v49 = vld [vmem:[%s4728_s16 + $0x820] sm:$0xff]  ;;  %v5776_v44 = vmul.f32 %v4751_v19, %v485_v41  ;;  %v5779_v26 = vmul.f32 %v4751_v19, %v486_v36 }
  0xf4   : > { %12176 = vst [vmem:[#allocation211_spill] sm:$0xff] %v5680_v50  ;;  %12177 = vst [vmem:[#allocation212_spill] sm:$0xff] %v5683_v51  ;;  %v489_v51 = vld [vmem:[%s4728_s16 + $0x810] sm:$0xff]  ;;  %v490_v50 = vld [vmem:[%s4728_s16 + $0x818] sm:$0xff]  ;;  %v5773_v43 = vmul.f32 %v4751_v19, %v484_v42  ;;  %v5798_v35 = vmul.f32 %v4751_v19, %v491_v49 }
  0xf5   : > { %12178 = vst [vmem:[#allocation213_spill] sm:$0xff] %v5686_v52  ;;  %12179 = vst [vmem:[#allocation214_spill] sm:$0xff] %v5693_v57  ;;  %v488_v52 = vld [vmem:[%s4728_s16 + $0x808] sm:$0xff]  ;;  %v495_v57 = vld [vmem:[%s4728_s16 + $0x840] sm:$0xff]  ;;  %v5792_v41 = vmul.f32 %v4751_v19, %v489_v51  ;;  %v5795_v36 = vmul.f32 %v4751_v19, %v490_v50 }
  0xf6   : > { %12180 = vst [vmem:[#allocation215_spill] sm:$0xff] %v5696_v58  ;;  %12181 = vst [vmem:[#allocation216_spill] sm:$0xff] %v5699_v59  ;;  %v493_v59 = vld [vmem:[%s4728_s16 + $0x830] sm:$0xff]  ;;  %v494_v58 = vld [vmem:[%s4728_s16 + $0x838] sm:$0xff]  ;;  %v5789_v42 = vmul.f32 %v4751_v19, %v488_v52  ;;  %v5814_v49 = vmul.f32 %v4751_v19, %v495_v57 }
  0xf7   : > { %12182 = vst [vmem:[#allocation217_spill] sm:$0xff] %v5702_v60  ;;  %12183 = vst [vmem:[#allocation218_spill] sm:$0xff] %v5709_v1  ;;  %v492_v60 = vld [vmem:[%s4728_s16 + $0x828] sm:$0xff]  ;;  %v499_v1 = vld [vmem:[%s4728_s16 + $0x860] sm:$0xff]  ;;  %v5808_v51 = vmul.f32 %v4751_v19, %v493_v59  ;;  %v5811_v50 = vmul.f32 %v4751_v19, %v494_v58 }
  0xf8   : > { %12184 = vst [vmem:[#allocation219_spill] sm:$0xff] %v5712_v2  ;;  %12185 = vst [vmem:[#allocation220_spill] sm:$0xff] %v5715_v3  ;;  %v497_v3 = vld [vmem:[%s4728_s16 + $0x850] sm:$0xff]  ;;  %v498_v2 = vld [vmem:[%s4728_s16 + $0x858] sm:$0xff]  ;;  %v5805_v52 = vmul.f32 %v4751_v19, %v492_v60  ;;  %v5830_v57 = vmul.f32 %v4751_v19, %v499_v1 }
  0xf9   : > { %12186 = vst [vmem:[#allocation221_spill] sm:$0xff] %v5718_v4  ;;  %12187 = vst [vmem:[#allocation222_spill] sm:$0xff] %v5725_v9  ;;  %v496_v4 = vld [vmem:[%s4728_s16 + $0x848] sm:$0xff]  ;;  %v503_v9 = vld [vmem:[%s4728_s16 + $0x880] sm:$0xff]  ;;  %v5824_v59 = vmul.f32 %v4751_v19, %v497_v3  ;;  %v5827_v58 = vmul.f32 %v4751_v19, %v498_v2 }
  0xfa   : > { %12188 = vst [vmem:[#allocation223_spill] sm:$0xff] %v5728_v10  ;;  %12189 = vst [vmem:[#allocation224_spill] sm:$0xff] %v5731_v11  ;;  %v501_v11 = vld [vmem:[%s4728_s16 + $0x870] sm:$0xff]  ;;  %v502_v10 = vld [vmem:[%s4728_s16 + $0x878] sm:$0xff]  ;;  %v5821_v60 = vmul.f32 %v4751_v19, %v496_v4  ;;  %v5846_v1 = vmul.f32 %v4751_v19, %v503_v9 }
  0xfb   : > { %12190 = vst [vmem:[#allocation225_spill] sm:$0xff] %v5734_v12  ;;  %12191 = vst [vmem:[#allocation226_spill] sm:$0xff] %v5741_v17  ;;  %v500_v12 = vld [vmem:[%s4728_s16 + $0x868] sm:$0xff]  ;;  %v507_v17 = vld [vmem:[%s4728_s16 + $0x8a0] sm:$0xff]  ;;  %v5840_v3 = vmul.f32 %v4751_v19, %v501_v11  ;;  %v5843_v2 = vmul.f32 %v4751_v19, %v502_v10 }
  0xfc   : > { %12192 = vst [vmem:[#allocation227_spill] sm:$0xff] %v5744_v18  ;;  %12193 = vst [vmem:[#allocation228_spill] sm:$0xff] %v5747_v20  ;;  %v505_v20 = vld [vmem:[%s4728_s16 + $0x890] sm:$0xff]  ;;  %v506_v18 = vld [vmem:[%s4728_s16 + $0x898] sm:$0xff]  ;;  %v5837_v4 = vmul.f32 %v4751_v19, %v500_v12  ;;  %v5862_v9 = vmul.f32 %v4751_v19, %v507_v17 }
  0xfd   : > { %12194 = vst [vmem:[#allocation229_spill] sm:$0xff] %v5750_v21  ;;  %12195 = vst [vmem:[#allocation230_spill] sm:$0xff] %v5757_v27  ;;  %v504_v21 = vld [vmem:[%s4728_s16 + $0x888] sm:$0xff]  ;;  %v511_v27 = vld [vmem:[%s4728_s16 + $0x8c0] sm:$0xff]  ;;  %v5856_v11 = vmul.f32 %v4751_v19, %v505_v20  ;;  %v5859_v10 = vmul.f32 %v4751_v19, %v506_v18 }
  0xfe   : > { %12196 = vst [vmem:[#allocation231_spill] sm:$0xff] %v5760_v28  ;;  %12197 = vst [vmem:[#allocation232_spill] sm:$0xff] %v5763_v33  ;;  %v509_v33 = vld [vmem:[%s4728_s16 + $0x8b0] sm:$0xff]  ;;  %v510_v28 = vld [vmem:[%s4728_s16 + $0x8b8] sm:$0xff]  ;;  %v5853_v12 = vmul.f32 %v4751_v19, %v504_v21  ;;  %v5878_v17 = vmul.f32 %v4751_v19, %v511_v27 }
  0xff   : > { %12198 = vst [vmem:[#allocation233_spill] sm:$0xff] %v5766_v34  ;;  %12199 = vst [vmem:[#allocation234_spill] sm:$0xff] %v5773_v43  ;;  %v508_v34 = vld [vmem:[%s4728_s16 + $0x8a8] sm:$0xff]  ;;  %v515_v43 = vld [vmem:[%s4728_s16 + $0x8e0] sm:$0xff]  ;;  %v5872_v20 = vmul.f32 %v4751_v19, %v509_v33  ;;  %v5875_v18 = vmul.f32 %v4751_v19, %v510_v28 }
 0x100   : > { %12200 = vst [vmem:[#allocation235_spill] sm:$0xff] %v5776_v44  ;;  %12201 = vst [vmem:[#allocation236_spill] sm:$0xff] %v5779_v26  ;;  %v513_v26 = vld [vmem:[%s4728_s16 + $0x8d0] sm:$0xff]  ;;  %v514_v44 = vld [vmem:[%s4728_s16 + $0x8d8] sm:$0xff]  ;;  %v5869_v21 = vmul.f32 %v4751_v19, %v508_v34  ;;  %v5894_v27 = vmul.f32 %v4751_v19, %v515_v43 }
 0x101   : > { %12202 = vst [vmem:[#allocation237_spill] sm:$0xff] %v5782_v25  ;;  %12203 = vst [vmem:[#allocation238_spill] sm:$0xff] %v5789_v42  ;;  %v512_v25 = vld [vmem:[%s4728_s16 + $0x8c8] sm:$0xff]  ;;  %v519_v42 = vld [vmem:[%s4728_s16 + $0x900] sm:$0xff]  ;;  %v5888_v33 = vmul.f32 %v4751_v19, %v513_v26  ;;  %v5891_v28 = vmul.f32 %v4751_v19, %v514_v44 }
 0x102   : > { %12204 = vst [vmem:[#allocation239_spill] sm:$0xff] %v5792_v41  ;;  %12205 = vst [vmem:[#allocation240_spill] sm:$0xff] %v5795_v36  ;;  %v517_v36 = vld [vmem:[%s4728_s16 + $0x8f0] sm:$0xff]  ;;  %v518_v41 = vld [vmem:[%s4728_s16 + $0x8f8] sm:$0xff]  ;;  %v5885_v34 = vmul.f32 %v4751_v19, %v512_v25  ;;  %v5910_v43 = vmul.f32 %v4751_v19, %v519_v42 }
 0x103   : > { %12206 = vst [vmem:[#allocation241_spill] sm:$0xff] %v5798_v35  ;;  %12207 = vst [vmem:[#allocation242_spill] sm:$0xff] %v5805_v52  ;;  %v516_v35 = vld [vmem:[%s4728_s16 + $0x8e8] sm:$0xff]  ;;  %v523_v52 = vld [vmem:[%s4728_s16 + $0x920] sm:$0xff]  ;;  %v5904_v26 = vmul.f32 %v4751_v19, %v517_v36  ;;  %v5907_v44 = vmul.f32 %v4751_v19, %v518_v41 }
 0x104   : > { %12208 = vst [vmem:[#allocation243_spill] sm:$0xff] %v5808_v51  ;;  %12209 = vst [vmem:[#allocation244_spill] sm:$0xff] %v5811_v50  ;;  %v521_v50 = vld [vmem:[%s4728_s16 + $0x910] sm:$0xff]  ;;  %v522_v51 = vld [vmem:[%s4728_s16 + $0x918] sm:$0xff]  ;;  %v5901_v25 = vmul.f32 %v4751_v19, %v516_v35  ;;  %v5926_v42 = vmul.f32 %v4751_v19, %v523_v52 }
 0x105   : > { %12210 = vst [vmem:[#allocation245_spill] sm:$0xff] %v5814_v49  ;;  %12211 = vst [vmem:[#allocation246_spill] sm:$0xff] %v5821_v60  ;;  %v520_v49 = vld [vmem:[%s4728_s16 + $0x908] sm:$0xff]  ;;  %v527_v60 = vld [vmem:[%s4728_s16 + $0x940] sm:$0xff]  ;;  %v5920_v36 = vmul.f32 %v4751_v19, %v521_v50  ;;  %v5923_v41 = vmul.f32 %v4751_v19, %v522_v51 }
 0x106   : > { %12212 = vst [vmem:[#allocation247_spill] sm:$0xff] %v5824_v59  ;;  %12213 = vst [vmem:[#allocation248_spill] sm:$0xff] %v5827_v58  ;;  %v525_v58 = vld [vmem:[%s4728_s16 + $0x930] sm:$0xff]  ;;  %v526_v59 = vld [vmem:[%s4728_s16 + $0x938] sm:$0xff]  ;;  %v5917_v35 = vmul.f32 %v4751_v19, %v520_v49  ;;  %v5942_v52 = vmul.f32 %v4751_v19, %v527_v60 }
 0x107   : > { %12214 = vst [vmem:[#allocation249_spill] sm:$0xff] %v5830_v57  ;;  %12215 = vst [vmem:[#allocation250_spill] sm:$0xff] %v5837_v4  ;;  %v524_v57 = vld [vmem:[%s4728_s16 + $0x928] sm:$0xff]  ;;  %v531_v4 = vld [vmem:[%s4728_s16 + $0x960] sm:$0xff]  ;;  %v5936_v50 = vmul.f32 %v4751_v19, %v525_v58  ;;  %v5939_v51 = vmul.f32 %v4751_v19, %v526_v59 }
 0x108   : > { %12216 = vst [vmem:[#allocation251_spill] sm:$0xff] %v5840_v3  ;;  %12217 = vst [vmem:[#allocation252_spill] sm:$0xff] %v5843_v2  ;;  %v529_v2 = vld [vmem:[%s4728_s16 + $0x950] sm:$0xff]  ;;  %v530_v3 = vld [vmem:[%s4728_s16 + $0x958] sm:$0xff]  ;;  %v5933_v49 = vmul.f32 %v4751_v19, %v524_v57  ;;  %v5958_v60 = vmul.f32 %v4751_v19, %v531_v4 }
 0x109   : > { %12218 = vst [vmem:[#allocation253_spill] sm:$0xff] %v5846_v1  ;;  %12219 = vst [vmem:[#allocation254_spill] sm:$0xff] %v5853_v12  ;;  %v528_v1 = vld [vmem:[%s4728_s16 + $0x948] sm:$0xff]  ;;  %v535_v12 = vld [vmem:[%s4728_s16 + $0x980] sm:$0xff]  ;;  %v5952_v58 = vmul.f32 %v4751_v19, %v529_v2  ;;  %v5955_v59 = vmul.f32 %v4751_v19, %v530_v3 }
 0x10a   : > { %12220 = vst [vmem:[#allocation255_spill] sm:$0xff] %v5856_v11  ;;  %12221 = vst [vmem:[#allocation256_spill] sm:$0xff] %v5859_v10  ;;  %v533_v10 = vld [vmem:[%s4728_s16 + $0x970] sm:$0xff]  ;;  %v534_v11 = vld [vmem:[%s4728_s16 + $0x978] sm:$0xff]  ;;  %v5949_v57 = vmul.f32 %v4751_v19, %v528_v1  ;;  %v5974_v4 = vmul.f32 %v4751_v19, %v535_v12 }
 0x10b   : > { %12222 = vst [vmem:[#allocation257_spill] sm:$0xff] %v5862_v9  ;;  %12223 = vst [vmem:[#allocation258_spill] sm:$0xff] %v5869_v21  ;;  %v532_v9 = vld [vmem:[%s4728_s16 + $0x968] sm:$0xff]  ;;  %v539_v21 = vld [vmem:[%s4728_s16 + $0x9a0] sm:$0xff]  ;;  %v5968_v2 = vmul.f32 %v4751_v19, %v533_v10  ;;  %v5971_v3 = vmul.f32 %v4751_v19, %v534_v11 }
 0x10c   : > { %12224 = vst [vmem:[#allocation259_spill] sm:$0xff] %v5872_v20  ;;  %12225 = vst [vmem:[#allocation260_spill] sm:$0xff] %v5875_v18  ;;  %v537_v18 = vld [vmem:[%s4728_s16 + $0x990] sm:$0xff]  ;;  %v538_v20 = vld [vmem:[%s4728_s16 + $0x998] sm:$0xff]  ;;  %v5965_v1 = vmul.f32 %v4751_v19, %v532_v9  ;;  %v5990_v12 = vmul.f32 %v4751_v19, %v539_v21 }
 0x10d   : > { %12226 = vst [vmem:[#allocation261_spill] sm:$0xff] %v5878_v17  ;;  %12227 = vst [vmem:[#allocation262_spill] sm:$0xff] %v5885_v34  ;;  %v536_v17 = vld [vmem:[%s4728_s16 + $0x988] sm:$0xff]  ;;  %v543_v34 = vld [vmem:[%s4728_s16 + $0x9c0] sm:$0xff]  ;;  %v5984_v10 = vmul.f32 %v4751_v19, %v537_v18  ;;  %v5987_v11 = vmul.f32 %v4751_v19, %v538_v20 }
 0x10e   : > { %12228 = vst [vmem:[#allocation263_spill] sm:$0xff] %v5888_v33  ;;  %12229 = vst [vmem:[#allocation264_spill] sm:$0xff] %v5891_v28  ;;  %v541_v28 = vld [vmem:[%s4728_s16 + $0x9b0] sm:$0xff]  ;;  %v542_v33 = vld [vmem:[%s4728_s16 + $0x9b8] sm:$0xff]  ;;  %v5981_v9 = vmul.f32 %v4751_v19, %v536_v17  ;;  %v6006_v21 = vmul.f32 %v4751_v19, %v543_v34 }
 0x10f   : > { %12230 = vst [vmem:[#allocation265_spill] sm:$0xff] %v5894_v27  ;;  %12231 = vst [vmem:[#allocation266_spill] sm:$0xff] %v5901_v25  ;;  %v540_v27 = vld [vmem:[%s4728_s16 + $0x9a8] sm:$0xff]  ;;  %v547_v25 = vld [vmem:[%s4728_s16 + $0x9e0] sm:$0xff]  ;;  %v6000_v18 = vmul.f32 %v4751_v19, %v541_v28  ;;  %v6003_v20 = vmul.f32 %v4751_v19, %v542_v33 }
 0x110   : > { %12232 = vst [vmem:[#allocation267_spill] sm:$0xff] %v5904_v26  ;;  %12233 = vst [vmem:[#allocation268_spill] sm:$0xff] %v5907_v44  ;;  %v545_v44 = vld [vmem:[%s4728_s16 + $0x9d0] sm:$0xff]  ;;  %v546_v26 = vld [vmem:[%s4728_s16 + $0x9d8] sm:$0xff]  ;;  %v5997_v17 = vmul.f32 %v4751_v19, %v540_v27  ;;  %v6022_v34 = vmul.f32 %v4751_v19, %v547_v25 }
 0x111   : > { %12234 = vst [vmem:[#allocation269_spill] sm:$0xff] %v5910_v43  ;;  %12235 = vst [vmem:[#allocation270_spill] sm:$0xff] %v5917_v35  ;;  %v544_v43 = vld [vmem:[%s4728_s16 + $0x9c8] sm:$0xff]  ;;  %v551_v35 = vld [vmem:[%s4728_s16 + $0xa00] sm:$0xff]  ;;  %v6016_v28 = vmul.f32 %v4751_v19, %v545_v44  ;;  %v6019_v33 = vmul.f32 %v4751_v19, %v546_v26 }
 0x112   : > { %12236 = vst [vmem:[#allocation271_spill] sm:$0xff] %v5920_v36  ;;  %12237 = vst [vmem:[#allocation272_spill] sm:$0xff] %v5923_v41  ;;  %v549_v41 = vld [vmem:[%s4728_s16 + $0x9f0] sm:$0xff]  ;;  %v550_v36 = vld [vmem:[%s4728_s16 + $0x9f8] sm:$0xff]  ;;  %v6013_v27 = vmul.f32 %v4751_v19, %v544_v43  ;;  %v6038_v25 = vmul.f32 %v4751_v19, %v551_v35 }
 0x113   : > { %12238 = vst [vmem:[#allocation273_spill] sm:$0xff] %v5926_v42  ;;  %12239 = vst [vmem:[#allocation274_spill] sm:$0xff] %v5933_v49  ;;  %v548_v42 = vld [vmem:[%s4728_s16 + $0x9e8] sm:$0xff]  ;;  %v555_v49 = vld [vmem:[%s4728_s16 + $0xa20] sm:$0xff]  ;;  %v6032_v44 = vmul.f32 %v4751_v19, %v549_v41  ;;  %v6035_v26 = vmul.f32 %v4751_v19, %v550_v36 }
 0x114   : > { %12240 = vst [vmem:[#allocation275_spill] sm:$0xff] %v5936_v50  ;;  %12241 = vst [vmem:[#allocation276_spill] sm:$0xff] %v5939_v51  ;;  %v553_v51 = vld [vmem:[%s4728_s16 + $0xa10] sm:$0xff]  ;;  %v554_v50 = vld [vmem:[%s4728_s16 + $0xa18] sm:$0xff]  ;;  %v6029_v43 = vmul.f32 %v4751_v19, %v548_v42  ;;  %v6054_v35 = vmul.f32 %v4751_v19, %v555_v49 }
 0x115   : > { %12242 = vst [vmem:[#allocation277_spill] sm:$0xff] %v5942_v52  ;;  %12243 = vst [vmem:[#allocation278_spill] sm:$0xff] %v5949_v57  ;;  %v552_v52 = vld [vmem:[%s4728_s16 + $0xa08] sm:$0xff]  ;;  %v559_v57 = vld [vmem:[%s4728_s16 + $0xa40] sm:$0xff]  ;;  %v6048_v41 = vmul.f32 %v4751_v19, %v553_v51  ;;  %v6051_v36 = vmul.f32 %v4751_v19, %v554_v50 }
 0x116   : > { %12244 = vst [vmem:[#allocation279_spill] sm:$0xff] %v5952_v58  ;;  %12245 = vst [vmem:[#allocation280_spill] sm:$0xff] %v5955_v59  ;;  %v557_v59 = vld [vmem:[%s4728_s16 + $0xa30] sm:$0xff]  ;;  %v558_v58 = vld [vmem:[%s4728_s16 + $0xa38] sm:$0xff]  ;;  %v6045_v42 = vmul.f32 %v4751_v19, %v552_v52  ;;  %v6070_v49 = vmul.f32 %v4751_v19, %v559_v57 }
 0x117   : > { %12246 = vst [vmem:[#allocation281_spill] sm:$0xff] %v5958_v60  ;;  %12247 = vst [vmem:[#allocation282_spill] sm:$0xff] %v5965_v1  ;;  %v556_v60 = vld [vmem:[%s4728_s16 + $0xa28] sm:$0xff]  ;;  %v563_v1 = vld [vmem:[%s4728_s16 + $0xa60] sm:$0xff]  ;;  %v6064_v51 = vmul.f32 %v4751_v19, %v557_v59  ;;  %v6067_v50 = vmul.f32 %v4751_v19, %v558_v58 }
 0x118   : > { %12248 = vst [vmem:[#allocation283_spill] sm:$0xff] %v5968_v2  ;;  %12249 = vst [vmem:[#allocation284_spill] sm:$0xff] %v5971_v3  ;;  %v561_v3 = vld [vmem:[%s4728_s16 + $0xa50] sm:$0xff]  ;;  %v562_v2 = vld [vmem:[%s4728_s16 + $0xa58] sm:$0xff]  ;;  %v6061_v52 = vmul.f32 %v4751_v19, %v556_v60  ;;  %v6086_v57 = vmul.f32 %v4751_v19, %v563_v1 }
 0x119   : > { %12250 = vst [vmem:[#allocation285_spill] sm:$0xff] %v5974_v4  ;;  %12251 = vst [vmem:[#allocation286_spill] sm:$0xff] %v5981_v9  ;;  %v560_v4 = vld [vmem:[%s4728_s16 + $0xa48] sm:$0xff]  ;;  %v567_v9 = vld [vmem:[%s4728_s16 + $0xa80] sm:$0xff]  ;;  %v6080_v59 = vmul.f32 %v4751_v19, %v561_v3  ;;  %v6083_v58 = vmul.f32 %v4751_v19, %v562_v2 }
 0x11a   : > { %12252 = vst [vmem:[#allocation287_spill] sm:$0xff] %v5984_v10  ;;  %12253 = vst [vmem:[#allocation288_spill] sm:$0xff] %v5987_v11  ;;  %v565_v11 = vld [vmem:[%s4728_s16 + $0xa70] sm:$0xff]  ;;  %v566_v10 = vld [vmem:[%s4728_s16 + $0xa78] sm:$0xff]  ;;  %v6077_v60 = vmul.f32 %v4751_v19, %v560_v4  ;;  %v6102_v1 = vmul.f32 %v4751_v19, %v567_v9 }
 0x11b   : > { %12254 = vst [vmem:[#allocation289_spill] sm:$0xff] %v5990_v12  ;;  %12255 = vst [vmem:[#allocation290_spill] sm:$0xff] %v5997_v17  ;;  %v564_v12 = vld [vmem:[%s4728_s16 + $0xa68] sm:$0xff]  ;;  %v571_v17 = vld [vmem:[%s4728_s16 + $0xaa0] sm:$0xff]  ;;  %v6096_v3 = vmul.f32 %v4751_v19, %v565_v11  ;;  %v6099_v2 = vmul.f32 %v4751_v19, %v566_v10 }
 0x11c   : > { %12256 = vst [vmem:[#allocation291_spill] sm:$0xff] %v6000_v18  ;;  %12257 = vst [vmem:[#allocation292_spill] sm:$0xff] %v6003_v20  ;;  %v569_v20 = vld [vmem:[%s4728_s16 + $0xa90] sm:$0xff]  ;;  %v570_v18 = vld [vmem:[%s4728_s16 + $0xa98] sm:$0xff]  ;;  %v6093_v4 = vmul.f32 %v4751_v19, %v564_v12  ;;  %v6118_v9 = vmul.f32 %v4751_v19, %v571_v17 }
 0x11d   : > { %12258 = vst [vmem:[#allocation293_spill] sm:$0xff] %v6006_v21  ;;  %12259 = vst [vmem:[#allocation294_spill] sm:$0xff] %v6013_v27  ;;  %v568_v21 = vld [vmem:[%s4728_s16 + $0xa88] sm:$0xff]  ;;  %v575_v27 = vld [vmem:[%s4728_s16 + $0xac0] sm:$0xff]  ;;  %v6112_v11 = vmul.f32 %v4751_v19, %v569_v20  ;;  %v6115_v10 = vmul.f32 %v4751_v19, %v570_v18 }
 0x11e   : > { %12260 = vst [vmem:[#allocation295_spill] sm:$0xff] %v6016_v28  ;;  %12261 = vst [vmem:[#allocation296_spill] sm:$0xff] %v6019_v33  ;;  %v573_v33 = vld [vmem:[%s4728_s16 + $0xab0] sm:$0xff]  ;;  %v574_v28 = vld [vmem:[%s4728_s16 + $0xab8] sm:$0xff]  ;;  %v6109_v12 = vmul.f32 %v4751_v19, %v568_v21  ;;  %v6134_v17 = vmul.f32 %v4751_v19, %v575_v27 }
 0x11f   : > { %12262 = vst [vmem:[#allocation297_spill] sm:$0xff] %v6022_v34  ;;  %12263 = vst [vmem:[#allocation298_spill] sm:$0xff] %v6029_v43  ;;  %v572_v34 = vld [vmem:[%s4728_s16 + $0xaa8] sm:$0xff]  ;;  %v579_v43 = vld [vmem:[%s4728_s16 + $0xae0] sm:$0xff]  ;;  %v6128_v20 = vmul.f32 %v4751_v19, %v573_v33  ;;  %v6131_v18 = vmul.f32 %v4751_v19, %v574_v28 }
 0x120   : > { %12264 = vst [vmem:[#allocation299_spill] sm:$0xff] %v6032_v44  ;;  %12265 = vst [vmem:[#allocation300_spill] sm:$0xff] %v6035_v26  ;;  %v577_v26 = vld [vmem:[%s4728_s16 + $0xad0] sm:$0xff]  ;;  %v578_v44 = vld [vmem:[%s4728_s16 + $0xad8] sm:$0xff]  ;;  %v6125_v21 = vmul.f32 %v4751_v19, %v572_v34  ;;  %v6150_v27 = vmul.f32 %v4751_v19, %v579_v43 }
 0x121   : > { %12266 = vst [vmem:[#allocation301_spill] sm:$0xff] %v6038_v25  ;;  %12267 = vst [vmem:[#allocation302_spill] sm:$0xff] %v6045_v42  ;;  %v576_v25 = vld [vmem:[%s4728_s16 + $0xac8] sm:$0xff]  ;;  %v583_v42 = vld [vmem:[%s4728_s16 + $0xb00] sm:$0xff]  ;;  %v6144_v33 = vmul.f32 %v4751_v19, %v577_v26  ;;  %v6147_v28 = vmul.f32 %v4751_v19, %v578_v44 }
 0x122   : > { %12268 = vst [vmem:[#allocation303_spill] sm:$0xff] %v6048_v41  ;;  %12269 = vst [vmem:[#allocation304_spill] sm:$0xff] %v6051_v36  ;;  %v581_v36 = vld [vmem:[%s4728_s16 + $0xaf0] sm:$0xff]  ;;  %v582_v41 = vld [vmem:[%s4728_s16 + $0xaf8] sm:$0xff]  ;;  %v6141_v34 = vmul.f32 %v4751_v19, %v576_v25  ;;  %v6166_v43 = vmul.f32 %v4751_v19, %v583_v42 }
 0x123   : > { %12270 = vst [vmem:[#allocation305_spill] sm:$0xff] %v6054_v35  ;;  %12271 = vst [vmem:[#allocation306_spill] sm:$0xff] %v6061_v52  ;;  %v580_v35 = vld [vmem:[%s4728_s16 + $0xae8] sm:$0xff]  ;;  %v587_v52 = vld [vmem:[%s4728_s16 + $0xb20] sm:$0xff]  ;;  %v6160_v26 = vmul.f32 %v4751_v19, %v581_v36  ;;  %v6163_v44 = vmul.f32 %v4751_v19, %v582_v41 }
 0x124   : > { %12272 = vst [vmem:[#allocation307_spill] sm:$0xff] %v6064_v51  ;;  %12273 = vst [vmem:[#allocation308_spill] sm:$0xff] %v6067_v50  ;;  %v585_v50 = vld [vmem:[%s4728_s16 + $0xb10] sm:$0xff]  ;;  %v586_v51 = vld [vmem:[%s4728_s16 + $0xb18] sm:$0xff]  ;;  %v6157_v25 = vmul.f32 %v4751_v19, %v580_v35  ;;  %v6182_v42 = vmul.f32 %v4751_v19, %v587_v52 }
 0x125   : > { %12274 = vst [vmem:[#allocation309_spill] sm:$0xff] %v6070_v49  ;;  %12275 = vst [vmem:[#allocation310_spill] sm:$0xff] %v6077_v60  ;;  %v584_v49 = vld [vmem:[%s4728_s16 + $0xb08] sm:$0xff]  ;;  %v591_v60 = vld [vmem:[%s4728_s16 + $0xb40] sm:$0xff]  ;;  %v6176_v36 = vmul.f32 %v4751_v19, %v585_v50  ;;  %v6179_v41 = vmul.f32 %v4751_v19, %v586_v51 }
 0x126   : > { %12276 = vst [vmem:[#allocation311_spill] sm:$0xff] %v6080_v59  ;;  %12277 = vst [vmem:[#allocation312_spill] sm:$0xff] %v6083_v58  ;;  %v589_v58 = vld [vmem:[%s4728_s16 + $0xb30] sm:$0xff]  ;;  %v590_v59 = vld [vmem:[%s4728_s16 + $0xb38] sm:$0xff]  ;;  %v6173_v35 = vmul.f32 %v4751_v19, %v584_v49  ;;  %v6198_v52 = vmul.f32 %v4751_v19, %v591_v60 }
 0x127   : > { %12278 = vst [vmem:[#allocation313_spill] sm:$0xff] %v6086_v57  ;;  %12279 = vst [vmem:[#allocation314_spill] sm:$0xff] %v6093_v4  ;;  %v588_v57 = vld [vmem:[%s4728_s16 + $0xb28] sm:$0xff]  ;;  %v595_v4 = vld [vmem:[%s4728_s16 + $0xb60] sm:$0xff]  ;;  %v6192_v50 = vmul.f32 %v4751_v19, %v589_v58  ;;  %v6195_v51 = vmul.f32 %v4751_v19, %v590_v59 }
 0x128   : > { %12280 = vst [vmem:[#allocation315_spill] sm:$0xff] %v6096_v3  ;;  %12281 = vst [vmem:[#allocation316_spill] sm:$0xff] %v6099_v2  ;;  %v593_v2 = vld [vmem:[%s4728_s16 + $0xb50] sm:$0xff]  ;;  %v594_v3 = vld [vmem:[%s4728_s16 + $0xb58] sm:$0xff]  ;;  %v6189_v49 = vmul.f32 %v4751_v19, %v588_v57  ;;  %v6214_v60 = vmul.f32 %v4751_v19, %v595_v4 }
 0x129   : > { %12282 = vst [vmem:[#allocation317_spill] sm:$0xff] %v6102_v1  ;;  %12283 = vst [vmem:[#allocation318_spill] sm:$0xff] %v6109_v12  ;;  %v592_v1 = vld [vmem:[%s4728_s16 + $0xb48] sm:$0xff]  ;;  %v599_v12 = vld [vmem:[%s4728_s16 + $0xb80] sm:$0xff]  ;;  %v6208_v58 = vmul.f32 %v4751_v19, %v593_v2  ;;  %v6211_v59 = vmul.f32 %v4751_v19, %v594_v3 }
 0x12a   : > { %12284 = vst [vmem:[#allocation319_spill] sm:$0xff] %v6112_v11  ;;  %12285 = vst [vmem:[#allocation320_spill] sm:$0xff] %v6115_v10  ;;  %v597_v10 = vld [vmem:[%s4728_s16 + $0xb70] sm:$0xff]  ;;  %v598_v11 = vld [vmem:[%s4728_s16 + $0xb78] sm:$0xff]  ;;  %v6205_v57 = vmul.f32 %v4751_v19, %v592_v1  ;;  %v6230_v4 = vmul.f32 %v4751_v19, %v599_v12 }
 0x12b   : > { %12286 = vst [vmem:[#allocation321_spill] sm:$0xff] %v6118_v9  ;;  %12287 = vst [vmem:[#allocation322_spill] sm:$0xff] %v6125_v21  ;;  %v596_v9 = vld [vmem:[%s4728_s16 + $0xb68] sm:$0xff]  ;;  %v603_v21 = vld [vmem:[%s4728_s16 + $0xba0] sm:$0xff]  ;;  %v6224_v2 = vmul.f32 %v4751_v19, %v597_v10  ;;  %v6227_v3 = vmul.f32 %v4751_v19, %v598_v11 }
 0x12c   : > { %12288 = vst [vmem:[#allocation323_spill] sm:$0xff] %v6128_v20  ;;  %12289 = vst [vmem:[#allocation324_spill] sm:$0xff] %v6131_v18  ;;  %v601_v18 = vld [vmem:[%s4728_s16 + $0xb90] sm:$0xff]  ;;  %v602_v20 = vld [vmem:[%s4728_s16 + $0xb98] sm:$0xff]  ;;  %v6221_v1 = vmul.f32 %v4751_v19, %v596_v9  ;;  %v6246_v12 = vmul.f32 %v4751_v19, %v603_v21 }
 0x12d   : > { %12290 = vst [vmem:[#allocation325_spill] sm:$0xff] %v6134_v17  ;;  %12291 = vst [vmem:[#allocation326_spill] sm:$0xff] %v6141_v34  ;;  %v600_v17 = vld [vmem:[%s4728_s16 + $0xb88] sm:$0xff]  ;;  %v607_v34 = vld [vmem:[%s4728_s16 + $0xbc0] sm:$0xff]  ;;  %v6240_v10 = vmul.f32 %v4751_v19, %v601_v18  ;;  %v6243_v11 = vmul.f32 %v4751_v19, %v602_v20 }
 0x12e   : > { %12292 = vst [vmem:[#allocation327_spill] sm:$0xff] %v6144_v33  ;;  %12293 = vst [vmem:[#allocation328_spill] sm:$0xff] %v6147_v28  ;;  %v605_v28 = vld [vmem:[%s4728_s16 + $0xbb0] sm:$0xff]  ;;  %v606_v33 = vld [vmem:[%s4728_s16 + $0xbb8] sm:$0xff]  ;;  %v6237_v9 = vmul.f32 %v4751_v19, %v600_v17  ;;  %v6262_v21 = vmul.f32 %v4751_v19, %v607_v34 }
 0x12f   : > { %12294 = vst [vmem:[#allocation329_spill] sm:$0xff] %v6150_v27  ;;  %12295 = vst [vmem:[#allocation330_spill] sm:$0xff] %v6157_v25  ;;  %v604_v27 = vld [vmem:[%s4728_s16 + $0xba8] sm:$0xff]  ;;  %v611_v25 = vld [vmem:[%s4728_s16 + $0xbe0] sm:$0xff]  ;;  %v6256_v18 = vmul.f32 %v4751_v19, %v605_v28  ;;  %v6259_v20 = vmul.f32 %v4751_v19, %v606_v33 }
 0x130   : > { %12296 = vst [vmem:[#allocation331_spill] sm:$0xff] %v6160_v26  ;;  %12297 = vst [vmem:[#allocation332_spill] sm:$0xff] %v6163_v44  ;;  %v609_v44 = vld [vmem:[%s4728_s16 + $0xbd0] sm:$0xff]  ;;  %v610_v26 = vld [vmem:[%s4728_s16 + $0xbd8] sm:$0xff]  ;;  %v6253_v17 = vmul.f32 %v4751_v19, %v604_v27  ;;  %v6278_v34 = vmul.f32 %v4751_v19, %v611_v25 }
 0x131   : > { %12298 = vst [vmem:[#allocation333_spill] sm:$0xff] %v6166_v43  ;;  %12299 = vst [vmem:[#allocation334_spill] sm:$0xff] %v6173_v35  ;;  %v608_v43 = vld [vmem:[%s4728_s16 + $0xbc8] sm:$0xff]  ;;  %v615_v35 = vld [vmem:[%s4728_s16 + $0xc00] sm:$0xff]  ;;  %v6272_v28 = vmul.f32 %v4751_v19, %v609_v44  ;;  %v6275_v33 = vmul.f32 %v4751_v19, %v610_v26 }
 0x132   : > { %12300 = vst [vmem:[#allocation335_spill] sm:$0xff] %v6176_v36  ;;  %12301 = vst [vmem:[#allocation336_spill] sm:$0xff] %v6179_v41  ;;  %v613_v41 = vld [vmem:[%s4728_s16 + $0xbf0] sm:$0xff]  ;;  %v614_v36 = vld [vmem:[%s4728_s16 + $0xbf8] sm:$0xff]  ;;  %v6269_v27 = vmul.f32 %v4751_v19, %v608_v43  ;;  %v6294_v25 = vmul.f32 %v4751_v19, %v615_v35 }
 0x133   : > { %12302 = vst [vmem:[#allocation337_spill] sm:$0xff] %v6182_v42  ;;  %12303 = vst [vmem:[#allocation338_spill] sm:$0xff] %v6189_v49  ;;  %v612_v42 = vld [vmem:[%s4728_s16 + $0xbe8] sm:$0xff]  ;;  %v619_v49 = vld [vmem:[%s4728_s16 + $0xc20] sm:$0xff]  ;;  %v6288_v44 = vmul.f32 %v4751_v19, %v613_v41  ;;  %v6291_v26 = vmul.f32 %v4751_v19, %v614_v36 }
 0x134   : > { %12304 = vst [vmem:[#allocation339_spill] sm:$0xff] %v6192_v50  ;;  %12305 = vst [vmem:[#allocation340_spill] sm:$0xff] %v6195_v51  ;;  %v617_v51 = vld [vmem:[%s4728_s16 + $0xc10] sm:$0xff]  ;;  %v618_v50 = vld [vmem:[%s4728_s16 + $0xc18] sm:$0xff]  ;;  %v6285_v43 = vmul.f32 %v4751_v19, %v612_v42  ;;  %v6310_v35 = vmul.f32 %v4751_v19, %v619_v49 }
 0x135   : > { %12306 = vst [vmem:[#allocation341_spill] sm:$0xff] %v6198_v52  ;;  %12307 = vst [vmem:[#allocation342_spill] sm:$0xff] %v6205_v57  ;;  %v616_v52 = vld [vmem:[%s4728_s16 + $0xc08] sm:$0xff]  ;;  %v623_v57 = vld [vmem:[%s4728_s16 + $0xc40] sm:$0xff]  ;;  %v6304_v41 = vmul.f32 %v4751_v19, %v617_v51  ;;  %v6307_v36 = vmul.f32 %v4751_v19, %v618_v50 }
 0x136   : > { %12308 = vst [vmem:[#allocation343_spill] sm:$0xff] %v6208_v58  ;;  %12309 = vst [vmem:[#allocation344_spill] sm:$0xff] %v6211_v59  ;;  %v621_v59 = vld [vmem:[%s4728_s16 + $0xc30] sm:$0xff]  ;;  %v622_v58 = vld [vmem:[%s4728_s16 + $0xc38] sm:$0xff]  ;;  %v6301_v42 = vmul.f32 %v4751_v19, %v616_v52  ;;  %v6326_v49 = vmul.f32 %v4751_v19, %v623_v57 }
 0x137   : > { %12310 = vst [vmem:[#allocation345_spill] sm:$0xff] %v6214_v60  ;;  %12311 = vst [vmem:[#allocation346_spill] sm:$0xff] %v6221_v1  ;;  %v620_v60 = vld [vmem:[%s4728_s16 + $0xc28] sm:$0xff]  ;;  %v627_v1 = vld [vmem:[%s4728_s16 + $0xc60] sm:$0xff]  ;;  %v6320_v51 = vmul.f32 %v4751_v19, %v621_v59  ;;  %v6323_v50 = vmul.f32 %v4751_v19, %v622_v58 }
 0x138   : > { %12312 = vst [vmem:[#allocation347_spill] sm:$0xff] %v6224_v2  ;;  %12313 = vst [vmem:[#allocation348_spill] sm:$0xff] %v6227_v3  ;;  %v625_v3 = vld [vmem:[%s4728_s16 + $0xc50] sm:$0xff]  ;;  %v626_v2 = vld [vmem:[%s4728_s16 + $0xc58] sm:$0xff]  ;;  %v6317_v52 = vmul.f32 %v4751_v19, %v620_v60  ;;  %v6342_v57 = vmul.f32 %v4751_v19, %v627_v1 }
 0x139   : > { %12314 = vst [vmem:[#allocation349_spill] sm:$0xff] %v6230_v4  ;;  %12315 = vst [vmem:[#allocation350_spill] sm:$0xff] %v6237_v9  ;;  %v624_v4 = vld [vmem:[%s4728_s16 + $0xc48] sm:$0xff]  ;;  %v631_v9 = vld [vmem:[%s4728_s16 + $0xc80] sm:$0xff]  ;;  %v6336_v59 = vmul.f32 %v4751_v19, %v625_v3  ;;  %v6339_v58 = vmul.f32 %v4751_v19, %v626_v2 }
 0x13a   : > { %12316 = vst [vmem:[#allocation351_spill] sm:$0xff] %v6240_v10  ;;  %12317 = vst [vmem:[#allocation352_spill] sm:$0xff] %v6243_v11  ;;  %v629_v11 = vld [vmem:[%s4728_s16 + $0xc70] sm:$0xff]  ;;  %v630_v10 = vld [vmem:[%s4728_s16 + $0xc78] sm:$0xff]  ;;  %v6333_v60 = vmul.f32 %v4751_v19, %v624_v4  ;;  %v6358_v1 = vmul.f32 %v4751_v19, %v631_v9 }
 0x13b   : > { %12318 = vst [vmem:[#allocation353_spill] sm:$0xff] %v6246_v12  ;;  %12319 = vst [vmem:[#allocation354_spill] sm:$0xff] %v6253_v17  ;;  %v628_v12 = vld [vmem:[%s4728_s16 + $0xc68] sm:$0xff]  ;;  %v635_v17 = vld [vmem:[%s4728_s16 + $0xca0] sm:$0xff]  ;;  %v6352_v3 = vmul.f32 %v4751_v19, %v629_v11  ;;  %v6355_v2 = vmul.f32 %v4751_v19, %v630_v10 }
 0x13c   : > { %12320 = vst [vmem:[#allocation355_spill] sm:$0xff] %v6256_v18  ;;  %12321 = vst [vmem:[#allocation356_spill] sm:$0xff] %v6259_v20  ;;  %v633_v20 = vld [vmem:[%s4728_s16 + $0xc90] sm:$0xff]  ;;  %v634_v18 = vld [vmem:[%s4728_s16 + $0xc98] sm:$0xff]  ;;  %v6349_v4 = vmul.f32 %v4751_v19, %v628_v12  ;;  %v6374_v9 = vmul.f32 %v4751_v19, %v635_v17 }
 0x13d   : > { %12322 = vst [vmem:[#allocation357_spill] sm:$0xff] %v6262_v21  ;;  %12323 = vst [vmem:[#allocation358_spill] sm:$0xff] %v6269_v27  ;;  %v632_v21 = vld [vmem:[%s4728_s16 + $0xc88] sm:$0xff]  ;;  %v639_v27 = vld [vmem:[%s4728_s16 + $0xcc0] sm:$0xff]  ;;  %v6368_v11 = vmul.f32 %v4751_v19, %v633_v20  ;;  %v6371_v10 = vmul.f32 %v4751_v19, %v634_v18 }
 0x13e   : > { %12324 = vst [vmem:[#allocation359_spill] sm:$0xff] %v6272_v28  ;;  %12325 = vst [vmem:[#allocation360_spill] sm:$0xff] %v6275_v33  ;;  %v637_v33 = vld [vmem:[%s4728_s16 + $0xcb0] sm:$0xff]  ;;  %v638_v28 = vld [vmem:[%s4728_s16 + $0xcb8] sm:$0xff]  ;;  %v6365_v12 = vmul.f32 %v4751_v19, %v632_v21  ;;  %v6390_v17 = vmul.f32 %v4751_v19, %v639_v27 }
 0x13f   : > { %12326 = vst [vmem:[#allocation361_spill] sm:$0xff] %v6278_v34  ;;  %12327 = vst [vmem:[#allocation362_spill] sm:$0xff] %v6285_v43  ;;  %v636_v34 = vld [vmem:[%s4728_s16 + $0xca8] sm:$0xff]  ;;  %v643_v43 = vld [vmem:[%s4728_s16 + $0xce0] sm:$0xff]  ;;  %v6384_v20 = vmul.f32 %v4751_v19, %v637_v33  ;;  %v6387_v18 = vmul.f32 %v4751_v19, %v638_v28 }
 0x140   : > { %12328 = vst [vmem:[#allocation363_spill] sm:$0xff] %v6288_v44  ;;  %12329 = vst [vmem:[#allocation364_spill] sm:$0xff] %v6291_v26  ;;  %v641_v26 = vld [vmem:[%s4728_s16 + $0xcd0] sm:$0xff]  ;;  %v642_v44 = vld [vmem:[%s4728_s16 + $0xcd8] sm:$0xff]  ;;  %v6381_v21 = vmul.f32 %v4751_v19, %v636_v34  ;;  %v6406_v27 = vmul.f32 %v4751_v19, %v643_v43 }
 0x141   : > { %12330 = vst [vmem:[#allocation365_spill] sm:$0xff] %v6294_v25  ;;  %12331 = vst [vmem:[#allocation366_spill] sm:$0xff] %v6301_v42  ;;  %v640_v25 = vld [vmem:[%s4728_s16 + $0xcc8] sm:$0xff]  ;;  %v647_v42 = vld [vmem:[%s4728_s16 + $0xd00] sm:$0xff]  ;;  %v6400_v33 = vmul.f32 %v4751_v19, %v641_v26  ;;  %v6403_v28 = vmul.f32 %v4751_v19, %v642_v44 }
 0x142   : > { %12332 = vst [vmem:[#allocation367_spill] sm:$0xff] %v6304_v41  ;;  %12333 = vst [vmem:[#allocation368_spill] sm:$0xff] %v6307_v36  ;;  %v645_v36 = vld [vmem:[%s4728_s16 + $0xcf0] sm:$0xff]  ;;  %v646_v41 = vld [vmem:[%s4728_s16 + $0xcf8] sm:$0xff]  ;;  %v6397_v34 = vmul.f32 %v4751_v19, %v640_v25  ;;  %v6422_v43 = vmul.f32 %v4751_v19, %v647_v42 }
 0x143   : > { %12334 = vst [vmem:[#allocation369_spill] sm:$0xff] %v6310_v35  ;;  %12335 = vst [vmem:[#allocation370_spill] sm:$0xff] %v6317_v52  ;;  %v644_v35 = vld [vmem:[%s4728_s16 + $0xce8] sm:$0xff]  ;;  %v651_v52 = vld [vmem:[%s4728_s16 + $0xd20] sm:$0xff]  ;;  %v6416_v26 = vmul.f32 %v4751_v19, %v645_v36  ;;  %v6419_v44 = vmul.f32 %v4751_v19, %v646_v41 }
 0x144   : > { %12336 = vst [vmem:[#allocation371_spill] sm:$0xff] %v6320_v51  ;;  %12337 = vst [vmem:[#allocation372_spill] sm:$0xff] %v6323_v50  ;;  %v649_v50 = vld [vmem:[%s4728_s16 + $0xd10] sm:$0xff]  ;;  %v650_v51 = vld [vmem:[%s4728_s16 + $0xd18] sm:$0xff]  ;;  %v6413_v25 = vmul.f32 %v4751_v19, %v644_v35  ;;  %v6438_v42 = vmul.f32 %v4751_v19, %v651_v52 }
 0x145   : > { %12338 = vst [vmem:[#allocation373_spill] sm:$0xff] %v6326_v49  ;;  %12339 = vst [vmem:[#allocation374_spill] sm:$0xff] %v6333_v60  ;;  %v648_v49 = vld [vmem:[%s4728_s16 + $0xd08] sm:$0xff]  ;;  %v655_v60 = vld [vmem:[%s4728_s16 + $0xd40] sm:$0xff]  ;;  %v6432_v36 = vmul.f32 %v4751_v19, %v649_v50  ;;  %v6435_v41 = vmul.f32 %v4751_v19, %v650_v51 }
 0x146   : > { %12340 = vst [vmem:[#allocation375_spill] sm:$0xff] %v6336_v59  ;;  %12341 = vst [vmem:[#allocation376_spill] sm:$0xff] %v6339_v58  ;;  %v653_v58 = vld [vmem:[%s4728_s16 + $0xd30] sm:$0xff]  ;;  %v654_v59 = vld [vmem:[%s4728_s16 + $0xd38] sm:$0xff]  ;;  %v6429_v35 = vmul.f32 %v4751_v19, %v648_v49  ;;  %v6454_v52 = vmul.f32 %v4751_v19, %v655_v60 }
 0x147   : > { %12342 = vst [vmem:[#allocation377_spill] sm:$0xff] %v6342_v57  ;;  %12343 = vst [vmem:[#allocation378_spill] sm:$0xff] %v6349_v4  ;;  %v652_v57 = vld [vmem:[%s4728_s16 + $0xd28] sm:$0xff]  ;;  %v659_v4 = vld [vmem:[%s4728_s16 + $0xd60] sm:$0xff]  ;;  %v6448_v50 = vmul.f32 %v4751_v19, %v653_v58  ;;  %v6451_v51 = vmul.f32 %v4751_v19, %v654_v59 }
 0x148   : > { %12344 = vst [vmem:[#allocation379_spill] sm:$0xff] %v6352_v3  ;;  %12345 = vst [vmem:[#allocation380_spill] sm:$0xff] %v6355_v2  ;;  %v657_v2 = vld [vmem:[%s4728_s16 + $0xd50] sm:$0xff]  ;;  %v658_v3 = vld [vmem:[%s4728_s16 + $0xd58] sm:$0xff]  ;;  %v6445_v49 = vmul.f32 %v4751_v19, %v652_v57  ;;  %v6470_v60 = vmul.f32 %v4751_v19, %v659_v4 }
 0x149   : > { %12346 = vst [vmem:[#allocation381_spill] sm:$0xff] %v6358_v1  ;;  %12347 = vst [vmem:[#allocation382_spill] sm:$0xff] %v6365_v12  ;;  %v656_v1 = vld [vmem:[%s4728_s16 + $0xd48] sm:$0xff]  ;;  %v663_v12 = vld [vmem:[%s4728_s16 + $0xd80] sm:$0xff]  ;;  %v6464_v58 = vmul.f32 %v4751_v19, %v657_v2  ;;  %v6467_v59 = vmul.f32 %v4751_v19, %v658_v3 }
 0x14a   : > { %12348 = vst [vmem:[#allocation383_spill] sm:$0xff] %v6368_v11  ;;  %12349 = vst [vmem:[#allocation384_spill] sm:$0xff] %v6371_v10  ;;  %v661_v10 = vld [vmem:[%s4728_s16 + $0xd70] sm:$0xff]  ;;  %v662_v11 = vld [vmem:[%s4728_s16 + $0xd78] sm:$0xff]  ;;  %v6461_v57 = vmul.f32 %v4751_v19, %v656_v1  ;;  %v6486_v4 = vmul.f32 %v4751_v19, %v663_v12 }
 0x14b   : > { %12350 = vst [vmem:[#allocation385_spill] sm:$0xff] %v6374_v9  ;;  %12351 = vst [vmem:[#allocation386_spill] sm:$0xff] %v6381_v21  ;;  %v660_v9 = vld [vmem:[%s4728_s16 + $0xd68] sm:$0xff]  ;;  %v667_v21 = vld [vmem:[%s4728_s16 + $0xda0] sm:$0xff]  ;;  %v6480_v2 = vmul.f32 %v4751_v19, %v661_v10  ;;  %v6483_v3 = vmul.f32 %v4751_v19, %v662_v11 }
 0x14c   : > { %12352 = vst [vmem:[#allocation387_spill] sm:$0xff] %v6384_v20  ;;  %12353 = vst [vmem:[#allocation388_spill] sm:$0xff] %v6387_v18  ;;  %v665_v18 = vld [vmem:[%s4728_s16 + $0xd90] sm:$0xff]  ;;  %v666_v20 = vld [vmem:[%s4728_s16 + $0xd98] sm:$0xff]  ;;  %v6477_v1 = vmul.f32 %v4751_v19, %v660_v9  ;;  %v6502_v12 = vmul.f32 %v4751_v19, %v667_v21 }
 0x14d   : > { %12354 = vst [vmem:[#allocation389_spill] sm:$0xff] %v6390_v17  ;;  %12355 = vst [vmem:[#allocation390_spill] sm:$0xff] %v6397_v34  ;;  %v664_v17 = vld [vmem:[%s4728_s16 + $0xd88] sm:$0xff]  ;;  %v671_v34 = vld [vmem:[%s4728_s16 + $0xdc0] sm:$0xff]  ;;  %v6496_v10 = vmul.f32 %v4751_v19, %v665_v18  ;;  %v6499_v11 = vmul.f32 %v4751_v19, %v666_v20 }
 0x14e   : > { %12356 = vst [vmem:[#allocation391_spill] sm:$0xff] %v6400_v33  ;;  %12357 = vst [vmem:[#allocation392_spill] sm:$0xff] %v6403_v28  ;;  %v669_v28 = vld [vmem:[%s4728_s16 + $0xdb0] sm:$0xff]  ;;  %v670_v33 = vld [vmem:[%s4728_s16 + $0xdb8] sm:$0xff]  ;;  %v6493_v9 = vmul.f32 %v4751_v19, %v664_v17  ;;  %v6518_v21 = vmul.f32 %v4751_v19, %v671_v34 }
 0x14f   : > { %12358 = vst [vmem:[#allocation393_spill] sm:$0xff] %v6406_v27  ;;  %12359 = vst [vmem:[#allocation394_spill] sm:$0xff] %v6413_v25  ;;  %v668_v27 = vld [vmem:[%s4728_s16 + $0xda8] sm:$0xff]  ;;  %v675_v25 = vld [vmem:[%s4728_s16 + $0xde0] sm:$0xff]  ;;  %v6512_v18 = vmul.f32 %v4751_v19, %v669_v28  ;;  %v6515_v20 = vmul.f32 %v4751_v19, %v670_v33 }
 0x150   : > { %12360 = vst [vmem:[#allocation395_spill] sm:$0xff] %v6416_v26  ;;  %12361 = vst [vmem:[#allocation396_spill] sm:$0xff] %v6419_v44  ;;  %v673_v44 = vld [vmem:[%s4728_s16 + $0xdd0] sm:$0xff]  ;;  %v674_v26 = vld [vmem:[%s4728_s16 + $0xdd8] sm:$0xff]  ;;  %v6509_v17 = vmul.f32 %v4751_v19, %v668_v27  ;;  %v6534_v34 = vmul.f32 %v4751_v19, %v675_v25 }
 0x151   : > { %12362 = vst [vmem:[#allocation397_spill] sm:$0xff] %v6422_v43  ;;  %12363 = vst [vmem:[#allocation398_spill] sm:$0xff] %v6429_v35  ;;  %v672_v43 = vld [vmem:[%s4728_s16 + $0xdc8] sm:$0xff]  ;;  %v679_v35 = vld [vmem:[%s4728_s16 + $0xe00] sm:$0xff]  ;;  %v6528_v28 = vmul.f32 %v4751_v19, %v673_v44  ;;  %v6531_v33 = vmul.f32 %v4751_v19, %v674_v26 }
 0x152   : > { %12364 = vst [vmem:[#allocation399_spill] sm:$0xff] %v6432_v36  ;;  %12365 = vst [vmem:[#allocation400_spill] sm:$0xff] %v6435_v41  ;;  %v677_v41 = vld [vmem:[%s4728_s16 + $0xdf0] sm:$0xff]  ;;  %v678_v36 = vld [vmem:[%s4728_s16 + $0xdf8] sm:$0xff]  ;;  %v6525_v27 = vmul.f32 %v4751_v19, %v672_v43  ;;  %v6550_v25 = vmul.f32 %v4751_v19, %v679_v35 }
 0x153   : > { %12366 = vst [vmem:[#allocation401_spill] sm:$0xff] %v6438_v42  ;;  %12367 = vst [vmem:[#allocation402_spill] sm:$0xff] %v6445_v49  ;;  %v676_v42 = vld [vmem:[%s4728_s16 + $0xde8] sm:$0xff]  ;;  %v683_v49 = vld [vmem:[%s4728_s16 + $0xe20] sm:$0xff]  ;;  %v6544_v44 = vmul.f32 %v4751_v19, %v677_v41  ;;  %v6547_v26 = vmul.f32 %v4751_v19, %v678_v36 }
 0x154   : > { %12368 = vst [vmem:[#allocation403_spill] sm:$0xff] %v6448_v50  ;;  %12369 = vst [vmem:[#allocation404_spill] sm:$0xff] %v6451_v51  ;;  %v681_v51 = vld [vmem:[%s4728_s16 + $0xe10] sm:$0xff]  ;;  %v682_v50 = vld [vmem:[%s4728_s16 + $0xe18] sm:$0xff]  ;;  %v6541_v43 = vmul.f32 %v4751_v19, %v676_v42  ;;  %v6566_v35 = vmul.f32 %v4751_v19, %v683_v49 }
 0x155   : > { %12370 = vst [vmem:[#allocation405_spill] sm:$0xff] %v6454_v52  ;;  %12371 = vst [vmem:[#allocation406_spill] sm:$0xff] %v6461_v57  ;;  %v680_v52 = vld [vmem:[%s4728_s16 + $0xe08] sm:$0xff]  ;;  %v687_v57 = vld [vmem:[%s4728_s16 + $0xe40] sm:$0xff]  ;;  %v6560_v41 = vmul.f32 %v4751_v19, %v681_v51  ;;  %v6563_v36 = vmul.f32 %v4751_v19, %v682_v50 }
 0x156   : > { %12372 = vst [vmem:[#allocation407_spill] sm:$0xff] %v6464_v58  ;;  %12373 = vst [vmem:[#allocation408_spill] sm:$0xff] %v6467_v59  ;;  %v685_v59 = vld [vmem:[%s4728_s16 + $0xe30] sm:$0xff]  ;;  %v686_v58 = vld [vmem:[%s4728_s16 + $0xe38] sm:$0xff]  ;;  %v6557_v42 = vmul.f32 %v4751_v19, %v680_v52  ;;  %v6582_v49 = vmul.f32 %v4751_v19, %v687_v57 }
 0x157   : > { %12374 = vst [vmem:[#allocation409_spill] sm:$0xff] %v6470_v60  ;;  %12375 = vst [vmem:[#allocation410_spill] sm:$0xff] %v6477_v1  ;;  %v684_v60 = vld [vmem:[%s4728_s16 + $0xe28] sm:$0xff]  ;;  %v691_v1 = vld [vmem:[%s4728_s16 + $0xe60] sm:$0xff]  ;;  %v6576_v51 = vmul.f32 %v4751_v19, %v685_v59  ;;  %v6579_v50 = vmul.f32 %v4751_v19, %v686_v58 }
 0x158   : > { %12376 = vst [vmem:[#allocation411_spill] sm:$0xff] %v6480_v2  ;;  %12377 = vst [vmem:[#allocation412_spill] sm:$0xff] %v6483_v3  ;;  %v689_v3 = vld [vmem:[%s4728_s16 + $0xe50] sm:$0xff]  ;;  %v690_v2 = vld [vmem:[%s4728_s16 + $0xe58] sm:$0xff]  ;;  %v6573_v52 = vmul.f32 %v4751_v19, %v684_v60  ;;  %v6598_v57 = vmul.f32 %v4751_v19, %v691_v1 }
 0x159   : > { %12378 = vst [vmem:[#allocation413_spill] sm:$0xff] %v6486_v4  ;;  %12379 = vst [vmem:[#allocation414_spill] sm:$0xff] %v6493_v9  ;;  %v688_v4 = vld [vmem:[%s4728_s16 + $0xe48] sm:$0xff]  ;;  %v695_v9 = vld [vmem:[%s4728_s16 + $0xe80] sm:$0xff]  ;;  %v6592_v59 = vmul.f32 %v4751_v19, %v689_v3  ;;  %v6595_v58 = vmul.f32 %v4751_v19, %v690_v2 }
 0x15a   : > { %12380 = vst [vmem:[#allocation415_spill] sm:$0xff] %v6496_v10  ;;  %12381 = vst [vmem:[#allocation416_spill] sm:$0xff] %v6499_v11  ;;  %v693_v11 = vld [vmem:[%s4728_s16 + $0xe70] sm:$0xff]  ;;  %v694_v10 = vld [vmem:[%s4728_s16 + $0xe78] sm:$0xff]  ;;  %v6589_v60 = vmul.f32 %v4751_v19, %v688_v4  ;;  %v6614_v1 = vmul.f32 %v4751_v19, %v695_v9 }
 0x15b   : > { %12382 = vst [vmem:[#allocation417_spill] sm:$0xff] %v6502_v12  ;;  %12383 = vst [vmem:[#allocation418_spill] sm:$0xff] %v6509_v17  ;;  %v692_v12 = vld [vmem:[%s4728_s16 + $0xe68] sm:$0xff]  ;;  %v699_v17 = vld [vmem:[%s4728_s16 + $0xea0] sm:$0xff]  ;;  %v6608_v3 = vmul.f32 %v4751_v19, %v693_v11  ;;  %v6611_v2 = vmul.f32 %v4751_v19, %v694_v10 }
 0x15c   : > { %12384 = vst [vmem:[#allocation419_spill] sm:$0xff] %v6512_v18  ;;  %12385 = vst [vmem:[#allocation420_spill] sm:$0xff] %v6515_v20  ;;  %v697_v20 = vld [vmem:[%s4728_s16 + $0xe90] sm:$0xff]  ;;  %v698_v18 = vld [vmem:[%s4728_s16 + $0xe98] sm:$0xff]  ;;  %v6605_v4 = vmul.f32 %v4751_v19, %v692_v12  ;;  %v6630_v9 = vmul.f32 %v4751_v19, %v699_v17 }
 0x15d   : > { %12386 = vst [vmem:[#allocation421_spill] sm:$0xff] %v6518_v21  ;;  %12387 = vst [vmem:[#allocation422_spill] sm:$0xff] %v6525_v27  ;;  %v696_v21 = vld [vmem:[%s4728_s16 + $0xe88] sm:$0xff]  ;;  %v703_v27 = vld [vmem:[%s4728_s16 + $0xec0] sm:$0xff]  ;;  %v6624_v11 = vmul.f32 %v4751_v19, %v697_v20  ;;  %v6627_v10 = vmul.f32 %v4751_v19, %v698_v18 }
 0x15e   : > { %12388 = vst [vmem:[#allocation423_spill] sm:$0xff] %v6528_v28  ;;  %12389 = vst [vmem:[#allocation424_spill] sm:$0xff] %v6531_v33  ;;  %v701_v33 = vld [vmem:[%s4728_s16 + $0xeb0] sm:$0xff]  ;;  %v702_v28 = vld [vmem:[%s4728_s16 + $0xeb8] sm:$0xff]  ;;  %v6621_v12 = vmul.f32 %v4751_v19, %v696_v21  ;;  %v6646_v17 = vmul.f32 %v4751_v19, %v703_v27 }
 0x15f   : > { %12390 = vst [vmem:[#allocation425_spill] sm:$0xff] %v6534_v34  ;;  %12391 = vst [vmem:[#allocation426_spill] sm:$0xff] %v6541_v43  ;;  %v700_v34 = vld [vmem:[%s4728_s16 + $0xea8] sm:$0xff]  ;;  %v707_v43 = vld [vmem:[%s4728_s16 + $0xee0] sm:$0xff]  ;;  %v6640_v20 = vmul.f32 %v4751_v19, %v701_v33  ;;  %v6643_v18 = vmul.f32 %v4751_v19, %v702_v28 }
 0x160   : > { %12392 = vst [vmem:[#allocation427_spill] sm:$0xff] %v6544_v44  ;;  %12393 = vst [vmem:[#allocation428_spill] sm:$0xff] %v6547_v26  ;;  %v705_v26 = vld [vmem:[%s4728_s16 + $0xed0] sm:$0xff]  ;;  %v706_v44 = vld [vmem:[%s4728_s16 + $0xed8] sm:$0xff]  ;;  %v6637_v21 = vmul.f32 %v4751_v19, %v700_v34  ;;  %v6662_v27 = vmul.f32 %v4751_v19, %v707_v43 }
 0x161   : > { %12394 = vst [vmem:[#allocation429_spill] sm:$0xff] %v6550_v25  ;;  %12395 = vst [vmem:[#allocation430_spill] sm:$0xff] %v6557_v42  ;;  %v704_v25 = vld [vmem:[%s4728_s16 + $0xec8] sm:$0xff]  ;;  %v711_v42 = vld [vmem:[%s4728_s16 + $0xf00] sm:$0xff]  ;;  %v6656_v33 = vmul.f32 %v4751_v19, %v705_v26  ;;  %v6659_v28 = vmul.f32 %v4751_v19, %v706_v44 }
 0x162   : > { %12396 = vst [vmem:[#allocation431_spill] sm:$0xff] %v6560_v41  ;;  %12397 = vst [vmem:[#allocation432_spill] sm:$0xff] %v6563_v36  ;;  %v709_v36 = vld [vmem:[%s4728_s16 + $0xef0] sm:$0xff]  ;;  %v710_v41 = vld [vmem:[%s4728_s16 + $0xef8] sm:$0xff]  ;;  %v6653_v34 = vmul.f32 %v4751_v19, %v704_v25  ;;  %v6678_v43 = vmul.f32 %v4751_v19, %v711_v42 }
 0x163   : > { %12398 = vst [vmem:[#allocation433_spill] sm:$0xff] %v6566_v35  ;;  %12399 = vst [vmem:[#allocation434_spill] sm:$0xff] %v6573_v52  ;;  %v708_v35 = vld [vmem:[%s4728_s16 + $0xee8] sm:$0xff]  ;;  %v715_v52 = vld [vmem:[%s4728_s16 + $0xf20] sm:$0xff]  ;;  %v6672_v26 = vmul.f32 %v4751_v19, %v709_v36  ;;  %v6675_v44 = vmul.f32 %v4751_v19, %v710_v41 }
 0x164   : > { %12400 = vst [vmem:[#allocation435_spill] sm:$0xff] %v6576_v51  ;;  %12401 = vst [vmem:[#allocation436_spill] sm:$0xff] %v6579_v50  ;;  %v713_v50 = vld [vmem:[%s4728_s16 + $0xf10] sm:$0xff]  ;;  %v714_v51 = vld [vmem:[%s4728_s16 + $0xf18] sm:$0xff]  ;;  %v6669_v25 = vmul.f32 %v4751_v19, %v708_v35  ;;  %v6694_v42 = vmul.f32 %v4751_v19, %v715_v52 }
 0x165   : > { %12402 = vst [vmem:[#allocation437_spill] sm:$0xff] %v6582_v49  ;;  %12403 = vst [vmem:[#allocation438_spill] sm:$0xff] %v6589_v60  ;;  %v712_v49 = vld [vmem:[%s4728_s16 + $0xf08] sm:$0xff]  ;;  %v719_v60 = vld [vmem:[%s4728_s16 + $0xf40] sm:$0xff]  ;;  %v6688_v36 = vmul.f32 %v4751_v19, %v713_v50  ;;  %v6691_v41 = vmul.f32 %v4751_v19, %v714_v51 }
 0x166   : > { %12404 = vst [vmem:[#allocation439_spill] sm:$0xff] %v6592_v59  ;;  %12405 = vst [vmem:[#allocation440_spill] sm:$0xff] %v6595_v58  ;;  %v717_v58 = vld [vmem:[%s4728_s16 + $0xf30] sm:$0xff]  ;;  %v718_v59 = vld [vmem:[%s4728_s16 + $0xf38] sm:$0xff]  ;;  %v6685_v35 = vmul.f32 %v4751_v19, %v712_v49  ;;  %v6710_v52 = vmul.f32 %v4751_v19, %v719_v60 }
 0x167   : > { %12406 = vst [vmem:[#allocation441_spill] sm:$0xff] %v6598_v57  ;;  %12407 = vst [vmem:[#allocation442_spill] sm:$0xff] %v6605_v4  ;;  %v716_v57 = vld [vmem:[%s4728_s16 + $0xf28] sm:$0xff]  ;;  %v723_v4 = vld [vmem:[%s4728_s16 + $0xf60] sm:$0xff]  ;;  %v6704_v50 = vmul.f32 %v4751_v19, %v717_v58  ;;  %v6707_v51 = vmul.f32 %v4751_v19, %v718_v59 }
 0x168   : > { %12408 = vst [vmem:[#allocation443_spill] sm:$0xff] %v6608_v3  ;;  %12409 = vst [vmem:[#allocation444_spill] sm:$0xff] %v6611_v2  ;;  %v721_v2 = vld [vmem:[%s4728_s16 + $0xf50] sm:$0xff]  ;;  %v722_v3 = vld [vmem:[%s4728_s16 + $0xf58] sm:$0xff]  ;;  %v6701_v49 = vmul.f32 %v4751_v19, %v716_v57  ;;  %v6726_v60 = vmul.f32 %v4751_v19, %v723_v4 }
 0x169   : > { %12410 = vst [vmem:[#allocation445_spill] sm:$0xff] %v6614_v1  ;;  %12411 = vst [vmem:[#allocation446_spill] sm:$0xff] %v6621_v12  ;;  %v720_v1 = vld [vmem:[%s4728_s16 + $0xf48] sm:$0xff]  ;;  %v727_v12 = vld [vmem:[%s4728_s16 + $0xf80] sm:$0xff]  ;;  %v6720_v58 = vmul.f32 %v4751_v19, %v721_v2  ;;  %v6723_v59 = vmul.f32 %v4751_v19, %v722_v3 }
 0x16a   : > { %12412 = vst [vmem:[#allocation447_spill] sm:$0xff] %v6624_v11  ;;  %12413 = vst [vmem:[#allocation448_spill] sm:$0xff] %v6627_v10  ;;  %v725_v10 = vld [vmem:[%s4728_s16 + $0xf70] sm:$0xff]  ;;  %v726_v11 = vld [vmem:[%s4728_s16 + $0xf78] sm:$0xff]  ;;  %v6717_v57 = vmul.f32 %v4751_v19, %v720_v1  ;;  %v6742_v4 = vmul.f32 %v4751_v19, %v727_v12 }
 0x16b   : > { %12414 = vst [vmem:[#allocation449_spill] sm:$0xff] %v6630_v9  ;;  %12415 = vst [vmem:[#allocation450_spill] sm:$0xff] %v6637_v21  ;;  %v724_v9 = vld [vmem:[%s4728_s16 + $0xf68] sm:$0xff]  ;;  %v731_v21 = vld [vmem:[%s4728_s16 + $0xfa0] sm:$0xff]  ;;  %v6736_v2 = vmul.f32 %v4751_v19, %v725_v10  ;;  %v6739_v3 = vmul.f32 %v4751_v19, %v726_v11 }
 0x16c   : > { %12416 = vst [vmem:[#allocation451_spill] sm:$0xff] %v6640_v20  ;;  %12417 = vst [vmem:[#allocation452_spill] sm:$0xff] %v6643_v18  ;;  %v729_v18 = vld [vmem:[%s4728_s16 + $0xf90] sm:$0xff]  ;;  %v730_v20 = vld [vmem:[%s4728_s16 + $0xf98] sm:$0xff]  ;;  %v6733_v1 = vmul.f32 %v4751_v19, %v724_v9  ;;  %v6758_v12 = vmul.f32 %v4751_v19, %v731_v21 }
 0x16d   : > { %12418 = vst [vmem:[#allocation453_spill] sm:$0xff] %v6646_v17  ;;  %12419 = vst [vmem:[#allocation454_spill] sm:$0xff] %v6653_v34  ;;  %v728_v17 = vld [vmem:[%s4728_s16 + $0xf88] sm:$0xff]  ;;  %v735_v34 = vld [vmem:[%s4728_s16 + $0xfc0] sm:$0xff]  ;;  %v6752_v10 = vmul.f32 %v4751_v19, %v729_v18  ;;  %v6755_v11 = vmul.f32 %v4751_v19, %v730_v20 }
 0x16e   : > { %12420 = vst [vmem:[#allocation455_spill] sm:$0xff] %v6656_v33  ;;  %12421 = vst [vmem:[#allocation456_spill] sm:$0xff] %v6659_v28  ;;  %v733_v28 = vld [vmem:[%s4728_s16 + $0xfb0] sm:$0xff]  ;;  %v734_v33 = vld [vmem:[%s4728_s16 + $0xfb8] sm:$0xff]  ;;  %v6749_v9 = vmul.f32 %v4751_v19, %v728_v17  ;;  %v6774_v21 = vmul.f32 %v4751_v19, %v735_v34 }
 0x16f   : > { %12422 = vst [vmem:[#allocation457_spill] sm:$0xff] %v6662_v27  ;;  %12423 = vst [vmem:[#allocation458_spill] sm:$0xff] %v6669_v25  ;;  %v732_v27 = vld [vmem:[%s4728_s16 + $0xfa8] sm:$0xff]  ;;  %v739_v25 = vld [vmem:[%s4728_s16 + $0xfe0] sm:$0xff]  ;;  %v6768_v18 = vmul.f32 %v4751_v19, %v733_v28  ;;  %v6771_v20 = vmul.f32 %v4751_v19, %v734_v33 }
 0x170   : > { %12424 = vst [vmem:[#allocation459_spill] sm:$0xff] %v6672_v26  ;;  %12425 = vst [vmem:[#allocation460_spill] sm:$0xff] %v6675_v44  ;;  %v737_v44 = vld [vmem:[%s4728_s16 + $0xfd0] sm:$0xff]  ;;  %v738_v26 = vld [vmem:[%s4728_s16 + $0xfd8] sm:$0xff]  ;;  %v6765_v17 = vmul.f32 %v4751_v19, %v732_v27  ;;  %v6790_v34 = vmul.f32 %v4751_v19, %v739_v25 }
 0x171   : > { %12426 = vst [vmem:[#allocation461_spill] sm:$0xff] %v6678_v43  ;;  %12427 = vst [vmem:[#allocation462_spill] sm:$0xff] %v6685_v35  ;;  %v736_v43 = vld [vmem:[%s4728_s16 + $0xfc8] sm:$0xff]  ;;  %v743_v35 = vld [vmem:[%s4728_s16 + $0x1000] sm:$0xff]  ;;  %v6784_v28 = vmul.f32 %v4751_v19, %v737_v44  ;;  %v6787_v33 = vmul.f32 %v4751_v19, %v738_v26 }
 0x172   : > { %12428 = vst [vmem:[#allocation463_spill] sm:$0xff] %v6688_v36  ;;  %12429 = vst [vmem:[#allocation464_spill] sm:$0xff] %v6691_v41  ;;  %v741_v41 = vld [vmem:[%s4728_s16 + $0xff0] sm:$0xff]  ;;  %v742_v36 = vld [vmem:[%s4728_s16 + $0xff8] sm:$0xff]  ;;  %v6781_v27 = vmul.f32 %v4751_v19, %v736_v43  ;;  %v6806_v25 = vmul.f32 %v4751_v19, %v743_v35 }
 0x173   : > { %12430 = vst [vmem:[#allocation465_spill] sm:$0xff] %v6694_v42  ;;  %12431 = vst [vmem:[#allocation466_spill] sm:$0xff] %v6701_v49  ;;  %v740_v42 = vld [vmem:[%s4728_s16 + $0xfe8] sm:$0xff]  ;;  %v747_v49 = vld [vmem:[%s4728_s16 + $0x1020] sm:$0xff]  ;;  %v6800_v44 = vmul.f32 %v4751_v19, %v741_v41  ;;  %v6803_v26 = vmul.f32 %v4751_v19, %v742_v36 }
 0x174   : > { %12432 = vst [vmem:[#allocation467_spill] sm:$0xff] %v6704_v50  ;;  %12433 = vst [vmem:[#allocation468_spill] sm:$0xff] %v6707_v51  ;;  %v745_v51 = vld [vmem:[%s4728_s16 + $0x1010] sm:$0xff]  ;;  %v746_v50 = vld [vmem:[%s4728_s16 + $0x1018] sm:$0xff]  ;;  %v6797_v43 = vmul.f32 %v4751_v19, %v740_v42  ;;  %v6822_v35 = vmul.f32 %v4751_v19, %v747_v49 }
 0x175   : > { %12434 = vst [vmem:[#allocation469_spill] sm:$0xff] %v6710_v52  ;;  %12435 = vst [vmem:[#allocation470_spill] sm:$0xff] %v6717_v57  ;;  %v744_v52 = vld [vmem:[%s4728_s16 + $0x1008] sm:$0xff]  ;;  %v751_v57 = vld [vmem:[%s4728_s16 + $0x1040] sm:$0xff]  ;;  %v6816_v41 = vmul.f32 %v4751_v19, %v745_v51  ;;  %v6819_v36 = vmul.f32 %v4751_v19, %v746_v50 }
 0x176   : > { %12436 = vst [vmem:[#allocation471_spill] sm:$0xff] %v6720_v58  ;;  %12437 = vst [vmem:[#allocation472_spill] sm:$0xff] %v6723_v59  ;;  %v749_v59 = vld [vmem:[%s4728_s16 + $0x1030] sm:$0xff]  ;;  %v750_v58 = vld [vmem:[%s4728_s16 + $0x1038] sm:$0xff]  ;;  %v6813_v42 = vmul.f32 %v4751_v19, %v744_v52  ;;  %v6838_v49 = vmul.f32 %v4751_v19, %v751_v57 }
 0x177   : > { %12438 = vst [vmem:[#allocation473_spill] sm:$0xff] %v6726_v60  ;;  %12439 = vst [vmem:[#allocation474_spill] sm:$0xff] %v6733_v1  ;;  %v748_v60 = vld [vmem:[%s4728_s16 + $0x1028] sm:$0xff]  ;;  %v755_v1 = vld [vmem:[%s4728_s16 + $0x1060] sm:$0xff]  ;;  %v6832_v51 = vmul.f32 %v4751_v19, %v749_v59  ;;  %v6835_v50 = vmul.f32 %v4751_v19, %v750_v58 }
 0x178   : > { %12440 = vst [vmem:[#allocation475_spill] sm:$0xff] %v6736_v2  ;;  %12441 = vst [vmem:[#allocation476_spill] sm:$0xff] %v6739_v3  ;;  %v753_v3 = vld [vmem:[%s4728_s16 + $0x1050] sm:$0xff]  ;;  %v754_v2 = vld [vmem:[%s4728_s16 + $0x1058] sm:$0xff]  ;;  %v6829_v52 = vmul.f32 %v4751_v19, %v748_v60  ;;  %v6854_v57 = vmul.f32 %v4751_v19, %v755_v1 }
 0x179   : > { %12442 = vst [vmem:[#allocation477_spill] sm:$0xff] %v6742_v4  ;;  %12443 = vst [vmem:[#allocation478_spill] sm:$0xff] %v6749_v9  ;;  %v752_v4 = vld [vmem:[%s4728_s16 + $0x1048] sm:$0xff]  ;;  %v759_v9 = vld [vmem:[%s4728_s16 + $0x1080] sm:$0xff]  ;;  %v6848_v59 = vmul.f32 %v4751_v19, %v753_v3  ;;  %v6851_v58 = vmul.f32 %v4751_v19, %v754_v2 }
 0x17a   : > { %12444 = vst [vmem:[#allocation479_spill] sm:$0xff] %v6752_v10  ;;  %12445 = vst [vmem:[#allocation480_spill] sm:$0xff] %v6755_v11  ;;  %v757_v11 = vld [vmem:[%s4728_s16 + $0x1070] sm:$0xff]  ;;  %v758_v10 = vld [vmem:[%s4728_s16 + $0x1078] sm:$0xff]  ;;  %v6845_v60 = vmul.f32 %v4751_v19, %v752_v4  ;;  %v6870_v1 = vmul.f32 %v4751_v19, %v759_v9 }
 0x17b   : > { %12446 = vst [vmem:[#allocation481_spill] sm:$0xff] %v6758_v12  ;;  %12447 = vst [vmem:[#allocation482_spill] sm:$0xff] %v6765_v17  ;;  %v756_v12 = vld [vmem:[%s4728_s16 + $0x1068] sm:$0xff]  ;;  %v763_v17 = vld [vmem:[%s4728_s16 + $0x10a0] sm:$0xff]  ;;  %v6864_v3 = vmul.f32 %v4751_v19, %v757_v11  ;;  %v6867_v2 = vmul.f32 %v4751_v19, %v758_v10 }
 0x17c   : > { %12448 = vst [vmem:[#allocation483_spill] sm:$0xff] %v6768_v18  ;;  %12449 = vst [vmem:[#allocation484_spill] sm:$0xff] %v6771_v20  ;;  %v761_v20 = vld [vmem:[%s4728_s16 + $0x1090] sm:$0xff]  ;;  %v762_v18 = vld [vmem:[%s4728_s16 + $0x1098] sm:$0xff]  ;;  %v6861_v4 = vmul.f32 %v4751_v19, %v756_v12  ;;  %v6886_v9 = vmul.f32 %v4751_v19, %v763_v17 }
 0x17d   : > { %12450 = vst [vmem:[#allocation485_spill] sm:$0xff] %v6774_v21  ;;  %12451 = vst [vmem:[#allocation486_spill] sm:$0xff] %v6781_v27  ;;  %v760_v21 = vld [vmem:[%s4728_s16 + $0x1088] sm:$0xff]  ;;  %v767_v27 = vld [vmem:[%s4728_s16 + $0x10c0] sm:$0xff]  ;;  %v6880_v11 = vmul.f32 %v4751_v19, %v761_v20  ;;  %v6883_v10 = vmul.f32 %v4751_v19, %v762_v18 }
 0x17e   : > { %12452 = vst [vmem:[#allocation487_spill] sm:$0xff] %v6784_v28  ;;  %12453 = vst [vmem:[#allocation488_spill] sm:$0xff] %v6787_v33  ;;  %v765_v33 = vld [vmem:[%s4728_s16 + $0x10b0] sm:$0xff]  ;;  %v766_v28 = vld [vmem:[%s4728_s16 + $0x10b8] sm:$0xff]  ;;  %v6877_v12 = vmul.f32 %v4751_v19, %v760_v21  ;;  %v6902_v17 = vmul.f32 %v4751_v19, %v767_v27 }
 0x17f   : > { %12454 = vst [vmem:[#allocation489_spill] sm:$0xff] %v6790_v34  ;;  %12455 = vst [vmem:[#allocation490_spill] sm:$0xff] %v6797_v43  ;;  %v764_v34 = vld [vmem:[%s4728_s16 + $0x10a8] sm:$0xff]  ;;  %v771_v43 = vld [vmem:[%s4728_s16 + $0x10e0] sm:$0xff]  ;;  %v6896_v20 = vmul.f32 %v4751_v19, %v765_v33  ;;  %v6899_v18 = vmul.f32 %v4751_v19, %v766_v28 }
 0x180   : > { %12456 = vst [vmem:[#allocation491_spill] sm:$0xff] %v6800_v44  ;;  %12457 = vst [vmem:[#allocation492_spill] sm:$0xff] %v6803_v26  ;;  %v769_v26 = vld [vmem:[%s4728_s16 + $0x10d0] sm:$0xff]  ;;  %v770_v44 = vld [vmem:[%s4728_s16 + $0x10d8] sm:$0xff]  ;;  %v6893_v21 = vmul.f32 %v4751_v19, %v764_v34  ;;  %v6918_v27 = vmul.f32 %v4751_v19, %v771_v43 }
 0x181   : > { %12458 = vst [vmem:[#allocation493_spill] sm:$0xff] %v6806_v25  ;;  %12459 = vst [vmem:[#allocation494_spill] sm:$0xff] %v6813_v42  ;;  %v768_v25 = vld [vmem:[%s4728_s16 + $0x10c8] sm:$0xff]  ;;  %v775_v42 = vld [vmem:[%s4728_s16 + $0x1100] sm:$0xff]  ;;  %v6912_v33 = vmul.f32 %v4751_v19, %v769_v26  ;;  %v6915_v28 = vmul.f32 %v4751_v19, %v770_v44 }
 0x182   : > { %12460 = vst [vmem:[#allocation495_spill] sm:$0xff] %v6816_v41  ;;  %12461 = vst [vmem:[#allocation496_spill] sm:$0xff] %v6819_v36  ;;  %v773_v36 = vld [vmem:[%s4728_s16 + $0x10f0] sm:$0xff]  ;;  %v774_v41 = vld [vmem:[%s4728_s16 + $0x10f8] sm:$0xff]  ;;  %v6909_v34 = vmul.f32 %v4751_v19, %v768_v25  ;;  %v6934_v43 = vmul.f32 %v4751_v19, %v775_v42 }
 0x183   : > { %12462 = vst [vmem:[#allocation497_spill] sm:$0xff] %v6822_v35  ;;  %12463 = vst [vmem:[#allocation498_spill] sm:$0xff] %v6829_v52  ;;  %v772_v35 = vld [vmem:[%s4728_s16 + $0x10e8] sm:$0xff]  ;;  %v779_v52 = vld [vmem:[%s4728_s16 + $0x1120] sm:$0xff]  ;;  %v6928_v26 = vmul.f32 %v4751_v19, %v773_v36  ;;  %v6931_v44 = vmul.f32 %v4751_v19, %v774_v41 }
 0x184   : > { %12464 = vst [vmem:[#allocation499_spill] sm:$0xff] %v6832_v51  ;;  %12465 = vst [vmem:[#allocation500_spill] sm:$0xff] %v6835_v50  ;;  %v777_v50 = vld [vmem:[%s4728_s16 + $0x1110] sm:$0xff]  ;;  %v778_v51 = vld [vmem:[%s4728_s16 + $0x1118] sm:$0xff]  ;;  %v6925_v25 = vmul.f32 %v4751_v19, %v772_v35  ;;  %v6950_v42 = vmul.f32 %v4751_v19, %v779_v52 }
 0x185   : > { %12466 = vst [vmem:[#allocation501_spill] sm:$0xff] %v6838_v49  ;;  %12467 = vst [vmem:[#allocation502_spill] sm:$0xff] %v6845_v60  ;;  %v776_v49 = vld [vmem:[%s4728_s16 + $0x1108] sm:$0xff]  ;;  %v783_v60 = vld [vmem:[%s4728_s16 + $0x1140] sm:$0xff]  ;;  %v6944_v36 = vmul.f32 %v4751_v19, %v777_v50  ;;  %v6947_v41 = vmul.f32 %v4751_v19, %v778_v51 }
 0x186   : > { %12468 = vst [vmem:[#allocation503_spill] sm:$0xff] %v6848_v59  ;;  %12469 = vst [vmem:[#allocation504_spill] sm:$0xff] %v6851_v58  ;;  %v781_v58 = vld [vmem:[%s4728_s16 + $0x1130] sm:$0xff]  ;;  %v782_v59 = vld [vmem:[%s4728_s16 + $0x1138] sm:$0xff]  ;;  %v6941_v35 = vmul.f32 %v4751_v19, %v776_v49  ;;  %v6966_v52 = vmul.f32 %v4751_v19, %v783_v60 }
 0x187   : > { %12470 = vst [vmem:[#allocation505_spill] sm:$0xff] %v6854_v57  ;;  %12471 = vst [vmem:[#allocation506_spill] sm:$0xff] %v6861_v4  ;;  %v780_v57 = vld [vmem:[%s4728_s16 + $0x1128] sm:$0xff]  ;;  %v787_v4 = vld [vmem:[%s4728_s16 + $0x1160] sm:$0xff]  ;;  %v6960_v50 = vmul.f32 %v4751_v19, %v781_v58  ;;  %v6963_v51 = vmul.f32 %v4751_v19, %v782_v59 }
 0x188   : > { %12472 = vst [vmem:[#allocation507_spill] sm:$0xff] %v6864_v3  ;;  %12473 = vst [vmem:[#allocation508_spill] sm:$0xff] %v6867_v2  ;;  %v785_v2 = vld [vmem:[%s4728_s16 + $0x1150] sm:$0xff]  ;;  %v786_v3 = vld [vmem:[%s4728_s16 + $0x1158] sm:$0xff]  ;;  %v6957_v49 = vmul.f32 %v4751_v19, %v780_v57  ;;  %v6982_v60 = vmul.f32 %v4751_v19, %v787_v4 }
 0x189   : > { %12474 = vst [vmem:[#allocation509_spill] sm:$0xff] %v6870_v1  ;;  %12475 = vst [vmem:[#allocation510_spill] sm:$0xff] %v6877_v12  ;;  %v784_v1 = vld [vmem:[%s4728_s16 + $0x1148] sm:$0xff]  ;;  %v791_v12 = vld [vmem:[%s4728_s16 + $0x1180] sm:$0xff]  ;;  %v6976_v58 = vmul.f32 %v4751_v19, %v785_v2  ;;  %v6979_v59 = vmul.f32 %v4751_v19, %v786_v3 }
 0x18a   : > { %12476 = vst [vmem:[#allocation511_spill] sm:$0xff] %v6880_v11  ;;  %12477 = vst [vmem:[#allocation512_spill] sm:$0xff] %v6883_v10  ;;  %v789_v10 = vld [vmem:[%s4728_s16 + $0x1170] sm:$0xff]  ;;  %v790_v11 = vld [vmem:[%s4728_s16 + $0x1178] sm:$0xff]  ;;  %v6973_v57 = vmul.f32 %v4751_v19, %v784_v1  ;;  %v6998_v4 = vmul.f32 %v4751_v19, %v791_v12 }
 0x18b   : > { %12478 = vst [vmem:[#allocation513_spill] sm:$0xff] %v6886_v9  ;;  %12479 = vst [vmem:[#allocation514_spill] sm:$0xff] %v6893_v21  ;;  %v788_v9 = vld [vmem:[%s4728_s16 + $0x1168] sm:$0xff]  ;;  %v795_v21 = vld [vmem:[%s4728_s16 + $0x11a0] sm:$0xff]  ;;  %v6992_v2 = vmul.f32 %v4751_v19, %v789_v10  ;;  %v6995_v3 = vmul.f32 %v4751_v19, %v790_v11 }
 0x18c   : > { %12480 = vst [vmem:[#allocation515_spill] sm:$0xff] %v6896_v20  ;;  %12481 = vst [vmem:[#allocation516_spill] sm:$0xff] %v6899_v18  ;;  %v793_v18 = vld [vmem:[%s4728_s16 + $0x1190] sm:$0xff]  ;;  %v794_v20 = vld [vmem:[%s4728_s16 + $0x1198] sm:$0xff]  ;;  %v6989_v1 = vmul.f32 %v4751_v19, %v788_v9  ;;  %v7014_v12 = vmul.f32 %v4751_v19, %v795_v21 }
 0x18d   : > { %12482 = vst [vmem:[#allocation517_spill] sm:$0xff] %v6902_v17  ;;  %12483 = vst [vmem:[#allocation518_spill] sm:$0xff] %v6909_v34  ;;  %v792_v17 = vld [vmem:[%s4728_s16 + $0x1188] sm:$0xff]  ;;  %v799_v34 = vld [vmem:[%s4728_s16 + $0x11c0] sm:$0xff]  ;;  %v7008_v10 = vmul.f32 %v4751_v19, %v793_v18  ;;  %v7011_v11 = vmul.f32 %v4751_v19, %v794_v20 }
 0x18e   : > { %12484 = vst [vmem:[#allocation519_spill] sm:$0xff] %v6912_v33  ;;  %12485 = vst [vmem:[#allocation520_spill] sm:$0xff] %v6915_v28  ;;  %v797_v28 = vld [vmem:[%s4728_s16 + $0x11b0] sm:$0xff]  ;;  %v798_v33 = vld [vmem:[%s4728_s16 + $0x11b8] sm:$0xff]  ;;  %v7005_v9 = vmul.f32 %v4751_v19, %v792_v17  ;;  %v7030_v21 = vmul.f32 %v4751_v19, %v799_v34 }
 0x18f   : > { %12486 = vst [vmem:[#allocation521_spill] sm:$0xff] %v6918_v27  ;;  %12487 = vst [vmem:[#allocation522_spill] sm:$0xff] %v6925_v25  ;;  %v796_v27 = vld [vmem:[%s4728_s16 + $0x11a8] sm:$0xff]  ;;  %v803_v25 = vld [vmem:[%s4728_s16 + $0x11e0] sm:$0xff]  ;;  %v7024_v18 = vmul.f32 %v4751_v19, %v797_v28  ;;  %v7027_v20 = vmul.f32 %v4751_v19, %v798_v33 }
 0x190   : > { %12488 = vst [vmem:[#allocation523_spill] sm:$0xff] %v6928_v26  ;;  %12489 = vst [vmem:[#allocation524_spill] sm:$0xff] %v6931_v44  ;;  %v801_v44 = vld [vmem:[%s4728_s16 + $0x11d0] sm:$0xff]  ;;  %v802_v26 = vld [vmem:[%s4728_s16 + $0x11d8] sm:$0xff]  ;;  %v7021_v17 = vmul.f32 %v4751_v19, %v796_v27  ;;  %v7046_v34 = vmul.f32 %v4751_v19, %v803_v25 }
 0x191   : > { %12490 = vst [vmem:[#allocation525_spill] sm:$0xff] %v6934_v43  ;;  %12491 = vst [vmem:[#allocation526_spill] sm:$0xff] %v6941_v35  ;;  %v800_v43 = vld [vmem:[%s4728_s16 + $0x11c8] sm:$0xff]  ;;  %v807_v35 = vld [vmem:[%s4728_s16 + $0x1200] sm:$0xff]  ;;  %v7040_v28 = vmul.f32 %v4751_v19, %v801_v44  ;;  %v7043_v33 = vmul.f32 %v4751_v19, %v802_v26 }
 0x192   : > { %12492 = vst [vmem:[#allocation527_spill] sm:$0xff] %v6944_v36  ;;  %12493 = vst [vmem:[#allocation528_spill] sm:$0xff] %v6947_v41  ;;  %v805_v41 = vld [vmem:[%s4728_s16 + $0x11f0] sm:$0xff]  ;;  %v806_v36 = vld [vmem:[%s4728_s16 + $0x11f8] sm:$0xff]  ;;  %v7037_v27 = vmul.f32 %v4751_v19, %v800_v43  ;;  %v7062_v25 = vmul.f32 %v4751_v19, %v807_v35 }
 0x193   : > { %12494 = vst [vmem:[#allocation529_spill] sm:$0xff] %v6950_v42  ;;  %12495 = vst [vmem:[#allocation530_spill] sm:$0xff] %v6957_v49  ;;  %v804_v42 = vld [vmem:[%s4728_s16 + $0x11e8] sm:$0xff]  ;;  %v811_v49 = vld [vmem:[%s4728_s16 + $0x1220] sm:$0xff]  ;;  %v7056_v44 = vmul.f32 %v4751_v19, %v805_v41  ;;  %v7059_v26 = vmul.f32 %v4751_v19, %v806_v36 }
 0x194   : > { %12496 = vst [vmem:[#allocation531_spill] sm:$0xff] %v6960_v50  ;;  %12497 = vst [vmem:[#allocation532_spill] sm:$0xff] %v6963_v51  ;;  %v809_v51 = vld [vmem:[%s4728_s16 + $0x1210] sm:$0xff]  ;;  %v810_v50 = vld [vmem:[%s4728_s16 + $0x1218] sm:$0xff]  ;;  %v7053_v43 = vmul.f32 %v4751_v19, %v804_v42  ;;  %v7078_v35 = vmul.f32 %v4751_v19, %v811_v49 }
 0x195   : > { %12498 = vst [vmem:[#allocation533_spill] sm:$0xff] %v6966_v52  ;;  %12499 = vst [vmem:[#allocation534_spill] sm:$0xff] %v6973_v57  ;;  %v808_v52 = vld [vmem:[%s4728_s16 + $0x1208] sm:$0xff]  ;;  %v815_v57 = vld [vmem:[%s4728_s16 + $0x1240] sm:$0xff]  ;;  %v7072_v41 = vmul.f32 %v4751_v19, %v809_v51  ;;  %v7075_v36 = vmul.f32 %v4751_v19, %v810_v50 }
 0x196   : > { %12500 = vst [vmem:[#allocation535_spill] sm:$0xff] %v6976_v58  ;;  %12501 = vst [vmem:[#allocation536_spill] sm:$0xff] %v6979_v59  ;;  %v813_v59 = vld [vmem:[%s4728_s16 + $0x1230] sm:$0xff]  ;;  %v814_v58 = vld [vmem:[%s4728_s16 + $0x1238] sm:$0xff]  ;;  %v7069_v42 = vmul.f32 %v4751_v19, %v808_v52  ;;  %v7094_v49 = vmul.f32 %v4751_v19, %v815_v57 }
 0x197   : > { %12502 = vst [vmem:[#allocation537_spill] sm:$0xff] %v6982_v60  ;;  %12503 = vst [vmem:[#allocation538_spill] sm:$0xff] %v6989_v1  ;;  %v812_v60 = vld [vmem:[%s4728_s16 + $0x1228] sm:$0xff]  ;;  %v819_v1 = vld [vmem:[%s4728_s16 + $0x1260] sm:$0xff]  ;;  %v7088_v51 = vmul.f32 %v4751_v19, %v813_v59  ;;  %v7091_v50 = vmul.f32 %v4751_v19, %v814_v58 }
 0x198   : > { %12504 = vst [vmem:[#allocation539_spill] sm:$0xff] %v6992_v2  ;;  %12505 = vst [vmem:[#allocation540_spill] sm:$0xff] %v6995_v3  ;;  %v817_v3 = vld [vmem:[%s4728_s16 + $0x1250] sm:$0xff]  ;;  %v818_v2 = vld [vmem:[%s4728_s16 + $0x1258] sm:$0xff]  ;;  %v7085_v52 = vmul.f32 %v4751_v19, %v812_v60  ;;  %v7110_v57 = vmul.f32 %v4751_v19, %v819_v1 }
 0x199   : > { %12506 = vst [vmem:[#allocation541_spill] sm:$0xff] %v6998_v4  ;;  %12507 = vst [vmem:[#allocation542_spill] sm:$0xff] %v7005_v9  ;;  %v816_v4 = vld [vmem:[%s4728_s16 + $0x1248] sm:$0xff]  ;;  %v823_v9 = vld [vmem:[%s4728_s16 + $0x1280] sm:$0xff]  ;;  %v7104_v59 = vmul.f32 %v4751_v19, %v817_v3  ;;  %v7107_v58 = vmul.f32 %v4751_v19, %v818_v2 }
 0x19a   : > { %12508 = vst [vmem:[#allocation543_spill] sm:$0xff] %v7008_v10  ;;  %12509 = vst [vmem:[#allocation544_spill] sm:$0xff] %v7011_v11  ;;  %v821_v11 = vld [vmem:[%s4728_s16 + $0x1270] sm:$0xff]  ;;  %v822_v10 = vld [vmem:[%s4728_s16 + $0x1278] sm:$0xff]  ;;  %v7101_v60 = vmul.f32 %v4751_v19, %v816_v4  ;;  %v7126_v1 = vmul.f32 %v4751_v19, %v823_v9 }
 0x19b   : > { %12510 = vst [vmem:[#allocation545_spill] sm:$0xff] %v7014_v12  ;;  %12511 = vst [vmem:[#allocation546_spill] sm:$0xff] %v7021_v17  ;;  %v820_v12 = vld [vmem:[%s4728_s16 + $0x1268] sm:$0xff]  ;;  %v827_v17 = vld [vmem:[%s4728_s16 + $0x12a0] sm:$0xff]  ;;  %v7120_v3 = vmul.f32 %v4751_v19, %v821_v11  ;;  %v7123_v2 = vmul.f32 %v4751_v19, %v822_v10 }
 0x19c   : > { %12512 = vst [vmem:[#allocation547_spill] sm:$0xff] %v7024_v18  ;;  %12513 = vst [vmem:[#allocation548_spill] sm:$0xff] %v7027_v20  ;;  %v825_v20 = vld [vmem:[%s4728_s16 + $0x1290] sm:$0xff]  ;;  %v826_v18 = vld [vmem:[%s4728_s16 + $0x1298] sm:$0xff]  ;;  %v7117_v4 = vmul.f32 %v4751_v19, %v820_v12  ;;  %v7142_v9 = vmul.f32 %v4751_v19, %v827_v17 }
 0x19d   : > { %12514 = vst [vmem:[#allocation549_spill] sm:$0xff] %v7030_v21  ;;  %12515 = vst [vmem:[#allocation550_spill] sm:$0xff] %v7037_v27  ;;  %v824_v21 = vld [vmem:[%s4728_s16 + $0x1288] sm:$0xff]  ;;  %v831_v27 = vld [vmem:[%s4728_s16 + $0x12c0] sm:$0xff]  ;;  %v7136_v11 = vmul.f32 %v4751_v19, %v825_v20  ;;  %v7139_v10 = vmul.f32 %v4751_v19, %v826_v18 }
 0x19e   : > { %12516 = vst [vmem:[#allocation551_spill] sm:$0xff] %v7040_v28  ;;  %12517 = vst [vmem:[#allocation552_spill] sm:$0xff] %v7043_v33  ;;  %v829_v33 = vld [vmem:[%s4728_s16 + $0x12b0] sm:$0xff]  ;;  %v830_v28 = vld [vmem:[%s4728_s16 + $0x12b8] sm:$0xff]  ;;  %v7133_v12 = vmul.f32 %v4751_v19, %v824_v21  ;;  %v7158_v17 = vmul.f32 %v4751_v19, %v831_v27 }
 0x19f   : > { %12518 = vst [vmem:[#allocation553_spill] sm:$0xff] %v7046_v34  ;;  %12519 = vst [vmem:[#allocation554_spill] sm:$0xff] %v7053_v43  ;;  %v828_v34 = vld [vmem:[%s4728_s16 + $0x12a8] sm:$0xff]  ;;  %v835_v43 = vld [vmem:[%s4728_s16 + $0x12e0] sm:$0xff]  ;;  %v7152_v20 = vmul.f32 %v4751_v19, %v829_v33  ;;  %v7155_v18 = vmul.f32 %v4751_v19, %v830_v28 }
 0x1a0   : > { %12520 = vst [vmem:[#allocation555_spill] sm:$0xff] %v7056_v44  ;;  %12521 = vst [vmem:[#allocation556_spill] sm:$0xff] %v7059_v26  ;;  %v833_v26 = vld [vmem:[%s4728_s16 + $0x12d0] sm:$0xff]  ;;  %v834_v44 = vld [vmem:[%s4728_s16 + $0x12d8] sm:$0xff]  ;;  %v7149_v21 = vmul.f32 %v4751_v19, %v828_v34  ;;  %v7174_v27 = vmul.f32 %v4751_v19, %v835_v43 }
 0x1a1   : > { %12522 = vst [vmem:[#allocation557_spill] sm:$0xff] %v7062_v25  ;;  %12523 = vst [vmem:[#allocation558_spill] sm:$0xff] %v7069_v42  ;;  %v832_v25 = vld [vmem:[%s4728_s16 + $0x12c8] sm:$0xff]  ;;  %v839_v42 = vld [vmem:[%s4728_s16 + $0x1300] sm:$0xff]  ;;  %v7168_v33 = vmul.f32 %v4751_v19, %v833_v26  ;;  %v7171_v28 = vmul.f32 %v4751_v19, %v834_v44 }
 0x1a2   : > { %12524 = vst [vmem:[#allocation559_spill] sm:$0xff] %v7072_v41  ;;  %12525 = vst [vmem:[#allocation560_spill] sm:$0xff] %v7075_v36  ;;  %v837_v36 = vld [vmem:[%s4728_s16 + $0x12f0] sm:$0xff]  ;;  %v838_v41 = vld [vmem:[%s4728_s16 + $0x12f8] sm:$0xff]  ;;  %v7165_v34 = vmul.f32 %v4751_v19, %v832_v25  ;;  %v7190_v43 = vmul.f32 %v4751_v19, %v839_v42 }
 0x1a3   : > { %12526 = vst [vmem:[#allocation561_spill] sm:$0xff] %v7078_v35  ;;  %12527 = vst [vmem:[#allocation562_spill] sm:$0xff] %v7085_v52  ;;  %v836_v35 = vld [vmem:[%s4728_s16 + $0x12e8] sm:$0xff]  ;;  %v843_v52 = vld [vmem:[%s4728_s16 + $0x1320] sm:$0xff]  ;;  %v7184_v26 = vmul.f32 %v4751_v19, %v837_v36  ;;  %v7187_v44 = vmul.f32 %v4751_v19, %v838_v41 }
 0x1a4   : > { %12528 = vst [vmem:[#allocation563_spill] sm:$0xff] %v7088_v51  ;;  %12529 = vst [vmem:[#allocation564_spill] sm:$0xff] %v7091_v50  ;;  %v841_v50 = vld [vmem:[%s4728_s16 + $0x1310] sm:$0xff]  ;;  %v842_v51 = vld [vmem:[%s4728_s16 + $0x1318] sm:$0xff]  ;;  %v7181_v25 = vmul.f32 %v4751_v19, %v836_v35  ;;  %v7206_v42 = vmul.f32 %v4751_v19, %v843_v52 }
 0x1a5   : > { %12530 = vst [vmem:[#allocation565_spill] sm:$0xff] %v7094_v49  ;;  %12531 = vst [vmem:[#allocation566_spill] sm:$0xff] %v7101_v60  ;;  %v840_v49 = vld [vmem:[%s4728_s16 + $0x1308] sm:$0xff]  ;;  %v847_v60 = vld [vmem:[%s4728_s16 + $0x1340] sm:$0xff]  ;;  %v7200_v36 = vmul.f32 %v4751_v19, %v841_v50  ;;  %v7203_v41 = vmul.f32 %v4751_v19, %v842_v51 }
 0x1a6   : > { %12532 = vst [vmem:[#allocation567_spill] sm:$0xff] %v7104_v59  ;;  %12533 = vst [vmem:[#allocation568_spill] sm:$0xff] %v7107_v58  ;;  %v845_v58 = vld [vmem:[%s4728_s16 + $0x1330] sm:$0xff]  ;;  %v846_v59 = vld [vmem:[%s4728_s16 + $0x1338] sm:$0xff]  ;;  %v7197_v35 = vmul.f32 %v4751_v19, %v840_v49  ;;  %v7222_v52 = vmul.f32 %v4751_v19, %v847_v60 }
 0x1a7   : > { %12534 = vst [vmem:[#allocation569_spill] sm:$0xff] %v7110_v57  ;;  %12535 = vst [vmem:[#allocation570_spill] sm:$0xff] %v7117_v4  ;;  %v844_v57 = vld [vmem:[%s4728_s16 + $0x1328] sm:$0xff]  ;;  %v851_v4 = vld [vmem:[%s4728_s16 + $0x1360] sm:$0xff]  ;;  %v7216_v50 = vmul.f32 %v4751_v19, %v845_v58  ;;  %v7219_v51 = vmul.f32 %v4751_v19, %v846_v59 }
 0x1a8   : > { %12536 = vst [vmem:[#allocation571_spill] sm:$0xff] %v7120_v3  ;;  %12537 = vst [vmem:[#allocation572_spill] sm:$0xff] %v7123_v2  ;;  %v849_v2 = vld [vmem:[%s4728_s16 + $0x1350] sm:$0xff]  ;;  %v850_v3 = vld [vmem:[%s4728_s16 + $0x1358] sm:$0xff]  ;;  %v7213_v49 = vmul.f32 %v4751_v19, %v844_v57  ;;  %v7238_v60 = vmul.f32 %v4751_v19, %v851_v4 }
 0x1a9   : > { %12538 = vst [vmem:[#allocation573_spill] sm:$0xff] %v7126_v1  ;;  %12539 = vst [vmem:[#allocation574_spill] sm:$0xff] %v7133_v12  ;;  %v848_v1 = vld [vmem:[%s4728_s16 + $0x1348] sm:$0xff]  ;;  %v855_v12 = vld [vmem:[%s4728_s16 + $0x1380] sm:$0xff]  ;;  %v7232_v58 = vmul.f32 %v4751_v19, %v849_v2  ;;  %v7235_v59 = vmul.f32 %v4751_v19, %v850_v3 }
 0x1aa   : > { %12540 = vst [vmem:[#allocation575_spill] sm:$0xff] %v7136_v11  ;;  %12541 = vst [vmem:[#allocation576_spill] sm:$0xff] %v7139_v10  ;;  %v853_v10 = vld [vmem:[%s4728_s16 + $0x1370] sm:$0xff]  ;;  %v854_v11 = vld [vmem:[%s4728_s16 + $0x1378] sm:$0xff]  ;;  %v7229_v57 = vmul.f32 %v4751_v19, %v848_v1  ;;  %v7254_v4 = vmul.f32 %v4751_v19, %v855_v12 }
 0x1ab   : > { %12542 = vst [vmem:[#allocation577_spill] sm:$0xff] %v7142_v9  ;;  %12543 = vst [vmem:[#allocation578_spill] sm:$0xff] %v7149_v21  ;;  %v852_v9 = vld [vmem:[%s4728_s16 + $0x1368] sm:$0xff]  ;;  %v859_v21 = vld [vmem:[%s4728_s16 + $0x13a0] sm:$0xff]  ;;  %v7248_v2 = vmul.f32 %v4751_v19, %v853_v10  ;;  %v7251_v3 = vmul.f32 %v4751_v19, %v854_v11 }
 0x1ac   : > { %12544 = vst [vmem:[#allocation579_spill] sm:$0xff] %v7152_v20  ;;  %12545 = vst [vmem:[#allocation580_spill] sm:$0xff] %v7155_v18  ;;  %v857_v18 = vld [vmem:[%s4728_s16 + $0x1390] sm:$0xff]  ;;  %v858_v20 = vld [vmem:[%s4728_s16 + $0x1398] sm:$0xff]  ;;  %v7245_v1 = vmul.f32 %v4751_v19, %v852_v9  ;;  %v7270_v12 = vmul.f32 %v4751_v19, %v859_v21 }
 0x1ad   : > { %12546 = vst [vmem:[#allocation581_spill] sm:$0xff] %v7158_v17  ;;  %12547 = vst [vmem:[#allocation582_spill] sm:$0xff] %v7165_v34  ;;  %v856_v17 = vld [vmem:[%s4728_s16 + $0x1388] sm:$0xff]  ;;  %v863_v34 = vld [vmem:[%s4728_s16 + $0x13c0] sm:$0xff]  ;;  %v7264_v10 = vmul.f32 %v4751_v19, %v857_v18  ;;  %v7267_v11 = vmul.f32 %v4751_v19, %v858_v20 }
 0x1ae   : > { %12548 = vst [vmem:[#allocation583_spill] sm:$0xff] %v7168_v33  ;;  %12549 = vst [vmem:[#allocation584_spill] sm:$0xff] %v7171_v28  ;;  %v861_v28 = vld [vmem:[%s4728_s16 + $0x13b0] sm:$0xff]  ;;  %v862_v33 = vld [vmem:[%s4728_s16 + $0x13b8] sm:$0xff]  ;;  %v7261_v9 = vmul.f32 %v4751_v19, %v856_v17  ;;  %v7286_v21 = vmul.f32 %v4751_v19, %v863_v34 }
 0x1af   : > { %12550 = vst [vmem:[#allocation585_spill] sm:$0xff] %v7174_v27  ;;  %12551 = vst [vmem:[#allocation586_spill] sm:$0xff] %v7181_v25  ;;  %v860_v27 = vld [vmem:[%s4728_s16 + $0x13a8] sm:$0xff]  ;;  %v867_v25 = vld [vmem:[%s4728_s16 + $0x13e0] sm:$0xff]  ;;  %v7280_v18 = vmul.f32 %v4751_v19, %v861_v28  ;;  %v7283_v20 = vmul.f32 %v4751_v19, %v862_v33 }
 0x1b0   : > { %12552 = vst [vmem:[#allocation587_spill] sm:$0xff] %v7184_v26  ;;  %12553 = vst [vmem:[#allocation588_spill] sm:$0xff] %v7187_v44  ;;  %v865_v44 = vld [vmem:[%s4728_s16 + $0x13d0] sm:$0xff]  ;;  %v866_v26 = vld [vmem:[%s4728_s16 + $0x13d8] sm:$0xff]  ;;  %v7277_v17 = vmul.f32 %v4751_v19, %v860_v27  ;;  %v7302_v34 = vmul.f32 %v4751_v19, %v867_v25 }
 0x1b1   : > { %12554 = vst [vmem:[#allocation589_spill] sm:$0xff] %v7190_v43  ;;  %12555 = vst [vmem:[#allocation590_spill] sm:$0xff] %v7197_v35  ;;  %v864_v43 = vld [vmem:[%s4728_s16 + $0x13c8] sm:$0xff]  ;;  %v871_v35 = vld [vmem:[%s4728_s16 + $0x1400] sm:$0xff]  ;;  %v7296_v28 = vmul.f32 %v4751_v19, %v865_v44  ;;  %v7299_v33 = vmul.f32 %v4751_v19, %v866_v26 }
 0x1b2   : > { %12556 = vst [vmem:[#allocation591_spill] sm:$0xff] %v7200_v36  ;;  %12557 = vst [vmem:[#allocation592_spill] sm:$0xff] %v7203_v41  ;;  %v869_v41 = vld [vmem:[%s4728_s16 + $0x13f0] sm:$0xff]  ;;  %v870_v36 = vld [vmem:[%s4728_s16 + $0x13f8] sm:$0xff]  ;;  %v7293_v27 = vmul.f32 %v4751_v19, %v864_v43  ;;  %v7318_v25 = vmul.f32 %v4751_v19, %v871_v35 }
 0x1b3   : > { %12558 = vst [vmem:[#allocation593_spill] sm:$0xff] %v7206_v42  ;;  %12559 = vst [vmem:[#allocation594_spill] sm:$0xff] %v7213_v49  ;;  %v868_v42 = vld [vmem:[%s4728_s16 + $0x13e8] sm:$0xff]  ;;  %v875_v49 = vld [vmem:[%s4728_s16 + $0x1420] sm:$0xff]  ;;  %v7312_v44 = vmul.f32 %v4751_v19, %v869_v41  ;;  %v7315_v26 = vmul.f32 %v4751_v19, %v870_v36 }
 0x1b4   : > { %12560 = vst [vmem:[#allocation595_spill] sm:$0xff] %v7216_v50  ;;  %12561 = vst [vmem:[#allocation596_spill] sm:$0xff] %v7219_v51  ;;  %v873_v51 = vld [vmem:[%s4728_s16 + $0x1410] sm:$0xff]  ;;  %v874_v50 = vld [vmem:[%s4728_s16 + $0x1418] sm:$0xff]  ;;  %v7309_v43 = vmul.f32 %v4751_v19, %v868_v42  ;;  %v7334_v35 = vmul.f32 %v4751_v19, %v875_v49 }
 0x1b5   : > { %12562 = vst [vmem:[#allocation597_spill] sm:$0xff] %v7222_v52  ;;  %12563 = vst [vmem:[#allocation598_spill] sm:$0xff] %v7229_v57  ;;  %v872_v52 = vld [vmem:[%s4728_s16 + $0x1408] sm:$0xff]  ;;  %v879_v57 = vld [vmem:[%s4728_s16 + $0x1440] sm:$0xff]  ;;  %v7328_v41 = vmul.f32 %v4751_v19, %v873_v51  ;;  %v7331_v36 = vmul.f32 %v4751_v19, %v874_v50 }
 0x1b6   : > { %12564 = vst [vmem:[#allocation599_spill] sm:$0xff] %v7232_v58  ;;  %12565 = vst [vmem:[#allocation600_spill] sm:$0xff] %v7235_v59  ;;  %v877_v59 = vld [vmem:[%s4728_s16 + $0x1430] sm:$0xff]  ;;  %v878_v58 = vld [vmem:[%s4728_s16 + $0x1438] sm:$0xff]  ;;  %v7325_v42 = vmul.f32 %v4751_v19, %v872_v52  ;;  %v7350_v49 = vmul.f32 %v4751_v19, %v879_v57 }
 0x1b7   : > { %12566 = vst [vmem:[#allocation601_spill] sm:$0xff] %v7238_v60  ;;  %12567 = vst [vmem:[#allocation602_spill] sm:$0xff] %v7245_v1  ;;  %v876_v60 = vld [vmem:[%s4728_s16 + $0x1428] sm:$0xff]  ;;  %v883_v1 = vld [vmem:[%s4728_s16 + $0x1460] sm:$0xff]  ;;  %v7344_v51 = vmul.f32 %v4751_v19, %v877_v59  ;;  %v7347_v50 = vmul.f32 %v4751_v19, %v878_v58 }
 0x1b8   : > { %12568 = vst [vmem:[#allocation603_spill] sm:$0xff] %v7248_v2  ;;  %12569 = vst [vmem:[#allocation604_spill] sm:$0xff] %v7251_v3  ;;  %v881_v3 = vld [vmem:[%s4728_s16 + $0x1450] sm:$0xff]  ;;  %v882_v2 = vld [vmem:[%s4728_s16 + $0x1458] sm:$0xff]  ;;  %v7341_v52 = vmul.f32 %v4751_v19, %v876_v60  ;;  %v7366_v57 = vmul.f32 %v4751_v19, %v883_v1 }
 0x1b9   : > { %12570 = vst [vmem:[#allocation605_spill] sm:$0xff] %v7254_v4  ;;  %12571 = vst [vmem:[#allocation606_spill] sm:$0xff] %v7261_v9  ;;  %v880_v4 = vld [vmem:[%s4728_s16 + $0x1448] sm:$0xff]  ;;  %v887_v9 = vld [vmem:[%s4728_s16 + $0x1480] sm:$0xff]  ;;  %v7360_v59 = vmul.f32 %v4751_v19, %v881_v3  ;;  %v7363_v58 = vmul.f32 %v4751_v19, %v882_v2 }
 0x1ba   : > { %12572 = vst [vmem:[#allocation607_spill] sm:$0xff] %v7264_v10  ;;  %12573 = vst [vmem:[#allocation608_spill] sm:$0xff] %v7267_v11  ;;  %v885_v11 = vld [vmem:[%s4728_s16 + $0x1470] sm:$0xff]  ;;  %v886_v10 = vld [vmem:[%s4728_s16 + $0x1478] sm:$0xff]  ;;  %v7357_v60 = vmul.f32 %v4751_v19, %v880_v4  ;;  %v7382_v1 = vmul.f32 %v4751_v19, %v887_v9 }
 0x1bb   : > { %12574 = vst [vmem:[#allocation609_spill] sm:$0xff] %v7270_v12  ;;  %12575 = vst [vmem:[#allocation610_spill] sm:$0xff] %v7277_v17  ;;  %v884_v12 = vld [vmem:[%s4728_s16 + $0x1468] sm:$0xff]  ;;  %v891_v17 = vld [vmem:[%s4728_s16 + $0x14a0] sm:$0xff]  ;;  %v7376_v3 = vmul.f32 %v4751_v19, %v885_v11  ;;  %v7379_v2 = vmul.f32 %v4751_v19, %v886_v10 }
 0x1bc   : > { %12576 = vst [vmem:[#allocation611_spill] sm:$0xff] %v7280_v18  ;;  %12577 = vst [vmem:[#allocation612_spill] sm:$0xff] %v7283_v20  ;;  %v889_v20 = vld [vmem:[%s4728_s16 + $0x1490] sm:$0xff]  ;;  %v890_v18 = vld [vmem:[%s4728_s16 + $0x1498] sm:$0xff]  ;;  %v7373_v4 = vmul.f32 %v4751_v19, %v884_v12  ;;  %v7398_v9 = vmul.f32 %v4751_v19, %v891_v17 }
 0x1bd   : > { %12578 = vst [vmem:[#allocation613_spill] sm:$0xff] %v7286_v21  ;;  %12579 = vst [vmem:[#allocation614_spill] sm:$0xff] %v7293_v27  ;;  %v888_v21 = vld [vmem:[%s4728_s16 + $0x1488] sm:$0xff]  ;;  %v895_v27 = vld [vmem:[%s4728_s16 + $0x14c0] sm:$0xff]  ;;  %v7392_v11 = vmul.f32 %v4751_v19, %v889_v20  ;;  %v7395_v10 = vmul.f32 %v4751_v19, %v890_v18 }
 0x1be   : > { %12580 = vst [vmem:[#allocation615_spill] sm:$0xff] %v7296_v28  ;;  %12581 = vst [vmem:[#allocation616_spill] sm:$0xff] %v7299_v33  ;;  %v893_v33 = vld [vmem:[%s4728_s16 + $0x14b0] sm:$0xff]  ;;  %v894_v28 = vld [vmem:[%s4728_s16 + $0x14b8] sm:$0xff]  ;;  %v7389_v12 = vmul.f32 %v4751_v19, %v888_v21  ;;  %v7414_v17 = vmul.f32 %v4751_v19, %v895_v27 }
 0x1bf   : > { %12582 = vst [vmem:[#allocation617_spill] sm:$0xff] %v7302_v34  ;;  %12583 = vst [vmem:[#allocation618_spill] sm:$0xff] %v7309_v43  ;;  %v892_v34 = vld [vmem:[%s4728_s16 + $0x14a8] sm:$0xff]  ;;  %v899_v43 = vld [vmem:[%s4728_s16 + $0x14e0] sm:$0xff]  ;;  %v7408_v20 = vmul.f32 %v4751_v19, %v893_v33  ;;  %v7411_v18 = vmul.f32 %v4751_v19, %v894_v28 }
 0x1c0   : > { %12584 = vst [vmem:[#allocation619_spill] sm:$0xff] %v7312_v44  ;;  %12585 = vst [vmem:[#allocation620_spill] sm:$0xff] %v7315_v26  ;;  %v897_v26 = vld [vmem:[%s4728_s16 + $0x14d0] sm:$0xff]  ;;  %v898_v44 = vld [vmem:[%s4728_s16 + $0x14d8] sm:$0xff]  ;;  %v7405_v21 = vmul.f32 %v4751_v19, %v892_v34  ;;  %v7430_v27 = vmul.f32 %v4751_v19, %v899_v43 }
 0x1c1   : > { %12586 = vst [vmem:[#allocation621_spill] sm:$0xff] %v7318_v25  ;;  %12587 = vst [vmem:[#allocation622_spill] sm:$0xff] %v7325_v42  ;;  %v896_v25 = vld [vmem:[%s4728_s16 + $0x14c8] sm:$0xff]  ;;  %v903_v42 = vld [vmem:[%s4728_s16 + $0x1500] sm:$0xff]  ;;  %v7424_v33 = vmul.f32 %v4751_v19, %v897_v26  ;;  %v7427_v28 = vmul.f32 %v4751_v19, %v898_v44 }
 0x1c2   : > { %12588 = vst [vmem:[#allocation623_spill] sm:$0xff] %v7328_v41  ;;  %12589 = vst [vmem:[#allocation624_spill] sm:$0xff] %v7331_v36  ;;  %v901_v36 = vld [vmem:[%s4728_s16 + $0x14f0] sm:$0xff]  ;;  %v902_v41 = vld [vmem:[%s4728_s16 + $0x14f8] sm:$0xff]  ;;  %v7421_v34 = vmul.f32 %v4751_v19, %v896_v25  ;;  %v7446_v43 = vmul.f32 %v4751_v19, %v903_v42 }
 0x1c3   : > { %12590 = vst [vmem:[#allocation625_spill] sm:$0xff] %v7334_v35  ;;  %12591 = vst [vmem:[#allocation626_spill] sm:$0xff] %v7341_v52  ;;  %v900_v35 = vld [vmem:[%s4728_s16 + $0x14e8] sm:$0xff]  ;;  %v907_v52 = vld [vmem:[%s4728_s16 + $0x1520] sm:$0xff]  ;;  %v7440_v26 = vmul.f32 %v4751_v19, %v901_v36  ;;  %v7443_v44 = vmul.f32 %v4751_v19, %v902_v41 }
 0x1c4   : > { %12592 = vst [vmem:[#allocation627_spill] sm:$0xff] %v7344_v51  ;;  %12593 = vst [vmem:[#allocation628_spill] sm:$0xff] %v7347_v50  ;;  %v905_v50 = vld [vmem:[%s4728_s16 + $0x1510] sm:$0xff]  ;;  %v906_v51 = vld [vmem:[%s4728_s16 + $0x1518] sm:$0xff]  ;;  %v7437_v25 = vmul.f32 %v4751_v19, %v900_v35  ;;  %v7462_v42 = vmul.f32 %v4751_v19, %v907_v52 }
 0x1c5   : > { %12594 = vst [vmem:[#allocation629_spill] sm:$0xff] %v7350_v49  ;;  %12595 = vst [vmem:[#allocation630_spill] sm:$0xff] %v7357_v60  ;;  %v904_v49 = vld [vmem:[%s4728_s16 + $0x1508] sm:$0xff]  ;;  %v911_v60 = vld [vmem:[%s4728_s16 + $0x1540] sm:$0xff]  ;;  %v7456_v36 = vmul.f32 %v4751_v19, %v905_v50  ;;  %v7459_v41 = vmul.f32 %v4751_v19, %v906_v51 }
 0x1c6   : > { %12596 = vst [vmem:[#allocation631_spill] sm:$0xff] %v7360_v59  ;;  %12597 = vst [vmem:[#allocation632_spill] sm:$0xff] %v7363_v58  ;;  %v909_v58 = vld [vmem:[%s4728_s16 + $0x1530] sm:$0xff]  ;;  %v910_v59 = vld [vmem:[%s4728_s16 + $0x1538] sm:$0xff]  ;;  %v7453_v35 = vmul.f32 %v4751_v19, %v904_v49  ;;  %v7478_v52 = vmul.f32 %v4751_v19, %v911_v60 }
 0x1c7   : > { %12598 = vst [vmem:[#allocation633_spill] sm:$0xff] %v7366_v57  ;;  %12599 = vst [vmem:[#allocation634_spill] sm:$0xff] %v7373_v4  ;;  %v908_v57 = vld [vmem:[%s4728_s16 + $0x1528] sm:$0xff]  ;;  %v915_v4 = vld [vmem:[%s4728_s16 + $0x1560] sm:$0xff]  ;;  %v7472_v50 = vmul.f32 %v4751_v19, %v909_v58  ;;  %v7475_v51 = vmul.f32 %v4751_v19, %v910_v59 }
 0x1c8   : > { %12600 = vst [vmem:[#allocation635_spill] sm:$0xff] %v7376_v3  ;;  %12601 = vst [vmem:[#allocation636_spill] sm:$0xff] %v7379_v2  ;;  %v913_v2 = vld [vmem:[%s4728_s16 + $0x1550] sm:$0xff]  ;;  %v914_v3 = vld [vmem:[%s4728_s16 + $0x1558] sm:$0xff]  ;;  %v7469_v49 = vmul.f32 %v4751_v19, %v908_v57  ;;  %v7494_v60 = vmul.f32 %v4751_v19, %v915_v4 }
 0x1c9   : > { %12602 = vst [vmem:[#allocation637_spill] sm:$0xff] %v7382_v1  ;;  %12603 = vst [vmem:[#allocation638_spill] sm:$0xff] %v7389_v12  ;;  %v912_v1 = vld [vmem:[%s4728_s16 + $0x1548] sm:$0xff]  ;;  %v919_v12 = vld [vmem:[%s4728_s16 + $0x1580] sm:$0xff]  ;;  %v7488_v58 = vmul.f32 %v4751_v19, %v913_v2  ;;  %v7491_v59 = vmul.f32 %v4751_v19, %v914_v3 }
 0x1ca   : > { %12604 = vst [vmem:[#allocation639_spill] sm:$0xff] %v7392_v11  ;;  %12605 = vst [vmem:[#allocation640_spill] sm:$0xff] %v7395_v10  ;;  %v917_v10 = vld [vmem:[%s4728_s16 + $0x1570] sm:$0xff]  ;;  %v918_v11 = vld [vmem:[%s4728_s16 + $0x1578] sm:$0xff]  ;;  %v7485_v57 = vmul.f32 %v4751_v19, %v912_v1  ;;  %v7510_v4 = vmul.f32 %v4751_v19, %v919_v12 }
 0x1cb   : > { %12606 = vst [vmem:[#allocation641_spill] sm:$0xff] %v7398_v9  ;;  %12607 = vst [vmem:[#allocation642_spill] sm:$0xff] %v7405_v21  ;;  %v916_v9 = vld [vmem:[%s4728_s16 + $0x1568] sm:$0xff]  ;;  %v923_v21 = vld [vmem:[%s4728_s16 + $0x15a0] sm:$0xff]  ;;  %v7504_v2 = vmul.f32 %v4751_v19, %v917_v10  ;;  %v7507_v3 = vmul.f32 %v4751_v19, %v918_v11 }
 0x1cc   : > { %12608 = vst [vmem:[#allocation643_spill] sm:$0xff] %v7408_v20  ;;  %12609 = vst [vmem:[#allocation644_spill] sm:$0xff] %v7411_v18  ;;  %v921_v18 = vld [vmem:[%s4728_s16 + $0x1590] sm:$0xff]  ;;  %v922_v20 = vld [vmem:[%s4728_s16 + $0x1598] sm:$0xff]  ;;  %v7501_v1 = vmul.f32 %v4751_v19, %v916_v9  ;;  %v7526_v12 = vmul.f32 %v4751_v19, %v923_v21 }
 0x1cd   : > { %12610 = vst [vmem:[#allocation645_spill] sm:$0xff] %v7414_v17  ;;  %12611 = vst [vmem:[#allocation646_spill] sm:$0xff] %v7421_v34  ;;  %v920_v17 = vld [vmem:[%s4728_s16 + $0x1588] sm:$0xff]  ;;  %v927_v34 = vld [vmem:[%s4728_s16 + $0x15c0] sm:$0xff]  ;;  %v7520_v10 = vmul.f32 %v4751_v19, %v921_v18  ;;  %v7523_v11 = vmul.f32 %v4751_v19, %v922_v20 }
 0x1ce   : > { %12612 = vst [vmem:[#allocation647_spill] sm:$0xff] %v7424_v33  ;;  %12613 = vst [vmem:[#allocation648_spill] sm:$0xff] %v7427_v28  ;;  %v925_v28 = vld [vmem:[%s4728_s16 + $0x15b0] sm:$0xff]  ;;  %v926_v33 = vld [vmem:[%s4728_s16 + $0x15b8] sm:$0xff]  ;;  %v7517_v9 = vmul.f32 %v4751_v19, %v920_v17  ;;  %v7542_v21 = vmul.f32 %v4751_v19, %v927_v34 }
 0x1cf   : > { %12614 = vst [vmem:[#allocation649_spill] sm:$0xff] %v7430_v27  ;;  %12615 = vst [vmem:[#allocation650_spill] sm:$0xff] %v7437_v25  ;;  %v924_v27 = vld [vmem:[%s4728_s16 + $0x15a8] sm:$0xff]  ;;  %v931_v25 = vld [vmem:[%s4728_s16 + $0x15e0] sm:$0xff]  ;;  %v7536_v18 = vmul.f32 %v4751_v19, %v925_v28  ;;  %v7539_v20 = vmul.f32 %v4751_v19, %v926_v33 }
 0x1d0   : > { %12616 = vst [vmem:[#allocation651_spill] sm:$0xff] %v7440_v26  ;;  %12617 = vst [vmem:[#allocation652_spill] sm:$0xff] %v7443_v44  ;;  %v929_v44 = vld [vmem:[%s4728_s16 + $0x15d0] sm:$0xff]  ;;  %v930_v26 = vld [vmem:[%s4728_s16 + $0x15d8] sm:$0xff]  ;;  %v7533_v17 = vmul.f32 %v4751_v19, %v924_v27  ;;  %v7558_v34 = vmul.f32 %v4751_v19, %v931_v25 }
 0x1d1   : > { %12618 = vst [vmem:[#allocation653_spill] sm:$0xff] %v7446_v43  ;;  %12619 = vst [vmem:[#allocation654_spill] sm:$0xff] %v7453_v35  ;;  %v928_v43 = vld [vmem:[%s4728_s16 + $0x15c8] sm:$0xff]  ;;  %v935_v35 = vld [vmem:[%s4728_s16 + $0x1600] sm:$0xff]  ;;  %v7552_v28 = vmul.f32 %v4751_v19, %v929_v44  ;;  %v7555_v33 = vmul.f32 %v4751_v19, %v930_v26 }
 0x1d2   : > { %12620 = vst [vmem:[#allocation655_spill] sm:$0xff] %v7456_v36  ;;  %12621 = vst [vmem:[#allocation656_spill] sm:$0xff] %v7459_v41  ;;  %v933_v41 = vld [vmem:[%s4728_s16 + $0x15f0] sm:$0xff]  ;;  %v934_v36 = vld [vmem:[%s4728_s16 + $0x15f8] sm:$0xff]  ;;  %v7549_v27 = vmul.f32 %v4751_v19, %v928_v43  ;;  %v7574_v25 = vmul.f32 %v4751_v19, %v935_v35 }
 0x1d3   : > { %12622 = vst [vmem:[#allocation657_spill] sm:$0xff] %v7462_v42  ;;  %12623 = vst [vmem:[#allocation658_spill] sm:$0xff] %v7469_v49  ;;  %v932_v42 = vld [vmem:[%s4728_s16 + $0x15e8] sm:$0xff]  ;;  %v939_v49 = vld [vmem:[%s4728_s16 + $0x1620] sm:$0xff]  ;;  %v7568_v44 = vmul.f32 %v4751_v19, %v933_v41  ;;  %v7571_v26 = vmul.f32 %v4751_v19, %v934_v36 }
 0x1d4   : > { %12624 = vst [vmem:[#allocation659_spill] sm:$0xff] %v7472_v50  ;;  %12625 = vst [vmem:[#allocation660_spill] sm:$0xff] %v7475_v51  ;;  %v937_v51 = vld [vmem:[%s4728_s16 + $0x1610] sm:$0xff]  ;;  %v938_v50 = vld [vmem:[%s4728_s16 + $0x1618] sm:$0xff]  ;;  %v7565_v43 = vmul.f32 %v4751_v19, %v932_v42  ;;  %v7590_v35 = vmul.f32 %v4751_v19, %v939_v49 }
 0x1d5   : > { %12626 = vst [vmem:[#allocation661_spill] sm:$0xff] %v7478_v52  ;;  %12627 = vst [vmem:[#allocation662_spill] sm:$0xff] %v7485_v57  ;;  %v936_v52 = vld [vmem:[%s4728_s16 + $0x1608] sm:$0xff]  ;;  %v943_v57 = vld [vmem:[%s4728_s16 + $0x1640] sm:$0xff]  ;;  %v7584_v41 = vmul.f32 %v4751_v19, %v937_v51  ;;  %v7587_v36 = vmul.f32 %v4751_v19, %v938_v50 }
 0x1d6   : > { %12628 = vst [vmem:[#allocation663_spill] sm:$0xff] %v7488_v58  ;;  %12629 = vst [vmem:[#allocation664_spill] sm:$0xff] %v7491_v59  ;;  %v941_v59 = vld [vmem:[%s4728_s16 + $0x1630] sm:$0xff]  ;;  %v942_v58 = vld [vmem:[%s4728_s16 + $0x1638] sm:$0xff]  ;;  %v7581_v42 = vmul.f32 %v4751_v19, %v936_v52  ;;  %v7606_v49 = vmul.f32 %v4751_v19, %v943_v57 }
 0x1d7   : > { %12630 = vst [vmem:[#allocation665_spill] sm:$0xff] %v7494_v60  ;;  %12631 = vst [vmem:[#allocation666_spill] sm:$0xff] %v7501_v1  ;;  %v940_v60 = vld [vmem:[%s4728_s16 + $0x1628] sm:$0xff]  ;;  %v947_v1 = vld [vmem:[%s4728_s16 + $0x1660] sm:$0xff]  ;;  %v7600_v51 = vmul.f32 %v4751_v19, %v941_v59  ;;  %v7603_v50 = vmul.f32 %v4751_v19, %v942_v58 }
 0x1d8   : > { %12632 = vst [vmem:[#allocation667_spill] sm:$0xff] %v7504_v2  ;;  %12633 = vst [vmem:[#allocation668_spill] sm:$0xff] %v7507_v3  ;;  %v945_v3 = vld [vmem:[%s4728_s16 + $0x1650] sm:$0xff]  ;;  %v946_v2 = vld [vmem:[%s4728_s16 + $0x1658] sm:$0xff]  ;;  %v7597_v52 = vmul.f32 %v4751_v19, %v940_v60  ;;  %v7622_v57 = vmul.f32 %v4751_v19, %v947_v1 }
 0x1d9   : > { %12634 = vst [vmem:[#allocation669_spill] sm:$0xff] %v7510_v4  ;;  %12635 = vst [vmem:[#allocation670_spill] sm:$0xff] %v7517_v9  ;;  %v944_v4 = vld [vmem:[%s4728_s16 + $0x1648] sm:$0xff]  ;;  %v951_v9 = vld [vmem:[%s4728_s16 + $0x1680] sm:$0xff]  ;;  %v7616_v59 = vmul.f32 %v4751_v19, %v945_v3  ;;  %v7619_v58 = vmul.f32 %v4751_v19, %v946_v2 }
 0x1da   : > { %12636 = vst [vmem:[#allocation671_spill] sm:$0xff] %v7520_v10  ;;  %12637 = vst [vmem:[#allocation672_spill] sm:$0xff] %v7523_v11  ;;  %v949_v11 = vld [vmem:[%s4728_s16 + $0x1670] sm:$0xff]  ;;  %v950_v10 = vld [vmem:[%s4728_s16 + $0x1678] sm:$0xff]  ;;  %v7613_v60 = vmul.f32 %v4751_v19, %v944_v4  ;;  %v7638_v1 = vmul.f32 %v4751_v19, %v951_v9 }
 0x1db   : > { %12638 = vst [vmem:[#allocation673_spill] sm:$0xff] %v7526_v12  ;;  %12639 = vst [vmem:[#allocation674_spill] sm:$0xff] %v7533_v17  ;;  %v948_v12 = vld [vmem:[%s4728_s16 + $0x1668] sm:$0xff]  ;;  %v955_v17 = vld [vmem:[%s4728_s16 + $0x16a0] sm:$0xff]  ;;  %v7632_v3 = vmul.f32 %v4751_v19, %v949_v11  ;;  %v7635_v2 = vmul.f32 %v4751_v19, %v950_v10 }
 0x1dc   : > { %12640 = vst [vmem:[#allocation675_spill] sm:$0xff] %v7536_v18  ;;  %12641 = vst [vmem:[#allocation676_spill] sm:$0xff] %v7539_v20  ;;  %v953_v20 = vld [vmem:[%s4728_s16 + $0x1690] sm:$0xff]  ;;  %v954_v18 = vld [vmem:[%s4728_s16 + $0x1698] sm:$0xff]  ;;  %v7629_v4 = vmul.f32 %v4751_v19, %v948_v12  ;;  %v7654_v9 = vmul.f32 %v4751_v19, %v955_v17 }
 0x1dd   : > { %12642 = vst [vmem:[#allocation677_spill] sm:$0xff] %v7542_v21  ;;  %12643 = vst [vmem:[#allocation678_spill] sm:$0xff] %v7549_v27  ;;  %v952_v21 = vld [vmem:[%s4728_s16 + $0x1688] sm:$0xff]  ;;  %v959_v27 = vld [vmem:[%s4728_s16 + $0x16c0] sm:$0xff]  ;;  %v7648_v11 = vmul.f32 %v4751_v19, %v953_v20  ;;  %v7651_v10 = vmul.f32 %v4751_v19, %v954_v18 }
 0x1de   : > { %12644 = vst [vmem:[#allocation679_spill] sm:$0xff] %v7552_v28  ;;  %12645 = vst [vmem:[#allocation680_spill] sm:$0xff] %v7555_v33  ;;  %v957_v33 = vld [vmem:[%s4728_s16 + $0x16b0] sm:$0xff]  ;;  %v958_v28 = vld [vmem:[%s4728_s16 + $0x16b8] sm:$0xff]  ;;  %v7645_v12 = vmul.f32 %v4751_v19, %v952_v21  ;;  %v7670_v17 = vmul.f32 %v4751_v19, %v959_v27 }
 0x1df   : > { %12646 = vst [vmem:[#allocation681_spill] sm:$0xff] %v7558_v34  ;;  %12647 = vst [vmem:[#allocation682_spill] sm:$0xff] %v7565_v43  ;;  %v956_v34 = vld [vmem:[%s4728_s16 + $0x16a8] sm:$0xff]  ;;  %v963_v43 = vld [vmem:[%s4728_s16 + $0x16e0] sm:$0xff]  ;;  %v7664_v20 = vmul.f32 %v4751_v19, %v957_v33  ;;  %v7667_v18 = vmul.f32 %v4751_v19, %v958_v28 }
 0x1e0   : > { %12648 = vst [vmem:[#allocation683_spill] sm:$0xff] %v7568_v44  ;;  %12649 = vst [vmem:[#allocation684_spill] sm:$0xff] %v7571_v26  ;;  %v961_v26 = vld [vmem:[%s4728_s16 + $0x16d0] sm:$0xff]  ;;  %v962_v44 = vld [vmem:[%s4728_s16 + $0x16d8] sm:$0xff]  ;;  %v7661_v21 = vmul.f32 %v4751_v19, %v956_v34  ;;  %v7686_v27 = vmul.f32 %v4751_v19, %v963_v43 }
 0x1e1   : > { %12650 = vst [vmem:[#allocation685_spill] sm:$0xff] %v7574_v25  ;;  %12651 = vst [vmem:[#allocation686_spill] sm:$0xff] %v7581_v42  ;;  %v960_v25 = vld [vmem:[%s4728_s16 + $0x16c8] sm:$0xff]  ;;  %v967_v42 = vld [vmem:[%s4728_s16 + $0x1700] sm:$0xff]  ;;  %v7680_v33 = vmul.f32 %v4751_v19, %v961_v26  ;;  %v7683_v28 = vmul.f32 %v4751_v19, %v962_v44 }
 0x1e2   : > { %12652 = vst [vmem:[#allocation687_spill] sm:$0xff] %v7584_v41  ;;  %12653 = vst [vmem:[#allocation688_spill] sm:$0xff] %v7587_v36  ;;  %v965_v36 = vld [vmem:[%s4728_s16 + $0x16f0] sm:$0xff]  ;;  %v966_v41 = vld [vmem:[%s4728_s16 + $0x16f8] sm:$0xff]  ;;  %v7677_v34 = vmul.f32 %v4751_v19, %v960_v25  ;;  %v7702_v43 = vmul.f32 %v4751_v19, %v967_v42 }
 0x1e3   : > { %12654 = vst [vmem:[#allocation689_spill] sm:$0xff] %v7590_v35  ;;  %12655 = vst [vmem:[#allocation690_spill] sm:$0xff] %v7597_v52  ;;  %v964_v35 = vld [vmem:[%s4728_s16 + $0x16e8] sm:$0xff]  ;;  %v971_v52 = vld [vmem:[%s4728_s16 + $0x1720] sm:$0xff]  ;;  %v7696_v26 = vmul.f32 %v4751_v19, %v965_v36  ;;  %v7699_v44 = vmul.f32 %v4751_v19, %v966_v41 }
 0x1e4   : > { %12656 = vst [vmem:[#allocation691_spill] sm:$0xff] %v7600_v51  ;;  %12657 = vst [vmem:[#allocation692_spill] sm:$0xff] %v7603_v50  ;;  %v969_v50 = vld [vmem:[%s4728_s16 + $0x1710] sm:$0xff]  ;;  %v970_v51 = vld [vmem:[%s4728_s16 + $0x1718] sm:$0xff]  ;;  %v7693_v25 = vmul.f32 %v4751_v19, %v964_v35  ;;  %v7718_v42 = vmul.f32 %v4751_v19, %v971_v52 }
 0x1e5   : > { %12658 = vst [vmem:[#allocation693_spill] sm:$0xff] %v7606_v49  ;;  %12659 = vst [vmem:[#allocation694_spill] sm:$0xff] %v7613_v60  ;;  %v968_v49 = vld [vmem:[%s4728_s16 + $0x1708] sm:$0xff]  ;;  %v975_v60 = vld [vmem:[%s4728_s16 + $0x1740] sm:$0xff]  ;;  %v7712_v36 = vmul.f32 %v4751_v19, %v969_v50  ;;  %v7715_v41 = vmul.f32 %v4751_v19, %v970_v51 }
 0x1e6   : > { %12660 = vst [vmem:[#allocation695_spill] sm:$0xff] %v7616_v59  ;;  %12661 = vst [vmem:[#allocation696_spill] sm:$0xff] %v7619_v58  ;;  %v973_v58 = vld [vmem:[%s4728_s16 + $0x1730] sm:$0xff]  ;;  %v974_v59 = vld [vmem:[%s4728_s16 + $0x1738] sm:$0xff]  ;;  %v7709_v35 = vmul.f32 %v4751_v19, %v968_v49  ;;  %v7734_v52 = vmul.f32 %v4751_v19, %v975_v60 }
 0x1e7   : > { %12662 = vst [vmem:[#allocation697_spill] sm:$0xff] %v7622_v57  ;;  %12663 = vst [vmem:[#allocation698_spill] sm:$0xff] %v7629_v4  ;;  %v972_v57 = vld [vmem:[%s4728_s16 + $0x1728] sm:$0xff]  ;;  %v979_v4 = vld [vmem:[%s4728_s16 + $0x1760] sm:$0xff]  ;;  %v7728_v50 = vmul.f32 %v4751_v19, %v973_v58  ;;  %v7731_v51 = vmul.f32 %v4751_v19, %v974_v59 }
 0x1e8   : > { %12664 = vst [vmem:[#allocation699_spill] sm:$0xff] %v7632_v3  ;;  %12665 = vst [vmem:[#allocation700_spill] sm:$0xff] %v7635_v2  ;;  %v977_v2 = vld [vmem:[%s4728_s16 + $0x1750] sm:$0xff]  ;;  %v978_v3 = vld [vmem:[%s4728_s16 + $0x1758] sm:$0xff]  ;;  %v7725_v49 = vmul.f32 %v4751_v19, %v972_v57  ;;  %v7750_v60 = vmul.f32 %v4751_v19, %v979_v4 }
 0x1e9   : > { %12666 = vst [vmem:[#allocation701_spill] sm:$0xff] %v7638_v1  ;;  %12667 = vst [vmem:[#allocation702_spill] sm:$0xff] %v7645_v12  ;;  %v976_v1 = vld [vmem:[%s4728_s16 + $0x1748] sm:$0xff]  ;;  %v983_v12 = vld [vmem:[%s4728_s16 + $0x1780] sm:$0xff]  ;;  %v7744_v58 = vmul.f32 %v4751_v19, %v977_v2  ;;  %v7747_v59 = vmul.f32 %v4751_v19, %v978_v3 }
 0x1ea   : > { %12668 = vst [vmem:[#allocation703_spill] sm:$0xff] %v7648_v11  ;;  %12669 = vst [vmem:[#allocation704_spill] sm:$0xff] %v7651_v10  ;;  %v981_v10 = vld [vmem:[%s4728_s16 + $0x1770] sm:$0xff]  ;;  %v982_v11 = vld [vmem:[%s4728_s16 + $0x1778] sm:$0xff]  ;;  %v7741_v57 = vmul.f32 %v4751_v19, %v976_v1  ;;  %v7766_v4 = vmul.f32 %v4751_v19, %v983_v12 }
 0x1eb   : > { %12670 = vst [vmem:[#allocation705_spill] sm:$0xff] %v7654_v9  ;;  %12671 = vst [vmem:[#allocation706_spill] sm:$0xff] %v7661_v21  ;;  %v980_v9 = vld [vmem:[%s4728_s16 + $0x1768] sm:$0xff]  ;;  %v987_v21 = vld [vmem:[%s4728_s16 + $0x17a0] sm:$0xff]  ;;  %v7760_v2 = vmul.f32 %v4751_v19, %v981_v10  ;;  %v7763_v3 = vmul.f32 %v4751_v19, %v982_v11 }
 0x1ec   : > { %12672 = vst [vmem:[#allocation707_spill] sm:$0xff] %v7664_v20  ;;  %12673 = vst [vmem:[#allocation708_spill] sm:$0xff] %v7667_v18  ;;  %v985_v18 = vld [vmem:[%s4728_s16 + $0x1790] sm:$0xff]  ;;  %v986_v20 = vld [vmem:[%s4728_s16 + $0x1798] sm:$0xff]  ;;  %v7757_v1 = vmul.f32 %v4751_v19, %v980_v9  ;;  %v7782_v12 = vmul.f32 %v4751_v19, %v987_v21 }
 0x1ed   : > { %12674 = vst [vmem:[#allocation709_spill] sm:$0xff] %v7670_v17  ;;  %12675 = vst [vmem:[#allocation710_spill] sm:$0xff] %v7677_v34  ;;  %v984_v17 = vld [vmem:[%s4728_s16 + $0x1788] sm:$0xff]  ;;  %v991_v34 = vld [vmem:[%s4728_s16 + $0x17c0] sm:$0xff]  ;;  %v7776_v10 = vmul.f32 %v4751_v19, %v985_v18  ;;  %v7779_v11 = vmul.f32 %v4751_v19, %v986_v20 }
 0x1ee   : > { %12676 = vst [vmem:[#allocation711_spill] sm:$0xff] %v7680_v33  ;;  %12677 = vst [vmem:[#allocation712_spill] sm:$0xff] %v7683_v28  ;;  %v989_v28 = vld [vmem:[%s4728_s16 + $0x17b0] sm:$0xff]  ;;  %v990_v33 = vld [vmem:[%s4728_s16 + $0x17b8] sm:$0xff]  ;;  %v7773_v9 = vmul.f32 %v4751_v19, %v984_v17  ;;  %v7798_v21 = vmul.f32 %v4751_v19, %v991_v34 }
 0x1ef   : > { %12678 = vst [vmem:[#allocation713_spill] sm:$0xff] %v7686_v27  ;;  %12679 = vst [vmem:[#allocation714_spill] sm:$0xff] %v7693_v25  ;;  %v988_v27 = vld [vmem:[%s4728_s16 + $0x17a8] sm:$0xff]  ;;  %v995_v25 = vld [vmem:[%s4728_s16 + $0x17e0] sm:$0xff]  ;;  %v7792_v18 = vmul.f32 %v4751_v19, %v989_v28  ;;  %v7795_v20 = vmul.f32 %v4751_v19, %v990_v33 }
 0x1f0   : > { %12680 = vst [vmem:[#allocation715_spill] sm:$0xff] %v7696_v26  ;;  %12681 = vst [vmem:[#allocation716_spill] sm:$0xff] %v7699_v44  ;;  %v993_v44 = vld [vmem:[%s4728_s16 + $0x17d0] sm:$0xff]  ;;  %v994_v26 = vld [vmem:[%s4728_s16 + $0x17d8] sm:$0xff]  ;;  %v7789_v17 = vmul.f32 %v4751_v19, %v988_v27  ;;  %v7814_v34 = vmul.f32 %v4751_v19, %v995_v25 }
 0x1f1   : > { %12682 = vst [vmem:[#allocation717_spill] sm:$0xff] %v7702_v43  ;;  %12683 = vst [vmem:[#allocation718_spill] sm:$0xff] %v7709_v35  ;;  %v992_v43 = vld [vmem:[%s4728_s16 + $0x17c8] sm:$0xff]  ;;  %v999_v35 = vld [vmem:[%s4728_s16 + $0x1800] sm:$0xff]  ;;  %v7808_v28 = vmul.f32 %v4751_v19, %v993_v44  ;;  %v7811_v33 = vmul.f32 %v4751_v19, %v994_v26 }
 0x1f2   : > { %12684 = vst [vmem:[#allocation719_spill] sm:$0xff] %v7712_v36  ;;  %12685 = vst [vmem:[#allocation720_spill] sm:$0xff] %v7715_v41  ;;  %v997_v41 = vld [vmem:[%s4728_s16 + $0x17f0] sm:$0xff]  ;;  %v998_v36 = vld [vmem:[%s4728_s16 + $0x17f8] sm:$0xff]  ;;  %v7805_v27 = vmul.f32 %v4751_v19, %v992_v43  ;;  %v7830_v25 = vmul.f32 %v4751_v19, %v999_v35 }
 0x1f3   : > { %12686 = vst [vmem:[#allocation721_spill] sm:$0xff] %v7718_v42  ;;  %12687 = vst [vmem:[#allocation722_spill] sm:$0xff] %v7725_v49  ;;  %v996_v42 = vld [vmem:[%s4728_s16 + $0x17e8] sm:$0xff]  ;;  %v1003_v49 = vld [vmem:[%s4728_s16 + $0x1820] sm:$0xff]  ;;  %v7824_v44 = vmul.f32 %v4751_v19, %v997_v41  ;;  %v7827_v26 = vmul.f32 %v4751_v19, %v998_v36 }
 0x1f4   : > { %12688 = vst [vmem:[#allocation723_spill] sm:$0xff] %v7728_v50  ;;  %12689 = vst [vmem:[#allocation724_spill] sm:$0xff] %v7731_v51  ;;  %v1001_v51 = vld [vmem:[%s4728_s16 + $0x1810] sm:$0xff]  ;;  %v1002_v50 = vld [vmem:[%s4728_s16 + $0x1818] sm:$0xff]  ;;  %v7821_v43 = vmul.f32 %v4751_v19, %v996_v42  ;;  %v7846_v35 = vmul.f32 %v4751_v19, %v1003_v49 }
 0x1f5   : > { %12690 = vst [vmem:[#allocation725_spill] sm:$0xff] %v7734_v52  ;;  %12691 = vst [vmem:[#allocation726_spill] sm:$0xff] %v7741_v57  ;;  %v1000_v52 = vld [vmem:[%s4728_s16 + $0x1808] sm:$0xff]  ;;  %v1007_v57 = vld [vmem:[%s4728_s16 + $0x1840] sm:$0xff]  ;;  %v7840_v41 = vmul.f32 %v4751_v19, %v1001_v51  ;;  %v7843_v36 = vmul.f32 %v4751_v19, %v1002_v50 }
 0x1f6   : > { %12692 = vst [vmem:[#allocation727_spill] sm:$0xff] %v7744_v58  ;;  %12693 = vst [vmem:[#allocation728_spill] sm:$0xff] %v7747_v59  ;;  %v1005_v59 = vld [vmem:[%s4728_s16 + $0x1830] sm:$0xff]  ;;  %v1006_v58 = vld [vmem:[%s4728_s16 + $0x1838] sm:$0xff]  ;;  %v7837_v42 = vmul.f32 %v4751_v19, %v1000_v52  ;;  %v7862_v49 = vmul.f32 %v4751_v19, %v1007_v57 }
 0x1f7   : > { %12694 = vst [vmem:[#allocation729_spill] sm:$0xff] %v7750_v60  ;;  %12695 = vst [vmem:[#allocation730_spill] sm:$0xff] %v7757_v1  ;;  %v1004_v60 = vld [vmem:[%s4728_s16 + $0x1828] sm:$0xff]  ;;  %v1011_v1 = vld [vmem:[%s4728_s16 + $0x1860] sm:$0xff]  ;;  %v7856_v51 = vmul.f32 %v4751_v19, %v1005_v59  ;;  %v7859_v50 = vmul.f32 %v4751_v19, %v1006_v58 }
 0x1f8   : > { %12696 = vst [vmem:[#allocation731_spill] sm:$0xff] %v7760_v2  ;;  %12697 = vst [vmem:[#allocation732_spill] sm:$0xff] %v7763_v3  ;;  %v1009_v3 = vld [vmem:[%s4728_s16 + $0x1850] sm:$0xff]  ;;  %v1010_v2 = vld [vmem:[%s4728_s16 + $0x1858] sm:$0xff]  ;;  %v7853_v52 = vmul.f32 %v4751_v19, %v1004_v60  ;;  %v7878_v57 = vmul.f32 %v4751_v19, %v1011_v1 }
 0x1f9   : > { %12698 = vst [vmem:[#allocation733_spill] sm:$0xff] %v7766_v4  ;;  %12699 = vst [vmem:[#allocation734_spill] sm:$0xff] %v7773_v9  ;;  %v1008_v4 = vld [vmem:[%s4728_s16 + $0x1848] sm:$0xff]  ;;  %v1015_v9 = vld [vmem:[%s4728_s16 + $0x1880] sm:$0xff]  ;;  %v7872_v59 = vmul.f32 %v4751_v19, %v1009_v3  ;;  %v7875_v58 = vmul.f32 %v4751_v19, %v1010_v2 }
 0x1fa   : > { %12700 = vst [vmem:[#allocation735_spill] sm:$0xff] %v7776_v10  ;;  %12701 = vst [vmem:[#allocation736_spill] sm:$0xff] %v7779_v11  ;;  %v1013_v11 = vld [vmem:[%s4728_s16 + $0x1870] sm:$0xff]  ;;  %v1014_v10 = vld [vmem:[%s4728_s16 + $0x1878] sm:$0xff]  ;;  %v7869_v60 = vmul.f32 %v4751_v19, %v1008_v4  ;;  %v7894_v1 = vmul.f32 %v4751_v19, %v1015_v9 }
 0x1fb   : > { %12702 = vst [vmem:[#allocation737_spill] sm:$0xff] %v7782_v12  ;;  %12703 = vst [vmem:[#allocation738_spill] sm:$0xff] %v7789_v17  ;;  %v1012_v12 = vld [vmem:[%s4728_s16 + $0x1868] sm:$0xff]  ;;  %v1019_v17 = vld [vmem:[%s4728_s16 + $0x18a0] sm:$0xff]  ;;  %v7888_v3 = vmul.f32 %v4751_v19, %v1013_v11  ;;  %v7891_v2 = vmul.f32 %v4751_v19, %v1014_v10 }
 0x1fc   : > { %12704 = vst [vmem:[#allocation739_spill] sm:$0xff] %v7792_v18  ;;  %12705 = vst [vmem:[#allocation740_spill] sm:$0xff] %v7795_v20  ;;  %v1017_v20 = vld [vmem:[%s4728_s16 + $0x1890] sm:$0xff]  ;;  %v1018_v18 = vld [vmem:[%s4728_s16 + $0x1898] sm:$0xff]  ;;  %v7885_v4 = vmul.f32 %v4751_v19, %v1012_v12  ;;  %v7910_v9 = vmul.f32 %v4751_v19, %v1019_v17 }
 0x1fd   : > { %12706 = vst [vmem:[#allocation741_spill] sm:$0xff] %v7798_v21  ;;  %12707 = vst [vmem:[#allocation742_spill] sm:$0xff] %v7805_v27  ;;  %v1016_v21 = vld [vmem:[%s4728_s16 + $0x1888] sm:$0xff]  ;;  %v1023_v27 = vld [vmem:[%s4728_s16 + $0x18c0] sm:$0xff]  ;;  %v7904_v11 = vmul.f32 %v4751_v19, %v1017_v20  ;;  %v7907_v10 = vmul.f32 %v4751_v19, %v1018_v18 }
 0x1fe   : > { %12708 = vst [vmem:[#allocation743_spill] sm:$0xff] %v7808_v28  ;;  %12709 = vst [vmem:[#allocation744_spill] sm:$0xff] %v7811_v33  ;;  %v1021_v33 = vld [vmem:[%s4728_s16 + $0x18b0] sm:$0xff]  ;;  %v1022_v28 = vld [vmem:[%s4728_s16 + $0x18b8] sm:$0xff]  ;;  %v7901_v12 = vmul.f32 %v4751_v19, %v1016_v21  ;;  %v7926_v17 = vmul.f32 %v4751_v19, %v1023_v27 }
 0x1ff   : > { %12710 = vst [vmem:[#allocation745_spill] sm:$0xff] %v7814_v34  ;;  %12711 = vst [vmem:[#allocation746_spill] sm:$0xff] %v7821_v43  ;;  %v1020_v34 = vld [vmem:[%s4728_s16 + $0x18a8] sm:$0xff]  ;;  %v1027_v43 = vld [vmem:[%s4728_s16 + $0x18e0] sm:$0xff]  ;;  %v7920_v20 = vmul.f32 %v4751_v19, %v1021_v33  ;;  %v7923_v18 = vmul.f32 %v4751_v19, %v1022_v28 }
 0x200   : > { %12712 = vst [vmem:[#allocation747_spill] sm:$0xff] %v7824_v44  ;;  %12713 = vst [vmem:[#allocation748_spill] sm:$0xff] %v7827_v26  ;;  %v1025_v26 = vld [vmem:[%s4728_s16 + $0x18d0] sm:$0xff]  ;;  %v1026_v44 = vld [vmem:[%s4728_s16 + $0x18d8] sm:$0xff]  ;;  %v7917_v21 = vmul.f32 %v4751_v19, %v1020_v34  ;;  %v7942_v27 = vmul.f32 %v4751_v19, %v1027_v43 }
 0x201   : > { %12714 = vst [vmem:[#allocation749_spill] sm:$0xff] %v7830_v25  ;;  %12715 = vst [vmem:[#allocation750_spill] sm:$0xff] %v7837_v42  ;;  %v1024_v25 = vld [vmem:[%s4728_s16 + $0x18c8] sm:$0xff]  ;;  %v1031_v42 = vld [vmem:[%s4728_s16 + $0x1900] sm:$0xff]  ;;  %v7936_v33 = vmul.f32 %v4751_v19, %v1025_v26  ;;  %v7939_v28 = vmul.f32 %v4751_v19, %v1026_v44 }
 0x202   : > { %12716 = vst [vmem:[#allocation751_spill] sm:$0xff] %v7840_v41  ;;  %12717 = vst [vmem:[#allocation752_spill] sm:$0xff] %v7843_v36  ;;  %v1029_v36 = vld [vmem:[%s4728_s16 + $0x18f0] sm:$0xff]  ;;  %v1030_v41 = vld [vmem:[%s4728_s16 + $0x18f8] sm:$0xff]  ;;  %v7933_v34 = vmul.f32 %v4751_v19, %v1024_v25  ;;  %v7958_v43 = vmul.f32 %v4751_v19, %v1031_v42 }
 0x203   : > { %12718 = vst [vmem:[#allocation753_spill] sm:$0xff] %v7846_v35  ;;  %12719 = vst [vmem:[#allocation754_spill] sm:$0xff] %v7853_v52  ;;  %v1028_v35 = vld [vmem:[%s4728_s16 + $0x18e8] sm:$0xff]  ;;  %v1035_v52 = vld [vmem:[%s4728_s16 + $0x1920] sm:$0xff]  ;;  %v7952_v26 = vmul.f32 %v4751_v19, %v1029_v36  ;;  %v7955_v44 = vmul.f32 %v4751_v19, %v1030_v41 }
 0x204   : > { %12720 = vst [vmem:[#allocation755_spill] sm:$0xff] %v7856_v51  ;;  %12721 = vst [vmem:[#allocation756_spill] sm:$0xff] %v7859_v50  ;;  %v1033_v50 = vld [vmem:[%s4728_s16 + $0x1910] sm:$0xff]  ;;  %v1034_v51 = vld [vmem:[%s4728_s16 + $0x1918] sm:$0xff]  ;;  %v7949_v25 = vmul.f32 %v4751_v19, %v1028_v35  ;;  %v7974_v42 = vmul.f32 %v4751_v19, %v1035_v52 }
 0x205   : > { %12722 = vst [vmem:[#allocation757_spill] sm:$0xff] %v7862_v49  ;;  %12723 = vst [vmem:[#allocation758_spill] sm:$0xff] %v7869_v60  ;;  %v1032_v49 = vld [vmem:[%s4728_s16 + $0x1908] sm:$0xff]  ;;  %v1039_v60 = vld [vmem:[%s4728_s16 + $0x1940] sm:$0xff]  ;;  %v7968_v36 = vmul.f32 %v4751_v19, %v1033_v50  ;;  %v7971_v41 = vmul.f32 %v4751_v19, %v1034_v51 }
 0x206   : > { %12724 = vst [vmem:[#allocation759_spill] sm:$0xff] %v7872_v59  ;;  %12725 = vst [vmem:[#allocation760_spill] sm:$0xff] %v7875_v58  ;;  %v1037_v58 = vld [vmem:[%s4728_s16 + $0x1930] sm:$0xff]  ;;  %v1038_v59 = vld [vmem:[%s4728_s16 + $0x1938] sm:$0xff]  ;;  %v7965_v35 = vmul.f32 %v4751_v19, %v1032_v49  ;;  %v7990_v52 = vmul.f32 %v4751_v19, %v1039_v60 }
 0x207   : > { %12726 = vst [vmem:[#allocation761_spill] sm:$0xff] %v7878_v57  ;;  %12727 = vst [vmem:[#allocation762_spill] sm:$0xff] %v7885_v4  ;;  %v1036_v57 = vld [vmem:[%s4728_s16 + $0x1928] sm:$0xff]  ;;  %v1043_v4 = vld [vmem:[%s4728_s16 + $0x1960] sm:$0xff]  ;;  %v7984_v50 = vmul.f32 %v4751_v19, %v1037_v58  ;;  %v7987_v51 = vmul.f32 %v4751_v19, %v1038_v59 }
 0x208   : > { %12728 = vst [vmem:[#allocation763_spill] sm:$0xff] %v7888_v3  ;;  %12729 = vst [vmem:[#allocation764_spill] sm:$0xff] %v7891_v2  ;;  %v1041_v2 = vld [vmem:[%s4728_s16 + $0x1950] sm:$0xff]  ;;  %v1042_v3 = vld [vmem:[%s4728_s16 + $0x1958] sm:$0xff]  ;;  %v7981_v49 = vmul.f32 %v4751_v19, %v1036_v57  ;;  %v8006_v60 = vmul.f32 %v4751_v19, %v1043_v4 }
 0x209   : > { %12730 = vst [vmem:[#allocation765_spill] sm:$0xff] %v7894_v1  ;;  %12731 = vst [vmem:[#allocation766_spill] sm:$0xff] %v7901_v12  ;;  %v1040_v1 = vld [vmem:[%s4728_s16 + $0x1948] sm:$0xff]  ;;  %v1047_v12 = vld [vmem:[%s4728_s16 + $0x1980] sm:$0xff]  ;;  %v8000_v58 = vmul.f32 %v4751_v19, %v1041_v2  ;;  %v8003_v59 = vmul.f32 %v4751_v19, %v1042_v3 }
 0x20a   : > { %12732 = vst [vmem:[#allocation767_spill] sm:$0xff] %v7904_v11  ;;  %12733 = vst [vmem:[#allocation768_spill] sm:$0xff] %v7907_v10  ;;  %v1045_v10 = vld [vmem:[%s4728_s16 + $0x1970] sm:$0xff]  ;;  %v1046_v11 = vld [vmem:[%s4728_s16 + $0x1978] sm:$0xff]  ;;  %v7997_v57 = vmul.f32 %v4751_v19, %v1040_v1  ;;  %v8022_v4 = vmul.f32 %v4751_v19, %v1047_v12 }
 0x20b   : > { %12734 = vst [vmem:[#allocation769_spill] sm:$0xff] %v7910_v9  ;;  %12735 = vst [vmem:[#allocation770_spill] sm:$0xff] %v7917_v21  ;;  %v1044_v9 = vld [vmem:[%s4728_s16 + $0x1968] sm:$0xff]  ;;  %v1051_v21 = vld [vmem:[%s4728_s16 + $0x19a0] sm:$0xff]  ;;  %v8016_v2 = vmul.f32 %v4751_v19, %v1045_v10  ;;  %v8019_v3 = vmul.f32 %v4751_v19, %v1046_v11 }
 0x20c   : > { %12736 = vst [vmem:[#allocation771_spill] sm:$0xff] %v7920_v20  ;;  %12737 = vst [vmem:[#allocation772_spill] sm:$0xff] %v7923_v18  ;;  %v1049_v18 = vld [vmem:[%s4728_s16 + $0x1990] sm:$0xff]  ;;  %v1050_v20 = vld [vmem:[%s4728_s16 + $0x1998] sm:$0xff]  ;;  %v8013_v1 = vmul.f32 %v4751_v19, %v1044_v9  ;;  %v8038_v12 = vmul.f32 %v4751_v19, %v1051_v21 }
 0x20d   : > { %12738 = vst [vmem:[#allocation773_spill] sm:$0xff] %v7926_v17  ;;  %12739 = vst [vmem:[#allocation774_spill] sm:$0xff] %v7933_v34  ;;  %v1048_v17 = vld [vmem:[%s4728_s16 + $0x1988] sm:$0xff]  ;;  %v1055_v34 = vld [vmem:[%s4728_s16 + $0x19c0] sm:$0xff]  ;;  %v8032_v10 = vmul.f32 %v4751_v19, %v1049_v18  ;;  %v8035_v11 = vmul.f32 %v4751_v19, %v1050_v20 }
 0x20e   : > { %12740 = vst [vmem:[#allocation775_spill] sm:$0xff] %v7936_v33  ;;  %12741 = vst [vmem:[#allocation776_spill] sm:$0xff] %v7939_v28  ;;  %v1053_v28 = vld [vmem:[%s4728_s16 + $0x19b0] sm:$0xff]  ;;  %v1054_v33 = vld [vmem:[%s4728_s16 + $0x19b8] sm:$0xff]  ;;  %v8029_v9 = vmul.f32 %v4751_v19, %v1048_v17  ;;  %v8054_v21 = vmul.f32 %v4751_v19, %v1055_v34 }
 0x20f   : > { %12742 = vst [vmem:[#allocation777_spill] sm:$0xff] %v7942_v27  ;;  %12743 = vst [vmem:[#allocation778_spill] sm:$0xff] %v7949_v25  ;;  %v1052_v27 = vld [vmem:[%s4728_s16 + $0x19a8] sm:$0xff]  ;;  %v1059_v25 = vld [vmem:[%s4728_s16 + $0x19e0] sm:$0xff]  ;;  %v8048_v18 = vmul.f32 %v4751_v19, %v1053_v28  ;;  %v8051_v20 = vmul.f32 %v4751_v19, %v1054_v33 }
 0x210   : > { %12744 = vst [vmem:[#allocation779_spill] sm:$0xff] %v7952_v26  ;;  %12745 = vst [vmem:[#allocation780_spill] sm:$0xff] %v7955_v44  ;;  %v1057_v44 = vld [vmem:[%s4728_s16 + $0x19d0] sm:$0xff]  ;;  %v1058_v26 = vld [vmem:[%s4728_s16 + $0x19d8] sm:$0xff]  ;;  %v8045_v17 = vmul.f32 %v4751_v19, %v1052_v27  ;;  %v8070_v34 = vmul.f32 %v4751_v19, %v1059_v25 }
 0x211   : > { %12746 = vst [vmem:[#allocation781_spill] sm:$0xff] %v7958_v43  ;;  %12747 = vst [vmem:[#allocation782_spill] sm:$0xff] %v7965_v35  ;;  %v1056_v43 = vld [vmem:[%s4728_s16 + $0x19c8] sm:$0xff]  ;;  %v1063_v35 = vld [vmem:[%s4728_s16 + $0x1a00] sm:$0xff]  ;;  %v8064_v28 = vmul.f32 %v4751_v19, %v1057_v44  ;;  %v8067_v33 = vmul.f32 %v4751_v19, %v1058_v26 }
 0x212   : > { %12748 = vst [vmem:[#allocation783_spill] sm:$0xff] %v7968_v36  ;;  %12749 = vst [vmem:[#allocation784_spill] sm:$0xff] %v7971_v41  ;;  %v1061_v41 = vld [vmem:[%s4728_s16 + $0x19f0] sm:$0xff]  ;;  %v1062_v36 = vld [vmem:[%s4728_s16 + $0x19f8] sm:$0xff]  ;;  %v8061_v27 = vmul.f32 %v4751_v19, %v1056_v43  ;;  %v8086_v25 = vmul.f32 %v4751_v19, %v1063_v35 }
 0x213   : > { %12750 = vst [vmem:[#allocation785_spill] sm:$0xff] %v7974_v42  ;;  %12751 = vst [vmem:[#allocation786_spill] sm:$0xff] %v7981_v49  ;;  %v1060_v42 = vld [vmem:[%s4728_s16 + $0x19e8] sm:$0xff]  ;;  %v1067_v49 = vld [vmem:[%s4728_s16 + $0x1a20] sm:$0xff]  ;;  %v8080_v44 = vmul.f32 %v4751_v19, %v1061_v41  ;;  %v8083_v26 = vmul.f32 %v4751_v19, %v1062_v36 }
 0x214   : > { %12752 = vst [vmem:[#allocation787_spill] sm:$0xff] %v7984_v50  ;;  %12753 = vst [vmem:[#allocation788_spill] sm:$0xff] %v7987_v51  ;;  %v1065_v51 = vld [vmem:[%s4728_s16 + $0x1a10] sm:$0xff]  ;;  %v1066_v50 = vld [vmem:[%s4728_s16 + $0x1a18] sm:$0xff]  ;;  %v8077_v43 = vmul.f32 %v4751_v19, %v1060_v42  ;;  %v8102_v35 = vmul.f32 %v4751_v19, %v1067_v49 }
 0x215   : > { %12754 = vst [vmem:[#allocation789_spill] sm:$0xff] %v7990_v52  ;;  %12755 = vst [vmem:[#allocation790_spill] sm:$0xff] %v7997_v57  ;;  %v1064_v52 = vld [vmem:[%s4728_s16 + $0x1a08] sm:$0xff]  ;;  %v1071_v57 = vld [vmem:[%s4728_s16 + $0x1a40] sm:$0xff]  ;;  %v8096_v41 = vmul.f32 %v4751_v19, %v1065_v51  ;;  %v8099_v36 = vmul.f32 %v4751_v19, %v1066_v50 }
 0x216   : > { %12756 = vst [vmem:[#allocation791_spill] sm:$0xff] %v8000_v58  ;;  %12757 = vst [vmem:[#allocation792_spill] sm:$0xff] %v8003_v59  ;;  %v1069_v59 = vld [vmem:[%s4728_s16 + $0x1a30] sm:$0xff]  ;;  %v1070_v58 = vld [vmem:[%s4728_s16 + $0x1a38] sm:$0xff]  ;;  %v8093_v42 = vmul.f32 %v4751_v19, %v1064_v52  ;;  %v8118_v49 = vmul.f32 %v4751_v19, %v1071_v57 }
 0x217   : > { %12758 = vst [vmem:[#allocation793_spill] sm:$0xff] %v8006_v60  ;;  %12759 = vst [vmem:[#allocation794_spill] sm:$0xff] %v8013_v1  ;;  %v1068_v60 = vld [vmem:[%s4728_s16 + $0x1a28] sm:$0xff]  ;;  %v1075_v1 = vld [vmem:[%s4728_s16 + $0x1a60] sm:$0xff]  ;;  %v8112_v51 = vmul.f32 %v4751_v19, %v1069_v59  ;;  %v8115_v50 = vmul.f32 %v4751_v19, %v1070_v58 }
 0x218   : > { %12760 = vst [vmem:[#allocation795_spill] sm:$0xff] %v8016_v2  ;;  %12761 = vst [vmem:[#allocation796_spill] sm:$0xff] %v8019_v3  ;;  %v1073_v3 = vld [vmem:[%s4728_s16 + $0x1a50] sm:$0xff]  ;;  %v1074_v2 = vld [vmem:[%s4728_s16 + $0x1a58] sm:$0xff]  ;;  %v8109_v52 = vmul.f32 %v4751_v19, %v1068_v60  ;;  %v8134_v57 = vmul.f32 %v4751_v19, %v1075_v1 }
 0x219   : > { %12762 = vst [vmem:[#allocation797_spill] sm:$0xff] %v8022_v4  ;;  %12763 = vst [vmem:[#allocation798_spill] sm:$0xff] %v8029_v9  ;;  %v1072_v4 = vld [vmem:[%s4728_s16 + $0x1a48] sm:$0xff]  ;;  %v1079_v9 = vld [vmem:[%s4728_s16 + $0x1a80] sm:$0xff]  ;;  %v8128_v59 = vmul.f32 %v4751_v19, %v1073_v3  ;;  %v8131_v58 = vmul.f32 %v4751_v19, %v1074_v2 }
 0x21a   : > { %12764 = vst [vmem:[#allocation799_spill] sm:$0xff] %v8032_v10  ;;  %12765 = vst [vmem:[#allocation800_spill] sm:$0xff] %v8035_v11  ;;  %v1077_v11 = vld [vmem:[%s4728_s16 + $0x1a70] sm:$0xff]  ;;  %v1078_v10 = vld [vmem:[%s4728_s16 + $0x1a78] sm:$0xff]  ;;  %v8125_v60 = vmul.f32 %v4751_v19, %v1072_v4  ;;  %v8150_v1 = vmul.f32 %v4751_v19, %v1079_v9 }
 0x21b   : > { %12766 = vst [vmem:[#allocation801_spill] sm:$0xff] %v8038_v12  ;;  %12767 = vst [vmem:[#allocation802_spill] sm:$0xff] %v8045_v17  ;;  %v1076_v12 = vld [vmem:[%s4728_s16 + $0x1a68] sm:$0xff]  ;;  %v1083_v17 = vld [vmem:[%s4728_s16 + $0x1aa0] sm:$0xff]  ;;  %v8144_v3 = vmul.f32 %v4751_v19, %v1077_v11  ;;  %v8147_v2 = vmul.f32 %v4751_v19, %v1078_v10 }
 0x21c   : > { %12768 = vst [vmem:[#allocation803_spill] sm:$0xff] %v8048_v18  ;;  %12769 = vst [vmem:[#allocation804_spill] sm:$0xff] %v8051_v20  ;;  %v1081_v20 = vld [vmem:[%s4728_s16 + $0x1a90] sm:$0xff]  ;;  %v1082_v18 = vld [vmem:[%s4728_s16 + $0x1a98] sm:$0xff]  ;;  %v8141_v4 = vmul.f32 %v4751_v19, %v1076_v12  ;;  %v8166_v9 = vmul.f32 %v4751_v19, %v1083_v17 }
 0x21d   : > { %12770 = vst [vmem:[#allocation805_spill] sm:$0xff] %v8054_v21  ;;  %12771 = vst [vmem:[#allocation806_spill] sm:$0xff] %v8061_v27  ;;  %v1080_v21 = vld [vmem:[%s4728_s16 + $0x1a88] sm:$0xff]  ;;  %v1087_v27 = vld [vmem:[%s4728_s16 + $0x1ac0] sm:$0xff]  ;;  %v8160_v11 = vmul.f32 %v4751_v19, %v1081_v20  ;;  %v8163_v10 = vmul.f32 %v4751_v19, %v1082_v18 }
 0x21e   : > { %12772 = vst [vmem:[#allocation807_spill] sm:$0xff] %v8064_v28  ;;  %12773 = vst [vmem:[#allocation808_spill] sm:$0xff] %v8067_v33  ;;  %v1085_v33 = vld [vmem:[%s4728_s16 + $0x1ab0] sm:$0xff]  ;;  %v1086_v28 = vld [vmem:[%s4728_s16 + $0x1ab8] sm:$0xff]  ;;  %v8157_v12 = vmul.f32 %v4751_v19, %v1080_v21  ;;  %v8182_v17 = vmul.f32 %v4751_v19, %v1087_v27 }
 0x21f   : > { %12774 = vst [vmem:[#allocation809_spill] sm:$0xff] %v8070_v34  ;;  %12775 = vst [vmem:[#allocation810_spill] sm:$0xff] %v8077_v43  ;;  %v1084_v34 = vld [vmem:[%s4728_s16 + $0x1aa8] sm:$0xff]  ;;  %v1091_v43 = vld [vmem:[%s4728_s16 + $0x1ae0] sm:$0xff]  ;;  %v8176_v20 = vmul.f32 %v4751_v19, %v1085_v33  ;;  %v8179_v18 = vmul.f32 %v4751_v19, %v1086_v28 }
 0x220   : > { %12776 = vst [vmem:[#allocation811_spill] sm:$0xff] %v8080_v44  ;;  %12777 = vst [vmem:[#allocation812_spill] sm:$0xff] %v8083_v26  ;;  %v1089_v26 = vld [vmem:[%s4728_s16 + $0x1ad0] sm:$0xff]  ;;  %v1090_v44 = vld [vmem:[%s4728_s16 + $0x1ad8] sm:$0xff]  ;;  %v8173_v21 = vmul.f32 %v4751_v19, %v1084_v34  ;;  %v8198_v27 = vmul.f32 %v4751_v19, %v1091_v43 }
 0x221   : > { %12778 = vst [vmem:[#allocation813_spill] sm:$0xff] %v8086_v25  ;;  %12779 = vst [vmem:[#allocation814_spill] sm:$0xff] %v8093_v42  ;;  %v1088_v25 = vld [vmem:[%s4728_s16 + $0x1ac8] sm:$0xff]  ;;  %v1095_v42 = vld [vmem:[%s4728_s16 + $0x1b00] sm:$0xff]  ;;  %v8192_v33 = vmul.f32 %v4751_v19, %v1089_v26  ;;  %v8195_v28 = vmul.f32 %v4751_v19, %v1090_v44 }
 0x222   : > { %12780 = vst [vmem:[#allocation815_spill] sm:$0xff] %v8096_v41  ;;  %12781 = vst [vmem:[#allocation816_spill] sm:$0xff] %v8099_v36  ;;  %v1093_v36 = vld [vmem:[%s4728_s16 + $0x1af0] sm:$0xff]  ;;  %v1094_v41 = vld [vmem:[%s4728_s16 + $0x1af8] sm:$0xff]  ;;  %v8189_v34 = vmul.f32 %v4751_v19, %v1088_v25  ;;  %v8214_v43 = vmul.f32 %v4751_v19, %v1095_v42 }
 0x223   : > { %12782 = vst [vmem:[#allocation817_spill] sm:$0xff] %v8102_v35  ;;  %12783 = vst [vmem:[#allocation818_spill] sm:$0xff] %v8109_v52  ;;  %v1092_v35 = vld [vmem:[%s4728_s16 + $0x1ae8] sm:$0xff]  ;;  %v1099_v52 = vld [vmem:[%s4728_s16 + $0x1b20] sm:$0xff]  ;;  %v8208_v26 = vmul.f32 %v4751_v19, %v1093_v36  ;;  %v8211_v44 = vmul.f32 %v4751_v19, %v1094_v41 }
 0x224   : > { %12784 = vst [vmem:[#allocation819_spill] sm:$0xff] %v8112_v51  ;;  %12785 = vst [vmem:[#allocation820_spill] sm:$0xff] %v8115_v50  ;;  %v1097_v50 = vld [vmem:[%s4728_s16 + $0x1b10] sm:$0xff]  ;;  %v1098_v51 = vld [vmem:[%s4728_s16 + $0x1b18] sm:$0xff]  ;;  %v8205_v25 = vmul.f32 %v4751_v19, %v1092_v35  ;;  %v8230_v42 = vmul.f32 %v4751_v19, %v1099_v52 }
 0x225   : > { %12786 = vst [vmem:[#allocation821_spill] sm:$0xff] %v8118_v49  ;;  %12787 = vst [vmem:[#allocation822_spill] sm:$0xff] %v8125_v60  ;;  %v1096_v49 = vld [vmem:[%s4728_s16 + $0x1b08] sm:$0xff]  ;;  %v1103_v60 = vld [vmem:[%s4728_s16 + $0x1b40] sm:$0xff]  ;;  %v8224_v36 = vmul.f32 %v4751_v19, %v1097_v50  ;;  %v8227_v41 = vmul.f32 %v4751_v19, %v1098_v51 }
 0x226   : > { %12788 = vst [vmem:[#allocation823_spill] sm:$0xff] %v8128_v59  ;;  %12789 = vst [vmem:[#allocation824_spill] sm:$0xff] %v8131_v58  ;;  %v1101_v58 = vld [vmem:[%s4728_s16 + $0x1b30] sm:$0xff]  ;;  %v1102_v59 = vld [vmem:[%s4728_s16 + $0x1b38] sm:$0xff]  ;;  %v8221_v35 = vmul.f32 %v4751_v19, %v1096_v49  ;;  %v8246_v52 = vmul.f32 %v4751_v19, %v1103_v60 }
 0x227   : > { %12790 = vst [vmem:[#allocation825_spill] sm:$0xff] %v8134_v57  ;;  %12791 = vst [vmem:[#allocation826_spill] sm:$0xff] %v8141_v4  ;;  %v1100_v57 = vld [vmem:[%s4728_s16 + $0x1b28] sm:$0xff]  ;;  %v1107_v4 = vld [vmem:[%s4728_s16 + $0x1b60] sm:$0xff]  ;;  %v8240_v50 = vmul.f32 %v4751_v19, %v1101_v58  ;;  %v8243_v51 = vmul.f32 %v4751_v19, %v1102_v59 }
 0x228   : > { %12792 = vst [vmem:[#allocation827_spill] sm:$0xff] %v8144_v3  ;;  %12793 = vst [vmem:[#allocation828_spill] sm:$0xff] %v8147_v2  ;;  %v1105_v2 = vld [vmem:[%s4728_s16 + $0x1b50] sm:$0xff]  ;;  %v1106_v3 = vld [vmem:[%s4728_s16 + $0x1b58] sm:$0xff]  ;;  %v8237_v49 = vmul.f32 %v4751_v19, %v1100_v57  ;;  %v8262_v60 = vmul.f32 %v4751_v19, %v1107_v4 }
 0x229   : > { %12794 = vst [vmem:[#allocation829_spill] sm:$0xff] %v8150_v1  ;;  %12795 = vst [vmem:[#allocation830_spill] sm:$0xff] %v8157_v12  ;;  %v1104_v1 = vld [vmem:[%s4728_s16 + $0x1b48] sm:$0xff]  ;;  %v1111_v12 = vld [vmem:[%s4728_s16 + $0x1b80] sm:$0xff]  ;;  %v8256_v58 = vmul.f32 %v4751_v19, %v1105_v2  ;;  %v8259_v59 = vmul.f32 %v4751_v19, %v1106_v3 }
 0x22a   : > { %12796 = vst [vmem:[#allocation831_spill] sm:$0xff] %v8160_v11  ;;  %12797 = vst [vmem:[#allocation832_spill] sm:$0xff] %v8163_v10  ;;  %v1109_v10 = vld [vmem:[%s4728_s16 + $0x1b70] sm:$0xff]  ;;  %v1110_v11 = vld [vmem:[%s4728_s16 + $0x1b78] sm:$0xff]  ;;  %v8253_v57 = vmul.f32 %v4751_v19, %v1104_v1  ;;  %v8278_v4 = vmul.f32 %v4751_v19, %v1111_v12 }
 0x22b   : > { %12798 = vst [vmem:[#allocation833_spill] sm:$0xff] %v8166_v9  ;;  %12799 = vst [vmem:[#allocation834_spill] sm:$0xff] %v8173_v21  ;;  %v1108_v9 = vld [vmem:[%s4728_s16 + $0x1b68] sm:$0xff]  ;;  %v1115_v21 = vld [vmem:[%s4728_s16 + $0x1ba0] sm:$0xff]  ;;  %v8272_v2 = vmul.f32 %v4751_v19, %v1109_v10  ;;  %v8275_v3 = vmul.f32 %v4751_v19, %v1110_v11 }
 0x22c   : > { %12800 = vst [vmem:[#allocation835_spill] sm:$0xff] %v8176_v20  ;;  %12801 = vst [vmem:[#allocation836_spill] sm:$0xff] %v8179_v18  ;;  %v1113_v18 = vld [vmem:[%s4728_s16 + $0x1b90] sm:$0xff]  ;;  %v1114_v20 = vld [vmem:[%s4728_s16 + $0x1b98] sm:$0xff]  ;;  %v8269_v1 = vmul.f32 %v4751_v19, %v1108_v9  ;;  %v8294_v12 = vmul.f32 %v4751_v19, %v1115_v21 }
 0x22d   : > { %12802 = vst [vmem:[#allocation837_spill] sm:$0xff] %v8182_v17  ;;  %12803 = vst [vmem:[#allocation838_spill] sm:$0xff] %v8189_v34  ;;  %v1112_v17 = vld [vmem:[%s4728_s16 + $0x1b88] sm:$0xff]  ;;  %v1119_v34 = vld [vmem:[%s4728_s16 + $0x1bc0] sm:$0xff]  ;;  %v8288_v10 = vmul.f32 %v4751_v19, %v1113_v18  ;;  %v8291_v11 = vmul.f32 %v4751_v19, %v1114_v20 }
 0x22e   : > { %12804 = vst [vmem:[#allocation839_spill] sm:$0xff] %v8192_v33  ;;  %12805 = vst [vmem:[#allocation840_spill] sm:$0xff] %v8195_v28  ;;  %v1117_v28 = vld [vmem:[%s4728_s16 + $0x1bb0] sm:$0xff]  ;;  %v1118_v33 = vld [vmem:[%s4728_s16 + $0x1bb8] sm:$0xff]  ;;  %v8285_v9 = vmul.f32 %v4751_v19, %v1112_v17  ;;  %v8310_v21 = vmul.f32 %v4751_v19, %v1119_v34 }
 0x22f   : > { %12806 = vst [vmem:[#allocation841_spill] sm:$0xff] %v8198_v27  ;;  %12807 = vst [vmem:[#allocation842_spill] sm:$0xff] %v8205_v25  ;;  %v1116_v27 = vld [vmem:[%s4728_s16 + $0x1ba8] sm:$0xff]  ;;  %v1123_v25 = vld [vmem:[%s4728_s16 + $0x1be0] sm:$0xff]  ;;  %v8304_v18 = vmul.f32 %v4751_v19, %v1117_v28  ;;  %v8307_v20 = vmul.f32 %v4751_v19, %v1118_v33 }
 0x230   : > { %12808 = vst [vmem:[#allocation843_spill] sm:$0xff] %v8208_v26  ;;  %12809 = vst [vmem:[#allocation844_spill] sm:$0xff] %v8211_v44  ;;  %v1121_v44 = vld [vmem:[%s4728_s16 + $0x1bd0] sm:$0xff]  ;;  %v1122_v26 = vld [vmem:[%s4728_s16 + $0x1bd8] sm:$0xff]  ;;  %v8301_v17 = vmul.f32 %v4751_v19, %v1116_v27  ;;  %v8326_v34 = vmul.f32 %v4751_v19, %v1123_v25 }
 0x231   : > { %12810 = vst [vmem:[#allocation845_spill] sm:$0xff] %v8214_v43  ;;  %12811 = vst [vmem:[#allocation846_spill] sm:$0xff] %v8221_v35  ;;  %v1120_v43 = vld [vmem:[%s4728_s16 + $0x1bc8] sm:$0xff]  ;;  %v1127_v35 = vld [vmem:[%s4728_s16 + $0x1c00] sm:$0xff]  ;;  %v8320_v28 = vmul.f32 %v4751_v19, %v1121_v44  ;;  %v8323_v33 = vmul.f32 %v4751_v19, %v1122_v26 }
 0x232   : > { %12812 = vst [vmem:[#allocation847_spill] sm:$0xff] %v8224_v36  ;;  %12813 = vst [vmem:[#allocation848_spill] sm:$0xff] %v8227_v41  ;;  %v1125_v41 = vld [vmem:[%s4728_s16 + $0x1bf0] sm:$0xff]  ;;  %v1126_v36 = vld [vmem:[%s4728_s16 + $0x1bf8] sm:$0xff]  ;;  %v8317_v27 = vmul.f32 %v4751_v19, %v1120_v43  ;;  %v8342_v25 = vmul.f32 %v4751_v19, %v1127_v35 }
 0x233   : > { %12814 = vst [vmem:[#allocation849_spill] sm:$0xff] %v8230_v42  ;;  %12815 = vst [vmem:[#allocation850_spill] sm:$0xff] %v8237_v49  ;;  %v1124_v42 = vld [vmem:[%s4728_s16 + $0x1be8] sm:$0xff]  ;;  %v1131_v49 = vld [vmem:[%s4728_s16 + $0x1c20] sm:$0xff]  ;;  %v8336_v44 = vmul.f32 %v4751_v19, %v1125_v41  ;;  %v8339_v26 = vmul.f32 %v4751_v19, %v1126_v36 }
 0x234   : > { %12816 = vst [vmem:[#allocation851_spill] sm:$0xff] %v8240_v50  ;;  %12817 = vst [vmem:[#allocation852_spill] sm:$0xff] %v8243_v51  ;;  %v1129_v51 = vld [vmem:[%s4728_s16 + $0x1c10] sm:$0xff]  ;;  %v1130_v50 = vld [vmem:[%s4728_s16 + $0x1c18] sm:$0xff]  ;;  %v8333_v43 = vmul.f32 %v4751_v19, %v1124_v42  ;;  %v8358_v35 = vmul.f32 %v4751_v19, %v1131_v49 }
 0x235   : > { %12818 = vst [vmem:[#allocation853_spill] sm:$0xff] %v8246_v52  ;;  %12819 = vst [vmem:[#allocation854_spill] sm:$0xff] %v8253_v57  ;;  %v1128_v52 = vld [vmem:[%s4728_s16 + $0x1c08] sm:$0xff]  ;;  %v1135_v57 = vld [vmem:[%s4728_s16 + $0x1c40] sm:$0xff]  ;;  %v8352_v41 = vmul.f32 %v4751_v19, %v1129_v51  ;;  %v8355_v36 = vmul.f32 %v4751_v19, %v1130_v50 }
 0x236   : > { %12820 = vst [vmem:[#allocation855_spill] sm:$0xff] %v8256_v58  ;;  %12821 = vst [vmem:[#allocation856_spill] sm:$0xff] %v8259_v59  ;;  %v1133_v59 = vld [vmem:[%s4728_s16 + $0x1c30] sm:$0xff]  ;;  %v1134_v58 = vld [vmem:[%s4728_s16 + $0x1c38] sm:$0xff]  ;;  %v8349_v42 = vmul.f32 %v4751_v19, %v1128_v52  ;;  %v8374_v49 = vmul.f32 %v4751_v19, %v1135_v57 }
 0x237   : > { %12822 = vst [vmem:[#allocation857_spill] sm:$0xff] %v8262_v60  ;;  %12823 = vst [vmem:[#allocation858_spill] sm:$0xff] %v8269_v1  ;;  %v1132_v60 = vld [vmem:[%s4728_s16 + $0x1c28] sm:$0xff]  ;;  %v1139_v1 = vld [vmem:[%s4728_s16 + $0x1c60] sm:$0xff]  ;;  %v8368_v51 = vmul.f32 %v4751_v19, %v1133_v59  ;;  %v8371_v50 = vmul.f32 %v4751_v19, %v1134_v58 }
 0x238   : > { %12824 = vst [vmem:[#allocation859_spill] sm:$0xff] %v8272_v2  ;;  %12825 = vst [vmem:[#allocation860_spill] sm:$0xff] %v8275_v3  ;;  %v1137_v3 = vld [vmem:[%s4728_s16 + $0x1c50] sm:$0xff]  ;;  %v1138_v2 = vld [vmem:[%s4728_s16 + $0x1c58] sm:$0xff]  ;;  %v8365_v52 = vmul.f32 %v4751_v19, %v1132_v60  ;;  %v8390_v57 = vmul.f32 %v4751_v19, %v1139_v1 }
 0x239   : > { %12826 = vst [vmem:[#allocation861_spill] sm:$0xff] %v8278_v4  ;;  %12827 = vst [vmem:[#allocation862_spill] sm:$0xff] %v8285_v9  ;;  %v1136_v4 = vld [vmem:[%s4728_s16 + $0x1c48] sm:$0xff]  ;;  %v1143_v9 = vld [vmem:[%s4728_s16 + $0x1c80] sm:$0xff]  ;;  %v8384_v59 = vmul.f32 %v4751_v19, %v1137_v3  ;;  %v8387_v58 = vmul.f32 %v4751_v19, %v1138_v2 }
 0x23a   : > { %12828 = vst [vmem:[#allocation863_spill] sm:$0xff] %v8288_v10  ;;  %12829 = vst [vmem:[#allocation864_spill] sm:$0xff] %v8291_v11  ;;  %v1141_v11 = vld [vmem:[%s4728_s16 + $0x1c70] sm:$0xff]  ;;  %v1142_v10 = vld [vmem:[%s4728_s16 + $0x1c78] sm:$0xff]  ;;  %v8381_v60 = vmul.f32 %v4751_v19, %v1136_v4  ;;  %v8406_v1 = vmul.f32 %v4751_v19, %v1143_v9 }
 0x23b   : > { %12830 = vst [vmem:[#allocation865_spill] sm:$0xff] %v8294_v12  ;;  %12831 = vst [vmem:[#allocation866_spill] sm:$0xff] %v8301_v17  ;;  %v1140_v12 = vld [vmem:[%s4728_s16 + $0x1c68] sm:$0xff]  ;;  %v1147_v17 = vld [vmem:[%s4728_s16 + $0x1ca0] sm:$0xff]  ;;  %v8400_v3 = vmul.f32 %v4751_v19, %v1141_v11  ;;  %v8403_v2 = vmul.f32 %v4751_v19, %v1142_v10 }
 0x23c   : > { %12832 = vst [vmem:[#allocation867_spill] sm:$0xff] %v8304_v18  ;;  %12833 = vst [vmem:[#allocation868_spill] sm:$0xff] %v8307_v20  ;;  %v1145_v20 = vld [vmem:[%s4728_s16 + $0x1c90] sm:$0xff]  ;;  %v1146_v18 = vld [vmem:[%s4728_s16 + $0x1c98] sm:$0xff]  ;;  %v8397_v4 = vmul.f32 %v4751_v19, %v1140_v12  ;;  %v8422_v9 = vmul.f32 %v4751_v19, %v1147_v17 }
 0x23d   : > { %12834 = vst [vmem:[#allocation869_spill] sm:$0xff] %v8310_v21  ;;  %12835 = vst [vmem:[#allocation870_spill] sm:$0xff] %v8317_v27  ;;  %v1144_v21 = vld [vmem:[%s4728_s16 + $0x1c88] sm:$0xff]  ;;  %v1151_v27 = vld [vmem:[%s4728_s16 + $0x1cc0] sm:$0xff]  ;;  %v8416_v11 = vmul.f32 %v4751_v19, %v1145_v20  ;;  %v8419_v10 = vmul.f32 %v4751_v19, %v1146_v18 }
 0x23e   : > { %12836 = vst [vmem:[#allocation871_spill] sm:$0xff] %v8320_v28  ;;  %12837 = vst [vmem:[#allocation872_spill] sm:$0xff] %v8323_v33  ;;  %v1149_v33 = vld [vmem:[%s4728_s16 + $0x1cb0] sm:$0xff]  ;;  %v1150_v28 = vld [vmem:[%s4728_s16 + $0x1cb8] sm:$0xff]  ;;  %v8413_v12 = vmul.f32 %v4751_v19, %v1144_v21  ;;  %v8438_v17 = vmul.f32 %v4751_v19, %v1151_v27 }
 0x23f   : > { %12838 = vst [vmem:[#allocation873_spill] sm:$0xff] %v8326_v34  ;;  %12839 = vst [vmem:[#allocation874_spill] sm:$0xff] %v8333_v43  ;;  %v1148_v34 = vld [vmem:[%s4728_s16 + $0x1ca8] sm:$0xff]  ;;  %v1155_v43 = vld [vmem:[%s4728_s16 + $0x1ce0] sm:$0xff]  ;;  %v8432_v20 = vmul.f32 %v4751_v19, %v1149_v33  ;;  %v8435_v18 = vmul.f32 %v4751_v19, %v1150_v28 }
 0x240   : > { %12840 = vst [vmem:[#allocation875_spill] sm:$0xff] %v8336_v44  ;;  %12841 = vst [vmem:[#allocation876_spill] sm:$0xff] %v8339_v26  ;;  %v1153_v26 = vld [vmem:[%s4728_s16 + $0x1cd0] sm:$0xff]  ;;  %v1154_v44 = vld [vmem:[%s4728_s16 + $0x1cd8] sm:$0xff]  ;;  %v8429_v21 = vmul.f32 %v4751_v19, %v1148_v34  ;;  %v8454_v27 = vmul.f32 %v4751_v19, %v1155_v43 }
 0x241   : > { %12842 = vst [vmem:[#allocation877_spill] sm:$0xff] %v8342_v25  ;;  %12843 = vst [vmem:[#allocation878_spill] sm:$0xff] %v8349_v42  ;;  %v1152_v25 = vld [vmem:[%s4728_s16 + $0x1cc8] sm:$0xff]  ;;  %v1159_v42 = vld [vmem:[%s4728_s16 + $0x1d00] sm:$0xff]  ;;  %v8448_v33 = vmul.f32 %v4751_v19, %v1153_v26  ;;  %v8451_v28 = vmul.f32 %v4751_v19, %v1154_v44 }
 0x242   : > { %12844 = vst [vmem:[#allocation879_spill] sm:$0xff] %v8352_v41  ;;  %12845 = vst [vmem:[#allocation880_spill] sm:$0xff] %v8355_v36  ;;  %v1157_v36 = vld [vmem:[%s4728_s16 + $0x1cf0] sm:$0xff]  ;;  %v1158_v41 = vld [vmem:[%s4728_s16 + $0x1cf8] sm:$0xff]  ;;  %v8445_v34 = vmul.f32 %v4751_v19, %v1152_v25  ;;  %v8470_v43 = vmul.f32 %v4751_v19, %v1159_v42 }
 0x243   : > { %12846 = vst [vmem:[#allocation881_spill] sm:$0xff] %v8358_v35  ;;  %12847 = vst [vmem:[#allocation882_spill] sm:$0xff] %v8365_v52  ;;  %v1156_v35 = vld [vmem:[%s4728_s16 + $0x1ce8] sm:$0xff]  ;;  %v1163_v52 = vld [vmem:[%s4728_s16 + $0x1d20] sm:$0xff]  ;;  %v8464_v26 = vmul.f32 %v4751_v19, %v1157_v36  ;;  %v8467_v44 = vmul.f32 %v4751_v19, %v1158_v41 }
 0x244   : > { %12848 = vst [vmem:[#allocation883_spill] sm:$0xff] %v8368_v51  ;;  %12849 = vst [vmem:[#allocation884_spill] sm:$0xff] %v8371_v50  ;;  %v1161_v50 = vld [vmem:[%s4728_s16 + $0x1d10] sm:$0xff]  ;;  %v1162_v51 = vld [vmem:[%s4728_s16 + $0x1d18] sm:$0xff]  ;;  %v8461_v25 = vmul.f32 %v4751_v19, %v1156_v35  ;;  %v8486_v42 = vmul.f32 %v4751_v19, %v1163_v52 }
 0x245   : > { %12850 = vst [vmem:[#allocation885_spill] sm:$0xff] %v8374_v49  ;;  %12851 = vst [vmem:[#allocation886_spill] sm:$0xff] %v8381_v60  ;;  %v1160_v49 = vld [vmem:[%s4728_s16 + $0x1d08] sm:$0xff]  ;;  %v1167_v60 = vld [vmem:[%s4728_s16 + $0x1d40] sm:$0xff]  ;;  %v8480_v36 = vmul.f32 %v4751_v19, %v1161_v50  ;;  %v8483_v41 = vmul.f32 %v4751_v19, %v1162_v51 }
 0x246   : > { %12852 = vst [vmem:[#allocation887_spill] sm:$0xff] %v8384_v59  ;;  %12853 = vst [vmem:[#allocation888_spill] sm:$0xff] %v8387_v58  ;;  %v1165_v58 = vld [vmem:[%s4728_s16 + $0x1d30] sm:$0xff]  ;;  %v1166_v59 = vld [vmem:[%s4728_s16 + $0x1d38] sm:$0xff]  ;;  %v8477_v35 = vmul.f32 %v4751_v19, %v1160_v49  ;;  %v8502_v52 = vmul.f32 %v4751_v19, %v1167_v60 }
 0x247   : > { %12854 = vst [vmem:[#allocation889_spill] sm:$0xff] %v8390_v57  ;;  %12855 = vst [vmem:[#allocation890_spill] sm:$0xff] %v8397_v4  ;;  %v1164_v57 = vld [vmem:[%s4728_s16 + $0x1d28] sm:$0xff]  ;;  %v1171_v4 = vld [vmem:[%s4728_s16 + $0x1d60] sm:$0xff]  ;;  %v8496_v50 = vmul.f32 %v4751_v19, %v1165_v58  ;;  %v8499_v51 = vmul.f32 %v4751_v19, %v1166_v59 }
 0x248   : > { %12856 = vst [vmem:[#allocation891_spill] sm:$0xff] %v8400_v3  ;;  %12857 = vst [vmem:[#allocation892_spill] sm:$0xff] %v8403_v2  ;;  %v1169_v2 = vld [vmem:[%s4728_s16 + $0x1d50] sm:$0xff]  ;;  %v1170_v3 = vld [vmem:[%s4728_s16 + $0x1d58] sm:$0xff]  ;;  %v8493_v49 = vmul.f32 %v4751_v19, %v1164_v57  ;;  %v8518_v60 = vmul.f32 %v4751_v19, %v1171_v4 }
 0x249   : > { %12858 = vst [vmem:[#allocation893_spill] sm:$0xff] %v8406_v1  ;;  %12859 = vst [vmem:[#allocation894_spill] sm:$0xff] %v8413_v12  ;;  %v1168_v1 = vld [vmem:[%s4728_s16 + $0x1d48] sm:$0xff]  ;;  %v1175_v12 = vld [vmem:[%s4728_s16 + $0x1d80] sm:$0xff]  ;;  %v8512_v58 = vmul.f32 %v4751_v19, %v1169_v2  ;;  %v8515_v59 = vmul.f32 %v4751_v19, %v1170_v3 }
 0x24a   : > { %12860 = vst [vmem:[#allocation895_spill] sm:$0xff] %v8416_v11  ;;  %12861 = vst [vmem:[#allocation896_spill] sm:$0xff] %v8419_v10  ;;  %v1173_v10 = vld [vmem:[%s4728_s16 + $0x1d70] sm:$0xff]  ;;  %v1174_v11 = vld [vmem:[%s4728_s16 + $0x1d78] sm:$0xff]  ;;  %v8509_v57 = vmul.f32 %v4751_v19, %v1168_v1  ;;  %v8534_v4 = vmul.f32 %v4751_v19, %v1175_v12 }
 0x24b   : > { %12862 = vst [vmem:[#allocation897_spill] sm:$0xff] %v8422_v9  ;;  %12863 = vst [vmem:[#allocation898_spill] sm:$0xff] %v8429_v21  ;;  %v1172_v9 = vld [vmem:[%s4728_s16 + $0x1d68] sm:$0xff]  ;;  %v1179_v21 = vld [vmem:[%s4728_s16 + $0x1da0] sm:$0xff]  ;;  %v8528_v2 = vmul.f32 %v4751_v19, %v1173_v10  ;;  %v8531_v3 = vmul.f32 %v4751_v19, %v1174_v11 }
 0x24c   : > { %12864 = vst [vmem:[#allocation899_spill] sm:$0xff] %v8432_v20  ;;  %12865 = vst [vmem:[#allocation900_spill] sm:$0xff] %v8435_v18  ;;  %v1177_v18 = vld [vmem:[%s4728_s16 + $0x1d90] sm:$0xff]  ;;  %v1178_v20 = vld [vmem:[%s4728_s16 + $0x1d98] sm:$0xff]  ;;  %v8525_v1 = vmul.f32 %v4751_v19, %v1172_v9  ;;  %v8550_v12 = vmul.f32 %v4751_v19, %v1179_v21 }
 0x24d   : > { %12866 = vst [vmem:[#allocation901_spill] sm:$0xff] %v8438_v17  ;;  %12867 = vst [vmem:[#allocation902_spill] sm:$0xff] %v8445_v34  ;;  %v1176_v17 = vld [vmem:[%s4728_s16 + $0x1d88] sm:$0xff]  ;;  %v1183_v34 = vld [vmem:[%s4728_s16 + $0x1dc0] sm:$0xff]  ;;  %v8544_v10 = vmul.f32 %v4751_v19, %v1177_v18  ;;  %v8547_v11 = vmul.f32 %v4751_v19, %v1178_v20 }
 0x24e   : > { %12868 = vst [vmem:[#allocation903_spill] sm:$0xff] %v8448_v33  ;;  %12869 = vst [vmem:[#allocation904_spill] sm:$0xff] %v8451_v28  ;;  %v1181_v28 = vld [vmem:[%s4728_s16 + $0x1db0] sm:$0xff]  ;;  %v1182_v33 = vld [vmem:[%s4728_s16 + $0x1db8] sm:$0xff]  ;;  %v8541_v9 = vmul.f32 %v4751_v19, %v1176_v17  ;;  %v8566_v21 = vmul.f32 %v4751_v19, %v1183_v34 }
 0x24f   : > { %12870 = vst [vmem:[#allocation905_spill] sm:$0xff] %v8454_v27  ;;  %12871 = vst [vmem:[#allocation906_spill] sm:$0xff] %v8461_v25  ;;  %v1180_v27 = vld [vmem:[%s4728_s16 + $0x1da8] sm:$0xff]  ;;  %v1187_v25 = vld [vmem:[%s4728_s16 + $0x1de0] sm:$0xff]  ;;  %v8560_v18 = vmul.f32 %v4751_v19, %v1181_v28  ;;  %v8563_v20 = vmul.f32 %v4751_v19, %v1182_v33 }
 0x250   : > { %12872 = vst [vmem:[#allocation907_spill] sm:$0xff] %v8464_v26  ;;  %12873 = vst [vmem:[#allocation908_spill] sm:$0xff] %v8467_v44  ;;  %v1185_v44 = vld [vmem:[%s4728_s16 + $0x1dd0] sm:$0xff]  ;;  %v1186_v26 = vld [vmem:[%s4728_s16 + $0x1dd8] sm:$0xff]  ;;  %v8557_v17 = vmul.f32 %v4751_v19, %v1180_v27  ;;  %v8582_v34 = vmul.f32 %v4751_v19, %v1187_v25 }
 0x251   : > { %12874 = vst [vmem:[#allocation909_spill] sm:$0xff] %v8470_v43  ;;  %12875 = vst [vmem:[#allocation910_spill] sm:$0xff] %v8477_v35  ;;  %v1184_v43 = vld [vmem:[%s4728_s16 + $0x1dc8] sm:$0xff]  ;;  %v1191_v35 = vld [vmem:[%s4728_s16 + $0x1e00] sm:$0xff]  ;;  %v8576_v28 = vmul.f32 %v4751_v19, %v1185_v44  ;;  %v8579_v33 = vmul.f32 %v4751_v19, %v1186_v26 }
 0x252   : > { %12876 = vst [vmem:[#allocation911_spill] sm:$0xff] %v8480_v36  ;;  %12877 = vst [vmem:[#allocation912_spill] sm:$0xff] %v8483_v41  ;;  %v1189_v41 = vld [vmem:[%s4728_s16 + $0x1df0] sm:$0xff]  ;;  %v1190_v36 = vld [vmem:[%s4728_s16 + $0x1df8] sm:$0xff]  ;;  %v8573_v27 = vmul.f32 %v4751_v19, %v1184_v43  ;;  %v8598_v25 = vmul.f32 %v4751_v19, %v1191_v35 }
 0x253   : > { %12878 = vst [vmem:[#allocation913_spill] sm:$0xff] %v8486_v42  ;;  %12879 = vst [vmem:[#allocation914_spill] sm:$0xff] %v8493_v49  ;;  %v1188_v42 = vld [vmem:[%s4728_s16 + $0x1de8] sm:$0xff]  ;;  %v1195_v49 = vld [vmem:[%s4728_s16 + $0x1e20] sm:$0xff]  ;;  %v8592_v44 = vmul.f32 %v4751_v19, %v1189_v41  ;;  %v8595_v26 = vmul.f32 %v4751_v19, %v1190_v36 }
 0x254   : > { %12880 = vst [vmem:[#allocation915_spill] sm:$0xff] %v8496_v50  ;;  %12881 = vst [vmem:[#allocation916_spill] sm:$0xff] %v8499_v51  ;;  %v1193_v51 = vld [vmem:[%s4728_s16 + $0x1e10] sm:$0xff]  ;;  %v1194_v50 = vld [vmem:[%s4728_s16 + $0x1e18] sm:$0xff]  ;;  %v8589_v43 = vmul.f32 %v4751_v19, %v1188_v42  ;;  %v8614_v35 = vmul.f32 %v4751_v19, %v1195_v49 }
 0x255   : > { %12882 = vst [vmem:[#allocation917_spill] sm:$0xff] %v8502_v52  ;;  %12883 = vst [vmem:[#allocation918_spill] sm:$0xff] %v8509_v57  ;;  %v1192_v52 = vld [vmem:[%s4728_s16 + $0x1e08] sm:$0xff]  ;;  %v1199_v57 = vld [vmem:[%s4728_s16 + $0x1e40] sm:$0xff]  ;;  %v8608_v41 = vmul.f32 %v4751_v19, %v1193_v51  ;;  %v8611_v36 = vmul.f32 %v4751_v19, %v1194_v50 }
 0x256   : > { %12884 = vst [vmem:[#allocation919_spill] sm:$0xff] %v8512_v58  ;;  %12885 = vst [vmem:[#allocation920_spill] sm:$0xff] %v8515_v59  ;;  %v1197_v59 = vld [vmem:[%s4728_s16 + $0x1e30] sm:$0xff]  ;;  %v1198_v58 = vld [vmem:[%s4728_s16 + $0x1e38] sm:$0xff]  ;;  %v8605_v42 = vmul.f32 %v4751_v19, %v1192_v52  ;;  %v8630_v49 = vmul.f32 %v4751_v19, %v1199_v57 }
 0x257   : > { %12886 = vst [vmem:[#allocation921_spill] sm:$0xff] %v8518_v60  ;;  %12887 = vst [vmem:[#allocation922_spill] sm:$0xff] %v8525_v1  ;;  %v1196_v60 = vld [vmem:[%s4728_s16 + $0x1e28] sm:$0xff]  ;;  %v1203_v1 = vld [vmem:[%s4728_s16 + $0x1e60] sm:$0xff]  ;;  %v8624_v51 = vmul.f32 %v4751_v19, %v1197_v59  ;;  %v8627_v50 = vmul.f32 %v4751_v19, %v1198_v58 }
 0x258   : > { %12888 = vst [vmem:[#allocation923_spill] sm:$0xff] %v8528_v2  ;;  %12889 = vst [vmem:[#allocation924_spill] sm:$0xff] %v8531_v3  ;;  %v1201_v3 = vld [vmem:[%s4728_s16 + $0x1e50] sm:$0xff]  ;;  %v1202_v2 = vld [vmem:[%s4728_s16 + $0x1e58] sm:$0xff]  ;;  %v8621_v52 = vmul.f32 %v4751_v19, %v1196_v60  ;;  %v8646_v58 = vmul.f32 %v4751_v19, %v1203_v1 }
 0x259   : > { %12890 = vst [vmem:[#allocation925_spill] sm:$0xff] %v8534_v4  ;;  %12891 = vst [vmem:[#allocation926_spill] sm:$0xff] %v8541_v9  ;;  %v1200_v4 = vld [vmem:[%s4728_s16 + $0x1e48] sm:$0xff]  ;;  %v1207_v9 = vld [vmem:[%s4728_s16 + $0x1e80] sm:$0xff]  ;;  %v8640_v60 = vmul.f32 %v4751_v19, %v1201_v3  ;;  %v8643_v59 = vmul.f32 %v4751_v19, %v1202_v2 }
 0x25a   : > { %12892 = vst [vmem:[#allocation927_spill] sm:$0xff] %v8544_v10  ;;  %12893 = vst [vmem:[#allocation928_spill] sm:$0xff] %v8547_v11  ;;  %v1205_v11 = vld [vmem:[%s4728_s16 + $0x1e70] sm:$0xff]  ;;  %v1206_v10 = vld [vmem:[%s4728_s16 + $0x1e78] sm:$0xff]  ;;  %v8637_v23 = vmul.f32 %v4751_v19, %v1200_v4  ;;  %v8662_v1 = vmul.f32 %v4751_v19, %v1207_v9 }
 0x25b   : > { %12894 = vst [vmem:[#allocation929_spill] sm:$0xff] %v8550_v12  ;;  %12895 = vst [vmem:[#allocation930_spill] sm:$0xff] %v8557_v17  ;;  %v1204_v12 = vld [vmem:[%s4728_s16 + $0x1e68] sm:$0xff]  ;;  %v1211_v17 = vld [vmem:[%s4728_s16 + $0x1ea0] sm:$0xff]  ;;  %v8656_v4 = vmul.f32 %v4751_v19, %v1205_v11  ;;  %v8659_v3 = vmul.f32 %v4751_v19, %v1206_v10 }
 0x25c   : > { %12896 = vst [vmem:[#allocation931_spill] sm:$0xff] %v8560_v18  ;;  %12897 = vst [vmem:[#allocation932_spill] sm:$0xff] %v8563_v20  ;;  %v1209_v20 = vld [vmem:[%s4728_s16 + $0x1e90] sm:$0xff]  ;;  %v1210_v18 = vld [vmem:[%s4728_s16 + $0x1e98] sm:$0xff]  ;;  %v8677_v10 = vmul.f32 %v4751_v19, %v1211_v17 }
 0x25d   : > { %12898 = vst [vmem:[#allocation933_spill] sm:$0xff] %v8566_v21  ;;  %12899 = vst [vmem:[#allocation934_spill] sm:$0xff] %v8573_v27  ;;  %v1208_v21 = vld [vmem:[%s4728_s16 + $0x1e88] sm:$0xff]  ;;  %v1215_v27 = vld [vmem:[%s4728_s16 + $0x1ec0] sm:$0xff]  ;;  %v8674_v11 = vmul.f32 %v4751_v19, %v1210_v18 }
 0x25e   : > { %12900 = vst [vmem:[#allocation935_spill] sm:$0xff] %v8576_v28  ;;  %12901 = vst [vmem:[#allocation936_spill] sm:$0xff] %v8579_v33  ;;  %v1213_v33 = vld [vmem:[%s4728_s16 + $0x1eb0] sm:$0xff]  ;;  %v1214_v28 = vld [vmem:[%s4728_s16 + $0x1eb8] sm:$0xff]  ;;  %v8692_v18 = vmul.f32 %v4751_v19, %v1215_v27 }
 0x25f   : > { %12902 = vst [vmem:[#allocation937_spill] sm:$0xff] %v8582_v34  ;;  %12903 = vst [vmem:[#allocation938_spill] sm:$0xff] %v8589_v43  ;;  %v1212_v34 = vld [vmem:[%s4728_s16 + $0x1ea8] sm:$0xff]  ;;  %v1219_v43 = vld [vmem:[%s4728_s16 + $0x1ee0] sm:$0xff] }
 0x260   : > { %12904 = vst [vmem:[#allocation939_spill] sm:$0xff] %v8592_v44  ;;  %12905 = vst [vmem:[#allocation940_spill] sm:$0xff] %v8595_v26  ;;  %v1217_v26 = vld [vmem:[%s4728_s16 + $0x1ed0] sm:$0xff]  ;;  %v1218_v44 = vld [vmem:[%s4728_s16 + $0x1ed8] sm:$0xff] }
 0x261   : > { %12906 = vst [vmem:[#allocation941_spill] sm:$0xff] %v8598_v25  ;;  %12907 = vst [vmem:[#allocation942_spill] sm:$0xff] %v8605_v42  ;;  %v1216_v25 = vld [vmem:[%s4728_s16 + $0x1ec8] sm:$0xff]  ;;  %v1223_v42 = vld [vmem:[%s4728_s16 + $0x1f00] sm:$0xff] }
 0x262   : > { %12908 = vst [vmem:[#allocation943_spill] sm:$0xff] %v8608_v41  ;;  %12909 = vst [vmem:[#allocation944_spill] sm:$0xff] %v8611_v36  ;;  %v1221_v36 = vld [vmem:[%s4728_s16 + $0x1ef0] sm:$0xff]  ;;  %v1222_v41 = vld [vmem:[%s4728_s16 + $0x1ef8] sm:$0xff] }
 0x263   : > { %12910 = vst [vmem:[#allocation945_spill] sm:$0xff] %v8614_v35  ;;  %12911 = vst [vmem:[#allocation946_spill] sm:$0xff] %v8621_v52  ;;  %v1220_v35 = vld [vmem:[%s4728_s16 + $0x1ee8] sm:$0xff]  ;;  %v8653_v52 = vmul.f32 %v4751_v19, %v1204_v12  ;;  %v8671_v12 = vmul.f32 %v4751_v19, %v1209_v20  ;;  %v1231_v9 = vld [vmem:[%s4728_s16 + $0x1f40] sm:$0xff]  ;;  %v8689_v20 = vmul.f32 %v4751_v19, %v1214_v28 }
 0x264   : > { %12912 = vst [vmem:[#allocation947_spill] sm:$0xff] %v8624_v51  ;;  %12913 = vst [vmem:[#allocation948_spill] sm:$0xff] %v8627_v50  ;;  %v1224_v57 = vld [vmem:[%s4728_s16 + $0x1f08] sm:$0xff]  ;;  %v1226_v50 = vld [vmem:[%s4728_s16 + $0x1f18] sm:$0xff]  ;;  %v8707_v28 = vmul.f32 %v4751_v19, %v1219_v43  ;;  %v8724_v43 = vmul.f32 %v4751_v19, %v1223_v42 }
 0x265   : > { %12914 = vst [vmem:[#allocation949_spill] sm:$0xff] %v8630_v49  ;;  %12915 = vst [vmem:[#allocation950_spill] sm:$0xff] %v8640_v60  ;;  %v1225_v49 = vld [vmem:[%s4728_s16 + $0x1f10] sm:$0xff]  ;;  %v1227_v51 = vld [vmem:[%s4728_s16 + $0x1f20] sm:$0xff]  ;;  %v8668_v60 = vmul.f32 %v4751_v19, %v1208_v21  ;;  %v8686_v21 = vmul.f32 %v4751_v19, %v1213_v33  ;;  %v8704_v33 = vmul.f32 %v4751_v19, %v1218_v44 }
 0x266   : > { %12916 = vst [vmem:[#allocation951_spill] sm:$0xff] %v8643_v59  ;;  %12917 = vst [vmem:[#allocation952_spill] sm:$0xff] %v8646_v58  ;;  %v1228_v2 = vld [vmem:[%s4728_s16 + $0x1f28] sm:$0xff]  ;;  %v1229_v58 = vld [vmem:[%s4728_s16 + $0x1f30] sm:$0xff]  ;;  %v8721_v44 = vmul.f32 %v4751_v19, %v1222_v41  ;;  %v8739_v41 = vmul.f32 %v4751_v19, %v1227_v51 }
 0x267   : > { %12918 = vst [vmem:[#allocation953_spill] sm:$0xff] %v8656_v4  ;;  %12919 = vst [vmem:[#allocation954_spill] sm:$0xff] %v8659_v3  ;;  %v1230_v59 = vld [vmem:[%s4728_s16 + $0x1f38] sm:$0xff]  ;;  %v1233_v3 = vld [vmem:[%s4728_s16 + $0x1f50] sm:$0xff]  ;;  %v8683_v4 = vmul.f32 %v4751_v19, %v1212_v34  ;;  %v8701_v34 = vmul.f32 %v4751_v19, %v1217_v26  ;;  %v8718_v26 = vmul.f32 %v4751_v19, %v1221_v36 }
 0x268   : > { %12920 = vst [vmem:[#allocation955_spill] sm:$0xff] %v8662_v1  ;;  %12921 = vst [vmem:[#allocation956_spill] sm:$0xff] %v8671_v12  ;;  %v1232_v1 = vld [vmem:[%s4728_s16 + $0x1f48] sm:$0xff]  ;;  %v1234_v17 = vld [vmem:[%s4728_s16 + $0x1f58] sm:$0xff]  ;;  %v8698_v12 = vmul.f32 %v4751_v19, %v1216_v25  ;;  %v8715_v25 = vmul.f32 %v4751_v19, %v1220_v35  ;;  %v8733_v35 = vmul.f32 %v4751_v19, %v1225_v49 }
 0x269   : > { %12922 = vst [vmem:[#allocation957_spill] sm:$0xff] %v8674_v11  ;;  %12923 = vst [vmem:[#allocation958_spill] sm:$0xff] %v8677_v10  ;;  %v1235_v10 = vld [vmem:[%s4728_s16 + $0x1f60] sm:$0xff]  ;;  %v1236_v11 = vld [vmem:[%s4728_s16 + $0x1f68] sm:$0xff]  ;;  %v8736_v36 = vmul.f32 %v4751_v19, %v1226_v50  ;;  %v8751_v49 = vmul.f32 %v4751_v19, %v1230_v59  ;;  %v8754_v50 = vmul.f32 %v4751_v19, %v1231_v9 }
 0x26a   : > { %12924 = vst [vmem:[#allocation959_spill] sm:$0xff] %v8689_v20  ;;  %12925 = vst [vmem:[#allocation960_spill] sm:$0xff] %v8692_v18  ;;  %v1237_v27 = vld [vmem:[%s4728_s16 + $0x1f70] sm:$0xff]  ;;  %v1238_v18 = vld [vmem:[%s4728_s16 + $0x1f78] sm:$0xff]  ;;  %v8769_v59 = vmul.f32 %v4751_v19, %v1235_v10 }
 0x26b   : > { %12926 = vst [vmem:[#allocation961_spill] sm:$0xff] %v8698_v12  ;;  %12927 = vst [vmem:[#allocation962_spill] sm:$0xff] %v8701_v34  ;;  %v1239_v20 = vld [vmem:[%s4728_s16 + $0x1f80] sm:$0xff]  ;;  %v1242_v34 = vld [vmem:[%s4728_s16 + $0x1f98] sm:$0xff]  ;;  %v8730_v12 = vmul.f32 %v4751_v19, %v1224_v57  ;;  %v8748_v57 = vmul.f32 %v4751_v19, %v1229_v58  ;;  %v8766_v58 = vmul.f32 %v4751_v19, %v1234_v17 }
 0x26c   : > { %12928 = vst [vmem:[#allocation963_spill] sm:$0xff] %v8704_v33  ;;  %12929 = vst [vmem:[#allocation964_spill] sm:$0xff] %v8707_v28  ;;  %v1240_v28 = vld [vmem:[%s4728_s16 + $0x1f88] sm:$0xff]  ;;  %v1241_v33 = vld [vmem:[%s4728_s16 + $0x1f90] sm:$0xff] }
 0x26d   : > { %12930 = vst [vmem:[#allocation965_spill] sm:$0xff] %v8718_v26  ;;  %12931 = vst [vmem:[#allocation966_spill] sm:$0xff] %v8721_v44  ;;  %v1243_v42 = vld [vmem:[%s4728_s16 + $0x1fa0] sm:$0xff]  ;;  %v1245_v44 = vld [vmem:[%s4728_s16 + $0x1fb0] sm:$0xff]  ;;  %v8745_v26 = vmul.f32 %v4751_v19, %v1228_v2  ;;  %v8763_v2 = vmul.f32 %v4751_v19, %v1233_v3  ;;  %v8784_v3 = vmul.f32 %v4751_v19, %v1239_v20 }
 0x26e   : > { %12932 = vst [vmem:[#allocation967_spill] sm:$0xff] %v8724_v43  ;;  %12933 = vst [vmem:[#allocation968_spill] sm:$0xff] %v8733_v35  ;;  %v1244_v43 = vld [vmem:[%s4728_s16 + $0x1fa8] sm:$0xff]  ;;  %v1246_v51 = vld [vmem:[%s4728_s16 + $0x1fb8] sm:$0xff]  ;;  %v8760_v35 = vmul.f32 %v4751_v19, %v1232_v1  ;;  %v8781_v1 = vmul.f32 %v4751_v19, %v1238_v18  ;;  %v8790_v10 = vmul.f32 %v4751_v19, %v1240_v28 }
 0x26f   : > { %12934 = vst [vmem:[#allocation969_spill] sm:$0xff] %v8736_v36  ;;  %12935 = vst [vmem:[#allocation970_spill] sm:$0xff] %v8739_v41  ;;  %v1247_v41 = vld [vmem:[%s4728_s16 + $0x1fc0] sm:$0xff]  ;;  %v1248_v36 = vld [vmem:[%s4728_s16 + $0x1fc8] sm:$0xff]  ;;  %v8802_v18 = vmul.f32 %v4751_v19, %v1244_v43  ;;  %v8805_v20 = vmul.f32 %v4751_v19, %v1245_v44 }
 0x270   : > { %12936 = vst [vmem:[#allocation971_spill] sm:$0xff] %v8745_v26  ;;  %12937 = vst [vmem:[#allocation972_spill] sm:$0xff] %v8748_v57  ;;  %v1250_v9 = vld [vmem:[%s4728_s16 + $0x1fd8] sm:$0xff]  ;;  %v8775_v57 = vmul.f32 %v4751_v19, %v1236_v11  ;;  %v8778_v26 = vmul.f32 %v4751_v19, %v1237_v27  ;;  %v1252_v17 = vld [vmem:[%s4728_s16 + $0x1fe8] sm:$0xff]  ;;  %v8796_v11 = vmul.f32 %v4751_v19, %v1242_v34 }
 0x271   : > { %12938 = vst [vmem:[#allocation973_spill] sm:$0xff] %v8751_v49  ;;  %12939 = vst [vmem:[#allocation974_spill] sm:$0xff] %v8754_v50  ;;  %v1249_v49 = vld [vmem:[%s4728_s16 + $0x1fd0] sm:$0xff]  ;;  %v1251_v50 = vld [vmem:[%s4728_s16 + $0x1fe0] sm:$0xff]  ;;  %v8799_v27 = vmul.f32 %v4751_v19, %v1243_v42  ;;  %v8811_v28 = vmul.f32 %v4751_v19, %v1247_v41  ;;  %v8820_v42 = vmul.f32 %v4751_v19, %v1250_v9 }
 0x272   : > { %12940 = vst [vmem:[#allocation975_spill] sm:$0xff] %v8763_v2  ;;  %12941 = vst [vmem:[#allocation976_spill] sm:$0xff] %v8766_v58  ;;  %v1253_v58 = vld [vmem:[%s4728_s16 + $0x1ff0] sm:$0xff]  ;;  %v1254_v2 = vld [vmem:[%s4728_s16 + $0x1ff8] sm:$0xff]  ;;  %v8817_v34 = vmul.f32 %v4751_v19, %v1249_v49  ;;  %v8823_v43 = vmul.f32 %v4751_v19, %v1251_v50  ;;  %v8826_v44 = vmul.f32 %v4751_v19, %v1252_v17 }
 0x273   : > { %12942 = vst [vmem:[#allocation977_spill] sm:$0xff] %v8769_v59  ;;  %12943 = vst [vmem:[#allocation978_spill] sm:$0xff] %v8784_v3  ;;  %v8793_v59 = vmul.f32 %v4751_v19, %v1241_v33  ;;  %v8808_v3 = vmul.f32 %v4751_v19, %v1246_v51  ;;  %v8814_v33 = vmul.f32 %v4751_v19, %v1248_v36  ;;  %v8835_v36 = vstv %s8709_s18 }
 0x274   : > { %v8829_v51 = vmul.f32 %v4751_v19, %v1253_v58  ;;  %v8832_v41 = vmul.f32 %v4751_v19, %v1254_v2  ;;  %v2281_v49 = vadd.f32 %v8835_v36, %v4758_v24  ;;  %v2282_v9 = vadd.f32 %v8835_v36, %v4765_v29 }
 0x275   : > { %v2283_v50 = vadd.f32 %v8835_v36, %v4768_v30  ;;  %v2284_v17 = vadd.f32 %v8835_v36, %v4771_v31  ;;  %v2285_v58 = vadd.f32 %v8835_v36, %v4774_v32  ;;  %v2286_v19 = vadd.f32 %v8835_v36, %v4781_v37 }
 0x276   : > { %v2287_v2 = vadd.f32 %v8835_v36, %v4784_v38  ;;  %v2288_v24 = vadd.f32 %v8835_v36, %v4787_v39  ;;  %v2289_v29 = vadd.f32 %v8835_v36, %v4790_v40  ;;  %v2290_v30 = vadd.f32 %v8835_v36, %v4797_v45  ;;  %3305 = vst [vmem:[%s8863_s19] sm:$0xff] %v2281_v49  ;;  %v12947_v49 = vld [vmem:[#allocation14_spill] sm:$0xff] }
 0x277   : > { %v2291_v31 = vadd.f32 %v8835_v36, %v4800_v46  ;;  %v2292_v32 = vadd.f32 %v8835_v36, %v4803_v47  ;;  %3306 = vst [vmem:[%s8863_s19 + $0x8] sm:$0xff] %v2282_v9  ;;  %3307 = vst [vmem:[%s8863_s19 + $0x10] sm:$0xff] %v2283_v50  ;;  %v2293_v37 = vadd.f32 %v8835_v36, %v4806_v48  ;;  %v12948_v9 = vld [vmem:[#allocation15_spill] sm:$0xff] }
 0x278   : > { %3308 = vst [vmem:[%s8863_s19 + $0x18] sm:$0xff] %v2284_v17  ;;  %v2294_v38 = vadd.f32 %v8835_v36, %v4813_v53  ;;  %v2295_v39 = vadd.f32 %v8835_v36, %v4816_v54  ;;  %v2296_v40 = vadd.f32 %v8835_v36, %v4819_v55  ;;  %3309 = vst [vmem:[%s8863_s19 + $0x20] sm:$0xff] %v2285_v58  ;;  %v12949_v17 = vld [vmem:[#allocation16_spill] sm:$0xff] }
 0x279   : > { %3310 = vst [vmem:[%s8863_s19 + $0x28] sm:$0xff] %v2286_v19  ;;  %3311 = vst [vmem:[%s8863_s19 + $0x30] sm:$0xff] %v2287_v2  ;;  %v2297_v45 = vadd.f32 %v8835_v36, %v4822_v56  ;;  %v2298_v46 = vadd.f32 %v8835_v36, %v4829_v61  ;;  %v2299_v47 = vadd.f32 %v8835_v36, %v4832_v62  ;;  %v12950_v19 = vld [vmem:[#allocation17_spill] sm:$0xff] }
 0x27a   : > { %3312 = vst [vmem:[%s8863_s19 + $0x38] sm:$0xff] %v2288_v24  ;;  %v2300_v48 = vadd.f32 %v8835_v36, %v4835_v63  ;;  %3313 = vst [vmem:[%s8863_s19 + $0x40] sm:$0xff] %v2289_v29  ;;  %v2301_v53 = vadd.f32 %v8835_v36, %v4838_v0  ;;  %v2302_v54 = vadd.f32 %v8835_v36, %v4845_v5  ;;  %v12951_v24 = vld [vmem:[#allocation18_spill] sm:$0xff] }
 0x27b   : > { %3314 = vst [vmem:[%s8863_s19 + $0x48] sm:$0xff] %v2290_v30  ;;  %3315 = vst [vmem:[%s8863_s19 + $0x50] sm:$0xff] %v2291_v31  ;;  %v2303_v55 = vadd.f32 %v8835_v36, %v4848_v6  ;;  %v2304_v56 = vadd.f32 %v8835_v36, %v4851_v7  ;;  %v2305_v61 = vadd.f32 %v8835_v36, %v4854_v8  ;;  %v12944_v7 = vld [vmem:[#allocation11_spill] sm:$0xff] }
 0x27c   : > { %3316 = vst [vmem:[%s8863_s19 + $0x58] sm:$0xff] %v2292_v32  ;;  %3317 = vst [vmem:[%s8863_s19 + $0x60] sm:$0xff] %v2293_v37  ;;  %v2306_v62 = vadd.f32 %v8835_v36, %v4861_v13  ;;  %v2307_v63 = vadd.f32 %v8835_v36, %v4864_v14  ;;  %v2308_v0 = vadd.f32 %v8835_v36, %v4867_v15  ;;  %v12945_v13 = vld [vmem:[#allocation12_spill] sm:$0xff]  ;;  %v12946_v15 = vld [vmem:[#allocation13_spill] sm:$0xff] }
 0x27d   : > { %3318 = vst [vmem:[%s8863_s19 + $0x68] sm:$0xff] %v2294_v38  ;;  %3319 = vst [vmem:[%s8863_s19 + $0x70] sm:$0xff] %v2295_v39  ;;  %v2309_v5 = vadd.f32 %v8835_v36, %v4870_v16  ;;  %v2310_v6 = vadd.f32 %v8835_v36, %v4877_v22  ;;  %v2311_v8 = vadd.f32 %v8835_v36, %v12944_v7  ;;  %v12952_v30 = vld [vmem:[#allocation19_spill] sm:$0xff]  ;;  %v12953_v32 = vld [vmem:[#allocation20_spill] sm:$0xff] }
 0x27e   : > { %3320 = vst [vmem:[%s8863_s19 + $0x78] sm:$0xff] %v2296_v40  ;;  %3321 = vst [vmem:[%s8863_s19 + $0x80] sm:$0xff] %v2297_v45  ;;  %v2312_v14 = vadd.f32 %v8835_v36, %v12945_v13  ;;  %v2313_v16 = vadd.f32 %v8835_v36, %v12946_v15  ;;  %v2314_v22 = vadd.f32 %v8835_v36, %v12947_v49  ;;  %v12954_v38 = vld [vmem:[#allocation21_spill] sm:$0xff]  ;;  %v12955_v40 = vld [vmem:[#allocation22_spill] sm:$0xff] }
 0x27f   : > { %3322 = vst [vmem:[%s8863_s19 + $0x88] sm:$0xff] %v2298_v46  ;;  %3323 = vst [vmem:[%s8863_s19 + $0x90] sm:$0xff] %v2299_v47  ;;  %v2315_v50 = vadd.f32 %v8835_v36, %v12948_v9  ;;  %v2316_v58 = vadd.f32 %v8835_v36, %v12949_v17  ;;  %v2317_v2 = vadd.f32 %v8835_v36, %v12950_v19  ;;  %v12956_v46 = vld [vmem:[#allocation23_spill] sm:$0xff] }
 0x280   : > { %3324 = vst [vmem:[%s8863_s19 + $0x98] sm:$0xff] %v2300_v48  ;;  %3325 = vst [vmem:[%s8863_s19 + $0xa0] sm:$0xff] %v2301_v53  ;;  %v2318_v29 = vadd.f32 %v8835_v36, %v12951_v24  ;;  %v2319_v31 = vadd.f32 %v8835_v36, %v12952_v30  ;;  %v2320_v37 = vadd.f32 %v8835_v36, %v12953_v32  ;;  %v12957_v48 = vld [vmem:[#allocation24_spill] sm:$0xff] }
 0x281   : > { %3326 = vst [vmem:[%s8863_s19 + $0xa8] sm:$0xff] %v2302_v54  ;;  %3327 = vst [vmem:[%s8863_s19 + $0xb0] sm:$0xff] %v2303_v55  ;;  %v2321_v39 = vadd.f32 %v8835_v36, %v12954_v38  ;;  %v2322_v45 = vadd.f32 %v8835_v36, %v12955_v40  ;;  %v2323_v47 = vadd.f32 %v8835_v36, %v12956_v46  ;;  %v12958_v54 = vld [vmem:[#allocation25_spill] sm:$0xff] }
 0x282   : > { %3328 = vst [vmem:[%s8863_s19 + $0xb8] sm:$0xff] %v2304_v56  ;;  %3329 = vst [vmem:[%s8863_s19 + $0xc0] sm:$0xff] %v2305_v61  ;;  %v2324_v53 = vadd.f32 %v8835_v36, %v12957_v48  ;;  %v2325_v55 = vadd.f32 %v8835_v36, %v12958_v54  ;;  %v12959_v56 = vld [vmem:[#allocation26_spill] sm:$0xff] }
 0x283   : > { %3330 = vst [vmem:[%s8863_s19 + $0xc8] sm:$0xff] %v2306_v62  ;;  %3331 = vst [vmem:[%s8863_s19 + $0xd0] sm:$0xff] %v2307_v63  ;;  %v2326_v61 = vadd.f32 %v8835_v36, %v12959_v56  ;;  %v12960_v62 = vld [vmem:[#allocation27_spill] sm:$0xff] }
 0x284   : > { %3332 = vst [vmem:[%s8863_s19 + $0xd8] sm:$0xff] %v2308_v0  ;;  %3333 = vst [vmem:[%s8863_s19 + $0xe0] sm:$0xff] %v2309_v5  ;;  %v2327_v63 = vadd.f32 %v8835_v36, %v12960_v62  ;;  %v12961_v0 = vld [vmem:[#allocation28_spill] sm:$0xff] }
 0x285   : > { %3334 = vst [vmem:[%s8863_s19 + $0xe8] sm:$0xff] %v2310_v6  ;;  %3335 = vst [vmem:[%s8863_s19 + $0xf0] sm:$0xff] %v2311_v8  ;;  %v2328_v5 = vadd.f32 %v8835_v36, %v12961_v0  ;;  %v12962_v6 = vld [vmem:[#allocation29_spill] sm:$0xff]  ;;  %v12963_v8 = vld [vmem:[#allocation30_spill] sm:$0xff] }
 0x286   : > { %3336 = vst [vmem:[%s8863_s19 + $0xf8] sm:$0xff] %v2312_v14  ;;  %3337 = vst [vmem:[%s8863_s19 + $0x100] sm:$0xff] %v2313_v16  ;;  %v2329_v7 = vadd.f32 %v8835_v36, %v12962_v6  ;;  %v2330_v13 = vadd.f32 %v8835_v36, %v12963_v8  ;;  %v12964_v14 = vld [vmem:[#allocation31_spill] sm:$0xff]  ;;  %v12965_v16 = vld [vmem:[#allocation32_spill] sm:$0xff] }
 0x287   : > { %3338 = vst [vmem:[%s8863_s19 + $0x108] sm:$0xff] %v2314_v22  ;;  %3339 = vst [vmem:[%s8863_s19 + $0x110] sm:$0xff] %v2315_v50  ;;  %v2331_v15 = vadd.f32 %v8835_v36, %v12964_v14  ;;  %v2332_v49 = vadd.f32 %v8835_v36, %v12965_v16  ;;  %v12966_v22 = vld [vmem:[#allocation33_spill] sm:$0xff]  ;;  %v12967_v50 = vld [vmem:[#allocation34_spill] sm:$0xff] }
 0x288   : > { %3340 = vst [vmem:[%s8863_s19 + $0x118] sm:$0xff] %v2316_v58  ;;  %3341 = vst [vmem:[%s8863_s19 + $0x120] sm:$0xff] %v2317_v2  ;;  %v2333_v9 = vadd.f32 %v8835_v36, %v12966_v22  ;;  %v2334_v17 = vadd.f32 %v8835_v36, %v12967_v50  ;;  %v12968_v58 = vld [vmem:[#allocation35_spill] sm:$0xff]  ;;  %v12969_v2 = vld [vmem:[#allocation36_spill] sm:$0xff] }
 0x289   : > { %3342 = vst [vmem:[%s8863_s19 + $0x128] sm:$0xff] %v2318_v29  ;;  %3343 = vst [vmem:[%s8863_s19 + $0x130] sm:$0xff] %v2319_v31  ;;  %v2335_v19 = vadd.f32 %v8835_v36, %v12968_v58  ;;  %v2336_v24 = vadd.f32 %v8835_v36, %v12969_v2  ;;  %v12970_v29 = vld [vmem:[#allocation37_spill] sm:$0xff]  ;;  %v12971_v31 = vld [vmem:[#allocation38_spill] sm:$0xff] }
 0x28a   : > { %3344 = vst [vmem:[%s8863_s19 + $0x138] sm:$0xff] %v2320_v37  ;;  %3345 = vst [vmem:[%s8863_s19 + $0x140] sm:$0xff] %v2321_v39  ;;  %v2337_v30 = vadd.f32 %v8835_v36, %v12970_v29  ;;  %v2338_v32 = vadd.f32 %v8835_v36, %v12971_v31  ;;  %v12972_v37 = vld [vmem:[#allocation39_spill] sm:$0xff]  ;;  %v12973_v39 = vld [vmem:[#allocation40_spill] sm:$0xff] }
 0x28b   : > { %3346 = vst [vmem:[%s8863_s19 + $0x148] sm:$0xff] %v2322_v45  ;;  %3347 = vst [vmem:[%s8863_s19 + $0x150] sm:$0xff] %v2323_v47  ;;  %v2339_v38 = vadd.f32 %v8835_v36, %v12972_v37  ;;  %v2340_v40 = vadd.f32 %v8835_v36, %v12973_v39  ;;  %v12974_v45 = vld [vmem:[#allocation41_spill] sm:$0xff]  ;;  %v12975_v47 = vld [vmem:[#allocation42_spill] sm:$0xff] }
 0x28c   : > { %3348 = vst [vmem:[%s8863_s19 + $0x158] sm:$0xff] %v2324_v53  ;;  %3349 = vst [vmem:[%s8863_s19 + $0x160] sm:$0xff] %v2325_v55  ;;  %v2341_v46 = vadd.f32 %v8835_v36, %v12974_v45  ;;  %v2342_v48 = vadd.f32 %v8835_v36, %v12975_v47  ;;  %v12976_v53 = vld [vmem:[#allocation43_spill] sm:$0xff]  ;;  %v12977_v55 = vld [vmem:[#allocation44_spill] sm:$0xff] }
 0x28d   : > { %3350 = vst [vmem:[%s8863_s19 + $0x168] sm:$0xff] %v2326_v61  ;;  %3351 = vst [vmem:[%s8863_s19 + $0x170] sm:$0xff] %v2327_v63  ;;  %v2343_v54 = vadd.f32 %v8835_v36, %v12976_v53  ;;  %v2344_v56 = vadd.f32 %v8835_v36, %v12977_v55  ;;  %v12978_v61 = vld [vmem:[#allocation45_spill] sm:$0xff]  ;;  %v12979_v63 = vld [vmem:[#allocation46_spill] sm:$0xff] }
 0x28e   : > { %3352 = vst [vmem:[%s8863_s19 + $0x178] sm:$0xff] %v2328_v5  ;;  %3353 = vst [vmem:[%s8863_s19 + $0x180] sm:$0xff] %v2329_v7  ;;  %v2345_v62 = vadd.f32 %v8835_v36, %v12978_v61  ;;  %v2346_v0 = vadd.f32 %v8835_v36, %v12979_v63  ;;  %v12980_v5 = vld [vmem:[#allocation47_spill] sm:$0xff]  ;;  %v12981_v7 = vld [vmem:[#allocation48_spill] sm:$0xff] }
 0x28f   : > { %3354 = vst [vmem:[%s8863_s19 + $0x188] sm:$0xff] %v2330_v13  ;;  %3355 = vst [vmem:[%s8863_s19 + $0x190] sm:$0xff] %v2331_v15  ;;  %v2347_v6 = vadd.f32 %v8835_v36, %v12980_v5  ;;  %v2348_v8 = vadd.f32 %v8835_v36, %v12981_v7  ;;  %v12982_v13 = vld [vmem:[#allocation49_spill] sm:$0xff]  ;;  %v12983_v15 = vld [vmem:[#allocation50_spill] sm:$0xff] }
 0x290   : > { %3356 = vst [vmem:[%s8863_s19 + $0x198] sm:$0xff] %v2332_v49  ;;  %3357 = vst [vmem:[%s8863_s19 + $0x1a0] sm:$0xff] %v2333_v9  ;;  %v2349_v14 = vadd.f32 %v8835_v36, %v12982_v13  ;;  %v2350_v16 = vadd.f32 %v8835_v36, %v12983_v15  ;;  %v12984_v49 = vld [vmem:[#allocation51_spill] sm:$0xff]  ;;  %v12985_v9 = vld [vmem:[#allocation52_spill] sm:$0xff] }
 0x291   : > { %3358 = vst [vmem:[%s8863_s19 + $0x1a8] sm:$0xff] %v2334_v17  ;;  %3359 = vst [vmem:[%s8863_s19 + $0x1b0] sm:$0xff] %v2335_v19  ;;  %v2351_v22 = vadd.f32 %v8835_v36, %v12984_v49  ;;  %v2352_v50 = vadd.f32 %v8835_v36, %v12985_v9  ;;  %v12986_v17 = vld [vmem:[#allocation53_spill] sm:$0xff]  ;;  %v12987_v19 = vld [vmem:[#allocation54_spill] sm:$0xff] }
 0x292   : > { %3360 = vst [vmem:[%s8863_s19 + $0x1b8] sm:$0xff] %v2336_v24  ;;  %3361 = vst [vmem:[%s8863_s19 + $0x1c0] sm:$0xff] %v2337_v30  ;;  %v2353_v58 = vadd.f32 %v8835_v36, %v12986_v17  ;;  %v2354_v2 = vadd.f32 %v8835_v36, %v12987_v19  ;;  %v12988_v24 = vld [vmem:[#allocation55_spill] sm:$0xff]  ;;  %v12989_v30 = vld [vmem:[#allocation56_spill] sm:$0xff] }
 0x293   : > { %3362 = vst [vmem:[%s8863_s19 + $0x1c8] sm:$0xff] %v2338_v32  ;;  %3363 = vst [vmem:[%s8863_s19 + $0x1d0] sm:$0xff] %v2339_v38  ;;  %v2355_v29 = vadd.f32 %v8835_v36, %v12988_v24  ;;  %v2356_v31 = vadd.f32 %v8835_v36, %v12989_v30  ;;  %v12990_v32 = vld [vmem:[#allocation57_spill] sm:$0xff]  ;;  %v12991_v38 = vld [vmem:[#allocation58_spill] sm:$0xff] }
 0x294   : > { %3364 = vst [vmem:[%s8863_s19 + $0x1d8] sm:$0xff] %v2340_v40  ;;  %3365 = vst [vmem:[%s8863_s19 + $0x1e0] sm:$0xff] %v2341_v46  ;;  %v2357_v37 = vadd.f32 %v8835_v36, %v12990_v32  ;;  %v2358_v39 = vadd.f32 %v8835_v36, %v12991_v38  ;;  %v12992_v40 = vld [vmem:[#allocation59_spill] sm:$0xff]  ;;  %v12993_v46 = vld [vmem:[#allocation60_spill] sm:$0xff] }
 0x295   : > { %3366 = vst [vmem:[%s8863_s19 + $0x1e8] sm:$0xff] %v2342_v48  ;;  %3367 = vst [vmem:[%s8863_s19 + $0x1f0] sm:$0xff] %v2343_v54  ;;  %v2359_v45 = vadd.f32 %v8835_v36, %v12992_v40  ;;  %v2360_v47 = vadd.f32 %v8835_v36, %v12993_v46  ;;  %v12994_v48 = vld [vmem:[#allocation61_spill] sm:$0xff]  ;;  %v12995_v54 = vld [vmem:[#allocation62_spill] sm:$0xff] }
 0x296   : > { %3368 = vst [vmem:[%s8863_s19 + $0x1f8] sm:$0xff] %v2344_v56  ;;  %3369 = vst [vmem:[%s8863_s19 + $0x200] sm:$0xff] %v2345_v62  ;;  %v2361_v53 = vadd.f32 %v8835_v36, %v12994_v48  ;;  %v2362_v55 = vadd.f32 %v8835_v36, %v12995_v54  ;;  %v12996_v56 = vld [vmem:[#allocation63_spill] sm:$0xff]  ;;  %v12997_v62 = vld [vmem:[#allocation64_spill] sm:$0xff] }
 0x297   : > { %3370 = vst [vmem:[%s8863_s19 + $0x208] sm:$0xff] %v2346_v0  ;;  %3371 = vst [vmem:[%s8863_s19 + $0x210] sm:$0xff] %v2347_v6  ;;  %v2363_v61 = vadd.f32 %v8835_v36, %v12996_v56  ;;  %v2364_v63 = vadd.f32 %v8835_v36, %v12997_v62  ;;  %v12998_v0 = vld [vmem:[#allocation65_spill] sm:$0xff]  ;;  %v12999_v6 = vld [vmem:[#allocation66_spill] sm:$0xff] }
 0x298   : > { %3372 = vst [vmem:[%s8863_s19 + $0x218] sm:$0xff] %v2348_v8  ;;  %3373 = vst [vmem:[%s8863_s19 + $0x220] sm:$0xff] %v2349_v14  ;;  %v2365_v5 = vadd.f32 %v8835_v36, %v12998_v0  ;;  %v2366_v7 = vadd.f32 %v8835_v36, %v12999_v6  ;;  %v13000_v8 = vld [vmem:[#allocation67_spill] sm:$0xff]  ;;  %v13001_v14 = vld [vmem:[#allocation68_spill] sm:$0xff] }
 0x299   : > { %3374 = vst [vmem:[%s8863_s19 + $0x228] sm:$0xff] %v2350_v16  ;;  %3375 = vst [vmem:[%s8863_s19 + $0x230] sm:$0xff] %v2351_v22  ;;  %v2367_v13 = vadd.f32 %v8835_v36, %v13000_v8  ;;  %v2368_v15 = vadd.f32 %v8835_v36, %v13001_v14  ;;  %v13002_v16 = vld [vmem:[#allocation69_spill] sm:$0xff]  ;;  %v13003_v22 = vld [vmem:[#allocation70_spill] sm:$0xff] }
 0x29a   : > { %3376 = vst [vmem:[%s8863_s19 + $0x238] sm:$0xff] %v2352_v50  ;;  %3377 = vst [vmem:[%s8863_s19 + $0x240] sm:$0xff] %v2353_v58  ;;  %v2369_v49 = vadd.f32 %v8835_v36, %v13002_v16  ;;  %v2370_v9 = vadd.f32 %v8835_v36, %v13003_v22  ;;  %v13004_v50 = vld [vmem:[#allocation71_spill] sm:$0xff]  ;;  %v13005_v58 = vld [vmem:[#allocation72_spill] sm:$0xff] }
 0x29b   : > { %3378 = vst [vmem:[%s8863_s19 + $0x248] sm:$0xff] %v2354_v2  ;;  %3379 = vst [vmem:[%s8863_s19 + $0x250] sm:$0xff] %v2355_v29  ;;  %v2371_v17 = vadd.f32 %v8835_v36, %v13004_v50  ;;  %v2372_v19 = vadd.f32 %v8835_v36, %v13005_v58  ;;  %v13006_v2 = vld [vmem:[#allocation73_spill] sm:$0xff]  ;;  %v13007_v29 = vld [vmem:[#allocation74_spill] sm:$0xff] }
 0x29c   : > { %3380 = vst [vmem:[%s8863_s19 + $0x258] sm:$0xff] %v2356_v31  ;;  %3381 = vst [vmem:[%s8863_s19 + $0x260] sm:$0xff] %v2357_v37  ;;  %v2373_v24 = vadd.f32 %v8835_v36, %v13006_v2  ;;  %v2374_v30 = vadd.f32 %v8835_v36, %v13007_v29  ;;  %v13008_v31 = vld [vmem:[#allocation75_spill] sm:$0xff]  ;;  %v13009_v37 = vld [vmem:[#allocation76_spill] sm:$0xff] }
 0x29d   : > { %3382 = vst [vmem:[%s8863_s19 + $0x268] sm:$0xff] %v2358_v39  ;;  %3383 = vst [vmem:[%s8863_s19 + $0x270] sm:$0xff] %v2359_v45  ;;  %v2375_v32 = vadd.f32 %v8835_v36, %v13008_v31  ;;  %v2376_v38 = vadd.f32 %v8835_v36, %v13009_v37  ;;  %v13010_v39 = vld [vmem:[#allocation77_spill] sm:$0xff]  ;;  %v13011_v45 = vld [vmem:[#allocation78_spill] sm:$0xff] }
 0x29e   : > { %3384 = vst [vmem:[%s8863_s19 + $0x278] sm:$0xff] %v2360_v47  ;;  %3385 = vst [vmem:[%s8863_s19 + $0x280] sm:$0xff] %v2361_v53  ;;  %v2377_v40 = vadd.f32 %v8835_v36, %v13010_v39  ;;  %v2378_v46 = vadd.f32 %v8835_v36, %v13011_v45  ;;  %v13012_v47 = vld [vmem:[#allocation79_spill] sm:$0xff]  ;;  %v13013_v53 = vld [vmem:[#allocation80_spill] sm:$0xff] }
 0x29f   : > { %3386 = vst [vmem:[%s8863_s19 + $0x288] sm:$0xff] %v2362_v55  ;;  %3387 = vst [vmem:[%s8863_s19 + $0x290] sm:$0xff] %v2363_v61  ;;  %v2379_v48 = vadd.f32 %v8835_v36, %v13012_v47  ;;  %v2380_v54 = vadd.f32 %v8835_v36, %v13013_v53  ;;  %v13014_v55 = vld [vmem:[#allocation81_spill] sm:$0xff]  ;;  %v13015_v61 = vld [vmem:[#allocation82_spill] sm:$0xff] }
 0x2a0   : > { %3388 = vst [vmem:[%s8863_s19 + $0x298] sm:$0xff] %v2364_v63  ;;  %3389 = vst [vmem:[%s8863_s19 + $0x2a0] sm:$0xff] %v2365_v5  ;;  %v2381_v56 = vadd.f32 %v8835_v36, %v13014_v55  ;;  %v2382_v62 = vadd.f32 %v8835_v36, %v13015_v61  ;;  %v13016_v63 = vld [vmem:[#allocation83_spill] sm:$0xff]  ;;  %v13017_v5 = vld [vmem:[#allocation84_spill] sm:$0xff] }
 0x2a1   : > { %3390 = vst [vmem:[%s8863_s19 + $0x2a8] sm:$0xff] %v2366_v7  ;;  %3391 = vst [vmem:[%s8863_s19 + $0x2b0] sm:$0xff] %v2367_v13  ;;  %v2383_v0 = vadd.f32 %v8835_v36, %v13016_v63  ;;  %v2384_v6 = vadd.f32 %v8835_v36, %v13017_v5  ;;  %v13018_v7 = vld [vmem:[#allocation85_spill] sm:$0xff]  ;;  %v13019_v13 = vld [vmem:[#allocation86_spill] sm:$0xff] }
 0x2a2   : > { %3392 = vst [vmem:[%s8863_s19 + $0x2b8] sm:$0xff] %v2368_v15  ;;  %3393 = vst [vmem:[%s8863_s19 + $0x2c0] sm:$0xff] %v2369_v49  ;;  %v2385_v8 = vadd.f32 %v8835_v36, %v13018_v7  ;;  %v2386_v14 = vadd.f32 %v8835_v36, %v13019_v13  ;;  %v13020_v15 = vld [vmem:[#allocation87_spill] sm:$0xff]  ;;  %v13021_v49 = vld [vmem:[#allocation88_spill] sm:$0xff] }
 0x2a3   : > { %3394 = vst [vmem:[%s8863_s19 + $0x2c8] sm:$0xff] %v2370_v9  ;;  %3395 = vst [vmem:[%s8863_s19 + $0x2d0] sm:$0xff] %v2371_v17  ;;  %v2387_v16 = vadd.f32 %v8835_v36, %v13020_v15  ;;  %v2388_v22 = vadd.f32 %v8835_v36, %v13021_v49  ;;  %v13022_v9 = vld [vmem:[#allocation89_spill] sm:$0xff]  ;;  %v13023_v17 = vld [vmem:[#allocation90_spill] sm:$0xff] }
 0x2a4   : > { %3396 = vst [vmem:[%s8863_s19 + $0x2d8] sm:$0xff] %v2372_v19  ;;  %3397 = vst [vmem:[%s8863_s19 + $0x2e0] sm:$0xff] %v2373_v24  ;;  %v2389_v50 = vadd.f32 %v8835_v36, %v13022_v9  ;;  %v2390_v58 = vadd.f32 %v8835_v36, %v13023_v17  ;;  %v13024_v19 = vld [vmem:[#allocation91_spill] sm:$0xff]  ;;  %v13025_v24 = vld [vmem:[#allocation92_spill] sm:$0xff] }
 0x2a5   : > { %3398 = vst [vmem:[%s8863_s19 + $0x2e8] sm:$0xff] %v2374_v30  ;;  %3399 = vst [vmem:[%s8863_s19 + $0x2f0] sm:$0xff] %v2375_v32  ;;  %v2391_v2 = vadd.f32 %v8835_v36, %v13024_v19  ;;  %v2392_v29 = vadd.f32 %v8835_v36, %v13025_v24  ;;  %v13026_v30 = vld [vmem:[#allocation93_spill] sm:$0xff]  ;;  %v13027_v32 = vld [vmem:[#allocation94_spill] sm:$0xff] }
 0x2a6   : > { %3400 = vst [vmem:[%s8863_s19 + $0x2f8] sm:$0xff] %v2376_v38  ;;  %3401 = vst [vmem:[%s8863_s19 + $0x300] sm:$0xff] %v2377_v40  ;;  %v2393_v31 = vadd.f32 %v8835_v36, %v13026_v30  ;;  %v2394_v37 = vadd.f32 %v8835_v36, %v13027_v32  ;;  %v13028_v38 = vld [vmem:[#allocation95_spill] sm:$0xff]  ;;  %v13029_v40 = vld [vmem:[#allocation96_spill] sm:$0xff] }
 0x2a7   : > { %3402 = vst [vmem:[%s8863_s19 + $0x308] sm:$0xff] %v2378_v46  ;;  %3403 = vst [vmem:[%s8863_s19 + $0x310] sm:$0xff] %v2379_v48  ;;  %v2395_v39 = vadd.f32 %v8835_v36, %v13028_v38  ;;  %v2396_v45 = vadd.f32 %v8835_v36, %v13029_v40  ;;  %v13030_v46 = vld [vmem:[#allocation97_spill] sm:$0xff]  ;;  %v13031_v48 = vld [vmem:[#allocation98_spill] sm:$0xff] }
 0x2a8   : > { %3404 = vst [vmem:[%s8863_s19 + $0x318] sm:$0xff] %v2380_v54  ;;  %3405 = vst [vmem:[%s8863_s19 + $0x320] sm:$0xff] %v2381_v56  ;;  %v2397_v47 = vadd.f32 %v8835_v36, %v13030_v46  ;;  %v2398_v53 = vadd.f32 %v8835_v36, %v13031_v48  ;;  %v13032_v54 = vld [vmem:[#allocation99_spill] sm:$0xff]  ;;  %v13033_v56 = vld [vmem:[#allocation100_spill] sm:$0xff] }
 0x2a9   : > { %3406 = vst [vmem:[%s8863_s19 + $0x328] sm:$0xff] %v2382_v62  ;;  %3407 = vst [vmem:[%s8863_s19 + $0x330] sm:$0xff] %v2383_v0  ;;  %v2399_v55 = vadd.f32 %v8835_v36, %v13032_v54  ;;  %v2400_v61 = vadd.f32 %v8835_v36, %v13033_v56  ;;  %v13034_v62 = vld [vmem:[#allocation101_spill] sm:$0xff]  ;;  %v13035_v0 = vld [vmem:[#allocation102_spill] sm:$0xff] }
 0x2aa   : > { %3408 = vst [vmem:[%s8863_s19 + $0x338] sm:$0xff] %v2384_v6  ;;  %3409 = vst [vmem:[%s8863_s19 + $0x340] sm:$0xff] %v2385_v8  ;;  %v2401_v63 = vadd.f32 %v8835_v36, %v13034_v62  ;;  %v2402_v5 = vadd.f32 %v8835_v36, %v13035_v0  ;;  %v13036_v6 = vld [vmem:[#allocation103_spill] sm:$0xff]  ;;  %v13037_v8 = vld [vmem:[#allocation104_spill] sm:$0xff] }
 0x2ab   : > { %3410 = vst [vmem:[%s8863_s19 + $0x348] sm:$0xff] %v2386_v14  ;;  %3411 = vst [vmem:[%s8863_s19 + $0x350] sm:$0xff] %v2387_v16  ;;  %v2403_v7 = vadd.f32 %v8835_v36, %v13036_v6  ;;  %v2404_v13 = vadd.f32 %v8835_v36, %v13037_v8  ;;  %v13038_v14 = vld [vmem:[#allocation105_spill] sm:$0xff]  ;;  %v13039_v16 = vld [vmem:[#allocation106_spill] sm:$0xff] }
 0x2ac   : > { %3412 = vst [vmem:[%s8863_s19 + $0x358] sm:$0xff] %v2388_v22  ;;  %3413 = vst [vmem:[%s8863_s19 + $0x360] sm:$0xff] %v2389_v50  ;;  %v2405_v15 = vadd.f32 %v8835_v36, %v13038_v14  ;;  %v2406_v49 = vadd.f32 %v8835_v36, %v13039_v16  ;;  %v13040_v22 = vld [vmem:[#allocation107_spill] sm:$0xff]  ;;  %v13041_v50 = vld [vmem:[#allocation108_spill] sm:$0xff] }
 0x2ad   : > { %3414 = vst [vmem:[%s8863_s19 + $0x368] sm:$0xff] %v2390_v58  ;;  %3415 = vst [vmem:[%s8863_s19 + $0x370] sm:$0xff] %v2391_v2  ;;  %v2407_v9 = vadd.f32 %v8835_v36, %v13040_v22  ;;  %v2408_v17 = vadd.f32 %v8835_v36, %v13041_v50  ;;  %v13042_v58 = vld [vmem:[#allocation109_spill] sm:$0xff]  ;;  %v13043_v2 = vld [vmem:[#allocation110_spill] sm:$0xff] }
 0x2ae   : > { %3416 = vst [vmem:[%s8863_s19 + $0x378] sm:$0xff] %v2392_v29  ;;  %3417 = vst [vmem:[%s8863_s19 + $0x380] sm:$0xff] %v2393_v31  ;;  %v2409_v19 = vadd.f32 %v8835_v36, %v13042_v58  ;;  %v2410_v24 = vadd.f32 %v8835_v36, %v13043_v2  ;;  %v13044_v29 = vld [vmem:[#allocation111_spill] sm:$0xff]  ;;  %v13045_v31 = vld [vmem:[#allocation112_spill] sm:$0xff] }
 0x2af   : > { %3418 = vst [vmem:[%s8863_s19 + $0x388] sm:$0xff] %v2394_v37  ;;  %3419 = vst [vmem:[%s8863_s19 + $0x390] sm:$0xff] %v2395_v39  ;;  %v2411_v30 = vadd.f32 %v8835_v36, %v13044_v29  ;;  %v2412_v32 = vadd.f32 %v8835_v36, %v13045_v31  ;;  %v13046_v37 = vld [vmem:[#allocation113_spill] sm:$0xff]  ;;  %v13047_v39 = vld [vmem:[#allocation114_spill] sm:$0xff] }
 0x2b0   : > { %3420 = vst [vmem:[%s8863_s19 + $0x398] sm:$0xff] %v2396_v45  ;;  %3421 = vst [vmem:[%s8863_s19 + $0x3a0] sm:$0xff] %v2397_v47  ;;  %v2413_v38 = vadd.f32 %v8835_v36, %v13046_v37  ;;  %v2414_v40 = vadd.f32 %v8835_v36, %v13047_v39  ;;  %v13048_v45 = vld [vmem:[#allocation115_spill] sm:$0xff]  ;;  %v13049_v47 = vld [vmem:[#allocation116_spill] sm:$0xff] }
 0x2b1   : > { %3422 = vst [vmem:[%s8863_s19 + $0x3a8] sm:$0xff] %v2398_v53  ;;  %3423 = vst [vmem:[%s8863_s19 + $0x3b0] sm:$0xff] %v2399_v55  ;;  %v2415_v46 = vadd.f32 %v8835_v36, %v13048_v45  ;;  %v2416_v48 = vadd.f32 %v8835_v36, %v13049_v47  ;;  %v13050_v53 = vld [vmem:[#allocation117_spill] sm:$0xff]  ;;  %v13051_v55 = vld [vmem:[#allocation118_spill] sm:$0xff] }
 0x2b2   : > { %3424 = vst [vmem:[%s8863_s19 + $0x3b8] sm:$0xff] %v2400_v61  ;;  %3425 = vst [vmem:[%s8863_s19 + $0x3c0] sm:$0xff] %v2401_v63  ;;  %v2417_v54 = vadd.f32 %v8835_v36, %v13050_v53  ;;  %v2418_v56 = vadd.f32 %v8835_v36, %v13051_v55  ;;  %v13052_v61 = vld [vmem:[#allocation119_spill] sm:$0xff]  ;;  %v13053_v63 = vld [vmem:[#allocation120_spill] sm:$0xff] }
 0x2b3   : > { %3426 = vst [vmem:[%s8863_s19 + $0x3c8] sm:$0xff] %v2402_v5  ;;  %3427 = vst [vmem:[%s8863_s19 + $0x3d0] sm:$0xff] %v2403_v7  ;;  %v2419_v62 = vadd.f32 %v8835_v36, %v13052_v61  ;;  %v2420_v0 = vadd.f32 %v8835_v36, %v13053_v63  ;;  %v13054_v5 = vld [vmem:[#allocation121_spill] sm:$0xff]  ;;  %v13055_v7 = vld [vmem:[#allocation122_spill] sm:$0xff] }
 0x2b4   : > { %3428 = vst [vmem:[%s8863_s19 + $0x3d8] sm:$0xff] %v2404_v13  ;;  %3429 = vst [vmem:[%s8863_s19 + $0x3e0] sm:$0xff] %v2405_v15  ;;  %v2421_v6 = vadd.f32 %v8835_v36, %v13054_v5  ;;  %v2422_v8 = vadd.f32 %v8835_v36, %v13055_v7  ;;  %v13056_v13 = vld [vmem:[#allocation123_spill] sm:$0xff]  ;;  %v13057_v15 = vld [vmem:[#allocation124_spill] sm:$0xff] }
 0x2b5   : > { %3430 = vst [vmem:[%s8863_s19 + $0x3e8] sm:$0xff] %v2406_v49  ;;  %3431 = vst [vmem:[%s8863_s19 + $0x3f0] sm:$0xff] %v2407_v9  ;;  %v2423_v14 = vadd.f32 %v8835_v36, %v13056_v13  ;;  %v2424_v16 = vadd.f32 %v8835_v36, %v13057_v15  ;;  %v13058_v49 = vld [vmem:[#allocation125_spill] sm:$0xff]  ;;  %v13059_v9 = vld [vmem:[#allocation126_spill] sm:$0xff] }
 0x2b6   : > { %3432 = vst [vmem:[%s8863_s19 + $0x3f8] sm:$0xff] %v2408_v17  ;;  %3433 = vst [vmem:[%s8863_s19 + $0x400] sm:$0xff] %v2409_v19  ;;  %v2425_v22 = vadd.f32 %v8835_v36, %v13058_v49  ;;  %v2426_v50 = vadd.f32 %v8835_v36, %v13059_v9  ;;  %v13060_v17 = vld [vmem:[#allocation127_spill] sm:$0xff]  ;;  %v13061_v19 = vld [vmem:[#allocation128_spill] sm:$0xff] }
 0x2b7   : > { %3434 = vst [vmem:[%s8863_s19 + $0x408] sm:$0xff] %v2410_v24  ;;  %3435 = vst [vmem:[%s8863_s19 + $0x410] sm:$0xff] %v2411_v30  ;;  %v2427_v58 = vadd.f32 %v8835_v36, %v13060_v17  ;;  %v2428_v2 = vadd.f32 %v8835_v36, %v13061_v19  ;;  %v13062_v24 = vld [vmem:[#allocation129_spill] sm:$0xff]  ;;  %v13063_v30 = vld [vmem:[#allocation130_spill] sm:$0xff] }
 0x2b8   : > { %3436 = vst [vmem:[%s8863_s19 + $0x418] sm:$0xff] %v2412_v32  ;;  %3437 = vst [vmem:[%s8863_s19 + $0x420] sm:$0xff] %v2413_v38  ;;  %v2429_v29 = vadd.f32 %v8835_v36, %v13062_v24  ;;  %v2430_v31 = vadd.f32 %v8835_v36, %v13063_v30  ;;  %v13064_v32 = vld [vmem:[#allocation131_spill] sm:$0xff]  ;;  %v13065_v38 = vld [vmem:[#allocation132_spill] sm:$0xff] }
 0x2b9   : > { %3438 = vst [vmem:[%s8863_s19 + $0x428] sm:$0xff] %v2414_v40  ;;  %3439 = vst [vmem:[%s8863_s19 + $0x430] sm:$0xff] %v2415_v46  ;;  %v2431_v37 = vadd.f32 %v8835_v36, %v13064_v32  ;;  %v2432_v39 = vadd.f32 %v8835_v36, %v13065_v38  ;;  %v13066_v40 = vld [vmem:[#allocation133_spill] sm:$0xff]  ;;  %v13067_v46 = vld [vmem:[#allocation134_spill] sm:$0xff] }
 0x2ba   : > { %3440 = vst [vmem:[%s8863_s19 + $0x438] sm:$0xff] %v2416_v48  ;;  %3441 = vst [vmem:[%s8863_s19 + $0x440] sm:$0xff] %v2417_v54  ;;  %v2433_v45 = vadd.f32 %v8835_v36, %v13066_v40  ;;  %v2434_v47 = vadd.f32 %v8835_v36, %v13067_v46  ;;  %v13068_v48 = vld [vmem:[#allocation135_spill] sm:$0xff]  ;;  %v13069_v54 = vld [vmem:[#allocation136_spill] sm:$0xff] }
 0x2bb   : > { %3442 = vst [vmem:[%s8863_s19 + $0x448] sm:$0xff] %v2418_v56  ;;  %3443 = vst [vmem:[%s8863_s19 + $0x450] sm:$0xff] %v2419_v62  ;;  %v2435_v53 = vadd.f32 %v8835_v36, %v13068_v48  ;;  %v2436_v55 = vadd.f32 %v8835_v36, %v13069_v54  ;;  %v13070_v56 = vld [vmem:[#allocation137_spill] sm:$0xff]  ;;  %v13071_v62 = vld [vmem:[#allocation138_spill] sm:$0xff] }
 0x2bc   : > { %3444 = vst [vmem:[%s8863_s19 + $0x458] sm:$0xff] %v2420_v0  ;;  %3445 = vst [vmem:[%s8863_s19 + $0x460] sm:$0xff] %v2421_v6  ;;  %v2437_v61 = vadd.f32 %v8835_v36, %v13070_v56  ;;  %v2438_v63 = vadd.f32 %v8835_v36, %v13071_v62  ;;  %v13072_v0 = vld [vmem:[#allocation139_spill] sm:$0xff]  ;;  %v13073_v6 = vld [vmem:[#allocation140_spill] sm:$0xff] }
 0x2bd   : > { %3446 = vst [vmem:[%s8863_s19 + $0x468] sm:$0xff] %v2422_v8  ;;  %3447 = vst [vmem:[%s8863_s19 + $0x470] sm:$0xff] %v2423_v14  ;;  %v2439_v5 = vadd.f32 %v8835_v36, %v13072_v0  ;;  %v2440_v7 = vadd.f32 %v8835_v36, %v13073_v6  ;;  %v13074_v8 = vld [vmem:[#allocation141_spill] sm:$0xff]  ;;  %v13075_v14 = vld [vmem:[#allocation142_spill] sm:$0xff] }
 0x2be   : > { %3448 = vst [vmem:[%s8863_s19 + $0x478] sm:$0xff] %v2424_v16  ;;  %3449 = vst [vmem:[%s8863_s19 + $0x480] sm:$0xff] %v2425_v22  ;;  %v2441_v13 = vadd.f32 %v8835_v36, %v13074_v8  ;;  %v2442_v15 = vadd.f32 %v8835_v36, %v13075_v14  ;;  %v13076_v16 = vld [vmem:[#allocation143_spill] sm:$0xff]  ;;  %v13077_v22 = vld [vmem:[#allocation144_spill] sm:$0xff] }
 0x2bf   : > { %3450 = vst [vmem:[%s8863_s19 + $0x488] sm:$0xff] %v2426_v50  ;;  %3451 = vst [vmem:[%s8863_s19 + $0x490] sm:$0xff] %v2427_v58  ;;  %v2443_v49 = vadd.f32 %v8835_v36, %v13076_v16  ;;  %v2444_v9 = vadd.f32 %v8835_v36, %v13077_v22  ;;  %v13078_v50 = vld [vmem:[#allocation145_spill] sm:$0xff]  ;;  %v13079_v58 = vld [vmem:[#allocation146_spill] sm:$0xff] }
 0x2c0   : > { %3452 = vst [vmem:[%s8863_s19 + $0x498] sm:$0xff] %v2428_v2  ;;  %3453 = vst [vmem:[%s8863_s19 + $0x4a0] sm:$0xff] %v2429_v29  ;;  %v2445_v17 = vadd.f32 %v8835_v36, %v13078_v50  ;;  %v2446_v19 = vadd.f32 %v8835_v36, %v13079_v58  ;;  %v13080_v2 = vld [vmem:[#allocation147_spill] sm:$0xff]  ;;  %v13081_v29 = vld [vmem:[#allocation148_spill] sm:$0xff] }
 0x2c1   : > { %3454 = vst [vmem:[%s8863_s19 + $0x4a8] sm:$0xff] %v2430_v31  ;;  %3455 = vst [vmem:[%s8863_s19 + $0x4b0] sm:$0xff] %v2431_v37  ;;  %v2447_v24 = vadd.f32 %v8835_v36, %v13080_v2  ;;  %v2448_v30 = vadd.f32 %v8835_v36, %v13081_v29  ;;  %v13082_v31 = vld [vmem:[#allocation149_spill] sm:$0xff]  ;;  %v13083_v37 = vld [vmem:[#allocation150_spill] sm:$0xff] }
 0x2c2   : > { %3456 = vst [vmem:[%s8863_s19 + $0x4b8] sm:$0xff] %v2432_v39  ;;  %3457 = vst [vmem:[%s8863_s19 + $0x4c0] sm:$0xff] %v2433_v45  ;;  %v2449_v32 = vadd.f32 %v8835_v36, %v13082_v31  ;;  %v2450_v38 = vadd.f32 %v8835_v36, %v13083_v37  ;;  %v13084_v39 = vld [vmem:[#allocation151_spill] sm:$0xff]  ;;  %v13085_v45 = vld [vmem:[#allocation152_spill] sm:$0xff] }
 0x2c3   : > { %3458 = vst [vmem:[%s8863_s19 + $0x4c8] sm:$0xff] %v2434_v47  ;;  %3459 = vst [vmem:[%s8863_s19 + $0x4d0] sm:$0xff] %v2435_v53  ;;  %v2451_v40 = vadd.f32 %v8835_v36, %v13084_v39  ;;  %v2452_v46 = vadd.f32 %v8835_v36, %v13085_v45  ;;  %v13086_v47 = vld [vmem:[#allocation153_spill] sm:$0xff]  ;;  %v13087_v53 = vld [vmem:[#allocation154_spill] sm:$0xff] }
 0x2c4   : > { %3460 = vst [vmem:[%s8863_s19 + $0x4d8] sm:$0xff] %v2436_v55  ;;  %3461 = vst [vmem:[%s8863_s19 + $0x4e0] sm:$0xff] %v2437_v61  ;;  %v2453_v48 = vadd.f32 %v8835_v36, %v13086_v47  ;;  %v2454_v54 = vadd.f32 %v8835_v36, %v13087_v53  ;;  %v13088_v55 = vld [vmem:[#allocation155_spill] sm:$0xff]  ;;  %v13089_v61 = vld [vmem:[#allocation156_spill] sm:$0xff] }
 0x2c5   : > { %3462 = vst [vmem:[%s8863_s19 + $0x4e8] sm:$0xff] %v2438_v63  ;;  %3463 = vst [vmem:[%s8863_s19 + $0x4f0] sm:$0xff] %v2439_v5  ;;  %v2455_v56 = vadd.f32 %v8835_v36, %v13088_v55  ;;  %v2456_v62 = vadd.f32 %v8835_v36, %v13089_v61  ;;  %v13090_v63 = vld [vmem:[#allocation157_spill] sm:$0xff]  ;;  %v13091_v5 = vld [vmem:[#allocation158_spill] sm:$0xff] }
 0x2c6   : > { %3464 = vst [vmem:[%s8863_s19 + $0x4f8] sm:$0xff] %v2440_v7  ;;  %3465 = vst [vmem:[%s8863_s19 + $0x500] sm:$0xff] %v2441_v13  ;;  %v2457_v0 = vadd.f32 %v8835_v36, %v13090_v63  ;;  %v2458_v6 = vadd.f32 %v8835_v36, %v13091_v5  ;;  %v13092_v7 = vld [vmem:[#allocation159_spill] sm:$0xff]  ;;  %v13093_v13 = vld [vmem:[#allocation160_spill] sm:$0xff] }
 0x2c7   : > { %3466 = vst [vmem:[%s8863_s19 + $0x508] sm:$0xff] %v2442_v15  ;;  %3467 = vst [vmem:[%s8863_s19 + $0x510] sm:$0xff] %v2443_v49  ;;  %v2459_v8 = vadd.f32 %v8835_v36, %v13092_v7  ;;  %v2460_v14 = vadd.f32 %v8835_v36, %v13093_v13  ;;  %v13094_v15 = vld [vmem:[#allocation161_spill] sm:$0xff]  ;;  %v13095_v49 = vld [vmem:[#allocation162_spill] sm:$0xff] }
 0x2c8   : > { %3468 = vst [vmem:[%s8863_s19 + $0x518] sm:$0xff] %v2444_v9  ;;  %3469 = vst [vmem:[%s8863_s19 + $0x520] sm:$0xff] %v2445_v17  ;;  %v2461_v16 = vadd.f32 %v8835_v36, %v13094_v15  ;;  %v2462_v22 = vadd.f32 %v8835_v36, %v13095_v49  ;;  %v13096_v9 = vld [vmem:[#allocation163_spill] sm:$0xff]  ;;  %v13097_v17 = vld [vmem:[#allocation164_spill] sm:$0xff] }
 0x2c9   : > { %3470 = vst [vmem:[%s8863_s19 + $0x528] sm:$0xff] %v2446_v19  ;;  %3471 = vst [vmem:[%s8863_s19 + $0x530] sm:$0xff] %v2447_v24  ;;  %v2463_v50 = vadd.f32 %v8835_v36, %v13096_v9  ;;  %v2464_v58 = vadd.f32 %v8835_v36, %v13097_v17  ;;  %v13098_v19 = vld [vmem:[#allocation165_spill] sm:$0xff]  ;;  %v13099_v24 = vld [vmem:[#allocation166_spill] sm:$0xff] }
 0x2ca   : > { %3472 = vst [vmem:[%s8863_s19 + $0x538] sm:$0xff] %v2448_v30  ;;  %3473 = vst [vmem:[%s8863_s19 + $0x540] sm:$0xff] %v2449_v32  ;;  %v2465_v2 = vadd.f32 %v8835_v36, %v13098_v19  ;;  %v2466_v29 = vadd.f32 %v8835_v36, %v13099_v24  ;;  %v13100_v30 = vld [vmem:[#allocation167_spill] sm:$0xff]  ;;  %v13101_v32 = vld [vmem:[#allocation168_spill] sm:$0xff] }
 0x2cb   : > { %3474 = vst [vmem:[%s8863_s19 + $0x548] sm:$0xff] %v2450_v38  ;;  %3475 = vst [vmem:[%s8863_s19 + $0x550] sm:$0xff] %v2451_v40  ;;  %v2467_v31 = vadd.f32 %v8835_v36, %v13100_v30  ;;  %v2468_v37 = vadd.f32 %v8835_v36, %v13101_v32  ;;  %v13102_v38 = vld [vmem:[#allocation169_spill] sm:$0xff]  ;;  %v13103_v40 = vld [vmem:[#allocation170_spill] sm:$0xff] }
 0x2cc   : > { %3476 = vst [vmem:[%s8863_s19 + $0x558] sm:$0xff] %v2452_v46  ;;  %3477 = vst [vmem:[%s8863_s19 + $0x560] sm:$0xff] %v2453_v48  ;;  %v2469_v39 = vadd.f32 %v8835_v36, %v13102_v38  ;;  %v2470_v45 = vadd.f32 %v8835_v36, %v13103_v40  ;;  %v13104_v46 = vld [vmem:[#allocation171_spill] sm:$0xff]  ;;  %v13105_v48 = vld [vmem:[#allocation172_spill] sm:$0xff] }
 0x2cd   : > { %3478 = vst [vmem:[%s8863_s19 + $0x568] sm:$0xff] %v2454_v54  ;;  %3479 = vst [vmem:[%s8863_s19 + $0x570] sm:$0xff] %v2455_v56  ;;  %v2471_v47 = vadd.f32 %v8835_v36, %v13104_v46  ;;  %v2472_v53 = vadd.f32 %v8835_v36, %v13105_v48  ;;  %v13106_v54 = vld [vmem:[#allocation173_spill] sm:$0xff]  ;;  %v13107_v56 = vld [vmem:[#allocation174_spill] sm:$0xff] }
 0x2ce   : > { %3480 = vst [vmem:[%s8863_s19 + $0x578] sm:$0xff] %v2456_v62  ;;  %3481 = vst [vmem:[%s8863_s19 + $0x580] sm:$0xff] %v2457_v0  ;;  %v2473_v55 = vadd.f32 %v8835_v36, %v13106_v54  ;;  %v2474_v61 = vadd.f32 %v8835_v36, %v13107_v56  ;;  %v13108_v62 = vld [vmem:[#allocation175_spill] sm:$0xff]  ;;  %v13109_v0 = vld [vmem:[#allocation176_spill] sm:$0xff] }
 0x2cf   : > { %3482 = vst [vmem:[%s8863_s19 + $0x588] sm:$0xff] %v2458_v6  ;;  %3483 = vst [vmem:[%s8863_s19 + $0x590] sm:$0xff] %v2459_v8  ;;  %v2475_v63 = vadd.f32 %v8835_v36, %v13108_v62  ;;  %v2476_v5 = vadd.f32 %v8835_v36, %v13109_v0  ;;  %v13110_v6 = vld [vmem:[#allocation177_spill] sm:$0xff]  ;;  %v13111_v8 = vld [vmem:[#allocation178_spill] sm:$0xff] }
 0x2d0   : > { %3484 = vst [vmem:[%s8863_s19 + $0x598] sm:$0xff] %v2460_v14  ;;  %3485 = vst [vmem:[%s8863_s19 + $0x5a0] sm:$0xff] %v2461_v16  ;;  %v2477_v7 = vadd.f32 %v8835_v36, %v13110_v6  ;;  %v2478_v13 = vadd.f32 %v8835_v36, %v13111_v8  ;;  %v13112_v14 = vld [vmem:[#allocation179_spill] sm:$0xff]  ;;  %v13113_v16 = vld [vmem:[#allocation180_spill] sm:$0xff] }
 0x2d1   : > { %3486 = vst [vmem:[%s8863_s19 + $0x5a8] sm:$0xff] %v2462_v22  ;;  %3487 = vst [vmem:[%s8863_s19 + $0x5b0] sm:$0xff] %v2463_v50  ;;  %v2479_v15 = vadd.f32 %v8835_v36, %v13112_v14  ;;  %v2480_v49 = vadd.f32 %v8835_v36, %v13113_v16  ;;  %v13114_v22 = vld [vmem:[#allocation181_spill] sm:$0xff]  ;;  %v13115_v50 = vld [vmem:[#allocation182_spill] sm:$0xff] }
 0x2d2   : > { %3488 = vst [vmem:[%s8863_s19 + $0x5b8] sm:$0xff] %v2464_v58  ;;  %3489 = vst [vmem:[%s8863_s19 + $0x5c0] sm:$0xff] %v2465_v2  ;;  %v2481_v9 = vadd.f32 %v8835_v36, %v13114_v22  ;;  %v2482_v17 = vadd.f32 %v8835_v36, %v13115_v50  ;;  %v13116_v58 = vld [vmem:[#allocation183_spill] sm:$0xff]  ;;  %v13117_v2 = vld [vmem:[#allocation184_spill] sm:$0xff] }
 0x2d3   : > { %3490 = vst [vmem:[%s8863_s19 + $0x5c8] sm:$0xff] %v2466_v29  ;;  %3491 = vst [vmem:[%s8863_s19 + $0x5d0] sm:$0xff] %v2467_v31  ;;  %v2483_v19 = vadd.f32 %v8835_v36, %v13116_v58  ;;  %v2484_v24 = vadd.f32 %v8835_v36, %v13117_v2  ;;  %v13118_v29 = vld [vmem:[#allocation185_spill] sm:$0xff]  ;;  %v13119_v31 = vld [vmem:[#allocation186_spill] sm:$0xff] }
 0x2d4   : > { %3492 = vst [vmem:[%s8863_s19 + $0x5d8] sm:$0xff] %v2468_v37  ;;  %3493 = vst [vmem:[%s8863_s19 + $0x5e0] sm:$0xff] %v2469_v39  ;;  %v2485_v30 = vadd.f32 %v8835_v36, %v13118_v29  ;;  %v2486_v32 = vadd.f32 %v8835_v36, %v13119_v31  ;;  %v13120_v37 = vld [vmem:[#allocation187_spill] sm:$0xff]  ;;  %v13121_v39 = vld [vmem:[#allocation188_spill] sm:$0xff] }
 0x2d5   : > { %3494 = vst [vmem:[%s8863_s19 + $0x5e8] sm:$0xff] %v2470_v45  ;;  %3495 = vst [vmem:[%s8863_s19 + $0x5f0] sm:$0xff] %v2471_v47  ;;  %v2487_v38 = vadd.f32 %v8835_v36, %v13120_v37  ;;  %v2488_v40 = vadd.f32 %v8835_v36, %v13121_v39  ;;  %v13122_v45 = vld [vmem:[#allocation189_spill] sm:$0xff]  ;;  %v13123_v47 = vld [vmem:[#allocation190_spill] sm:$0xff] }
 0x2d6   : > { %3496 = vst [vmem:[%s8863_s19 + $0x5f8] sm:$0xff] %v2472_v53  ;;  %3497 = vst [vmem:[%s8863_s19 + $0x600] sm:$0xff] %v2473_v55  ;;  %v2489_v46 = vadd.f32 %v8835_v36, %v13122_v45  ;;  %v2490_v48 = vadd.f32 %v8835_v36, %v13123_v47  ;;  %v13124_v53 = vld [vmem:[#allocation191_spill] sm:$0xff]  ;;  %v13125_v55 = vld [vmem:[#allocation192_spill] sm:$0xff] }
 0x2d7   : > { %3498 = vst [vmem:[%s8863_s19 + $0x608] sm:$0xff] %v2474_v61  ;;  %3499 = vst [vmem:[%s8863_s19 + $0x610] sm:$0xff] %v2475_v63  ;;  %v2491_v54 = vadd.f32 %v8835_v36, %v13124_v53  ;;  %v2492_v56 = vadd.f32 %v8835_v36, %v13125_v55  ;;  %v13126_v61 = vld [vmem:[#allocation193_spill] sm:$0xff]  ;;  %v13127_v63 = vld [vmem:[#allocation194_spill] sm:$0xff] }
 0x2d8   : > { %3500 = vst [vmem:[%s8863_s19 + $0x618] sm:$0xff] %v2476_v5  ;;  %3501 = vst [vmem:[%s8863_s19 + $0x620] sm:$0xff] %v2477_v7  ;;  %v2493_v62 = vadd.f32 %v8835_v36, %v13126_v61  ;;  %v2494_v0 = vadd.f32 %v8835_v36, %v13127_v63  ;;  %v13128_v5 = vld [vmem:[#allocation195_spill] sm:$0xff]  ;;  %v13129_v7 = vld [vmem:[#allocation196_spill] sm:$0xff] }
 0x2d9   : > { %3502 = vst [vmem:[%s8863_s19 + $0x628] sm:$0xff] %v2478_v13  ;;  %3503 = vst [vmem:[%s8863_s19 + $0x630] sm:$0xff] %v2479_v15  ;;  %v2495_v6 = vadd.f32 %v8835_v36, %v13128_v5  ;;  %v2496_v8 = vadd.f32 %v8835_v36, %v13129_v7  ;;  %v13130_v13 = vld [vmem:[#allocation197_spill] sm:$0xff]  ;;  %v13131_v15 = vld [vmem:[#allocation198_spill] sm:$0xff] }
 0x2da   : > { %3504 = vst [vmem:[%s8863_s19 + $0x638] sm:$0xff] %v2480_v49  ;;  %3505 = vst [vmem:[%s8863_s19 + $0x640] sm:$0xff] %v2481_v9  ;;  %v2497_v14 = vadd.f32 %v8835_v36, %v13130_v13  ;;  %v2498_v16 = vadd.f32 %v8835_v36, %v13131_v15  ;;  %v13132_v49 = vld [vmem:[#allocation199_spill] sm:$0xff]  ;;  %v13133_v9 = vld [vmem:[#allocation200_spill] sm:$0xff] }
 0x2db   : > { %3506 = vst [vmem:[%s8863_s19 + $0x648] sm:$0xff] %v2482_v17  ;;  %3507 = vst [vmem:[%s8863_s19 + $0x650] sm:$0xff] %v2483_v19  ;;  %v2499_v22 = vadd.f32 %v8835_v36, %v13132_v49  ;;  %v2500_v50 = vadd.f32 %v8835_v36, %v13133_v9  ;;  %v13134_v17 = vld [vmem:[#allocation201_spill] sm:$0xff]  ;;  %v13135_v19 = vld [vmem:[#allocation202_spill] sm:$0xff] }
 0x2dc   : > { %3508 = vst [vmem:[%s8863_s19 + $0x658] sm:$0xff] %v2484_v24  ;;  %3509 = vst [vmem:[%s8863_s19 + $0x660] sm:$0xff] %v2485_v30  ;;  %v2501_v58 = vadd.f32 %v8835_v36, %v13134_v17  ;;  %v2502_v2 = vadd.f32 %v8835_v36, %v13135_v19  ;;  %v13136_v24 = vld [vmem:[#allocation203_spill] sm:$0xff]  ;;  %v13137_v30 = vld [vmem:[#allocation204_spill] sm:$0xff] }
 0x2dd   : > { %3510 = vst [vmem:[%s8863_s19 + $0x668] sm:$0xff] %v2486_v32  ;;  %3511 = vst [vmem:[%s8863_s19 + $0x670] sm:$0xff] %v2487_v38  ;;  %v2503_v29 = vadd.f32 %v8835_v36, %v13136_v24  ;;  %v2504_v31 = vadd.f32 %v8835_v36, %v13137_v30  ;;  %v13138_v32 = vld [vmem:[#allocation205_spill] sm:$0xff]  ;;  %v13139_v38 = vld [vmem:[#allocation206_spill] sm:$0xff] }
 0x2de   : > { %3512 = vst [vmem:[%s8863_s19 + $0x678] sm:$0xff] %v2488_v40  ;;  %3513 = vst [vmem:[%s8863_s19 + $0x680] sm:$0xff] %v2489_v46  ;;  %v2505_v37 = vadd.f32 %v8835_v36, %v13138_v32  ;;  %v2506_v39 = vadd.f32 %v8835_v36, %v13139_v38  ;;  %v13140_v40 = vld [vmem:[#allocation207_spill] sm:$0xff]  ;;  %v13141_v46 = vld [vmem:[#allocation208_spill] sm:$0xff] }
 0x2df   : > { %3514 = vst [vmem:[%s8863_s19 + $0x688] sm:$0xff] %v2490_v48  ;;  %3515 = vst [vmem:[%s8863_s19 + $0x690] sm:$0xff] %v2491_v54  ;;  %v2507_v45 = vadd.f32 %v8835_v36, %v13140_v40  ;;  %v2508_v47 = vadd.f32 %v8835_v36, %v13141_v46  ;;  %v13142_v48 = vld [vmem:[#allocation209_spill] sm:$0xff]  ;;  %v13143_v54 = vld [vmem:[#allocation210_spill] sm:$0xff] }
 0x2e0   : > { %3516 = vst [vmem:[%s8863_s19 + $0x698] sm:$0xff] %v2492_v56  ;;  %3517 = vst [vmem:[%s8863_s19 + $0x6a0] sm:$0xff] %v2493_v62  ;;  %v2509_v53 = vadd.f32 %v8835_v36, %v13142_v48  ;;  %v2510_v55 = vadd.f32 %v8835_v36, %v13143_v54  ;;  %v13144_v56 = vld [vmem:[#allocation211_spill] sm:$0xff]  ;;  %v13145_v62 = vld [vmem:[#allocation212_spill] sm:$0xff] }
 0x2e1   : > { %3518 = vst [vmem:[%s8863_s19 + $0x6a8] sm:$0xff] %v2494_v0  ;;  %3519 = vst [vmem:[%s8863_s19 + $0x6b0] sm:$0xff] %v2495_v6  ;;  %v2511_v61 = vadd.f32 %v8835_v36, %v13144_v56  ;;  %v2512_v63 = vadd.f32 %v8835_v36, %v13145_v62  ;;  %v13146_v0 = vld [vmem:[#allocation213_spill] sm:$0xff]  ;;  %v13147_v6 = vld [vmem:[#allocation214_spill] sm:$0xff] }
 0x2e2   : > { %3520 = vst [vmem:[%s8863_s19 + $0x6b8] sm:$0xff] %v2496_v8  ;;  %3521 = vst [vmem:[%s8863_s19 + $0x6c0] sm:$0xff] %v2497_v14  ;;  %v2513_v5 = vadd.f32 %v8835_v36, %v13146_v0  ;;  %v2514_v7 = vadd.f32 %v8835_v36, %v13147_v6  ;;  %v13148_v8 = vld [vmem:[#allocation215_spill] sm:$0xff]  ;;  %v13149_v14 = vld [vmem:[#allocation216_spill] sm:$0xff] }
 0x2e3   : > { %3522 = vst [vmem:[%s8863_s19 + $0x6c8] sm:$0xff] %v2498_v16  ;;  %3523 = vst [vmem:[%s8863_s19 + $0x6d0] sm:$0xff] %v2499_v22  ;;  %v2515_v13 = vadd.f32 %v8835_v36, %v13148_v8  ;;  %v2516_v15 = vadd.f32 %v8835_v36, %v13149_v14  ;;  %v13150_v16 = vld [vmem:[#allocation217_spill] sm:$0xff]  ;;  %v13151_v22 = vld [vmem:[#allocation218_spill] sm:$0xff] }
 0x2e4   : > { %3524 = vst [vmem:[%s8863_s19 + $0x6d8] sm:$0xff] %v2500_v50  ;;  %3525 = vst [vmem:[%s8863_s19 + $0x6e0] sm:$0xff] %v2501_v58  ;;  %v2517_v49 = vadd.f32 %v8835_v36, %v13150_v16  ;;  %v2518_v9 = vadd.f32 %v8835_v36, %v13151_v22  ;;  %v13152_v50 = vld [vmem:[#allocation219_spill] sm:$0xff]  ;;  %v13153_v58 = vld [vmem:[#allocation220_spill] sm:$0xff] }
 0x2e5   : > { %3526 = vst [vmem:[%s8863_s19 + $0x6e8] sm:$0xff] %v2502_v2  ;;  %3527 = vst [vmem:[%s8863_s19 + $0x6f0] sm:$0xff] %v2503_v29  ;;  %v2519_v17 = vadd.f32 %v8835_v36, %v13152_v50  ;;  %v2520_v19 = vadd.f32 %v8835_v36, %v13153_v58  ;;  %v13154_v2 = vld [vmem:[#allocation221_spill] sm:$0xff]  ;;  %v13155_v29 = vld [vmem:[#allocation222_spill] sm:$0xff] }
 0x2e6   : > { %3528 = vst [vmem:[%s8863_s19 + $0x6f8] sm:$0xff] %v2504_v31  ;;  %3529 = vst [vmem:[%s8863_s19 + $0x700] sm:$0xff] %v2505_v37  ;;  %v2521_v24 = vadd.f32 %v8835_v36, %v13154_v2  ;;  %v2522_v30 = vadd.f32 %v8835_v36, %v13155_v29  ;;  %v13156_v31 = vld [vmem:[#allocation223_spill] sm:$0xff]  ;;  %v13157_v37 = vld [vmem:[#allocation224_spill] sm:$0xff] }
 0x2e7   : > { %3530 = vst [vmem:[%s8863_s19 + $0x708] sm:$0xff] %v2506_v39  ;;  %3531 = vst [vmem:[%s8863_s19 + $0x710] sm:$0xff] %v2507_v45  ;;  %v2523_v32 = vadd.f32 %v8835_v36, %v13156_v31  ;;  %v2524_v38 = vadd.f32 %v8835_v36, %v13157_v37  ;;  %v13158_v39 = vld [vmem:[#allocation225_spill] sm:$0xff]  ;;  %v13159_v45 = vld [vmem:[#allocation226_spill] sm:$0xff] }
 0x2e8   : > { %3532 = vst [vmem:[%s8863_s19 + $0x718] sm:$0xff] %v2508_v47  ;;  %3533 = vst [vmem:[%s8863_s19 + $0x720] sm:$0xff] %v2509_v53  ;;  %v2525_v40 = vadd.f32 %v8835_v36, %v13158_v39  ;;  %v2526_v46 = vadd.f32 %v8835_v36, %v13159_v45  ;;  %v13160_v47 = vld [vmem:[#allocation227_spill] sm:$0xff]  ;;  %v13161_v53 = vld [vmem:[#allocation228_spill] sm:$0xff] }
 0x2e9   : > { %3534 = vst [vmem:[%s8863_s19 + $0x728] sm:$0xff] %v2510_v55  ;;  %3535 = vst [vmem:[%s8863_s19 + $0x730] sm:$0xff] %v2511_v61  ;;  %v2527_v48 = vadd.f32 %v8835_v36, %v13160_v47  ;;  %v2528_v54 = vadd.f32 %v8835_v36, %v13161_v53  ;;  %v13162_v55 = vld [vmem:[#allocation229_spill] sm:$0xff]  ;;  %v13163_v61 = vld [vmem:[#allocation230_spill] sm:$0xff] }
 0x2ea   : > { %3536 = vst [vmem:[%s8863_s19 + $0x738] sm:$0xff] %v2512_v63  ;;  %3537 = vst [vmem:[%s8863_s19 + $0x740] sm:$0xff] %v2513_v5  ;;  %v2529_v56 = vadd.f32 %v8835_v36, %v13162_v55  ;;  %v2530_v62 = vadd.f32 %v8835_v36, %v13163_v61  ;;  %v13164_v63 = vld [vmem:[#allocation231_spill] sm:$0xff]  ;;  %v13165_v5 = vld [vmem:[#allocation232_spill] sm:$0xff] }
 0x2eb   : > { %3538 = vst [vmem:[%s8863_s19 + $0x748] sm:$0xff] %v2514_v7  ;;  %3539 = vst [vmem:[%s8863_s19 + $0x750] sm:$0xff] %v2515_v13  ;;  %v2531_v0 = vadd.f32 %v8835_v36, %v13164_v63  ;;  %v2532_v6 = vadd.f32 %v8835_v36, %v13165_v5  ;;  %v13166_v7 = vld [vmem:[#allocation233_spill] sm:$0xff]  ;;  %v13167_v13 = vld [vmem:[#allocation234_spill] sm:$0xff] }
 0x2ec   : > { %3540 = vst [vmem:[%s8863_s19 + $0x758] sm:$0xff] %v2516_v15  ;;  %3541 = vst [vmem:[%s8863_s19 + $0x760] sm:$0xff] %v2517_v49  ;;  %v2533_v8 = vadd.f32 %v8835_v36, %v13166_v7  ;;  %v2534_v14 = vadd.f32 %v8835_v36, %v13167_v13  ;;  %v13168_v15 = vld [vmem:[#allocation235_spill] sm:$0xff]  ;;  %v13169_v49 = vld [vmem:[#allocation236_spill] sm:$0xff] }
 0x2ed   : > { %3542 = vst [vmem:[%s8863_s19 + $0x768] sm:$0xff] %v2518_v9  ;;  %3543 = vst [vmem:[%s8863_s19 + $0x770] sm:$0xff] %v2519_v17  ;;  %v2535_v16 = vadd.f32 %v8835_v36, %v13168_v15  ;;  %v2536_v22 = vadd.f32 %v8835_v36, %v13169_v49  ;;  %v13170_v9 = vld [vmem:[#allocation237_spill] sm:$0xff]  ;;  %v13171_v17 = vld [vmem:[#allocation238_spill] sm:$0xff] }
 0x2ee   : > { %3544 = vst [vmem:[%s8863_s19 + $0x778] sm:$0xff] %v2520_v19  ;;  %3545 = vst [vmem:[%s8863_s19 + $0x780] sm:$0xff] %v2521_v24  ;;  %v2537_v50 = vadd.f32 %v8835_v36, %v13170_v9  ;;  %v2538_v58 = vadd.f32 %v8835_v36, %v13171_v17  ;;  %v13172_v19 = vld [vmem:[#allocation239_spill] sm:$0xff]  ;;  %v13173_v24 = vld [vmem:[#allocation240_spill] sm:$0xff] }
 0x2ef   : > { %3546 = vst [vmem:[%s8863_s19 + $0x788] sm:$0xff] %v2522_v30  ;;  %3547 = vst [vmem:[%s8863_s19 + $0x790] sm:$0xff] %v2523_v32  ;;  %v2539_v2 = vadd.f32 %v8835_v36, %v13172_v19  ;;  %v2540_v29 = vadd.f32 %v8835_v36, %v13173_v24  ;;  %v13174_v30 = vld [vmem:[#allocation241_spill] sm:$0xff]  ;;  %v13175_v32 = vld [vmem:[#allocation242_spill] sm:$0xff] }
 0x2f0   : > { %3548 = vst [vmem:[%s8863_s19 + $0x798] sm:$0xff] %v2524_v38  ;;  %3549 = vst [vmem:[%s8863_s19 + $0x7a0] sm:$0xff] %v2525_v40  ;;  %v2541_v31 = vadd.f32 %v8835_v36, %v13174_v30  ;;  %v2542_v37 = vadd.f32 %v8835_v36, %v13175_v32  ;;  %v13176_v38 = vld [vmem:[#allocation243_spill] sm:$0xff]  ;;  %v13177_v40 = vld [vmem:[#allocation244_spill] sm:$0xff] }
 0x2f1   : > { %3550 = vst [vmem:[%s8863_s19 + $0x7a8] sm:$0xff] %v2526_v46  ;;  %3551 = vst [vmem:[%s8863_s19 + $0x7b0] sm:$0xff] %v2527_v48  ;;  %v2543_v39 = vadd.f32 %v8835_v36, %v13176_v38  ;;  %v2544_v45 = vadd.f32 %v8835_v36, %v13177_v40  ;;  %v13178_v46 = vld [vmem:[#allocation245_spill] sm:$0xff]  ;;  %v13179_v48 = vld [vmem:[#allocation246_spill] sm:$0xff] }
 0x2f2   : > { %3552 = vst [vmem:[%s8863_s19 + $0x7b8] sm:$0xff] %v2528_v54  ;;  %3553 = vst [vmem:[%s8863_s19 + $0x7c0] sm:$0xff] %v2529_v56  ;;  %v2545_v47 = vadd.f32 %v8835_v36, %v13178_v46  ;;  %v2546_v53 = vadd.f32 %v8835_v36, %v13179_v48  ;;  %v13180_v54 = vld [vmem:[#allocation247_spill] sm:$0xff]  ;;  %v13181_v56 = vld [vmem:[#allocation248_spill] sm:$0xff] }
 0x2f3   : > { %3554 = vst [vmem:[%s8863_s19 + $0x7c8] sm:$0xff] %v2530_v62  ;;  %3555 = vst [vmem:[%s8863_s19 + $0x7d0] sm:$0xff] %v2531_v0  ;;  %v2547_v55 = vadd.f32 %v8835_v36, %v13180_v54  ;;  %v2548_v61 = vadd.f32 %v8835_v36, %v13181_v56  ;;  %v13182_v62 = vld [vmem:[#allocation249_spill] sm:$0xff]  ;;  %v13183_v0 = vld [vmem:[#allocation250_spill] sm:$0xff] }
 0x2f4   : > { %3556 = vst [vmem:[%s8863_s19 + $0x7d8] sm:$0xff] %v2532_v6  ;;  %3557 = vst [vmem:[%s8863_s19 + $0x7e0] sm:$0xff] %v2533_v8  ;;  %v2549_v63 = vadd.f32 %v8835_v36, %v13182_v62  ;;  %v2550_v5 = vadd.f32 %v8835_v36, %v13183_v0  ;;  %v13184_v6 = vld [vmem:[#allocation251_spill] sm:$0xff]  ;;  %v13185_v8 = vld [vmem:[#allocation252_spill] sm:$0xff] }
 0x2f5   : > { %3558 = vst [vmem:[%s8863_s19 + $0x7e8] sm:$0xff] %v2534_v14  ;;  %3559 = vst [vmem:[%s8863_s19 + $0x7f0] sm:$0xff] %v2535_v16  ;;  %v2551_v7 = vadd.f32 %v8835_v36, %v13184_v6  ;;  %v2552_v13 = vadd.f32 %v8835_v36, %v13185_v8  ;;  %v13186_v14 = vld [vmem:[#allocation253_spill] sm:$0xff]  ;;  %v13187_v16 = vld [vmem:[#allocation254_spill] sm:$0xff] }
 0x2f6   : > { %3560 = vst [vmem:[%s8863_s19 + $0x7f8] sm:$0xff] %v2536_v22  ;;  %3561 = vst [vmem:[%s8863_s19 + $0x800] sm:$0xff] %v2537_v50  ;;  %v2553_v15 = vadd.f32 %v8835_v36, %v13186_v14  ;;  %v2554_v49 = vadd.f32 %v8835_v36, %v13187_v16  ;;  %v13188_v22 = vld [vmem:[#allocation255_spill] sm:$0xff]  ;;  %v13189_v50 = vld [vmem:[#allocation256_spill] sm:$0xff] }
 0x2f7   : > { %3562 = vst [vmem:[%s8863_s19 + $0x808] sm:$0xff] %v2538_v58  ;;  %3563 = vst [vmem:[%s8863_s19 + $0x810] sm:$0xff] %v2539_v2  ;;  %v2555_v9 = vadd.f32 %v8835_v36, %v13188_v22  ;;  %v2556_v17 = vadd.f32 %v8835_v36, %v13189_v50  ;;  %v13190_v58 = vld [vmem:[#allocation257_spill] sm:$0xff]  ;;  %v13191_v2 = vld [vmem:[#allocation258_spill] sm:$0xff] }
 0x2f8   : > { %3564 = vst [vmem:[%s8863_s19 + $0x818] sm:$0xff] %v2540_v29  ;;  %3565 = vst [vmem:[%s8863_s19 + $0x820] sm:$0xff] %v2541_v31  ;;  %v2557_v19 = vadd.f32 %v8835_v36, %v13190_v58  ;;  %v2558_v24 = vadd.f32 %v8835_v36, %v13191_v2  ;;  %v13192_v29 = vld [vmem:[#allocation259_spill] sm:$0xff]  ;;  %v13193_v31 = vld [vmem:[#allocation260_spill] sm:$0xff] }
 0x2f9   : > { %3566 = vst [vmem:[%s8863_s19 + $0x828] sm:$0xff] %v2542_v37  ;;  %3567 = vst [vmem:[%s8863_s19 + $0x830] sm:$0xff] %v2543_v39  ;;  %v2559_v30 = vadd.f32 %v8835_v36, %v13192_v29  ;;  %v2560_v32 = vadd.f32 %v8835_v36, %v13193_v31  ;;  %v13194_v37 = vld [vmem:[#allocation261_spill] sm:$0xff]  ;;  %v13195_v39 = vld [vmem:[#allocation262_spill] sm:$0xff] }
 0x2fa   : > { %3568 = vst [vmem:[%s8863_s19 + $0x838] sm:$0xff] %v2544_v45  ;;  %3569 = vst [vmem:[%s8863_s19 + $0x840] sm:$0xff] %v2545_v47  ;;  %v2561_v38 = vadd.f32 %v8835_v36, %v13194_v37  ;;  %v2562_v40 = vadd.f32 %v8835_v36, %v13195_v39  ;;  %v13196_v45 = vld [vmem:[#allocation263_spill] sm:$0xff]  ;;  %v13197_v47 = vld [vmem:[#allocation264_spill] sm:$0xff] }
 0x2fb   : > { %3570 = vst [vmem:[%s8863_s19 + $0x848] sm:$0xff] %v2546_v53  ;;  %3571 = vst [vmem:[%s8863_s19 + $0x850] sm:$0xff] %v2547_v55  ;;  %v2563_v46 = vadd.f32 %v8835_v36, %v13196_v45  ;;  %v2564_v48 = vadd.f32 %v8835_v36, %v13197_v47  ;;  %v13198_v53 = vld [vmem:[#allocation265_spill] sm:$0xff]  ;;  %v13199_v55 = vld [vmem:[#allocation266_spill] sm:$0xff] }
 0x2fc   : > { %3572 = vst [vmem:[%s8863_s19 + $0x858] sm:$0xff] %v2548_v61  ;;  %3573 = vst [vmem:[%s8863_s19 + $0x860] sm:$0xff] %v2549_v63  ;;  %v2565_v54 = vadd.f32 %v8835_v36, %v13198_v53  ;;  %v2566_v56 = vadd.f32 %v8835_v36, %v13199_v55  ;;  %v13200_v61 = vld [vmem:[#allocation267_spill] sm:$0xff]  ;;  %v13201_v63 = vld [vmem:[#allocation268_spill] sm:$0xff] }
 0x2fd   : > { %3574 = vst [vmem:[%s8863_s19 + $0x868] sm:$0xff] %v2550_v5  ;;  %3575 = vst [vmem:[%s8863_s19 + $0x870] sm:$0xff] %v2551_v7  ;;  %v2567_v62 = vadd.f32 %v8835_v36, %v13200_v61  ;;  %v2568_v0 = vadd.f32 %v8835_v36, %v13201_v63  ;;  %v13202_v5 = vld [vmem:[#allocation269_spill] sm:$0xff]  ;;  %v13203_v7 = vld [vmem:[#allocation270_spill] sm:$0xff] }
 0x2fe   : > { %3576 = vst [vmem:[%s8863_s19 + $0x878] sm:$0xff] %v2552_v13  ;;  %3577 = vst [vmem:[%s8863_s19 + $0x880] sm:$0xff] %v2553_v15  ;;  %v2569_v6 = vadd.f32 %v8835_v36, %v13202_v5  ;;  %v2570_v8 = vadd.f32 %v8835_v36, %v13203_v7  ;;  %v13204_v13 = vld [vmem:[#allocation271_spill] sm:$0xff]  ;;  %v13205_v15 = vld [vmem:[#allocation272_spill] sm:$0xff] }
 0x2ff   : > { %3578 = vst [vmem:[%s8863_s19 + $0x888] sm:$0xff] %v2554_v49  ;;  %3579 = vst [vmem:[%s8863_s19 + $0x890] sm:$0xff] %v2555_v9  ;;  %v2571_v14 = vadd.f32 %v8835_v36, %v13204_v13  ;;  %v2572_v16 = vadd.f32 %v8835_v36, %v13205_v15  ;;  %v13206_v49 = vld [vmem:[#allocation273_spill] sm:$0xff]  ;;  %v13207_v9 = vld [vmem:[#allocation274_spill] sm:$0xff] }
 0x300   : > { %3580 = vst [vmem:[%s8863_s19 + $0x898] sm:$0xff] %v2556_v17  ;;  %3581 = vst [vmem:[%s8863_s19 + $0x8a0] sm:$0xff] %v2557_v19  ;;  %v2573_v22 = vadd.f32 %v8835_v36, %v13206_v49  ;;  %v2574_v50 = vadd.f32 %v8835_v36, %v13207_v9  ;;  %v13208_v17 = vld [vmem:[#allocation275_spill] sm:$0xff]  ;;  %v13209_v19 = vld [vmem:[#allocation276_spill] sm:$0xff] }
 0x301   : > { %3582 = vst [vmem:[%s8863_s19 + $0x8a8] sm:$0xff] %v2558_v24  ;;  %3583 = vst [vmem:[%s8863_s19 + $0x8b0] sm:$0xff] %v2559_v30  ;;  %v2575_v58 = vadd.f32 %v8835_v36, %v13208_v17  ;;  %v2576_v2 = vadd.f32 %v8835_v36, %v13209_v19  ;;  %v13210_v24 = vld [vmem:[#allocation277_spill] sm:$0xff]  ;;  %v13211_v30 = vld [vmem:[#allocation278_spill] sm:$0xff] }
 0x302   : > { %3584 = vst [vmem:[%s8863_s19 + $0x8b8] sm:$0xff] %v2560_v32  ;;  %3585 = vst [vmem:[%s8863_s19 + $0x8c0] sm:$0xff] %v2561_v38  ;;  %v2577_v29 = vadd.f32 %v8835_v36, %v13210_v24  ;;  %v2578_v31 = vadd.f32 %v8835_v36, %v13211_v30  ;;  %v13212_v32 = vld [vmem:[#allocation279_spill] sm:$0xff]  ;;  %v13213_v38 = vld [vmem:[#allocation280_spill] sm:$0xff] }
 0x303   : > { %3586 = vst [vmem:[%s8863_s19 + $0x8c8] sm:$0xff] %v2562_v40  ;;  %3587 = vst [vmem:[%s8863_s19 + $0x8d0] sm:$0xff] %v2563_v46  ;;  %v2579_v37 = vadd.f32 %v8835_v36, %v13212_v32  ;;  %v2580_v39 = vadd.f32 %v8835_v36, %v13213_v38  ;;  %v13214_v40 = vld [vmem:[#allocation281_spill] sm:$0xff]  ;;  %v13215_v46 = vld [vmem:[#allocation282_spill] sm:$0xff] }
 0x304   : > { %3588 = vst [vmem:[%s8863_s19 + $0x8d8] sm:$0xff] %v2564_v48  ;;  %3589 = vst [vmem:[%s8863_s19 + $0x8e0] sm:$0xff] %v2565_v54  ;;  %v2581_v45 = vadd.f32 %v8835_v36, %v13214_v40  ;;  %v2582_v47 = vadd.f32 %v8835_v36, %v13215_v46  ;;  %v13216_v48 = vld [vmem:[#allocation283_spill] sm:$0xff]  ;;  %v13217_v54 = vld [vmem:[#allocation284_spill] sm:$0xff] }
 0x305   : > { %3590 = vst [vmem:[%s8863_s19 + $0x8e8] sm:$0xff] %v2566_v56  ;;  %3591 = vst [vmem:[%s8863_s19 + $0x8f0] sm:$0xff] %v2567_v62  ;;  %v2583_v53 = vadd.f32 %v8835_v36, %v13216_v48  ;;  %v2584_v55 = vadd.f32 %v8835_v36, %v13217_v54  ;;  %v13218_v56 = vld [vmem:[#allocation285_spill] sm:$0xff]  ;;  %v13219_v62 = vld [vmem:[#allocation286_spill] sm:$0xff] }
 0x306   : > { %3592 = vst [vmem:[%s8863_s19 + $0x8f8] sm:$0xff] %v2568_v0  ;;  %3593 = vst [vmem:[%s8863_s19 + $0x900] sm:$0xff] %v2569_v6  ;;  %v2585_v61 = vadd.f32 %v8835_v36, %v13218_v56  ;;  %v2586_v63 = vadd.f32 %v8835_v36, %v13219_v62  ;;  %v13220_v0 = vld [vmem:[#allocation287_spill] sm:$0xff]  ;;  %v13221_v6 = vld [vmem:[#allocation288_spill] sm:$0xff] }
 0x307   : > { %3594 = vst [vmem:[%s8863_s19 + $0x908] sm:$0xff] %v2570_v8  ;;  %3595 = vst [vmem:[%s8863_s19 + $0x910] sm:$0xff] %v2571_v14  ;;  %v2587_v5 = vadd.f32 %v8835_v36, %v13220_v0  ;;  %v2588_v7 = vadd.f32 %v8835_v36, %v13221_v6  ;;  %v13222_v8 = vld [vmem:[#allocation289_spill] sm:$0xff]  ;;  %v13223_v14 = vld [vmem:[#allocation290_spill] sm:$0xff] }
 0x308   : > { %3596 = vst [vmem:[%s8863_s19 + $0x918] sm:$0xff] %v2572_v16  ;;  %3597 = vst [vmem:[%s8863_s19 + $0x920] sm:$0xff] %v2573_v22  ;;  %v2589_v13 = vadd.f32 %v8835_v36, %v13222_v8  ;;  %v2590_v15 = vadd.f32 %v8835_v36, %v13223_v14  ;;  %v13224_v16 = vld [vmem:[#allocation291_spill] sm:$0xff]  ;;  %v13225_v22 = vld [vmem:[#allocation292_spill] sm:$0xff] }
 0x309   : > { %3598 = vst [vmem:[%s8863_s19 + $0x928] sm:$0xff] %v2574_v50  ;;  %3599 = vst [vmem:[%s8863_s19 + $0x930] sm:$0xff] %v2575_v58  ;;  %v2591_v49 = vadd.f32 %v8835_v36, %v13224_v16  ;;  %v2592_v9 = vadd.f32 %v8835_v36, %v13225_v22  ;;  %v13226_v50 = vld [vmem:[#allocation293_spill] sm:$0xff]  ;;  %v13227_v58 = vld [vmem:[#allocation294_spill] sm:$0xff] }
 0x30a   : > { %3600 = vst [vmem:[%s8863_s19 + $0x938] sm:$0xff] %v2576_v2  ;;  %3601 = vst [vmem:[%s8863_s19 + $0x940] sm:$0xff] %v2577_v29  ;;  %v2593_v17 = vadd.f32 %v8835_v36, %v13226_v50  ;;  %v2594_v19 = vadd.f32 %v8835_v36, %v13227_v58  ;;  %v13228_v2 = vld [vmem:[#allocation295_spill] sm:$0xff]  ;;  %v13229_v29 = vld [vmem:[#allocation296_spill] sm:$0xff] }
 0x30b   : > { %3602 = vst [vmem:[%s8863_s19 + $0x948] sm:$0xff] %v2578_v31  ;;  %3603 = vst [vmem:[%s8863_s19 + $0x950] sm:$0xff] %v2579_v37  ;;  %v2595_v24 = vadd.f32 %v8835_v36, %v13228_v2  ;;  %v2596_v30 = vadd.f32 %v8835_v36, %v13229_v29  ;;  %v13230_v31 = vld [vmem:[#allocation297_spill] sm:$0xff]  ;;  %v13231_v37 = vld [vmem:[#allocation298_spill] sm:$0xff] }
 0x30c   : > { %3604 = vst [vmem:[%s8863_s19 + $0x958] sm:$0xff] %v2580_v39  ;;  %3605 = vst [vmem:[%s8863_s19 + $0x960] sm:$0xff] %v2581_v45  ;;  %v2597_v32 = vadd.f32 %v8835_v36, %v13230_v31  ;;  %v2598_v38 = vadd.f32 %v8835_v36, %v13231_v37  ;;  %v13232_v39 = vld [vmem:[#allocation299_spill] sm:$0xff]  ;;  %v13233_v45 = vld [vmem:[#allocation300_spill] sm:$0xff] }
 0x30d   : > { %3606 = vst [vmem:[%s8863_s19 + $0x968] sm:$0xff] %v2582_v47  ;;  %3607 = vst [vmem:[%s8863_s19 + $0x970] sm:$0xff] %v2583_v53  ;;  %v2599_v40 = vadd.f32 %v8835_v36, %v13232_v39  ;;  %v2600_v46 = vadd.f32 %v8835_v36, %v13233_v45  ;;  %v13234_v47 = vld [vmem:[#allocation301_spill] sm:$0xff]  ;;  %v13235_v53 = vld [vmem:[#allocation302_spill] sm:$0xff] }
 0x30e   : > { %3608 = vst [vmem:[%s8863_s19 + $0x978] sm:$0xff] %v2584_v55  ;;  %3609 = vst [vmem:[%s8863_s19 + $0x980] sm:$0xff] %v2585_v61  ;;  %v2601_v48 = vadd.f32 %v8835_v36, %v13234_v47  ;;  %v2602_v54 = vadd.f32 %v8835_v36, %v13235_v53  ;;  %v13236_v55 = vld [vmem:[#allocation303_spill] sm:$0xff]  ;;  %v13237_v61 = vld [vmem:[#allocation304_spill] sm:$0xff] }
 0x30f   : > { %3610 = vst [vmem:[%s8863_s19 + $0x988] sm:$0xff] %v2586_v63  ;;  %3611 = vst [vmem:[%s8863_s19 + $0x990] sm:$0xff] %v2587_v5  ;;  %v2603_v56 = vadd.f32 %v8835_v36, %v13236_v55  ;;  %v2604_v62 = vadd.f32 %v8835_v36, %v13237_v61  ;;  %v13238_v63 = vld [vmem:[#allocation305_spill] sm:$0xff]  ;;  %v13239_v5 = vld [vmem:[#allocation306_spill] sm:$0xff] }
 0x310   : > { %3612 = vst [vmem:[%s8863_s19 + $0x998] sm:$0xff] %v2588_v7  ;;  %3613 = vst [vmem:[%s8863_s19 + $0x9a0] sm:$0xff] %v2589_v13  ;;  %v2605_v0 = vadd.f32 %v8835_v36, %v13238_v63  ;;  %v2606_v6 = vadd.f32 %v8835_v36, %v13239_v5  ;;  %v13240_v7 = vld [vmem:[#allocation307_spill] sm:$0xff]  ;;  %v13241_v13 = vld [vmem:[#allocation308_spill] sm:$0xff] }
 0x311   : > { %3614 = vst [vmem:[%s8863_s19 + $0x9a8] sm:$0xff] %v2590_v15  ;;  %3615 = vst [vmem:[%s8863_s19 + $0x9b0] sm:$0xff] %v2591_v49  ;;  %v2607_v8 = vadd.f32 %v8835_v36, %v13240_v7  ;;  %v2608_v14 = vadd.f32 %v8835_v36, %v13241_v13  ;;  %v13242_v15 = vld [vmem:[#allocation309_spill] sm:$0xff]  ;;  %v13243_v49 = vld [vmem:[#allocation310_spill] sm:$0xff] }
 0x312   : > { %3616 = vst [vmem:[%s8863_s19 + $0x9b8] sm:$0xff] %v2592_v9  ;;  %3617 = vst [vmem:[%s8863_s19 + $0x9c0] sm:$0xff] %v2593_v17  ;;  %v2609_v16 = vadd.f32 %v8835_v36, %v13242_v15  ;;  %v2610_v22 = vadd.f32 %v8835_v36, %v13243_v49  ;;  %v13244_v9 = vld [vmem:[#allocation311_spill] sm:$0xff]  ;;  %v13245_v17 = vld [vmem:[#allocation312_spill] sm:$0xff] }
 0x313   : > { %3618 = vst [vmem:[%s8863_s19 + $0x9c8] sm:$0xff] %v2594_v19  ;;  %3619 = vst [vmem:[%s8863_s19 + $0x9d0] sm:$0xff] %v2595_v24  ;;  %v2611_v50 = vadd.f32 %v8835_v36, %v13244_v9  ;;  %v2612_v58 = vadd.f32 %v8835_v36, %v13245_v17  ;;  %v13246_v19 = vld [vmem:[#allocation313_spill] sm:$0xff]  ;;  %v13247_v24 = vld [vmem:[#allocation314_spill] sm:$0xff] }
 0x314   : > { %3620 = vst [vmem:[%s8863_s19 + $0x9d8] sm:$0xff] %v2596_v30  ;;  %3621 = vst [vmem:[%s8863_s19 + $0x9e0] sm:$0xff] %v2597_v32  ;;  %v2613_v2 = vadd.f32 %v8835_v36, %v13246_v19  ;;  %v2614_v29 = vadd.f32 %v8835_v36, %v13247_v24  ;;  %v13248_v30 = vld [vmem:[#allocation315_spill] sm:$0xff]  ;;  %v13249_v32 = vld [vmem:[#allocation316_spill] sm:$0xff] }
 0x315   : > { %3622 = vst [vmem:[%s8863_s19 + $0x9e8] sm:$0xff] %v2598_v38  ;;  %3623 = vst [vmem:[%s8863_s19 + $0x9f0] sm:$0xff] %v2599_v40  ;;  %v2615_v31 = vadd.f32 %v8835_v36, %v13248_v30  ;;  %v2616_v37 = vadd.f32 %v8835_v36, %v13249_v32  ;;  %v13250_v38 = vld [vmem:[#allocation317_spill] sm:$0xff]  ;;  %v13251_v40 = vld [vmem:[#allocation318_spill] sm:$0xff] }
 0x316   : > { %3624 = vst [vmem:[%s8863_s19 + $0x9f8] sm:$0xff] %v2600_v46  ;;  %3625 = vst [vmem:[%s8863_s19 + $0xa00] sm:$0xff] %v2601_v48  ;;  %v2617_v39 = vadd.f32 %v8835_v36, %v13250_v38  ;;  %v2618_v45 = vadd.f32 %v8835_v36, %v13251_v40  ;;  %v13252_v46 = vld [vmem:[#allocation319_spill] sm:$0xff]  ;;  %v13253_v48 = vld [vmem:[#allocation320_spill] sm:$0xff] }
 0x317   : > { %3626 = vst [vmem:[%s8863_s19 + $0xa08] sm:$0xff] %v2602_v54  ;;  %3627 = vst [vmem:[%s8863_s19 + $0xa10] sm:$0xff] %v2603_v56  ;;  %v2619_v47 = vadd.f32 %v8835_v36, %v13252_v46  ;;  %v2620_v53 = vadd.f32 %v8835_v36, %v13253_v48  ;;  %v13254_v54 = vld [vmem:[#allocation321_spill] sm:$0xff]  ;;  %v13255_v56 = vld [vmem:[#allocation322_spill] sm:$0xff] }
 0x318   : > { %3628 = vst [vmem:[%s8863_s19 + $0xa18] sm:$0xff] %v2604_v62  ;;  %3629 = vst [vmem:[%s8863_s19 + $0xa20] sm:$0xff] %v2605_v0  ;;  %v2621_v55 = vadd.f32 %v8835_v36, %v13254_v54  ;;  %v2622_v61 = vadd.f32 %v8835_v36, %v13255_v56  ;;  %v13256_v62 = vld [vmem:[#allocation323_spill] sm:$0xff]  ;;  %v13257_v0 = vld [vmem:[#allocation324_spill] sm:$0xff] }
 0x319   : > { %3630 = vst [vmem:[%s8863_s19 + $0xa28] sm:$0xff] %v2606_v6  ;;  %3631 = vst [vmem:[%s8863_s19 + $0xa30] sm:$0xff] %v2607_v8  ;;  %v2623_v63 = vadd.f32 %v8835_v36, %v13256_v62  ;;  %v2624_v5 = vadd.f32 %v8835_v36, %v13257_v0  ;;  %v13258_v6 = vld [vmem:[#allocation325_spill] sm:$0xff]  ;;  %v13259_v8 = vld [vmem:[#allocation326_spill] sm:$0xff] }
 0x31a   : > { %3632 = vst [vmem:[%s8863_s19 + $0xa38] sm:$0xff] %v2608_v14  ;;  %3633 = vst [vmem:[%s8863_s19 + $0xa40] sm:$0xff] %v2609_v16  ;;  %v2625_v7 = vadd.f32 %v8835_v36, %v13258_v6  ;;  %v2626_v13 = vadd.f32 %v8835_v36, %v13259_v8  ;;  %v13260_v14 = vld [vmem:[#allocation327_spill] sm:$0xff]  ;;  %v13261_v16 = vld [vmem:[#allocation328_spill] sm:$0xff] }
 0x31b   : > { %3634 = vst [vmem:[%s8863_s19 + $0xa48] sm:$0xff] %v2610_v22  ;;  %3635 = vst [vmem:[%s8863_s19 + $0xa50] sm:$0xff] %v2611_v50  ;;  %v2627_v15 = vadd.f32 %v8835_v36, %v13260_v14  ;;  %v2628_v49 = vadd.f32 %v8835_v36, %v13261_v16  ;;  %v13262_v22 = vld [vmem:[#allocation329_spill] sm:$0xff]  ;;  %v13263_v50 = vld [vmem:[#allocation330_spill] sm:$0xff] }
 0x31c   : > { %3636 = vst [vmem:[%s8863_s19 + $0xa58] sm:$0xff] %v2612_v58  ;;  %3637 = vst [vmem:[%s8863_s19 + $0xa60] sm:$0xff] %v2613_v2  ;;  %v2629_v9 = vadd.f32 %v8835_v36, %v13262_v22  ;;  %v2630_v17 = vadd.f32 %v8835_v36, %v13263_v50  ;;  %v13264_v58 = vld [vmem:[#allocation331_spill] sm:$0xff]  ;;  %v13265_v2 = vld [vmem:[#allocation332_spill] sm:$0xff] }
 0x31d   : > { %3638 = vst [vmem:[%s8863_s19 + $0xa68] sm:$0xff] %v2614_v29  ;;  %3639 = vst [vmem:[%s8863_s19 + $0xa70] sm:$0xff] %v2615_v31  ;;  %v2631_v19 = vadd.f32 %v8835_v36, %v13264_v58  ;;  %v2632_v24 = vadd.f32 %v8835_v36, %v13265_v2  ;;  %v13266_v29 = vld [vmem:[#allocation333_spill] sm:$0xff]  ;;  %v13267_v31 = vld [vmem:[#allocation334_spill] sm:$0xff] }
 0x31e   : > { %3640 = vst [vmem:[%s8863_s19 + $0xa78] sm:$0xff] %v2616_v37  ;;  %3641 = vst [vmem:[%s8863_s19 + $0xa80] sm:$0xff] %v2617_v39  ;;  %v2633_v30 = vadd.f32 %v8835_v36, %v13266_v29  ;;  %v2634_v32 = vadd.f32 %v8835_v36, %v13267_v31  ;;  %v13268_v37 = vld [vmem:[#allocation335_spill] sm:$0xff]  ;;  %v13269_v39 = vld [vmem:[#allocation336_spill] sm:$0xff] }
 0x31f   : > { %3642 = vst [vmem:[%s8863_s19 + $0xa88] sm:$0xff] %v2618_v45  ;;  %3643 = vst [vmem:[%s8863_s19 + $0xa90] sm:$0xff] %v2619_v47  ;;  %v2635_v38 = vadd.f32 %v8835_v36, %v13268_v37  ;;  %v2636_v40 = vadd.f32 %v8835_v36, %v13269_v39  ;;  %v13270_v45 = vld [vmem:[#allocation337_spill] sm:$0xff]  ;;  %v13271_v47 = vld [vmem:[#allocation338_spill] sm:$0xff] }
 0x320   : > { %3644 = vst [vmem:[%s8863_s19 + $0xa98] sm:$0xff] %v2620_v53  ;;  %3645 = vst [vmem:[%s8863_s19 + $0xaa0] sm:$0xff] %v2621_v55  ;;  %v2637_v46 = vadd.f32 %v8835_v36, %v13270_v45  ;;  %v2638_v48 = vadd.f32 %v8835_v36, %v13271_v47  ;;  %v13272_v53 = vld [vmem:[#allocation339_spill] sm:$0xff]  ;;  %v13273_v55 = vld [vmem:[#allocation340_spill] sm:$0xff] }
 0x321   : > { %3646 = vst [vmem:[%s8863_s19 + $0xaa8] sm:$0xff] %v2622_v61  ;;  %3647 = vst [vmem:[%s8863_s19 + $0xab0] sm:$0xff] %v2623_v63  ;;  %v2639_v54 = vadd.f32 %v8835_v36, %v13272_v53  ;;  %v2640_v56 = vadd.f32 %v8835_v36, %v13273_v55  ;;  %v13274_v61 = vld [vmem:[#allocation341_spill] sm:$0xff]  ;;  %v13275_v63 = vld [vmem:[#allocation342_spill] sm:$0xff] }
 0x322   : > { %3648 = vst [vmem:[%s8863_s19 + $0xab8] sm:$0xff] %v2624_v5  ;;  %3649 = vst [vmem:[%s8863_s19 + $0xac0] sm:$0xff] %v2625_v7  ;;  %v2641_v62 = vadd.f32 %v8835_v36, %v13274_v61  ;;  %v2642_v0 = vadd.f32 %v8835_v36, %v13275_v63  ;;  %v13276_v5 = vld [vmem:[#allocation343_spill] sm:$0xff]  ;;  %v13277_v7 = vld [vmem:[#allocation344_spill] sm:$0xff] }
 0x323   : > { %3650 = vst [vmem:[%s8863_s19 + $0xac8] sm:$0xff] %v2626_v13  ;;  %3651 = vst [vmem:[%s8863_s19 + $0xad0] sm:$0xff] %v2627_v15  ;;  %v2643_v6 = vadd.f32 %v8835_v36, %v13276_v5  ;;  %v2644_v8 = vadd.f32 %v8835_v36, %v13277_v7  ;;  %v13278_v13 = vld [vmem:[#allocation345_spill] sm:$0xff]  ;;  %v13279_v15 = vld [vmem:[#allocation346_spill] sm:$0xff] }
 0x324   : > { %3652 = vst [vmem:[%s8863_s19 + $0xad8] sm:$0xff] %v2628_v49  ;;  %3653 = vst [vmem:[%s8863_s19 + $0xae0] sm:$0xff] %v2629_v9  ;;  %v2645_v14 = vadd.f32 %v8835_v36, %v13278_v13  ;;  %v2646_v16 = vadd.f32 %v8835_v36, %v13279_v15  ;;  %v13280_v49 = vld [vmem:[#allocation347_spill] sm:$0xff]  ;;  %v13281_v9 = vld [vmem:[#allocation348_spill] sm:$0xff] }
 0x325   : > { %3654 = vst [vmem:[%s8863_s19 + $0xae8] sm:$0xff] %v2630_v17  ;;  %3655 = vst [vmem:[%s8863_s19 + $0xaf0] sm:$0xff] %v2631_v19  ;;  %v2647_v22 = vadd.f32 %v8835_v36, %v13280_v49  ;;  %v2648_v50 = vadd.f32 %v8835_v36, %v13281_v9  ;;  %v13282_v17 = vld [vmem:[#allocation349_spill] sm:$0xff]  ;;  %v13283_v19 = vld [vmem:[#allocation350_spill] sm:$0xff] }
 0x326   : > { %3656 = vst [vmem:[%s8863_s19 + $0xaf8] sm:$0xff] %v2632_v24  ;;  %3657 = vst [vmem:[%s8863_s19 + $0xb00] sm:$0xff] %v2633_v30  ;;  %v2649_v58 = vadd.f32 %v8835_v36, %v13282_v17  ;;  %v2650_v2 = vadd.f32 %v8835_v36, %v13283_v19  ;;  %v13284_v24 = vld [vmem:[#allocation351_spill] sm:$0xff]  ;;  %v13285_v30 = vld [vmem:[#allocation352_spill] sm:$0xff] }
 0x327   : > { %3658 = vst [vmem:[%s8863_s19 + $0xb08] sm:$0xff] %v2634_v32  ;;  %3659 = vst [vmem:[%s8863_s19 + $0xb10] sm:$0xff] %v2635_v38  ;;  %v2651_v29 = vadd.f32 %v8835_v36, %v13284_v24  ;;  %v2652_v31 = vadd.f32 %v8835_v36, %v13285_v30  ;;  %v13286_v32 = vld [vmem:[#allocation353_spill] sm:$0xff]  ;;  %v13287_v38 = vld [vmem:[#allocation354_spill] sm:$0xff] }
 0x328   : > { %3660 = vst [vmem:[%s8863_s19 + $0xb18] sm:$0xff] %v2636_v40  ;;  %3661 = vst [vmem:[%s8863_s19 + $0xb20] sm:$0xff] %v2637_v46  ;;  %v2653_v37 = vadd.f32 %v8835_v36, %v13286_v32  ;;  %v2654_v39 = vadd.f32 %v8835_v36, %v13287_v38  ;;  %v13288_v40 = vld [vmem:[#allocation355_spill] sm:$0xff]  ;;  %v13289_v46 = vld [vmem:[#allocation356_spill] sm:$0xff] }
 0x329   : > { %3662 = vst [vmem:[%s8863_s19 + $0xb28] sm:$0xff] %v2638_v48  ;;  %3663 = vst [vmem:[%s8863_s19 + $0xb30] sm:$0xff] %v2639_v54  ;;  %v2655_v45 = vadd.f32 %v8835_v36, %v13288_v40  ;;  %v2656_v47 = vadd.f32 %v8835_v36, %v13289_v46  ;;  %v13290_v48 = vld [vmem:[#allocation357_spill] sm:$0xff]  ;;  %v13291_v54 = vld [vmem:[#allocation358_spill] sm:$0xff] }
 0x32a   : > { %3664 = vst [vmem:[%s8863_s19 + $0xb38] sm:$0xff] %v2640_v56  ;;  %3665 = vst [vmem:[%s8863_s19 + $0xb40] sm:$0xff] %v2641_v62  ;;  %v2657_v53 = vadd.f32 %v8835_v36, %v13290_v48  ;;  %v2658_v55 = vadd.f32 %v8835_v36, %v13291_v54  ;;  %v13292_v56 = vld [vmem:[#allocation359_spill] sm:$0xff]  ;;  %v13293_v62 = vld [vmem:[#allocation360_spill] sm:$0xff] }
 0x32b   : > { %3666 = vst [vmem:[%s8863_s19 + $0xb48] sm:$0xff] %v2642_v0  ;;  %3667 = vst [vmem:[%s8863_s19 + $0xb50] sm:$0xff] %v2643_v6  ;;  %v2659_v61 = vadd.f32 %v8835_v36, %v13292_v56  ;;  %v2660_v63 = vadd.f32 %v8835_v36, %v13293_v62  ;;  %v13294_v0 = vld [vmem:[#allocation361_spill] sm:$0xff]  ;;  %v13295_v6 = vld [vmem:[#allocation362_spill] sm:$0xff] }
 0x32c   : > { %3668 = vst [vmem:[%s8863_s19 + $0xb58] sm:$0xff] %v2644_v8  ;;  %3669 = vst [vmem:[%s8863_s19 + $0xb60] sm:$0xff] %v2645_v14  ;;  %v2661_v5 = vadd.f32 %v8835_v36, %v13294_v0  ;;  %v2662_v7 = vadd.f32 %v8835_v36, %v13295_v6  ;;  %v13296_v8 = vld [vmem:[#allocation363_spill] sm:$0xff]  ;;  %v13297_v14 = vld [vmem:[#allocation364_spill] sm:$0xff] }
 0x32d   : > { %3670 = vst [vmem:[%s8863_s19 + $0xb68] sm:$0xff] %v2646_v16  ;;  %3671 = vst [vmem:[%s8863_s19 + $0xb70] sm:$0xff] %v2647_v22  ;;  %v2663_v13 = vadd.f32 %v8835_v36, %v13296_v8  ;;  %v2664_v15 = vadd.f32 %v8835_v36, %v13297_v14  ;;  %v13298_v16 = vld [vmem:[#allocation365_spill] sm:$0xff]  ;;  %v13299_v22 = vld [vmem:[#allocation366_spill] sm:$0xff] }
 0x32e   : > { %3672 = vst [vmem:[%s8863_s19 + $0xb78] sm:$0xff] %v2648_v50  ;;  %3673 = vst [vmem:[%s8863_s19 + $0xb80] sm:$0xff] %v2649_v58  ;;  %v2665_v49 = vadd.f32 %v8835_v36, %v13298_v16  ;;  %v2666_v9 = vadd.f32 %v8835_v36, %v13299_v22  ;;  %v13300_v50 = vld [vmem:[#allocation367_spill] sm:$0xff]  ;;  %v13301_v58 = vld [vmem:[#allocation368_spill] sm:$0xff] }
 0x32f   : > { %3674 = vst [vmem:[%s8863_s19 + $0xb88] sm:$0xff] %v2650_v2  ;;  %3675 = vst [vmem:[%s8863_s19 + $0xb90] sm:$0xff] %v2651_v29  ;;  %v2667_v17 = vadd.f32 %v8835_v36, %v13300_v50  ;;  %v2668_v19 = vadd.f32 %v8835_v36, %v13301_v58  ;;  %v13302_v2 = vld [vmem:[#allocation369_spill] sm:$0xff]  ;;  %v13303_v29 = vld [vmem:[#allocation370_spill] sm:$0xff] }
 0x330   : > { %3676 = vst [vmem:[%s8863_s19 + $0xb98] sm:$0xff] %v2652_v31  ;;  %3677 = vst [vmem:[%s8863_s19 + $0xba0] sm:$0xff] %v2653_v37  ;;  %v2669_v24 = vadd.f32 %v8835_v36, %v13302_v2  ;;  %v2670_v30 = vadd.f32 %v8835_v36, %v13303_v29  ;;  %v13304_v31 = vld [vmem:[#allocation371_spill] sm:$0xff]  ;;  %v13305_v37 = vld [vmem:[#allocation372_spill] sm:$0xff] }
 0x331   : > { %3678 = vst [vmem:[%s8863_s19 + $0xba8] sm:$0xff] %v2654_v39  ;;  %3679 = vst [vmem:[%s8863_s19 + $0xbb0] sm:$0xff] %v2655_v45  ;;  %v2671_v32 = vadd.f32 %v8835_v36, %v13304_v31  ;;  %v2672_v38 = vadd.f32 %v8835_v36, %v13305_v37  ;;  %v13306_v39 = vld [vmem:[#allocation373_spill] sm:$0xff]  ;;  %v13307_v45 = vld [vmem:[#allocation374_spill] sm:$0xff] }
 0x332   : > { %3680 = vst [vmem:[%s8863_s19 + $0xbb8] sm:$0xff] %v2656_v47  ;;  %3681 = vst [vmem:[%s8863_s19 + $0xbc0] sm:$0xff] %v2657_v53  ;;  %v2673_v40 = vadd.f32 %v8835_v36, %v13306_v39  ;;  %v2674_v46 = vadd.f32 %v8835_v36, %v13307_v45  ;;  %v13308_v47 = vld [vmem:[#allocation375_spill] sm:$0xff]  ;;  %v13309_v53 = vld [vmem:[#allocation376_spill] sm:$0xff] }
 0x333   : > { %3682 = vst [vmem:[%s8863_s19 + $0xbc8] sm:$0xff] %v2658_v55  ;;  %3683 = vst [vmem:[%s8863_s19 + $0xbd0] sm:$0xff] %v2659_v61  ;;  %v2675_v48 = vadd.f32 %v8835_v36, %v13308_v47  ;;  %v2676_v54 = vadd.f32 %v8835_v36, %v13309_v53  ;;  %v13310_v55 = vld [vmem:[#allocation377_spill] sm:$0xff]  ;;  %v13311_v61 = vld [vmem:[#allocation378_spill] sm:$0xff] }
 0x334   : > { %3684 = vst [vmem:[%s8863_s19 + $0xbd8] sm:$0xff] %v2660_v63  ;;  %3685 = vst [vmem:[%s8863_s19 + $0xbe0] sm:$0xff] %v2661_v5  ;;  %v2677_v56 = vadd.f32 %v8835_v36, %v13310_v55  ;;  %v2678_v62 = vadd.f32 %v8835_v36, %v13311_v61  ;;  %v13312_v63 = vld [vmem:[#allocation379_spill] sm:$0xff]  ;;  %v13313_v5 = vld [vmem:[#allocation380_spill] sm:$0xff] }
 0x335   : > { %3686 = vst [vmem:[%s8863_s19 + $0xbe8] sm:$0xff] %v2662_v7  ;;  %3687 = vst [vmem:[%s8863_s19 + $0xbf0] sm:$0xff] %v2663_v13  ;;  %v2679_v0 = vadd.f32 %v8835_v36, %v13312_v63  ;;  %v2680_v6 = vadd.f32 %v8835_v36, %v13313_v5  ;;  %v13314_v7 = vld [vmem:[#allocation381_spill] sm:$0xff]  ;;  %v13315_v13 = vld [vmem:[#allocation382_spill] sm:$0xff] }
 0x336   : > { %3688 = vst [vmem:[%s8863_s19 + $0xbf8] sm:$0xff] %v2664_v15  ;;  %3689 = vst [vmem:[%s8863_s19 + $0xc00] sm:$0xff] %v2665_v49  ;;  %v2681_v8 = vadd.f32 %v8835_v36, %v13314_v7  ;;  %v2682_v14 = vadd.f32 %v8835_v36, %v13315_v13  ;;  %v13316_v15 = vld [vmem:[#allocation383_spill] sm:$0xff]  ;;  %v13317_v49 = vld [vmem:[#allocation384_spill] sm:$0xff] }
 0x337   : > { %3690 = vst [vmem:[%s8863_s19 + $0xc08] sm:$0xff] %v2666_v9  ;;  %3691 = vst [vmem:[%s8863_s19 + $0xc10] sm:$0xff] %v2667_v17  ;;  %v2683_v16 = vadd.f32 %v8835_v36, %v13316_v15  ;;  %v2684_v22 = vadd.f32 %v8835_v36, %v13317_v49  ;;  %v13318_v9 = vld [vmem:[#allocation385_spill] sm:$0xff]  ;;  %v13319_v17 = vld [vmem:[#allocation386_spill] sm:$0xff] }
 0x338   : > { %3692 = vst [vmem:[%s8863_s19 + $0xc18] sm:$0xff] %v2668_v19  ;;  %3693 = vst [vmem:[%s8863_s19 + $0xc20] sm:$0xff] %v2669_v24  ;;  %v2685_v50 = vadd.f32 %v8835_v36, %v13318_v9  ;;  %v2686_v58 = vadd.f32 %v8835_v36, %v13319_v17  ;;  %v13320_v19 = vld [vmem:[#allocation387_spill] sm:$0xff]  ;;  %v13321_v24 = vld [vmem:[#allocation388_spill] sm:$0xff] }
 0x339   : > { %3694 = vst [vmem:[%s8863_s19 + $0xc28] sm:$0xff] %v2670_v30  ;;  %3695 = vst [vmem:[%s8863_s19 + $0xc30] sm:$0xff] %v2671_v32  ;;  %v2687_v2 = vadd.f32 %v8835_v36, %v13320_v19  ;;  %v2688_v29 = vadd.f32 %v8835_v36, %v13321_v24  ;;  %v13322_v30 = vld [vmem:[#allocation389_spill] sm:$0xff]  ;;  %v13323_v32 = vld [vmem:[#allocation390_spill] sm:$0xff] }
 0x33a   : > { %3696 = vst [vmem:[%s8863_s19 + $0xc38] sm:$0xff] %v2672_v38  ;;  %3697 = vst [vmem:[%s8863_s19 + $0xc40] sm:$0xff] %v2673_v40  ;;  %v2689_v31 = vadd.f32 %v8835_v36, %v13322_v30  ;;  %v2690_v37 = vadd.f32 %v8835_v36, %v13323_v32  ;;  %v13324_v38 = vld [vmem:[#allocation391_spill] sm:$0xff]  ;;  %v13325_v40 = vld [vmem:[#allocation392_spill] sm:$0xff] }
 0x33b   : > { %3698 = vst [vmem:[%s8863_s19 + $0xc48] sm:$0xff] %v2674_v46  ;;  %3699 = vst [vmem:[%s8863_s19 + $0xc50] sm:$0xff] %v2675_v48  ;;  %v2691_v39 = vadd.f32 %v8835_v36, %v13324_v38  ;;  %v2692_v45 = vadd.f32 %v8835_v36, %v13325_v40  ;;  %v13326_v46 = vld [vmem:[#allocation393_spill] sm:$0xff]  ;;  %v13327_v48 = vld [vmem:[#allocation394_spill] sm:$0xff] }
 0x33c   : > { %3700 = vst [vmem:[%s8863_s19 + $0xc58] sm:$0xff] %v2676_v54  ;;  %3701 = vst [vmem:[%s8863_s19 + $0xc60] sm:$0xff] %v2677_v56  ;;  %v2693_v47 = vadd.f32 %v8835_v36, %v13326_v46  ;;  %v2694_v53 = vadd.f32 %v8835_v36, %v13327_v48  ;;  %v13328_v54 = vld [vmem:[#allocation395_spill] sm:$0xff]  ;;  %v13329_v56 = vld [vmem:[#allocation396_spill] sm:$0xff] }
 0x33d   : > { %3702 = vst [vmem:[%s8863_s19 + $0xc68] sm:$0xff] %v2678_v62  ;;  %3703 = vst [vmem:[%s8863_s19 + $0xc70] sm:$0xff] %v2679_v0  ;;  %v2695_v55 = vadd.f32 %v8835_v36, %v13328_v54  ;;  %v2696_v61 = vadd.f32 %v8835_v36, %v13329_v56  ;;  %v13330_v62 = vld [vmem:[#allocation397_spill] sm:$0xff]  ;;  %v13331_v0 = vld [vmem:[#allocation398_spill] sm:$0xff] }
 0x33e   : > { %3704 = vst [vmem:[%s8863_s19 + $0xc78] sm:$0xff] %v2680_v6  ;;  %3705 = vst [vmem:[%s8863_s19 + $0xc80] sm:$0xff] %v2681_v8  ;;  %v2697_v63 = vadd.f32 %v8835_v36, %v13330_v62  ;;  %v2698_v5 = vadd.f32 %v8835_v36, %v13331_v0  ;;  %v13332_v6 = vld [vmem:[#allocation399_spill] sm:$0xff]  ;;  %v13333_v8 = vld [vmem:[#allocation400_spill] sm:$0xff] }
 0x33f   : > { %3706 = vst [vmem:[%s8863_s19 + $0xc88] sm:$0xff] %v2682_v14  ;;  %3707 = vst [vmem:[%s8863_s19 + $0xc90] sm:$0xff] %v2683_v16  ;;  %v2699_v7 = vadd.f32 %v8835_v36, %v13332_v6  ;;  %v2700_v13 = vadd.f32 %v8835_v36, %v13333_v8  ;;  %v13334_v14 = vld [vmem:[#allocation401_spill] sm:$0xff]  ;;  %v13335_v16 = vld [vmem:[#allocation402_spill] sm:$0xff] }
 0x340   : > { %3708 = vst [vmem:[%s8863_s19 + $0xc98] sm:$0xff] %v2684_v22  ;;  %3709 = vst [vmem:[%s8863_s19 + $0xca0] sm:$0xff] %v2685_v50  ;;  %v2701_v15 = vadd.f32 %v8835_v36, %v13334_v14  ;;  %v2702_v49 = vadd.f32 %v8835_v36, %v13335_v16  ;;  %v13336_v22 = vld [vmem:[#allocation403_spill] sm:$0xff]  ;;  %v13337_v50 = vld [vmem:[#allocation404_spill] sm:$0xff] }
 0x341   : > { %3710 = vst [vmem:[%s8863_s19 + $0xca8] sm:$0xff] %v2686_v58  ;;  %3711 = vst [vmem:[%s8863_s19 + $0xcb0] sm:$0xff] %v2687_v2  ;;  %v2703_v9 = vadd.f32 %v8835_v36, %v13336_v22  ;;  %v2704_v17 = vadd.f32 %v8835_v36, %v13337_v50  ;;  %v13338_v58 = vld [vmem:[#allocation405_spill] sm:$0xff]  ;;  %v13339_v2 = vld [vmem:[#allocation406_spill] sm:$0xff] }
 0x342   : > { %3712 = vst [vmem:[%s8863_s19 + $0xcb8] sm:$0xff] %v2688_v29  ;;  %3713 = vst [vmem:[%s8863_s19 + $0xcc0] sm:$0xff] %v2689_v31  ;;  %v2705_v19 = vadd.f32 %v8835_v36, %v13338_v58  ;;  %v2706_v24 = vadd.f32 %v8835_v36, %v13339_v2  ;;  %v13340_v29 = vld [vmem:[#allocation407_spill] sm:$0xff]  ;;  %v13341_v31 = vld [vmem:[#allocation408_spill] sm:$0xff] }
 0x343   : > { %3714 = vst [vmem:[%s8863_s19 + $0xcc8] sm:$0xff] %v2690_v37  ;;  %3715 = vst [vmem:[%s8863_s19 + $0xcd0] sm:$0xff] %v2691_v39  ;;  %v2707_v30 = vadd.f32 %v8835_v36, %v13340_v29  ;;  %v2708_v32 = vadd.f32 %v8835_v36, %v13341_v31  ;;  %v13342_v37 = vld [vmem:[#allocation409_spill] sm:$0xff]  ;;  %v13343_v39 = vld [vmem:[#allocation410_spill] sm:$0xff] }
 0x344   : > { %3716 = vst [vmem:[%s8863_s19 + $0xcd8] sm:$0xff] %v2692_v45  ;;  %3717 = vst [vmem:[%s8863_s19 + $0xce0] sm:$0xff] %v2693_v47  ;;  %v2709_v38 = vadd.f32 %v8835_v36, %v13342_v37  ;;  %v2710_v40 = vadd.f32 %v8835_v36, %v13343_v39  ;;  %v13344_v45 = vld [vmem:[#allocation411_spill] sm:$0xff]  ;;  %v13345_v47 = vld [vmem:[#allocation412_spill] sm:$0xff] }
 0x345   : > { %3718 = vst [vmem:[%s8863_s19 + $0xce8] sm:$0xff] %v2694_v53  ;;  %3719 = vst [vmem:[%s8863_s19 + $0xcf0] sm:$0xff] %v2695_v55  ;;  %v2711_v46 = vadd.f32 %v8835_v36, %v13344_v45  ;;  %v2712_v48 = vadd.f32 %v8835_v36, %v13345_v47  ;;  %v13346_v53 = vld [vmem:[#allocation413_spill] sm:$0xff]  ;;  %v13347_v55 = vld [vmem:[#allocation414_spill] sm:$0xff] }
 0x346   : > { %3720 = vst [vmem:[%s8863_s19 + $0xcf8] sm:$0xff] %v2696_v61  ;;  %3721 = vst [vmem:[%s8863_s19 + $0xd00] sm:$0xff] %v2697_v63  ;;  %v2713_v54 = vadd.f32 %v8835_v36, %v13346_v53  ;;  %v2714_v56 = vadd.f32 %v8835_v36, %v13347_v55  ;;  %v13348_v61 = vld [vmem:[#allocation415_spill] sm:$0xff]  ;;  %v13349_v63 = vld [vmem:[#allocation416_spill] sm:$0xff] }
 0x347   : > { %3722 = vst [vmem:[%s8863_s19 + $0xd08] sm:$0xff] %v2698_v5  ;;  %3723 = vst [vmem:[%s8863_s19 + $0xd10] sm:$0xff] %v2699_v7  ;;  %v2715_v62 = vadd.f32 %v8835_v36, %v13348_v61  ;;  %v2716_v0 = vadd.f32 %v8835_v36, %v13349_v63  ;;  %v13350_v5 = vld [vmem:[#allocation417_spill] sm:$0xff]  ;;  %v13351_v7 = vld [vmem:[#allocation418_spill] sm:$0xff] }
 0x348   : > { %3724 = vst [vmem:[%s8863_s19 + $0xd18] sm:$0xff] %v2700_v13  ;;  %3725 = vst [vmem:[%s8863_s19 + $0xd20] sm:$0xff] %v2701_v15  ;;  %v2717_v6 = vadd.f32 %v8835_v36, %v13350_v5  ;;  %v2718_v8 = vadd.f32 %v8835_v36, %v13351_v7  ;;  %v13352_v13 = vld [vmem:[#allocation419_spill] sm:$0xff]  ;;  %v13353_v15 = vld [vmem:[#allocation420_spill] sm:$0xff] }
 0x349   : > { %3726 = vst [vmem:[%s8863_s19 + $0xd28] sm:$0xff] %v2702_v49  ;;  %3727 = vst [vmem:[%s8863_s19 + $0xd30] sm:$0xff] %v2703_v9  ;;  %v2719_v14 = vadd.f32 %v8835_v36, %v13352_v13  ;;  %v2720_v16 = vadd.f32 %v8835_v36, %v13353_v15  ;;  %v13354_v49 = vld [vmem:[#allocation421_spill] sm:$0xff]  ;;  %v13355_v9 = vld [vmem:[#allocation422_spill] sm:$0xff] }
 0x34a   : > { %3728 = vst [vmem:[%s8863_s19 + $0xd38] sm:$0xff] %v2704_v17  ;;  %3729 = vst [vmem:[%s8863_s19 + $0xd40] sm:$0xff] %v2705_v19  ;;  %v2721_v22 = vadd.f32 %v8835_v36, %v13354_v49  ;;  %v2722_v50 = vadd.f32 %v8835_v36, %v13355_v9  ;;  %v13356_v17 = vld [vmem:[#allocation423_spill] sm:$0xff]  ;;  %v13357_v19 = vld [vmem:[#allocation424_spill] sm:$0xff] }
 0x34b   : > { %3730 = vst [vmem:[%s8863_s19 + $0xd48] sm:$0xff] %v2706_v24  ;;  %3731 = vst [vmem:[%s8863_s19 + $0xd50] sm:$0xff] %v2707_v30  ;;  %v2723_v58 = vadd.f32 %v8835_v36, %v13356_v17  ;;  %v2724_v2 = vadd.f32 %v8835_v36, %v13357_v19  ;;  %v13358_v24 = vld [vmem:[#allocation425_spill] sm:$0xff]  ;;  %v13359_v30 = vld [vmem:[#allocation426_spill] sm:$0xff] }
 0x34c   : > { %3732 = vst [vmem:[%s8863_s19 + $0xd58] sm:$0xff] %v2708_v32  ;;  %3733 = vst [vmem:[%s8863_s19 + $0xd60] sm:$0xff] %v2709_v38  ;;  %v2725_v29 = vadd.f32 %v8835_v36, %v13358_v24  ;;  %v2726_v31 = vadd.f32 %v8835_v36, %v13359_v30  ;;  %v13360_v32 = vld [vmem:[#allocation427_spill] sm:$0xff]  ;;  %v13361_v38 = vld [vmem:[#allocation428_spill] sm:$0xff] }
 0x34d   : > { %3734 = vst [vmem:[%s8863_s19 + $0xd68] sm:$0xff] %v2710_v40  ;;  %3735 = vst [vmem:[%s8863_s19 + $0xd70] sm:$0xff] %v2711_v46  ;;  %v2727_v37 = vadd.f32 %v8835_v36, %v13360_v32  ;;  %v2728_v39 = vadd.f32 %v8835_v36, %v13361_v38  ;;  %v13362_v40 = vld [vmem:[#allocation429_spill] sm:$0xff]  ;;  %v13363_v46 = vld [vmem:[#allocation430_spill] sm:$0xff] }
 0x34e   : > { %3736 = vst [vmem:[%s8863_s19 + $0xd78] sm:$0xff] %v2712_v48  ;;  %3737 = vst [vmem:[%s8863_s19 + $0xd80] sm:$0xff] %v2713_v54  ;;  %v2729_v45 = vadd.f32 %v8835_v36, %v13362_v40  ;;  %v2730_v47 = vadd.f32 %v8835_v36, %v13363_v46  ;;  %v13364_v48 = vld [vmem:[#allocation431_spill] sm:$0xff]  ;;  %v13365_v54 = vld [vmem:[#allocation432_spill] sm:$0xff] }
 0x34f   : > { %3738 = vst [vmem:[%s8863_s19 + $0xd88] sm:$0xff] %v2714_v56  ;;  %3739 = vst [vmem:[%s8863_s19 + $0xd90] sm:$0xff] %v2715_v62  ;;  %v2731_v53 = vadd.f32 %v8835_v36, %v13364_v48  ;;  %v2732_v55 = vadd.f32 %v8835_v36, %v13365_v54  ;;  %v13366_v56 = vld [vmem:[#allocation433_spill] sm:$0xff]  ;;  %v13367_v62 = vld [vmem:[#allocation434_spill] sm:$0xff] }
 0x350   : > { %3740 = vst [vmem:[%s8863_s19 + $0xd98] sm:$0xff] %v2716_v0  ;;  %3741 = vst [vmem:[%s8863_s19 + $0xda0] sm:$0xff] %v2717_v6  ;;  %v2733_v61 = vadd.f32 %v8835_v36, %v13366_v56  ;;  %v2734_v63 = vadd.f32 %v8835_v36, %v13367_v62  ;;  %v13368_v0 = vld [vmem:[#allocation435_spill] sm:$0xff]  ;;  %v13369_v6 = vld [vmem:[#allocation436_spill] sm:$0xff] }
 0x351   : > { %3742 = vst [vmem:[%s8863_s19 + $0xda8] sm:$0xff] %v2718_v8  ;;  %3743 = vst [vmem:[%s8863_s19 + $0xdb0] sm:$0xff] %v2719_v14  ;;  %v2735_v5 = vadd.f32 %v8835_v36, %v13368_v0  ;;  %v2736_v7 = vadd.f32 %v8835_v36, %v13369_v6  ;;  %v13370_v8 = vld [vmem:[#allocation437_spill] sm:$0xff]  ;;  %v13371_v14 = vld [vmem:[#allocation438_spill] sm:$0xff] }
 0x352   : > { %3744 = vst [vmem:[%s8863_s19 + $0xdb8] sm:$0xff] %v2720_v16  ;;  %3745 = vst [vmem:[%s8863_s19 + $0xdc0] sm:$0xff] %v2721_v22  ;;  %v2737_v13 = vadd.f32 %v8835_v36, %v13370_v8  ;;  %v2738_v15 = vadd.f32 %v8835_v36, %v13371_v14  ;;  %v13372_v16 = vld [vmem:[#allocation439_spill] sm:$0xff]  ;;  %v13373_v22 = vld [vmem:[#allocation440_spill] sm:$0xff] }
 0x353   : > { %3746 = vst [vmem:[%s8863_s19 + $0xdc8] sm:$0xff] %v2722_v50  ;;  %3747 = vst [vmem:[%s8863_s19 + $0xdd0] sm:$0xff] %v2723_v58  ;;  %v2739_v49 = vadd.f32 %v8835_v36, %v13372_v16  ;;  %v2740_v9 = vadd.f32 %v8835_v36, %v13373_v22  ;;  %v13374_v50 = vld [vmem:[#allocation441_spill] sm:$0xff]  ;;  %v13375_v58 = vld [vmem:[#allocation442_spill] sm:$0xff] }
 0x354   : > { %3748 = vst [vmem:[%s8863_s19 + $0xdd8] sm:$0xff] %v2724_v2  ;;  %3749 = vst [vmem:[%s8863_s19 + $0xde0] sm:$0xff] %v2725_v29  ;;  %v2741_v17 = vadd.f32 %v8835_v36, %v13374_v50  ;;  %v2742_v19 = vadd.f32 %v8835_v36, %v13375_v58  ;;  %v13376_v2 = vld [vmem:[#allocation443_spill] sm:$0xff]  ;;  %v13377_v29 = vld [vmem:[#allocation444_spill] sm:$0xff] }
 0x355   : > { %3750 = vst [vmem:[%s8863_s19 + $0xde8] sm:$0xff] %v2726_v31  ;;  %3751 = vst [vmem:[%s8863_s19 + $0xdf0] sm:$0xff] %v2727_v37  ;;  %v2743_v24 = vadd.f32 %v8835_v36, %v13376_v2  ;;  %v2744_v30 = vadd.f32 %v8835_v36, %v13377_v29  ;;  %v13378_v31 = vld [vmem:[#allocation445_spill] sm:$0xff]  ;;  %v13379_v37 = vld [vmem:[#allocation446_spill] sm:$0xff] }
 0x356   : > { %3752 = vst [vmem:[%s8863_s19 + $0xdf8] sm:$0xff] %v2728_v39  ;;  %3753 = vst [vmem:[%s8863_s19 + $0xe00] sm:$0xff] %v2729_v45  ;;  %v2745_v32 = vadd.f32 %v8835_v36, %v13378_v31  ;;  %v2746_v38 = vadd.f32 %v8835_v36, %v13379_v37  ;;  %v13380_v39 = vld [vmem:[#allocation447_spill] sm:$0xff]  ;;  %v13381_v45 = vld [vmem:[#allocation448_spill] sm:$0xff] }
 0x357   : > { %3754 = vst [vmem:[%s8863_s19 + $0xe08] sm:$0xff] %v2730_v47  ;;  %3755 = vst [vmem:[%s8863_s19 + $0xe10] sm:$0xff] %v2731_v53  ;;  %v2747_v40 = vadd.f32 %v8835_v36, %v13380_v39  ;;  %v2748_v46 = vadd.f32 %v8835_v36, %v13381_v45  ;;  %v13382_v47 = vld [vmem:[#allocation449_spill] sm:$0xff]  ;;  %v13383_v53 = vld [vmem:[#allocation450_spill] sm:$0xff] }
 0x358   : > { %3756 = vst [vmem:[%s8863_s19 + $0xe18] sm:$0xff] %v2732_v55  ;;  %3757 = vst [vmem:[%s8863_s19 + $0xe20] sm:$0xff] %v2733_v61  ;;  %v2749_v48 = vadd.f32 %v8835_v36, %v13382_v47  ;;  %v2750_v54 = vadd.f32 %v8835_v36, %v13383_v53  ;;  %v13384_v55 = vld [vmem:[#allocation451_spill] sm:$0xff]  ;;  %v13385_v61 = vld [vmem:[#allocation452_spill] sm:$0xff] }
 0x359   : > { %3758 = vst [vmem:[%s8863_s19 + $0xe28] sm:$0xff] %v2734_v63  ;;  %3759 = vst [vmem:[%s8863_s19 + $0xe30] sm:$0xff] %v2735_v5  ;;  %v2751_v56 = vadd.f32 %v8835_v36, %v13384_v55  ;;  %v2752_v62 = vadd.f32 %v8835_v36, %v13385_v61  ;;  %v13386_v63 = vld [vmem:[#allocation453_spill] sm:$0xff]  ;;  %v13387_v5 = vld [vmem:[#allocation454_spill] sm:$0xff] }
 0x35a   : > { %3760 = vst [vmem:[%s8863_s19 + $0xe38] sm:$0xff] %v2736_v7  ;;  %3761 = vst [vmem:[%s8863_s19 + $0xe40] sm:$0xff] %v2737_v13  ;;  %v2753_v0 = vadd.f32 %v8835_v36, %v13386_v63  ;;  %v2754_v6 = vadd.f32 %v8835_v36, %v13387_v5  ;;  %v13388_v7 = vld [vmem:[#allocation455_spill] sm:$0xff]  ;;  %v13389_v13 = vld [vmem:[#allocation456_spill] sm:$0xff] }
 0x35b   : > { %3762 = vst [vmem:[%s8863_s19 + $0xe48] sm:$0xff] %v2738_v15  ;;  %3763 = vst [vmem:[%s8863_s19 + $0xe50] sm:$0xff] %v2739_v49  ;;  %v2755_v8 = vadd.f32 %v8835_v36, %v13388_v7  ;;  %v2756_v14 = vadd.f32 %v8835_v36, %v13389_v13  ;;  %v13390_v15 = vld [vmem:[#allocation457_spill] sm:$0xff]  ;;  %v13391_v49 = vld [vmem:[#allocation458_spill] sm:$0xff] }
 0x35c   : > { %3764 = vst [vmem:[%s8863_s19 + $0xe58] sm:$0xff] %v2740_v9  ;;  %3765 = vst [vmem:[%s8863_s19 + $0xe60] sm:$0xff] %v2741_v17  ;;  %v2757_v16 = vadd.f32 %v8835_v36, %v13390_v15  ;;  %v2758_v22 = vadd.f32 %v8835_v36, %v13391_v49  ;;  %v13392_v9 = vld [vmem:[#allocation459_spill] sm:$0xff]  ;;  %v13393_v17 = vld [vmem:[#allocation460_spill] sm:$0xff] }
 0x35d   : > { %3766 = vst [vmem:[%s8863_s19 + $0xe68] sm:$0xff] %v2742_v19  ;;  %3767 = vst [vmem:[%s8863_s19 + $0xe70] sm:$0xff] %v2743_v24  ;;  %v2759_v50 = vadd.f32 %v8835_v36, %v13392_v9  ;;  %v2760_v58 = vadd.f32 %v8835_v36, %v13393_v17  ;;  %v13394_v19 = vld [vmem:[#allocation461_spill] sm:$0xff]  ;;  %v13395_v24 = vld [vmem:[#allocation462_spill] sm:$0xff] }
 0x35e   : > { %3768 = vst [vmem:[%s8863_s19 + $0xe78] sm:$0xff] %v2744_v30  ;;  %3769 = vst [vmem:[%s8863_s19 + $0xe80] sm:$0xff] %v2745_v32  ;;  %v2761_v2 = vadd.f32 %v8835_v36, %v13394_v19  ;;  %v2762_v29 = vadd.f32 %v8835_v36, %v13395_v24  ;;  %v13396_v30 = vld [vmem:[#allocation463_spill] sm:$0xff]  ;;  %v13397_v32 = vld [vmem:[#allocation464_spill] sm:$0xff] }
 0x35f   : > { %3770 = vst [vmem:[%s8863_s19 + $0xe88] sm:$0xff] %v2746_v38  ;;  %3771 = vst [vmem:[%s8863_s19 + $0xe90] sm:$0xff] %v2747_v40  ;;  %v2763_v31 = vadd.f32 %v8835_v36, %v13396_v30  ;;  %v2764_v37 = vadd.f32 %v8835_v36, %v13397_v32  ;;  %v13398_v38 = vld [vmem:[#allocation465_spill] sm:$0xff]  ;;  %v13399_v40 = vld [vmem:[#allocation466_spill] sm:$0xff] }
 0x360   : > { %3772 = vst [vmem:[%s8863_s19 + $0xe98] sm:$0xff] %v2748_v46  ;;  %3773 = vst [vmem:[%s8863_s19 + $0xea0] sm:$0xff] %v2749_v48  ;;  %v2765_v39 = vadd.f32 %v8835_v36, %v13398_v38  ;;  %v2766_v45 = vadd.f32 %v8835_v36, %v13399_v40  ;;  %v13400_v46 = vld [vmem:[#allocation467_spill] sm:$0xff]  ;;  %v13401_v48 = vld [vmem:[#allocation468_spill] sm:$0xff] }
 0x361   : > { %3774 = vst [vmem:[%s8863_s19 + $0xea8] sm:$0xff] %v2750_v54  ;;  %3775 = vst [vmem:[%s8863_s19 + $0xeb0] sm:$0xff] %v2751_v56  ;;  %v2767_v47 = vadd.f32 %v8835_v36, %v13400_v46  ;;  %v2768_v53 = vadd.f32 %v8835_v36, %v13401_v48  ;;  %v13402_v54 = vld [vmem:[#allocation469_spill] sm:$0xff]  ;;  %v13403_v56 = vld [vmem:[#allocation470_spill] sm:$0xff] }
 0x362   : > { %3776 = vst [vmem:[%s8863_s19 + $0xeb8] sm:$0xff] %v2752_v62  ;;  %3777 = vst [vmem:[%s8863_s19 + $0xec0] sm:$0xff] %v2753_v0  ;;  %v2769_v55 = vadd.f32 %v8835_v36, %v13402_v54  ;;  %v2770_v61 = vadd.f32 %v8835_v36, %v13403_v56  ;;  %v13404_v62 = vld [vmem:[#allocation471_spill] sm:$0xff]  ;;  %v13405_v0 = vld [vmem:[#allocation472_spill] sm:$0xff] }
 0x363   : > { %3778 = vst [vmem:[%s8863_s19 + $0xec8] sm:$0xff] %v2754_v6  ;;  %3779 = vst [vmem:[%s8863_s19 + $0xed0] sm:$0xff] %v2755_v8  ;;  %v2771_v63 = vadd.f32 %v8835_v36, %v13404_v62  ;;  %v2772_v5 = vadd.f32 %v8835_v36, %v13405_v0  ;;  %v13406_v6 = vld [vmem:[#allocation473_spill] sm:$0xff]  ;;  %v13407_v8 = vld [vmem:[#allocation474_spill] sm:$0xff] }
 0x364   : > { %3780 = vst [vmem:[%s8863_s19 + $0xed8] sm:$0xff] %v2756_v14  ;;  %3781 = vst [vmem:[%s8863_s19 + $0xee0] sm:$0xff] %v2757_v16  ;;  %v2773_v7 = vadd.f32 %v8835_v36, %v13406_v6  ;;  %v2774_v13 = vadd.f32 %v8835_v36, %v13407_v8  ;;  %v13408_v14 = vld [vmem:[#allocation475_spill] sm:$0xff]  ;;  %v13409_v16 = vld [vmem:[#allocation476_spill] sm:$0xff] }
 0x365   : > { %3782 = vst [vmem:[%s8863_s19 + $0xee8] sm:$0xff] %v2758_v22  ;;  %3783 = vst [vmem:[%s8863_s19 + $0xef0] sm:$0xff] %v2759_v50  ;;  %v2775_v15 = vadd.f32 %v8835_v36, %v13408_v14  ;;  %v2776_v49 = vadd.f32 %v8835_v36, %v13409_v16  ;;  %v13410_v22 = vld [vmem:[#allocation477_spill] sm:$0xff]  ;;  %v13411_v50 = vld [vmem:[#allocation478_spill] sm:$0xff] }
 0x366   : > { %3784 = vst [vmem:[%s8863_s19 + $0xef8] sm:$0xff] %v2760_v58  ;;  %3785 = vst [vmem:[%s8863_s19 + $0xf00] sm:$0xff] %v2761_v2  ;;  %v2777_v9 = vadd.f32 %v8835_v36, %v13410_v22  ;;  %v2778_v17 = vadd.f32 %v8835_v36, %v13411_v50  ;;  %v13412_v58 = vld [vmem:[#allocation479_spill] sm:$0xff]  ;;  %v13413_v2 = vld [vmem:[#allocation480_spill] sm:$0xff] }
 0x367   : > { %3786 = vst [vmem:[%s8863_s19 + $0xf08] sm:$0xff] %v2762_v29  ;;  %3787 = vst [vmem:[%s8863_s19 + $0xf10] sm:$0xff] %v2763_v31  ;;  %v2779_v19 = vadd.f32 %v8835_v36, %v13412_v58  ;;  %v2780_v24 = vadd.f32 %v8835_v36, %v13413_v2  ;;  %v13414_v29 = vld [vmem:[#allocation481_spill] sm:$0xff]  ;;  %v13415_v31 = vld [vmem:[#allocation482_spill] sm:$0xff] }
 0x368   : > { %3788 = vst [vmem:[%s8863_s19 + $0xf18] sm:$0xff] %v2764_v37  ;;  %3789 = vst [vmem:[%s8863_s19 + $0xf20] sm:$0xff] %v2765_v39  ;;  %v2781_v30 = vadd.f32 %v8835_v36, %v13414_v29  ;;  %v2782_v32 = vadd.f32 %v8835_v36, %v13415_v31  ;;  %v13416_v37 = vld [vmem:[#allocation483_spill] sm:$0xff]  ;;  %v13417_v39 = vld [vmem:[#allocation484_spill] sm:$0xff] }
 0x369   : > { %3790 = vst [vmem:[%s8863_s19 + $0xf28] sm:$0xff] %v2766_v45  ;;  %3791 = vst [vmem:[%s8863_s19 + $0xf30] sm:$0xff] %v2767_v47  ;;  %v2783_v38 = vadd.f32 %v8835_v36, %v13416_v37  ;;  %v2784_v40 = vadd.f32 %v8835_v36, %v13417_v39  ;;  %v13418_v45 = vld [vmem:[#allocation485_spill] sm:$0xff]  ;;  %v13419_v47 = vld [vmem:[#allocation486_spill] sm:$0xff] }
 0x36a   : > { %3792 = vst [vmem:[%s8863_s19 + $0xf38] sm:$0xff] %v2768_v53  ;;  %3793 = vst [vmem:[%s8863_s19 + $0xf40] sm:$0xff] %v2769_v55  ;;  %v2785_v46 = vadd.f32 %v8835_v36, %v13418_v45  ;;  %v2786_v48 = vadd.f32 %v8835_v36, %v13419_v47  ;;  %v13420_v53 = vld [vmem:[#allocation487_spill] sm:$0xff]  ;;  %v13421_v55 = vld [vmem:[#allocation488_spill] sm:$0xff] }
 0x36b   : > { %3794 = vst [vmem:[%s8863_s19 + $0xf48] sm:$0xff] %v2770_v61  ;;  %3795 = vst [vmem:[%s8863_s19 + $0xf50] sm:$0xff] %v2771_v63  ;;  %v2787_v54 = vadd.f32 %v8835_v36, %v13420_v53  ;;  %v2788_v56 = vadd.f32 %v8835_v36, %v13421_v55  ;;  %v13422_v61 = vld [vmem:[#allocation489_spill] sm:$0xff]  ;;  %v13423_v63 = vld [vmem:[#allocation490_spill] sm:$0xff] }
 0x36c   : > { %3796 = vst [vmem:[%s8863_s19 + $0xf58] sm:$0xff] %v2772_v5  ;;  %3797 = vst [vmem:[%s8863_s19 + $0xf60] sm:$0xff] %v2773_v7  ;;  %v2789_v62 = vadd.f32 %v8835_v36, %v13422_v61  ;;  %v2790_v0 = vadd.f32 %v8835_v36, %v13423_v63  ;;  %v13424_v5 = vld [vmem:[#allocation491_spill] sm:$0xff]  ;;  %v13425_v7 = vld [vmem:[#allocation492_spill] sm:$0xff] }
 0x36d   : > { %3798 = vst [vmem:[%s8863_s19 + $0xf68] sm:$0xff] %v2774_v13  ;;  %3799 = vst [vmem:[%s8863_s19 + $0xf70] sm:$0xff] %v2775_v15  ;;  %v2791_v6 = vadd.f32 %v8835_v36, %v13424_v5  ;;  %v2792_v8 = vadd.f32 %v8835_v36, %v13425_v7  ;;  %v13426_v13 = vld [vmem:[#allocation493_spill] sm:$0xff]  ;;  %v13427_v15 = vld [vmem:[#allocation494_spill] sm:$0xff] }
 0x36e   : > { %3800 = vst [vmem:[%s8863_s19 + $0xf78] sm:$0xff] %v2776_v49  ;;  %3801 = vst [vmem:[%s8863_s19 + $0xf80] sm:$0xff] %v2777_v9  ;;  %v2793_v14 = vadd.f32 %v8835_v36, %v13426_v13  ;;  %v2794_v16 = vadd.f32 %v8835_v36, %v13427_v15  ;;  %v13428_v49 = vld [vmem:[#allocation495_spill] sm:$0xff]  ;;  %v13429_v9 = vld [vmem:[#allocation496_spill] sm:$0xff] }
 0x36f   : > { %3802 = vst [vmem:[%s8863_s19 + $0xf88] sm:$0xff] %v2778_v17  ;;  %3803 = vst [vmem:[%s8863_s19 + $0xf90] sm:$0xff] %v2779_v19  ;;  %v2795_v22 = vadd.f32 %v8835_v36, %v13428_v49  ;;  %v2796_v50 = vadd.f32 %v8835_v36, %v13429_v9  ;;  %v13430_v17 = vld [vmem:[#allocation497_spill] sm:$0xff]  ;;  %v13431_v19 = vld [vmem:[#allocation498_spill] sm:$0xff] }
 0x370   : > { %3804 = vst [vmem:[%s8863_s19 + $0xf98] sm:$0xff] %v2780_v24  ;;  %3805 = vst [vmem:[%s8863_s19 + $0xfa0] sm:$0xff] %v2781_v30  ;;  %v2797_v58 = vadd.f32 %v8835_v36, %v13430_v17  ;;  %v2798_v2 = vadd.f32 %v8835_v36, %v13431_v19  ;;  %v13432_v24 = vld [vmem:[#allocation499_spill] sm:$0xff]  ;;  %v13433_v30 = vld [vmem:[#allocation500_spill] sm:$0xff] }
 0x371   : > { %3806 = vst [vmem:[%s8863_s19 + $0xfa8] sm:$0xff] %v2782_v32  ;;  %3807 = vst [vmem:[%s8863_s19 + $0xfb0] sm:$0xff] %v2783_v38  ;;  %v2799_v29 = vadd.f32 %v8835_v36, %v13432_v24  ;;  %v2800_v31 = vadd.f32 %v8835_v36, %v13433_v30  ;;  %v13434_v32 = vld [vmem:[#allocation501_spill] sm:$0xff]  ;;  %v13435_v38 = vld [vmem:[#allocation502_spill] sm:$0xff] }
 0x372   : > { %3808 = vst [vmem:[%s8863_s19 + $0xfb8] sm:$0xff] %v2784_v40  ;;  %3809 = vst [vmem:[%s8863_s19 + $0xfc0] sm:$0xff] %v2785_v46  ;;  %v2801_v37 = vadd.f32 %v8835_v36, %v13434_v32  ;;  %v2802_v39 = vadd.f32 %v8835_v36, %v13435_v38  ;;  %v13436_v40 = vld [vmem:[#allocation503_spill] sm:$0xff]  ;;  %v13437_v46 = vld [vmem:[#allocation504_spill] sm:$0xff] }
 0x373   : > { %3810 = vst [vmem:[%s8863_s19 + $0xfc8] sm:$0xff] %v2786_v48  ;;  %3811 = vst [vmem:[%s8863_s19 + $0xfd0] sm:$0xff] %v2787_v54  ;;  %v2803_v45 = vadd.f32 %v8835_v36, %v13436_v40  ;;  %v2804_v47 = vadd.f32 %v8835_v36, %v13437_v46  ;;  %v13438_v48 = vld [vmem:[#allocation505_spill] sm:$0xff]  ;;  %v13439_v54 = vld [vmem:[#allocation506_spill] sm:$0xff] }
 0x374   : > { %3812 = vst [vmem:[%s8863_s19 + $0xfd8] sm:$0xff] %v2788_v56  ;;  %3813 = vst [vmem:[%s8863_s19 + $0xfe0] sm:$0xff] %v2789_v62  ;;  %v2805_v53 = vadd.f32 %v8835_v36, %v13438_v48  ;;  %v2806_v55 = vadd.f32 %v8835_v36, %v13439_v54  ;;  %v13440_v56 = vld [vmem:[#allocation507_spill] sm:$0xff]  ;;  %v13441_v62 = vld [vmem:[#allocation508_spill] sm:$0xff] }
 0x375   : > { %3814 = vst [vmem:[%s8863_s19 + $0xfe8] sm:$0xff] %v2790_v0  ;;  %3815 = vst [vmem:[%s8863_s19 + $0xff0] sm:$0xff] %v2791_v6  ;;  %v2807_v61 = vadd.f32 %v8835_v36, %v13440_v56  ;;  %v2808_v63 = vadd.f32 %v8835_v36, %v13441_v62  ;;  %v13442_v0 = vld [vmem:[#allocation509_spill] sm:$0xff]  ;;  %v13443_v6 = vld [vmem:[#allocation510_spill] sm:$0xff] }
 0x376   : > { %3816 = vst [vmem:[%s8863_s19 + $0xff8] sm:$0xff] %v2792_v8  ;;  %3817 = vst [vmem:[%s8863_s19 + $0x1000] sm:$0xff] %v2793_v14  ;;  %v2809_v5 = vadd.f32 %v8835_v36, %v13442_v0  ;;  %v2810_v7 = vadd.f32 %v8835_v36, %v13443_v6  ;;  %v13444_v8 = vld [vmem:[#allocation511_spill] sm:$0xff]  ;;  %v13445_v14 = vld [vmem:[#allocation512_spill] sm:$0xff] }
 0x377   : > { %3818 = vst [vmem:[%s8863_s19 + $0x1008] sm:$0xff] %v2794_v16  ;;  %3819 = vst [vmem:[%s8863_s19 + $0x1010] sm:$0xff] %v2795_v22  ;;  %v2811_v13 = vadd.f32 %v8835_v36, %v13444_v8  ;;  %v2812_v15 = vadd.f32 %v8835_v36, %v13445_v14  ;;  %v13446_v16 = vld [vmem:[#allocation513_spill] sm:$0xff]  ;;  %v13447_v22 = vld [vmem:[#allocation514_spill] sm:$0xff] }
 0x378   : > { %3820 = vst [vmem:[%s8863_s19 + $0x1018] sm:$0xff] %v2796_v50  ;;  %3821 = vst [vmem:[%s8863_s19 + $0x1020] sm:$0xff] %v2797_v58  ;;  %v2813_v49 = vadd.f32 %v8835_v36, %v13446_v16  ;;  %v2814_v9 = vadd.f32 %v8835_v36, %v13447_v22  ;;  %v13448_v50 = vld [vmem:[#allocation515_spill] sm:$0xff]  ;;  %v13449_v58 = vld [vmem:[#allocation516_spill] sm:$0xff] }
 0x379   : > { %3822 = vst [vmem:[%s8863_s19 + $0x1028] sm:$0xff] %v2798_v2  ;;  %3823 = vst [vmem:[%s8863_s19 + $0x1030] sm:$0xff] %v2799_v29  ;;  %v2815_v17 = vadd.f32 %v8835_v36, %v13448_v50  ;;  %v2816_v19 = vadd.f32 %v8835_v36, %v13449_v58  ;;  %v13450_v2 = vld [vmem:[#allocation517_spill] sm:$0xff]  ;;  %v13451_v29 = vld [vmem:[#allocation518_spill] sm:$0xff] }
 0x37a   : > { %3824 = vst [vmem:[%s8863_s19 + $0x1038] sm:$0xff] %v2800_v31  ;;  %3825 = vst [vmem:[%s8863_s19 + $0x1040] sm:$0xff] %v2801_v37  ;;  %v2817_v24 = vadd.f32 %v8835_v36, %v13450_v2  ;;  %v2818_v30 = vadd.f32 %v8835_v36, %v13451_v29  ;;  %v13452_v31 = vld [vmem:[#allocation519_spill] sm:$0xff]  ;;  %v13453_v37 = vld [vmem:[#allocation520_spill] sm:$0xff] }
 0x37b   : > { %3826 = vst [vmem:[%s8863_s19 + $0x1048] sm:$0xff] %v2802_v39  ;;  %3827 = vst [vmem:[%s8863_s19 + $0x1050] sm:$0xff] %v2803_v45  ;;  %v2819_v32 = vadd.f32 %v8835_v36, %v13452_v31  ;;  %v2820_v38 = vadd.f32 %v8835_v36, %v13453_v37  ;;  %v13454_v39 = vld [vmem:[#allocation521_spill] sm:$0xff]  ;;  %v13455_v45 = vld [vmem:[#allocation522_spill] sm:$0xff] }
 0x37c   : > { %3828 = vst [vmem:[%s8863_s19 + $0x1058] sm:$0xff] %v2804_v47  ;;  %3829 = vst [vmem:[%s8863_s19 + $0x1060] sm:$0xff] %v2805_v53  ;;  %v2821_v40 = vadd.f32 %v8835_v36, %v13454_v39  ;;  %v2822_v46 = vadd.f32 %v8835_v36, %v13455_v45  ;;  %v13456_v47 = vld [vmem:[#allocation523_spill] sm:$0xff]  ;;  %v13457_v53 = vld [vmem:[#allocation524_spill] sm:$0xff] }
 0x37d   : > { %3830 = vst [vmem:[%s8863_s19 + $0x1068] sm:$0xff] %v2806_v55  ;;  %3831 = vst [vmem:[%s8863_s19 + $0x1070] sm:$0xff] %v2807_v61  ;;  %v2823_v48 = vadd.f32 %v8835_v36, %v13456_v47  ;;  %v2824_v54 = vadd.f32 %v8835_v36, %v13457_v53  ;;  %v13458_v55 = vld [vmem:[#allocation525_spill] sm:$0xff]  ;;  %v13459_v61 = vld [vmem:[#allocation526_spill] sm:$0xff] }
 0x37e   : > { %3832 = vst [vmem:[%s8863_s19 + $0x1078] sm:$0xff] %v2808_v63  ;;  %3833 = vst [vmem:[%s8863_s19 + $0x1080] sm:$0xff] %v2809_v5  ;;  %v2825_v56 = vadd.f32 %v8835_v36, %v13458_v55  ;;  %v2826_v62 = vadd.f32 %v8835_v36, %v13459_v61  ;;  %v13460_v63 = vld [vmem:[#allocation527_spill] sm:$0xff]  ;;  %v13461_v5 = vld [vmem:[#allocation528_spill] sm:$0xff] }
 0x37f   : > { %3834 = vst [vmem:[%s8863_s19 + $0x1088] sm:$0xff] %v2810_v7  ;;  %3835 = vst [vmem:[%s8863_s19 + $0x1090] sm:$0xff] %v2811_v13  ;;  %v2827_v0 = vadd.f32 %v8835_v36, %v13460_v63  ;;  %v2828_v6 = vadd.f32 %v8835_v36, %v13461_v5  ;;  %v13462_v7 = vld [vmem:[#allocation529_spill] sm:$0xff]  ;;  %v13463_v13 = vld [vmem:[#allocation530_spill] sm:$0xff] }
 0x380   : > { %3836 = vst [vmem:[%s8863_s19 + $0x1098] sm:$0xff] %v2812_v15  ;;  %3837 = vst [vmem:[%s8863_s19 + $0x10a0] sm:$0xff] %v2813_v49  ;;  %v2829_v8 = vadd.f32 %v8835_v36, %v13462_v7  ;;  %v2830_v14 = vadd.f32 %v8835_v36, %v13463_v13  ;;  %v13464_v15 = vld [vmem:[#allocation531_spill] sm:$0xff]  ;;  %v13465_v49 = vld [vmem:[#allocation532_spill] sm:$0xff] }
 0x381   : > { %3838 = vst [vmem:[%s8863_s19 + $0x10a8] sm:$0xff] %v2814_v9  ;;  %3839 = vst [vmem:[%s8863_s19 + $0x10b0] sm:$0xff] %v2815_v17  ;;  %v2831_v16 = vadd.f32 %v8835_v36, %v13464_v15  ;;  %v2832_v22 = vadd.f32 %v8835_v36, %v13465_v49  ;;  %v13466_v9 = vld [vmem:[#allocation533_spill] sm:$0xff]  ;;  %v13467_v17 = vld [vmem:[#allocation534_spill] sm:$0xff] }
 0x382   : > { %3840 = vst [vmem:[%s8863_s19 + $0x10b8] sm:$0xff] %v2816_v19  ;;  %3841 = vst [vmem:[%s8863_s19 + $0x10c0] sm:$0xff] %v2817_v24  ;;  %v2833_v50 = vadd.f32 %v8835_v36, %v13466_v9  ;;  %v2834_v58 = vadd.f32 %v8835_v36, %v13467_v17  ;;  %v13468_v19 = vld [vmem:[#allocation535_spill] sm:$0xff]  ;;  %v13469_v24 = vld [vmem:[#allocation536_spill] sm:$0xff] }
 0x383   : > { %3842 = vst [vmem:[%s8863_s19 + $0x10c8] sm:$0xff] %v2818_v30  ;;  %3843 = vst [vmem:[%s8863_s19 + $0x10d0] sm:$0xff] %v2819_v32  ;;  %v2835_v2 = vadd.f32 %v8835_v36, %v13468_v19  ;;  %v2836_v29 = vadd.f32 %v8835_v36, %v13469_v24  ;;  %v13470_v30 = vld [vmem:[#allocation537_spill] sm:$0xff]  ;;  %v13471_v32 = vld [vmem:[#allocation538_spill] sm:$0xff] }
 0x384   : > { %3844 = vst [vmem:[%s8863_s19 + $0x10d8] sm:$0xff] %v2820_v38  ;;  %3845 = vst [vmem:[%s8863_s19 + $0x10e0] sm:$0xff] %v2821_v40  ;;  %v2837_v31 = vadd.f32 %v8835_v36, %v13470_v30  ;;  %v2838_v37 = vadd.f32 %v8835_v36, %v13471_v32  ;;  %v13472_v38 = vld [vmem:[#allocation539_spill] sm:$0xff]  ;;  %v13473_v40 = vld [vmem:[#allocation540_spill] sm:$0xff] }
 0x385   : > { %3846 = vst [vmem:[%s8863_s19 + $0x10e8] sm:$0xff] %v2822_v46  ;;  %3847 = vst [vmem:[%s8863_s19 + $0x10f0] sm:$0xff] %v2823_v48  ;;  %v2839_v39 = vadd.f32 %v8835_v36, %v13472_v38  ;;  %v2840_v45 = vadd.f32 %v8835_v36, %v13473_v40  ;;  %v13474_v46 = vld [vmem:[#allocation541_spill] sm:$0xff]  ;;  %v13475_v48 = vld [vmem:[#allocation542_spill] sm:$0xff] }
 0x386   : > { %3848 = vst [vmem:[%s8863_s19 + $0x10f8] sm:$0xff] %v2824_v54  ;;  %3849 = vst [vmem:[%s8863_s19 + $0x1100] sm:$0xff] %v2825_v56  ;;  %v2841_v47 = vadd.f32 %v8835_v36, %v13474_v46  ;;  %v2842_v53 = vadd.f32 %v8835_v36, %v13475_v48  ;;  %v13476_v54 = vld [vmem:[#allocation543_spill] sm:$0xff]  ;;  %v13477_v56 = vld [vmem:[#allocation544_spill] sm:$0xff] }
 0x387   : > { %3850 = vst [vmem:[%s8863_s19 + $0x1108] sm:$0xff] %v2826_v62  ;;  %3851 = vst [vmem:[%s8863_s19 + $0x1110] sm:$0xff] %v2827_v0  ;;  %v2843_v55 = vadd.f32 %v8835_v36, %v13476_v54  ;;  %v2844_v61 = vadd.f32 %v8835_v36, %v13477_v56  ;;  %v13478_v62 = vld [vmem:[#allocation545_spill] sm:$0xff]  ;;  %v13479_v0 = vld [vmem:[#allocation546_spill] sm:$0xff] }
 0x388   : > { %3852 = vst [vmem:[%s8863_s19 + $0x1118] sm:$0xff] %v2828_v6  ;;  %3853 = vst [vmem:[%s8863_s19 + $0x1120] sm:$0xff] %v2829_v8  ;;  %v2845_v63 = vadd.f32 %v8835_v36, %v13478_v62  ;;  %v2846_v5 = vadd.f32 %v8835_v36, %v13479_v0  ;;  %v13480_v6 = vld [vmem:[#allocation547_spill] sm:$0xff]  ;;  %v13481_v8 = vld [vmem:[#allocation548_spill] sm:$0xff] }
 0x389   : > { %3854 = vst [vmem:[%s8863_s19 + $0x1128] sm:$0xff] %v2830_v14  ;;  %3855 = vst [vmem:[%s8863_s19 + $0x1130] sm:$0xff] %v2831_v16  ;;  %v2847_v7 = vadd.f32 %v8835_v36, %v13480_v6  ;;  %v2848_v13 = vadd.f32 %v8835_v36, %v13481_v8  ;;  %v13482_v14 = vld [vmem:[#allocation549_spill] sm:$0xff]  ;;  %v13483_v16 = vld [vmem:[#allocation550_spill] sm:$0xff] }
 0x38a   : > { %3856 = vst [vmem:[%s8863_s19 + $0x1138] sm:$0xff] %v2832_v22  ;;  %3857 = vst [vmem:[%s8863_s19 + $0x1140] sm:$0xff] %v2833_v50  ;;  %v2849_v15 = vadd.f32 %v8835_v36, %v13482_v14  ;;  %v2850_v49 = vadd.f32 %v8835_v36, %v13483_v16  ;;  %v13484_v22 = vld [vmem:[#allocation551_spill] sm:$0xff]  ;;  %v13485_v50 = vld [vmem:[#allocation552_spill] sm:$0xff] }
 0x38b   : > { %3858 = vst [vmem:[%s8863_s19 + $0x1148] sm:$0xff] %v2834_v58  ;;  %3859 = vst [vmem:[%s8863_s19 + $0x1150] sm:$0xff] %v2835_v2  ;;  %v2851_v9 = vadd.f32 %v8835_v36, %v13484_v22  ;;  %v2852_v17 = vadd.f32 %v8835_v36, %v13485_v50  ;;  %v13486_v58 = vld [vmem:[#allocation553_spill] sm:$0xff]  ;;  %v13487_v2 = vld [vmem:[#allocation554_spill] sm:$0xff] }
 0x38c   : > { %3860 = vst [vmem:[%s8863_s19 + $0x1158] sm:$0xff] %v2836_v29  ;;  %3861 = vst [vmem:[%s8863_s19 + $0x1160] sm:$0xff] %v2837_v31  ;;  %v2853_v19 = vadd.f32 %v8835_v36, %v13486_v58  ;;  %v2854_v24 = vadd.f32 %v8835_v36, %v13487_v2  ;;  %v13488_v29 = vld [vmem:[#allocation555_spill] sm:$0xff]  ;;  %v13489_v31 = vld [vmem:[#allocation556_spill] sm:$0xff] }
 0x38d   : > { %3862 = vst [vmem:[%s8863_s19 + $0x1168] sm:$0xff] %v2838_v37  ;;  %3863 = vst [vmem:[%s8863_s19 + $0x1170] sm:$0xff] %v2839_v39  ;;  %v2855_v30 = vadd.f32 %v8835_v36, %v13488_v29  ;;  %v2856_v32 = vadd.f32 %v8835_v36, %v13489_v31  ;;  %v13490_v37 = vld [vmem:[#allocation557_spill] sm:$0xff]  ;;  %v13491_v39 = vld [vmem:[#allocation558_spill] sm:$0xff] }
 0x38e   : > { %3864 = vst [vmem:[%s8863_s19 + $0x1178] sm:$0xff] %v2840_v45  ;;  %3865 = vst [vmem:[%s8863_s19 + $0x1180] sm:$0xff] %v2841_v47  ;;  %v2857_v38 = vadd.f32 %v8835_v36, %v13490_v37  ;;  %v2858_v40 = vadd.f32 %v8835_v36, %v13491_v39  ;;  %v13492_v45 = vld [vmem:[#allocation559_spill] sm:$0xff]  ;;  %v13493_v47 = vld [vmem:[#allocation560_spill] sm:$0xff] }
 0x38f   : > { %3866 = vst [vmem:[%s8863_s19 + $0x1188] sm:$0xff] %v2842_v53  ;;  %3867 = vst [vmem:[%s8863_s19 + $0x1190] sm:$0xff] %v2843_v55  ;;  %v2859_v46 = vadd.f32 %v8835_v36, %v13492_v45  ;;  %v2860_v48 = vadd.f32 %v8835_v36, %v13493_v47  ;;  %v13494_v53 = vld [vmem:[#allocation561_spill] sm:$0xff]  ;;  %v13495_v55 = vld [vmem:[#allocation562_spill] sm:$0xff] }
 0x390   : > { %3868 = vst [vmem:[%s8863_s19 + $0x1198] sm:$0xff] %v2844_v61  ;;  %3869 = vst [vmem:[%s8863_s19 + $0x11a0] sm:$0xff] %v2845_v63  ;;  %v2861_v54 = vadd.f32 %v8835_v36, %v13494_v53  ;;  %v2862_v56 = vadd.f32 %v8835_v36, %v13495_v55  ;;  %v13496_v61 = vld [vmem:[#allocation563_spill] sm:$0xff]  ;;  %v13497_v63 = vld [vmem:[#allocation564_spill] sm:$0xff] }
 0x391   : > { %3870 = vst [vmem:[%s8863_s19 + $0x11a8] sm:$0xff] %v2846_v5  ;;  %3871 = vst [vmem:[%s8863_s19 + $0x11b0] sm:$0xff] %v2847_v7  ;;  %v2863_v62 = vadd.f32 %v8835_v36, %v13496_v61  ;;  %v2864_v0 = vadd.f32 %v8835_v36, %v13497_v63  ;;  %v13498_v5 = vld [vmem:[#allocation565_spill] sm:$0xff]  ;;  %v13499_v7 = vld [vmem:[#allocation566_spill] sm:$0xff] }
 0x392   : > { %3872 = vst [vmem:[%s8863_s19 + $0x11b8] sm:$0xff] %v2848_v13  ;;  %3873 = vst [vmem:[%s8863_s19 + $0x11c0] sm:$0xff] %v2849_v15  ;;  %v2865_v6 = vadd.f32 %v8835_v36, %v13498_v5  ;;  %v2866_v8 = vadd.f32 %v8835_v36, %v13499_v7  ;;  %v13500_v13 = vld [vmem:[#allocation567_spill] sm:$0xff]  ;;  %v13501_v15 = vld [vmem:[#allocation568_spill] sm:$0xff] }
 0x393   : > { %3874 = vst [vmem:[%s8863_s19 + $0x11c8] sm:$0xff] %v2850_v49  ;;  %3875 = vst [vmem:[%s8863_s19 + $0x11d0] sm:$0xff] %v2851_v9  ;;  %v2867_v14 = vadd.f32 %v8835_v36, %v13500_v13  ;;  %v2868_v16 = vadd.f32 %v8835_v36, %v13501_v15  ;;  %v13502_v49 = vld [vmem:[#allocation569_spill] sm:$0xff]  ;;  %v13503_v9 = vld [vmem:[#allocation570_spill] sm:$0xff] }
 0x394   : > { %3876 = vst [vmem:[%s8863_s19 + $0x11d8] sm:$0xff] %v2852_v17  ;;  %3877 = vst [vmem:[%s8863_s19 + $0x11e0] sm:$0xff] %v2853_v19  ;;  %v2869_v22 = vadd.f32 %v8835_v36, %v13502_v49  ;;  %v2870_v50 = vadd.f32 %v8835_v36, %v13503_v9  ;;  %v13504_v17 = vld [vmem:[#allocation571_spill] sm:$0xff]  ;;  %v13505_v19 = vld [vmem:[#allocation572_spill] sm:$0xff] }
 0x395   : > { %3878 = vst [vmem:[%s8863_s19 + $0x11e8] sm:$0xff] %v2854_v24  ;;  %3879 = vst [vmem:[%s8863_s19 + $0x11f0] sm:$0xff] %v2855_v30  ;;  %v2871_v58 = vadd.f32 %v8835_v36, %v13504_v17  ;;  %v2872_v2 = vadd.f32 %v8835_v36, %v13505_v19  ;;  %v13506_v24 = vld [vmem:[#allocation573_spill] sm:$0xff]  ;;  %v13507_v30 = vld [vmem:[#allocation574_spill] sm:$0xff] }
 0x396   : > { %3880 = vst [vmem:[%s8863_s19 + $0x11f8] sm:$0xff] %v2856_v32  ;;  %3881 = vst [vmem:[%s8863_s19 + $0x1200] sm:$0xff] %v2857_v38  ;;  %v2873_v29 = vadd.f32 %v8835_v36, %v13506_v24  ;;  %v2874_v31 = vadd.f32 %v8835_v36, %v13507_v30  ;;  %v13508_v32 = vld [vmem:[#allocation575_spill] sm:$0xff]  ;;  %v13509_v38 = vld [vmem:[#allocation576_spill] sm:$0xff] }
 0x397   : > { %3882 = vst [vmem:[%s8863_s19 + $0x1208] sm:$0xff] %v2858_v40  ;;  %3883 = vst [vmem:[%s8863_s19 + $0x1210] sm:$0xff] %v2859_v46  ;;  %v2875_v37 = vadd.f32 %v8835_v36, %v13508_v32  ;;  %v2876_v39 = vadd.f32 %v8835_v36, %v13509_v38  ;;  %v13510_v40 = vld [vmem:[#allocation577_spill] sm:$0xff]  ;;  %v13511_v46 = vld [vmem:[#allocation578_spill] sm:$0xff] }
 0x398   : > { %3884 = vst [vmem:[%s8863_s19 + $0x1218] sm:$0xff] %v2860_v48  ;;  %3885 = vst [vmem:[%s8863_s19 + $0x1220] sm:$0xff] %v2861_v54  ;;  %v2877_v45 = vadd.f32 %v8835_v36, %v13510_v40  ;;  %v2878_v47 = vadd.f32 %v8835_v36, %v13511_v46  ;;  %v13512_v48 = vld [vmem:[#allocation579_spill] sm:$0xff]  ;;  %v13513_v54 = vld [vmem:[#allocation580_spill] sm:$0xff] }
 0x399   : > { %3886 = vst [vmem:[%s8863_s19 + $0x1228] sm:$0xff] %v2862_v56  ;;  %3887 = vst [vmem:[%s8863_s19 + $0x1230] sm:$0xff] %v2863_v62  ;;  %v2879_v53 = vadd.f32 %v8835_v36, %v13512_v48  ;;  %v2880_v55 = vadd.f32 %v8835_v36, %v13513_v54  ;;  %v13514_v56 = vld [vmem:[#allocation581_spill] sm:$0xff]  ;;  %v13515_v62 = vld [vmem:[#allocation582_spill] sm:$0xff] }
 0x39a   : > { %3888 = vst [vmem:[%s8863_s19 + $0x1238] sm:$0xff] %v2864_v0  ;;  %3889 = vst [vmem:[%s8863_s19 + $0x1240] sm:$0xff] %v2865_v6  ;;  %v2881_v61 = vadd.f32 %v8835_v36, %v13514_v56  ;;  %v2882_v63 = vadd.f32 %v8835_v36, %v13515_v62  ;;  %v13516_v0 = vld [vmem:[#allocation583_spill] sm:$0xff]  ;;  %v13517_v6 = vld [vmem:[#allocation584_spill] sm:$0xff] }
 0x39b   : > { %3890 = vst [vmem:[%s8863_s19 + $0x1248] sm:$0xff] %v2866_v8  ;;  %3891 = vst [vmem:[%s8863_s19 + $0x1250] sm:$0xff] %v2867_v14  ;;  %v2883_v5 = vadd.f32 %v8835_v36, %v13516_v0  ;;  %v2884_v7 = vadd.f32 %v8835_v36, %v13517_v6  ;;  %v13518_v8 = vld [vmem:[#allocation585_spill] sm:$0xff]  ;;  %v13519_v14 = vld [vmem:[#allocation586_spill] sm:$0xff] }
 0x39c   : > { %3892 = vst [vmem:[%s8863_s19 + $0x1258] sm:$0xff] %v2868_v16  ;;  %3893 = vst [vmem:[%s8863_s19 + $0x1260] sm:$0xff] %v2869_v22  ;;  %v2885_v13 = vadd.f32 %v8835_v36, %v13518_v8  ;;  %v2886_v15 = vadd.f32 %v8835_v36, %v13519_v14  ;;  %v13520_v16 = vld [vmem:[#allocation587_spill] sm:$0xff]  ;;  %v13521_v22 = vld [vmem:[#allocation588_spill] sm:$0xff] }
 0x39d   : > { %3894 = vst [vmem:[%s8863_s19 + $0x1268] sm:$0xff] %v2870_v50  ;;  %3895 = vst [vmem:[%s8863_s19 + $0x1270] sm:$0xff] %v2871_v58  ;;  %v2887_v49 = vadd.f32 %v8835_v36, %v13520_v16  ;;  %v2888_v9 = vadd.f32 %v8835_v36, %v13521_v22  ;;  %v13522_v50 = vld [vmem:[#allocation589_spill] sm:$0xff]  ;;  %v13523_v58 = vld [vmem:[#allocation590_spill] sm:$0xff] }
 0x39e   : > { %3896 = vst [vmem:[%s8863_s19 + $0x1278] sm:$0xff] %v2872_v2  ;;  %3897 = vst [vmem:[%s8863_s19 + $0x1280] sm:$0xff] %v2873_v29  ;;  %v2889_v17 = vadd.f32 %v8835_v36, %v13522_v50  ;;  %v2890_v19 = vadd.f32 %v8835_v36, %v13523_v58  ;;  %v13524_v2 = vld [vmem:[#allocation591_spill] sm:$0xff]  ;;  %v13525_v29 = vld [vmem:[#allocation592_spill] sm:$0xff] }
 0x39f   : > { %3898 = vst [vmem:[%s8863_s19 + $0x1288] sm:$0xff] %v2874_v31  ;;  %3899 = vst [vmem:[%s8863_s19 + $0x1290] sm:$0xff] %v2875_v37  ;;  %v2891_v24 = vadd.f32 %v8835_v36, %v13524_v2  ;;  %v2892_v30 = vadd.f32 %v8835_v36, %v13525_v29  ;;  %v13526_v31 = vld [vmem:[#allocation593_spill] sm:$0xff]  ;;  %v13527_v37 = vld [vmem:[#allocation594_spill] sm:$0xff] }
 0x3a0   : > { %3900 = vst [vmem:[%s8863_s19 + $0x1298] sm:$0xff] %v2876_v39  ;;  %3901 = vst [vmem:[%s8863_s19 + $0x12a0] sm:$0xff] %v2877_v45  ;;  %v2893_v32 = vadd.f32 %v8835_v36, %v13526_v31  ;;  %v2894_v38 = vadd.f32 %v8835_v36, %v13527_v37  ;;  %v13528_v39 = vld [vmem:[#allocation595_spill] sm:$0xff]  ;;  %v13529_v45 = vld [vmem:[#allocation596_spill] sm:$0xff] }
 0x3a1   : > { %3902 = vst [vmem:[%s8863_s19 + $0x12a8] sm:$0xff] %v2878_v47  ;;  %3903 = vst [vmem:[%s8863_s19 + $0x12b0] sm:$0xff] %v2879_v53  ;;  %v2895_v40 = vadd.f32 %v8835_v36, %v13528_v39  ;;  %v2896_v46 = vadd.f32 %v8835_v36, %v13529_v45  ;;  %v13530_v47 = vld [vmem:[#allocation597_spill] sm:$0xff]  ;;  %v13531_v53 = vld [vmem:[#allocation598_spill] sm:$0xff] }
 0x3a2   : > { %3904 = vst [vmem:[%s8863_s19 + $0x12b8] sm:$0xff] %v2880_v55  ;;  %3905 = vst [vmem:[%s8863_s19 + $0x12c0] sm:$0xff] %v2881_v61  ;;  %v2897_v48 = vadd.f32 %v8835_v36, %v13530_v47  ;;  %v2898_v54 = vadd.f32 %v8835_v36, %v13531_v53  ;;  %v13532_v55 = vld [vmem:[#allocation599_spill] sm:$0xff]  ;;  %v13533_v61 = vld [vmem:[#allocation600_spill] sm:$0xff] }
 0x3a3   : > { %3906 = vst [vmem:[%s8863_s19 + $0x12c8] sm:$0xff] %v2882_v63  ;;  %3907 = vst [vmem:[%s8863_s19 + $0x12d0] sm:$0xff] %v2883_v5  ;;  %v2899_v56 = vadd.f32 %v8835_v36, %v13532_v55  ;;  %v2900_v62 = vadd.f32 %v8835_v36, %v13533_v61  ;;  %v13534_v63 = vld [vmem:[#allocation601_spill] sm:$0xff]  ;;  %v13535_v5 = vld [vmem:[#allocation602_spill] sm:$0xff] }
 0x3a4   : > { %3908 = vst [vmem:[%s8863_s19 + $0x12d8] sm:$0xff] %v2884_v7  ;;  %3909 = vst [vmem:[%s8863_s19 + $0x12e0] sm:$0xff] %v2885_v13  ;;  %v2901_v0 = vadd.f32 %v8835_v36, %v13534_v63  ;;  %v2902_v6 = vadd.f32 %v8835_v36, %v13535_v5  ;;  %v13536_v7 = vld [vmem:[#allocation603_spill] sm:$0xff]  ;;  %v13537_v13 = vld [vmem:[#allocation604_spill] sm:$0xff] }
 0x3a5   : > { %3910 = vst [vmem:[%s8863_s19 + $0x12e8] sm:$0xff] %v2886_v15  ;;  %3911 = vst [vmem:[%s8863_s19 + $0x12f0] sm:$0xff] %v2887_v49  ;;  %v2903_v8 = vadd.f32 %v8835_v36, %v13536_v7  ;;  %v2904_v14 = vadd.f32 %v8835_v36, %v13537_v13  ;;  %v13538_v15 = vld [vmem:[#allocation605_spill] sm:$0xff]  ;;  %v13539_v49 = vld [vmem:[#allocation606_spill] sm:$0xff] }
 0x3a6   : > { %3912 = vst [vmem:[%s8863_s19 + $0x12f8] sm:$0xff] %v2888_v9  ;;  %3913 = vst [vmem:[%s8863_s19 + $0x1300] sm:$0xff] %v2889_v17  ;;  %v2905_v16 = vadd.f32 %v8835_v36, %v13538_v15  ;;  %v2906_v22 = vadd.f32 %v8835_v36, %v13539_v49  ;;  %v13540_v9 = vld [vmem:[#allocation607_spill] sm:$0xff]  ;;  %v13541_v17 = vld [vmem:[#allocation608_spill] sm:$0xff] }
 0x3a7   : > { %3914 = vst [vmem:[%s8863_s19 + $0x1308] sm:$0xff] %v2890_v19  ;;  %3915 = vst [vmem:[%s8863_s19 + $0x1310] sm:$0xff] %v2891_v24  ;;  %v2907_v50 = vadd.f32 %v8835_v36, %v13540_v9  ;;  %v2908_v58 = vadd.f32 %v8835_v36, %v13541_v17  ;;  %v13542_v19 = vld [vmem:[#allocation609_spill] sm:$0xff]  ;;  %v13543_v24 = vld [vmem:[#allocation610_spill] sm:$0xff] }
 0x3a8   : > { %3916 = vst [vmem:[%s8863_s19 + $0x1318] sm:$0xff] %v2892_v30  ;;  %3917 = vst [vmem:[%s8863_s19 + $0x1320] sm:$0xff] %v2893_v32  ;;  %v2909_v2 = vadd.f32 %v8835_v36, %v13542_v19  ;;  %v2910_v29 = vadd.f32 %v8835_v36, %v13543_v24  ;;  %v13544_v30 = vld [vmem:[#allocation611_spill] sm:$0xff]  ;;  %v13545_v32 = vld [vmem:[#allocation612_spill] sm:$0xff] }
 0x3a9   : > { %3918 = vst [vmem:[%s8863_s19 + $0x1328] sm:$0xff] %v2894_v38  ;;  %3919 = vst [vmem:[%s8863_s19 + $0x1330] sm:$0xff] %v2895_v40  ;;  %v2911_v31 = vadd.f32 %v8835_v36, %v13544_v30  ;;  %v2912_v37 = vadd.f32 %v8835_v36, %v13545_v32  ;;  %v13546_v38 = vld [vmem:[#allocation613_spill] sm:$0xff]  ;;  %v13547_v40 = vld [vmem:[#allocation614_spill] sm:$0xff] }
 0x3aa   : > { %3920 = vst [vmem:[%s8863_s19 + $0x1338] sm:$0xff] %v2896_v46  ;;  %3921 = vst [vmem:[%s8863_s19 + $0x1340] sm:$0xff] %v2897_v48  ;;  %v2913_v39 = vadd.f32 %v8835_v36, %v13546_v38  ;;  %v2914_v45 = vadd.f32 %v8835_v36, %v13547_v40  ;;  %v13548_v46 = vld [vmem:[#allocation615_spill] sm:$0xff]  ;;  %v13549_v48 = vld [vmem:[#allocation616_spill] sm:$0xff] }
 0x3ab   : > { %3922 = vst [vmem:[%s8863_s19 + $0x1348] sm:$0xff] %v2898_v54  ;;  %3923 = vst [vmem:[%s8863_s19 + $0x1350] sm:$0xff] %v2899_v56  ;;  %v2915_v47 = vadd.f32 %v8835_v36, %v13548_v46  ;;  %v2916_v53 = vadd.f32 %v8835_v36, %v13549_v48  ;;  %v13550_v54 = vld [vmem:[#allocation617_spill] sm:$0xff]  ;;  %v13551_v56 = vld [vmem:[#allocation618_spill] sm:$0xff] }
 0x3ac   : > { %3924 = vst [vmem:[%s8863_s19 + $0x1358] sm:$0xff] %v2900_v62  ;;  %3925 = vst [vmem:[%s8863_s19 + $0x1360] sm:$0xff] %v2901_v0  ;;  %v2917_v55 = vadd.f32 %v8835_v36, %v13550_v54  ;;  %v2918_v61 = vadd.f32 %v8835_v36, %v13551_v56  ;;  %v13552_v62 = vld [vmem:[#allocation619_spill] sm:$0xff]  ;;  %v13553_v0 = vld [vmem:[#allocation620_spill] sm:$0xff] }
 0x3ad   : > { %3926 = vst [vmem:[%s8863_s19 + $0x1368] sm:$0xff] %v2902_v6  ;;  %3927 = vst [vmem:[%s8863_s19 + $0x1370] sm:$0xff] %v2903_v8  ;;  %v2919_v63 = vadd.f32 %v8835_v36, %v13552_v62  ;;  %v2920_v5 = vadd.f32 %v8835_v36, %v13553_v0  ;;  %v13554_v6 = vld [vmem:[#allocation621_spill] sm:$0xff]  ;;  %v13555_v8 = vld [vmem:[#allocation622_spill] sm:$0xff] }
 0x3ae   : > { %3928 = vst [vmem:[%s8863_s19 + $0x1378] sm:$0xff] %v2904_v14  ;;  %3929 = vst [vmem:[%s8863_s19 + $0x1380] sm:$0xff] %v2905_v16  ;;  %v2921_v7 = vadd.f32 %v8835_v36, %v13554_v6  ;;  %v2922_v13 = vadd.f32 %v8835_v36, %v13555_v8  ;;  %v13556_v14 = vld [vmem:[#allocation623_spill] sm:$0xff]  ;;  %v13557_v16 = vld [vmem:[#allocation624_spill] sm:$0xff] }
 0x3af   : > { %3930 = vst [vmem:[%s8863_s19 + $0x1388] sm:$0xff] %v2906_v22  ;;  %3931 = vst [vmem:[%s8863_s19 + $0x1390] sm:$0xff] %v2907_v50  ;;  %v2923_v15 = vadd.f32 %v8835_v36, %v13556_v14  ;;  %v2924_v49 = vadd.f32 %v8835_v36, %v13557_v16  ;;  %v13558_v22 = vld [vmem:[#allocation625_spill] sm:$0xff]  ;;  %v13559_v50 = vld [vmem:[#allocation626_spill] sm:$0xff] }
 0x3b0   : > { %3932 = vst [vmem:[%s8863_s19 + $0x1398] sm:$0xff] %v2908_v58  ;;  %3933 = vst [vmem:[%s8863_s19 + $0x13a0] sm:$0xff] %v2909_v2  ;;  %v2925_v9 = vadd.f32 %v8835_v36, %v13558_v22  ;;  %v2926_v17 = vadd.f32 %v8835_v36, %v13559_v50  ;;  %v13560_v58 = vld [vmem:[#allocation627_spill] sm:$0xff]  ;;  %v13561_v2 = vld [vmem:[#allocation628_spill] sm:$0xff] }
 0x3b1   : > { %3934 = vst [vmem:[%s8863_s19 + $0x13a8] sm:$0xff] %v2910_v29  ;;  %3935 = vst [vmem:[%s8863_s19 + $0x13b0] sm:$0xff] %v2911_v31  ;;  %v2927_v19 = vadd.f32 %v8835_v36, %v13560_v58  ;;  %v2928_v24 = vadd.f32 %v8835_v36, %v13561_v2  ;;  %v13562_v29 = vld [vmem:[#allocation629_spill] sm:$0xff]  ;;  %v13563_v31 = vld [vmem:[#allocation630_spill] sm:$0xff] }
 0x3b2   : > { %3936 = vst [vmem:[%s8863_s19 + $0x13b8] sm:$0xff] %v2912_v37  ;;  %3937 = vst [vmem:[%s8863_s19 + $0x13c0] sm:$0xff] %v2913_v39  ;;  %v2929_v30 = vadd.f32 %v8835_v36, %v13562_v29  ;;  %v2930_v32 = vadd.f32 %v8835_v36, %v13563_v31  ;;  %v13564_v37 = vld [vmem:[#allocation631_spill] sm:$0xff]  ;;  %v13565_v39 = vld [vmem:[#allocation632_spill] sm:$0xff] }
 0x3b3   : > { %3938 = vst [vmem:[%s8863_s19 + $0x13c8] sm:$0xff] %v2914_v45  ;;  %3939 = vst [vmem:[%s8863_s19 + $0x13d0] sm:$0xff] %v2915_v47  ;;  %v2931_v38 = vadd.f32 %v8835_v36, %v13564_v37  ;;  %v2932_v40 = vadd.f32 %v8835_v36, %v13565_v39  ;;  %v13566_v45 = vld [vmem:[#allocation633_spill] sm:$0xff]  ;;  %v13567_v47 = vld [vmem:[#allocation634_spill] sm:$0xff] }
 0x3b4   : > { %3940 = vst [vmem:[%s8863_s19 + $0x13d8] sm:$0xff] %v2916_v53  ;;  %3941 = vst [vmem:[%s8863_s19 + $0x13e0] sm:$0xff] %v2917_v55  ;;  %v2933_v46 = vadd.f32 %v8835_v36, %v13566_v45  ;;  %v2934_v48 = vadd.f32 %v8835_v36, %v13567_v47  ;;  %v13568_v53 = vld [vmem:[#allocation635_spill] sm:$0xff]  ;;  %v13569_v55 = vld [vmem:[#allocation636_spill] sm:$0xff] }
 0x3b5   : > { %3942 = vst [vmem:[%s8863_s19 + $0x13e8] sm:$0xff] %v2918_v61  ;;  %3943 = vst [vmem:[%s8863_s19 + $0x13f0] sm:$0xff] %v2919_v63  ;;  %v2935_v54 = vadd.f32 %v8835_v36, %v13568_v53  ;;  %v2936_v56 = vadd.f32 %v8835_v36, %v13569_v55  ;;  %v13570_v61 = vld [vmem:[#allocation637_spill] sm:$0xff]  ;;  %v13571_v63 = vld [vmem:[#allocation638_spill] sm:$0xff] }
 0x3b6   : > { %3944 = vst [vmem:[%s8863_s19 + $0x13f8] sm:$0xff] %v2920_v5  ;;  %3945 = vst [vmem:[%s8863_s19 + $0x1400] sm:$0xff] %v2921_v7  ;;  %v2937_v62 = vadd.f32 %v8835_v36, %v13570_v61  ;;  %v2938_v0 = vadd.f32 %v8835_v36, %v13571_v63  ;;  %v13572_v5 = vld [vmem:[#allocation639_spill] sm:$0xff]  ;;  %v13573_v7 = vld [vmem:[#allocation640_spill] sm:$0xff] }
 0x3b7   : > { %3946 = vst [vmem:[%s8863_s19 + $0x1408] sm:$0xff] %v2922_v13  ;;  %3947 = vst [vmem:[%s8863_s19 + $0x1410] sm:$0xff] %v2923_v15  ;;  %v2939_v6 = vadd.f32 %v8835_v36, %v13572_v5  ;;  %v2940_v8 = vadd.f32 %v8835_v36, %v13573_v7  ;;  %v13574_v13 = vld [vmem:[#allocation641_spill] sm:$0xff]  ;;  %v13575_v15 = vld [vmem:[#allocation642_spill] sm:$0xff] }
 0x3b8   : > { %3948 = vst [vmem:[%s8863_s19 + $0x1418] sm:$0xff] %v2924_v49  ;;  %3949 = vst [vmem:[%s8863_s19 + $0x1420] sm:$0xff] %v2925_v9  ;;  %v2941_v14 = vadd.f32 %v8835_v36, %v13574_v13  ;;  %v2942_v16 = vadd.f32 %v8835_v36, %v13575_v15  ;;  %v13576_v49 = vld [vmem:[#allocation643_spill] sm:$0xff]  ;;  %v13577_v9 = vld [vmem:[#allocation644_spill] sm:$0xff] }
 0x3b9   : > { %3950 = vst [vmem:[%s8863_s19 + $0x1428] sm:$0xff] %v2926_v17  ;;  %3951 = vst [vmem:[%s8863_s19 + $0x1430] sm:$0xff] %v2927_v19  ;;  %v2943_v22 = vadd.f32 %v8835_v36, %v13576_v49  ;;  %v2944_v50 = vadd.f32 %v8835_v36, %v13577_v9  ;;  %v13578_v17 = vld [vmem:[#allocation645_spill] sm:$0xff]  ;;  %v13579_v19 = vld [vmem:[#allocation646_spill] sm:$0xff] }
 0x3ba   : > { %3952 = vst [vmem:[%s8863_s19 + $0x1438] sm:$0xff] %v2928_v24  ;;  %3953 = vst [vmem:[%s8863_s19 + $0x1440] sm:$0xff] %v2929_v30  ;;  %v2945_v58 = vadd.f32 %v8835_v36, %v13578_v17  ;;  %v2946_v2 = vadd.f32 %v8835_v36, %v13579_v19  ;;  %v13580_v24 = vld [vmem:[#allocation647_spill] sm:$0xff]  ;;  %v13581_v30 = vld [vmem:[#allocation648_spill] sm:$0xff] }
 0x3bb   : > { %3954 = vst [vmem:[%s8863_s19 + $0x1448] sm:$0xff] %v2930_v32  ;;  %3955 = vst [vmem:[%s8863_s19 + $0x1450] sm:$0xff] %v2931_v38  ;;  %v2947_v29 = vadd.f32 %v8835_v36, %v13580_v24  ;;  %v2948_v31 = vadd.f32 %v8835_v36, %v13581_v30  ;;  %v13582_v32 = vld [vmem:[#allocation649_spill] sm:$0xff]  ;;  %v13583_v38 = vld [vmem:[#allocation650_spill] sm:$0xff] }
 0x3bc   : > { %3956 = vst [vmem:[%s8863_s19 + $0x1458] sm:$0xff] %v2932_v40  ;;  %3957 = vst [vmem:[%s8863_s19 + $0x1460] sm:$0xff] %v2933_v46  ;;  %v2949_v37 = vadd.f32 %v8835_v36, %v13582_v32  ;;  %v2950_v39 = vadd.f32 %v8835_v36, %v13583_v38  ;;  %v13584_v40 = vld [vmem:[#allocation651_spill] sm:$0xff]  ;;  %v13585_v46 = vld [vmem:[#allocation652_spill] sm:$0xff] }
 0x3bd   : > { %3958 = vst [vmem:[%s8863_s19 + $0x1468] sm:$0xff] %v2934_v48  ;;  %3959 = vst [vmem:[%s8863_s19 + $0x1470] sm:$0xff] %v2935_v54  ;;  %v2951_v45 = vadd.f32 %v8835_v36, %v13584_v40  ;;  %v2952_v47 = vadd.f32 %v8835_v36, %v13585_v46  ;;  %v13586_v48 = vld [vmem:[#allocation653_spill] sm:$0xff]  ;;  %v13587_v54 = vld [vmem:[#allocation654_spill] sm:$0xff] }
 0x3be   : > { %3960 = vst [vmem:[%s8863_s19 + $0x1478] sm:$0xff] %v2936_v56  ;;  %3961 = vst [vmem:[%s8863_s19 + $0x1480] sm:$0xff] %v2937_v62  ;;  %v2953_v53 = vadd.f32 %v8835_v36, %v13586_v48  ;;  %v2954_v55 = vadd.f32 %v8835_v36, %v13587_v54  ;;  %v13588_v56 = vld [vmem:[#allocation655_spill] sm:$0xff]  ;;  %v13589_v62 = vld [vmem:[#allocation656_spill] sm:$0xff] }
 0x3bf   : > { %3962 = vst [vmem:[%s8863_s19 + $0x1488] sm:$0xff] %v2938_v0  ;;  %3963 = vst [vmem:[%s8863_s19 + $0x1490] sm:$0xff] %v2939_v6  ;;  %v2955_v61 = vadd.f32 %v8835_v36, %v13588_v56  ;;  %v2956_v63 = vadd.f32 %v8835_v36, %v13589_v62  ;;  %v13590_v0 = vld [vmem:[#allocation657_spill] sm:$0xff]  ;;  %v13591_v6 = vld [vmem:[#allocation658_spill] sm:$0xff] }
 0x3c0   : > { %3964 = vst [vmem:[%s8863_s19 + $0x1498] sm:$0xff] %v2940_v8  ;;  %3965 = vst [vmem:[%s8863_s19 + $0x14a0] sm:$0xff] %v2941_v14  ;;  %v2957_v5 = vadd.f32 %v8835_v36, %v13590_v0  ;;  %v2958_v7 = vadd.f32 %v8835_v36, %v13591_v6  ;;  %v13592_v8 = vld [vmem:[#allocation659_spill] sm:$0xff]  ;;  %v13593_v14 = vld [vmem:[#allocation660_spill] sm:$0xff] }
 0x3c1   : > { %3966 = vst [vmem:[%s8863_s19 + $0x14a8] sm:$0xff] %v2942_v16  ;;  %3967 = vst [vmem:[%s8863_s19 + $0x14b0] sm:$0xff] %v2943_v22  ;;  %v2959_v13 = vadd.f32 %v8835_v36, %v13592_v8  ;;  %v2960_v15 = vadd.f32 %v8835_v36, %v13593_v14  ;;  %v13594_v16 = vld [vmem:[#allocation661_spill] sm:$0xff]  ;;  %v13595_v22 = vld [vmem:[#allocation662_spill] sm:$0xff] }
 0x3c2   : > { %3968 = vst [vmem:[%s8863_s19 + $0x14b8] sm:$0xff] %v2944_v50  ;;  %3969 = vst [vmem:[%s8863_s19 + $0x14c0] sm:$0xff] %v2945_v58  ;;  %v2961_v49 = vadd.f32 %v8835_v36, %v13594_v16  ;;  %v2962_v9 = vadd.f32 %v8835_v36, %v13595_v22  ;;  %v13596_v50 = vld [vmem:[#allocation663_spill] sm:$0xff]  ;;  %v13597_v58 = vld [vmem:[#allocation664_spill] sm:$0xff] }
 0x3c3   : > { %3970 = vst [vmem:[%s8863_s19 + $0x14c8] sm:$0xff] %v2946_v2  ;;  %3971 = vst [vmem:[%s8863_s19 + $0x14d0] sm:$0xff] %v2947_v29  ;;  %v2963_v17 = vadd.f32 %v8835_v36, %v13596_v50  ;;  %v2964_v19 = vadd.f32 %v8835_v36, %v13597_v58  ;;  %v13598_v2 = vld [vmem:[#allocation665_spill] sm:$0xff]  ;;  %v13599_v29 = vld [vmem:[#allocation666_spill] sm:$0xff] }
 0x3c4   : > { %3972 = vst [vmem:[%s8863_s19 + $0x14d8] sm:$0xff] %v2948_v31  ;;  %3973 = vst [vmem:[%s8863_s19 + $0x14e0] sm:$0xff] %v2949_v37  ;;  %v2965_v24 = vadd.f32 %v8835_v36, %v13598_v2  ;;  %v2966_v30 = vadd.f32 %v8835_v36, %v13599_v29  ;;  %v13600_v31 = vld [vmem:[#allocation667_spill] sm:$0xff]  ;;  %v13601_v37 = vld [vmem:[#allocation668_spill] sm:$0xff] }
 0x3c5   : > { %3974 = vst [vmem:[%s8863_s19 + $0x14e8] sm:$0xff] %v2950_v39  ;;  %3975 = vst [vmem:[%s8863_s19 + $0x14f0] sm:$0xff] %v2951_v45  ;;  %v2967_v32 = vadd.f32 %v8835_v36, %v13600_v31  ;;  %v2968_v38 = vadd.f32 %v8835_v36, %v13601_v37  ;;  %v13602_v39 = vld [vmem:[#allocation669_spill] sm:$0xff]  ;;  %v13603_v45 = vld [vmem:[#allocation670_spill] sm:$0xff] }
 0x3c6   : > { %3976 = vst [vmem:[%s8863_s19 + $0x14f8] sm:$0xff] %v2952_v47  ;;  %3977 = vst [vmem:[%s8863_s19 + $0x1500] sm:$0xff] %v2953_v53  ;;  %v2969_v40 = vadd.f32 %v8835_v36, %v13602_v39  ;;  %v2970_v46 = vadd.f32 %v8835_v36, %v13603_v45  ;;  %v13604_v47 = vld [vmem:[#allocation671_spill] sm:$0xff]  ;;  %v13605_v53 = vld [vmem:[#allocation672_spill] sm:$0xff] }
 0x3c7   : > { %3978 = vst [vmem:[%s8863_s19 + $0x1508] sm:$0xff] %v2954_v55  ;;  %3979 = vst [vmem:[%s8863_s19 + $0x1510] sm:$0xff] %v2955_v61  ;;  %v2971_v48 = vadd.f32 %v8835_v36, %v13604_v47  ;;  %v2972_v54 = vadd.f32 %v8835_v36, %v13605_v53  ;;  %v13606_v55 = vld [vmem:[#allocation673_spill] sm:$0xff]  ;;  %v13607_v61 = vld [vmem:[#allocation674_spill] sm:$0xff] }
 0x3c8   : > { %3980 = vst [vmem:[%s8863_s19 + $0x1518] sm:$0xff] %v2956_v63  ;;  %3981 = vst [vmem:[%s8863_s19 + $0x1520] sm:$0xff] %v2957_v5  ;;  %v2973_v56 = vadd.f32 %v8835_v36, %v13606_v55  ;;  %v2974_v62 = vadd.f32 %v8835_v36, %v13607_v61  ;;  %v13608_v63 = vld [vmem:[#allocation675_spill] sm:$0xff]  ;;  %v13609_v5 = vld [vmem:[#allocation676_spill] sm:$0xff] }
 0x3c9   : > { %3982 = vst [vmem:[%s8863_s19 + $0x1528] sm:$0xff] %v2958_v7  ;;  %3983 = vst [vmem:[%s8863_s19 + $0x1530] sm:$0xff] %v2959_v13  ;;  %v2975_v0 = vadd.f32 %v8835_v36, %v13608_v63  ;;  %v2976_v6 = vadd.f32 %v8835_v36, %v13609_v5  ;;  %v13610_v7 = vld [vmem:[#allocation677_spill] sm:$0xff]  ;;  %v13611_v13 = vld [vmem:[#allocation678_spill] sm:$0xff] }
 0x3ca   : > { %3984 = vst [vmem:[%s8863_s19 + $0x1538] sm:$0xff] %v2960_v15  ;;  %3985 = vst [vmem:[%s8863_s19 + $0x1540] sm:$0xff] %v2961_v49  ;;  %v2977_v8 = vadd.f32 %v8835_v36, %v13610_v7  ;;  %v2978_v14 = vadd.f32 %v8835_v36, %v13611_v13  ;;  %v13612_v15 = vld [vmem:[#allocation679_spill] sm:$0xff]  ;;  %v13613_v49 = vld [vmem:[#allocation680_spill] sm:$0xff] }
 0x3cb   : > { %3986 = vst [vmem:[%s8863_s19 + $0x1548] sm:$0xff] %v2962_v9  ;;  %3987 = vst [vmem:[%s8863_s19 + $0x1550] sm:$0xff] %v2963_v17  ;;  %v2979_v16 = vadd.f32 %v8835_v36, %v13612_v15  ;;  %v2980_v22 = vadd.f32 %v8835_v36, %v13613_v49  ;;  %v13614_v9 = vld [vmem:[#allocation681_spill] sm:$0xff]  ;;  %v13615_v17 = vld [vmem:[#allocation682_spill] sm:$0xff] }
 0x3cc   : > { %3988 = vst [vmem:[%s8863_s19 + $0x1558] sm:$0xff] %v2964_v19  ;;  %3989 = vst [vmem:[%s8863_s19 + $0x1560] sm:$0xff] %v2965_v24  ;;  %v2981_v50 = vadd.f32 %v8835_v36, %v13614_v9  ;;  %v2982_v58 = vadd.f32 %v8835_v36, %v13615_v17  ;;  %v13616_v19 = vld [vmem:[#allocation683_spill] sm:$0xff]  ;;  %v13617_v24 = vld [vmem:[#allocation684_spill] sm:$0xff] }
 0x3cd   : > { %3990 = vst [vmem:[%s8863_s19 + $0x1568] sm:$0xff] %v2966_v30  ;;  %3991 = vst [vmem:[%s8863_s19 + $0x1570] sm:$0xff] %v2967_v32  ;;  %v2983_v2 = vadd.f32 %v8835_v36, %v13616_v19  ;;  %v2984_v29 = vadd.f32 %v8835_v36, %v13617_v24  ;;  %v13618_v30 = vld [vmem:[#allocation685_spill] sm:$0xff]  ;;  %v13619_v32 = vld [vmem:[#allocation686_spill] sm:$0xff] }
 0x3ce   : > { %3992 = vst [vmem:[%s8863_s19 + $0x1578] sm:$0xff] %v2968_v38  ;;  %3993 = vst [vmem:[%s8863_s19 + $0x1580] sm:$0xff] %v2969_v40  ;;  %v2985_v31 = vadd.f32 %v8835_v36, %v13618_v30  ;;  %v2986_v37 = vadd.f32 %v8835_v36, %v13619_v32  ;;  %v13620_v38 = vld [vmem:[#allocation687_spill] sm:$0xff]  ;;  %v13621_v40 = vld [vmem:[#allocation688_spill] sm:$0xff] }
 0x3cf   : > { %3994 = vst [vmem:[%s8863_s19 + $0x1588] sm:$0xff] %v2970_v46  ;;  %3995 = vst [vmem:[%s8863_s19 + $0x1590] sm:$0xff] %v2971_v48  ;;  %v2987_v39 = vadd.f32 %v8835_v36, %v13620_v38  ;;  %v2988_v45 = vadd.f32 %v8835_v36, %v13621_v40  ;;  %v13622_v46 = vld [vmem:[#allocation689_spill] sm:$0xff]  ;;  %v13623_v48 = vld [vmem:[#allocation690_spill] sm:$0xff] }
 0x3d0   : > { %3996 = vst [vmem:[%s8863_s19 + $0x1598] sm:$0xff] %v2972_v54  ;;  %3997 = vst [vmem:[%s8863_s19 + $0x15a0] sm:$0xff] %v2973_v56  ;;  %v2989_v47 = vadd.f32 %v8835_v36, %v13622_v46  ;;  %v2990_v53 = vadd.f32 %v8835_v36, %v13623_v48  ;;  %v13624_v54 = vld [vmem:[#allocation691_spill] sm:$0xff]  ;;  %v13625_v56 = vld [vmem:[#allocation692_spill] sm:$0xff] }
 0x3d1   : > { %3998 = vst [vmem:[%s8863_s19 + $0x15a8] sm:$0xff] %v2974_v62  ;;  %3999 = vst [vmem:[%s8863_s19 + $0x15b0] sm:$0xff] %v2975_v0  ;;  %v2991_v55 = vadd.f32 %v8835_v36, %v13624_v54  ;;  %v2992_v61 = vadd.f32 %v8835_v36, %v13625_v56  ;;  %v13626_v62 = vld [vmem:[#allocation693_spill] sm:$0xff]  ;;  %v13627_v0 = vld [vmem:[#allocation694_spill] sm:$0xff] }
 0x3d2   : > { %4000 = vst [vmem:[%s8863_s19 + $0x15b8] sm:$0xff] %v2976_v6  ;;  %4001 = vst [vmem:[%s8863_s19 + $0x15c0] sm:$0xff] %v2977_v8  ;;  %v2993_v63 = vadd.f32 %v8835_v36, %v13626_v62  ;;  %v2994_v5 = vadd.f32 %v8835_v36, %v13627_v0  ;;  %v13628_v6 = vld [vmem:[#allocation695_spill] sm:$0xff]  ;;  %v13629_v8 = vld [vmem:[#allocation696_spill] sm:$0xff] }
 0x3d3   : > { %4002 = vst [vmem:[%s8863_s19 + $0x15c8] sm:$0xff] %v2978_v14  ;;  %4003 = vst [vmem:[%s8863_s19 + $0x15d0] sm:$0xff] %v2979_v16  ;;  %v2995_v7 = vadd.f32 %v8835_v36, %v13628_v6  ;;  %v2996_v13 = vadd.f32 %v8835_v36, %v13629_v8  ;;  %v13630_v14 = vld [vmem:[#allocation697_spill] sm:$0xff]  ;;  %v13631_v16 = vld [vmem:[#allocation698_spill] sm:$0xff] }
 0x3d4   : > { %4004 = vst [vmem:[%s8863_s19 + $0x15d8] sm:$0xff] %v2980_v22  ;;  %4005 = vst [vmem:[%s8863_s19 + $0x15e0] sm:$0xff] %v2981_v50  ;;  %v2997_v15 = vadd.f32 %v8835_v36, %v13630_v14  ;;  %v2998_v49 = vadd.f32 %v8835_v36, %v13631_v16  ;;  %v13632_v22 = vld [vmem:[#allocation699_spill] sm:$0xff]  ;;  %v13633_v50 = vld [vmem:[#allocation700_spill] sm:$0xff] }
 0x3d5   : > { %4006 = vst [vmem:[%s8863_s19 + $0x15e8] sm:$0xff] %v2982_v58  ;;  %4007 = vst [vmem:[%s8863_s19 + $0x15f0] sm:$0xff] %v2983_v2  ;;  %v2999_v9 = vadd.f32 %v8835_v36, %v13632_v22  ;;  %v3000_v17 = vadd.f32 %v8835_v36, %v13633_v50  ;;  %v13634_v58 = vld [vmem:[#allocation701_spill] sm:$0xff]  ;;  %v13635_v2 = vld [vmem:[#allocation702_spill] sm:$0xff] }
 0x3d6   : > { %4008 = vst [vmem:[%s8863_s19 + $0x15f8] sm:$0xff] %v2984_v29  ;;  %4009 = vst [vmem:[%s8863_s19 + $0x1600] sm:$0xff] %v2985_v31  ;;  %v3001_v19 = vadd.f32 %v8835_v36, %v13634_v58  ;;  %v3002_v24 = vadd.f32 %v8835_v36, %v13635_v2  ;;  %v13636_v29 = vld [vmem:[#allocation703_spill] sm:$0xff]  ;;  %v13637_v31 = vld [vmem:[#allocation704_spill] sm:$0xff] }
 0x3d7   : > { %4010 = vst [vmem:[%s8863_s19 + $0x1608] sm:$0xff] %v2986_v37  ;;  %4011 = vst [vmem:[%s8863_s19 + $0x1610] sm:$0xff] %v2987_v39  ;;  %v3003_v30 = vadd.f32 %v8835_v36, %v13636_v29  ;;  %v3004_v32 = vadd.f32 %v8835_v36, %v13637_v31  ;;  %v13638_v37 = vld [vmem:[#allocation705_spill] sm:$0xff]  ;;  %v13639_v39 = vld [vmem:[#allocation706_spill] sm:$0xff] }
 0x3d8   : > { %4012 = vst [vmem:[%s8863_s19 + $0x1618] sm:$0xff] %v2988_v45  ;;  %4013 = vst [vmem:[%s8863_s19 + $0x1620] sm:$0xff] %v2989_v47  ;;  %v3005_v38 = vadd.f32 %v8835_v36, %v13638_v37  ;;  %v3006_v40 = vadd.f32 %v8835_v36, %v13639_v39  ;;  %v13640_v45 = vld [vmem:[#allocation707_spill] sm:$0xff]  ;;  %v13641_v47 = vld [vmem:[#allocation708_spill] sm:$0xff] }
 0x3d9   : > { %4014 = vst [vmem:[%s8863_s19 + $0x1628] sm:$0xff] %v2990_v53  ;;  %4015 = vst [vmem:[%s8863_s19 + $0x1630] sm:$0xff] %v2991_v55  ;;  %v3007_v46 = vadd.f32 %v8835_v36, %v13640_v45  ;;  %v3008_v48 = vadd.f32 %v8835_v36, %v13641_v47  ;;  %v13642_v53 = vld [vmem:[#allocation709_spill] sm:$0xff]  ;;  %v13643_v55 = vld [vmem:[#allocation710_spill] sm:$0xff] }
 0x3da   : > { %4016 = vst [vmem:[%s8863_s19 + $0x1638] sm:$0xff] %v2992_v61  ;;  %4017 = vst [vmem:[%s8863_s19 + $0x1640] sm:$0xff] %v2993_v63  ;;  %v3009_v54 = vadd.f32 %v8835_v36, %v13642_v53  ;;  %v3010_v56 = vadd.f32 %v8835_v36, %v13643_v55  ;;  %v13644_v61 = vld [vmem:[#allocation711_spill] sm:$0xff]  ;;  %v13645_v63 = vld [vmem:[#allocation712_spill] sm:$0xff] }
 0x3db   : > { %4018 = vst [vmem:[%s8863_s19 + $0x1648] sm:$0xff] %v2994_v5  ;;  %4019 = vst [vmem:[%s8863_s19 + $0x1650] sm:$0xff] %v2995_v7  ;;  %v3011_v62 = vadd.f32 %v8835_v36, %v13644_v61  ;;  %v3012_v0 = vadd.f32 %v8835_v36, %v13645_v63  ;;  %v13646_v5 = vld [vmem:[#allocation713_spill] sm:$0xff]  ;;  %v13647_v7 = vld [vmem:[#allocation714_spill] sm:$0xff] }
 0x3dc   : > { %4020 = vst [vmem:[%s8863_s19 + $0x1658] sm:$0xff] %v2996_v13  ;;  %4021 = vst [vmem:[%s8863_s19 + $0x1660] sm:$0xff] %v2997_v15  ;;  %v3013_v6 = vadd.f32 %v8835_v36, %v13646_v5  ;;  %v3014_v8 = vadd.f32 %v8835_v36, %v13647_v7  ;;  %v13648_v13 = vld [vmem:[#allocation715_spill] sm:$0xff]  ;;  %v13649_v15 = vld [vmem:[#allocation716_spill] sm:$0xff] }
 0x3dd   : > { %4022 = vst [vmem:[%s8863_s19 + $0x1668] sm:$0xff] %v2998_v49  ;;  %4023 = vst [vmem:[%s8863_s19 + $0x1670] sm:$0xff] %v2999_v9  ;;  %v3015_v14 = vadd.f32 %v8835_v36, %v13648_v13  ;;  %v3016_v16 = vadd.f32 %v8835_v36, %v13649_v15  ;;  %v13650_v49 = vld [vmem:[#allocation717_spill] sm:$0xff]  ;;  %v13651_v9 = vld [vmem:[#allocation718_spill] sm:$0xff] }
 0x3de   : > { %4024 = vst [vmem:[%s8863_s19 + $0x1678] sm:$0xff] %v3000_v17  ;;  %4025 = vst [vmem:[%s8863_s19 + $0x1680] sm:$0xff] %v3001_v19  ;;  %v3017_v22 = vadd.f32 %v8835_v36, %v13650_v49  ;;  %v3018_v50 = vadd.f32 %v8835_v36, %v13651_v9  ;;  %v13652_v17 = vld [vmem:[#allocation719_spill] sm:$0xff]  ;;  %v13653_v19 = vld [vmem:[#allocation720_spill] sm:$0xff] }
 0x3df   : > { %4026 = vst [vmem:[%s8863_s19 + $0x1688] sm:$0xff] %v3002_v24  ;;  %4027 = vst [vmem:[%s8863_s19 + $0x1690] sm:$0xff] %v3003_v30  ;;  %v3019_v58 = vadd.f32 %v8835_v36, %v13652_v17  ;;  %v3020_v2 = vadd.f32 %v8835_v36, %v13653_v19  ;;  %v13654_v24 = vld [vmem:[#allocation721_spill] sm:$0xff]  ;;  %v13655_v30 = vld [vmem:[#allocation722_spill] sm:$0xff] }
 0x3e0   : > { %4028 = vst [vmem:[%s8863_s19 + $0x1698] sm:$0xff] %v3004_v32  ;;  %4029 = vst [vmem:[%s8863_s19 + $0x16a0] sm:$0xff] %v3005_v38  ;;  %v3021_v29 = vadd.f32 %v8835_v36, %v13654_v24  ;;  %v3022_v31 = vadd.f32 %v8835_v36, %v13655_v30  ;;  %v13656_v32 = vld [vmem:[#allocation723_spill] sm:$0xff]  ;;  %v13657_v38 = vld [vmem:[#allocation724_spill] sm:$0xff] }
 0x3e1   : > { %4030 = vst [vmem:[%s8863_s19 + $0x16a8] sm:$0xff] %v3006_v40  ;;  %4031 = vst [vmem:[%s8863_s19 + $0x16b0] sm:$0xff] %v3007_v46  ;;  %v3023_v37 = vadd.f32 %v8835_v36, %v13656_v32  ;;  %v3024_v39 = vadd.f32 %v8835_v36, %v13657_v38  ;;  %v13658_v40 = vld [vmem:[#allocation725_spill] sm:$0xff]  ;;  %v13659_v46 = vld [vmem:[#allocation726_spill] sm:$0xff] }
 0x3e2   : > { %4032 = vst [vmem:[%s8863_s19 + $0x16b8] sm:$0xff] %v3008_v48  ;;  %4033 = vst [vmem:[%s8863_s19 + $0x16c0] sm:$0xff] %v3009_v54  ;;  %v3025_v45 = vadd.f32 %v8835_v36, %v13658_v40  ;;  %v3026_v47 = vadd.f32 %v8835_v36, %v13659_v46  ;;  %v13660_v48 = vld [vmem:[#allocation727_spill] sm:$0xff]  ;;  %v13661_v54 = vld [vmem:[#allocation728_spill] sm:$0xff] }
 0x3e3   : > { %4034 = vst [vmem:[%s8863_s19 + $0x16c8] sm:$0xff] %v3010_v56  ;;  %4035 = vst [vmem:[%s8863_s19 + $0x16d0] sm:$0xff] %v3011_v62  ;;  %v3027_v53 = vadd.f32 %v8835_v36, %v13660_v48  ;;  %v3028_v55 = vadd.f32 %v8835_v36, %v13661_v54  ;;  %v13662_v56 = vld [vmem:[#allocation729_spill] sm:$0xff]  ;;  %v13663_v62 = vld [vmem:[#allocation730_spill] sm:$0xff] }
 0x3e4   : > { %4036 = vst [vmem:[%s8863_s19 + $0x16d8] sm:$0xff] %v3012_v0  ;;  %4037 = vst [vmem:[%s8863_s19 + $0x16e0] sm:$0xff] %v3013_v6  ;;  %v3029_v61 = vadd.f32 %v8835_v36, %v13662_v56  ;;  %v3030_v63 = vadd.f32 %v8835_v36, %v13663_v62  ;;  %v13664_v0 = vld [vmem:[#allocation731_spill] sm:$0xff]  ;;  %v13665_v6 = vld [vmem:[#allocation732_spill] sm:$0xff] }
 0x3e5   : > { %4038 = vst [vmem:[%s8863_s19 + $0x16e8] sm:$0xff] %v3014_v8  ;;  %4039 = vst [vmem:[%s8863_s19 + $0x16f0] sm:$0xff] %v3015_v14  ;;  %v3031_v5 = vadd.f32 %v8835_v36, %v13664_v0  ;;  %v3032_v7 = vadd.f32 %v8835_v36, %v13665_v6  ;;  %v13666_v8 = vld [vmem:[#allocation733_spill] sm:$0xff]  ;;  %v13667_v14 = vld [vmem:[#allocation734_spill] sm:$0xff] }
 0x3e6   : > { %4040 = vst [vmem:[%s8863_s19 + $0x16f8] sm:$0xff] %v3016_v16  ;;  %4041 = vst [vmem:[%s8863_s19 + $0x1700] sm:$0xff] %v3017_v22  ;;  %v3033_v13 = vadd.f32 %v8835_v36, %v13666_v8  ;;  %v3034_v15 = vadd.f32 %v8835_v36, %v13667_v14  ;;  %v13668_v16 = vld [vmem:[#allocation735_spill] sm:$0xff]  ;;  %v13669_v22 = vld [vmem:[#allocation736_spill] sm:$0xff] }
 0x3e7   : > { %4042 = vst [vmem:[%s8863_s19 + $0x1708] sm:$0xff] %v3018_v50  ;;  %4043 = vst [vmem:[%s8863_s19 + $0x1710] sm:$0xff] %v3019_v58  ;;  %v3035_v49 = vadd.f32 %v8835_v36, %v13668_v16  ;;  %v3036_v9 = vadd.f32 %v8835_v36, %v13669_v22  ;;  %v13670_v50 = vld [vmem:[#allocation737_spill] sm:$0xff]  ;;  %v13671_v58 = vld [vmem:[#allocation738_spill] sm:$0xff] }
 0x3e8   : > { %4044 = vst [vmem:[%s8863_s19 + $0x1718] sm:$0xff] %v3020_v2  ;;  %4045 = vst [vmem:[%s8863_s19 + $0x1720] sm:$0xff] %v3021_v29  ;;  %v3037_v17 = vadd.f32 %v8835_v36, %v13670_v50  ;;  %v3038_v19 = vadd.f32 %v8835_v36, %v13671_v58  ;;  %v13672_v2 = vld [vmem:[#allocation739_spill] sm:$0xff]  ;;  %v13673_v29 = vld [vmem:[#allocation740_spill] sm:$0xff] }
 0x3e9   : > { %4046 = vst [vmem:[%s8863_s19 + $0x1728] sm:$0xff] %v3022_v31  ;;  %4047 = vst [vmem:[%s8863_s19 + $0x1730] sm:$0xff] %v3023_v37  ;;  %v3039_v24 = vadd.f32 %v8835_v36, %v13672_v2  ;;  %v3040_v30 = vadd.f32 %v8835_v36, %v13673_v29  ;;  %v13674_v31 = vld [vmem:[#allocation741_spill] sm:$0xff]  ;;  %v13675_v37 = vld [vmem:[#allocation742_spill] sm:$0xff] }
 0x3ea   : > { %4048 = vst [vmem:[%s8863_s19 + $0x1738] sm:$0xff] %v3024_v39  ;;  %4049 = vst [vmem:[%s8863_s19 + $0x1740] sm:$0xff] %v3025_v45  ;;  %v3041_v32 = vadd.f32 %v8835_v36, %v13674_v31  ;;  %v3042_v38 = vadd.f32 %v8835_v36, %v13675_v37  ;;  %v13676_v39 = vld [vmem:[#allocation743_spill] sm:$0xff]  ;;  %v13677_v45 = vld [vmem:[#allocation744_spill] sm:$0xff] }
 0x3eb   : > { %4050 = vst [vmem:[%s8863_s19 + $0x1748] sm:$0xff] %v3026_v47  ;;  %4051 = vst [vmem:[%s8863_s19 + $0x1750] sm:$0xff] %v3027_v53  ;;  %v3043_v40 = vadd.f32 %v8835_v36, %v13676_v39  ;;  %v3044_v46 = vadd.f32 %v8835_v36, %v13677_v45  ;;  %v13678_v47 = vld [vmem:[#allocation745_spill] sm:$0xff]  ;;  %v13679_v53 = vld [vmem:[#allocation746_spill] sm:$0xff] }
 0x3ec   : > { %4052 = vst [vmem:[%s8863_s19 + $0x1758] sm:$0xff] %v3028_v55  ;;  %4053 = vst [vmem:[%s8863_s19 + $0x1760] sm:$0xff] %v3029_v61  ;;  %v3045_v48 = vadd.f32 %v8835_v36, %v13678_v47  ;;  %v3046_v54 = vadd.f32 %v8835_v36, %v13679_v53  ;;  %v13680_v55 = vld [vmem:[#allocation747_spill] sm:$0xff]  ;;  %v13681_v61 = vld [vmem:[#allocation748_spill] sm:$0xff] }
 0x3ed   : > { %4054 = vst [vmem:[%s8863_s19 + $0x1768] sm:$0xff] %v3030_v63  ;;  %4055 = vst [vmem:[%s8863_s19 + $0x1770] sm:$0xff] %v3031_v5  ;;  %v3047_v56 = vadd.f32 %v8835_v36, %v13680_v55  ;;  %v3048_v62 = vadd.f32 %v8835_v36, %v13681_v61  ;;  %v13682_v63 = vld [vmem:[#allocation749_spill] sm:$0xff]  ;;  %v13683_v5 = vld [vmem:[#allocation750_spill] sm:$0xff] }
 0x3ee   : > { %4056 = vst [vmem:[%s8863_s19 + $0x1778] sm:$0xff] %v3032_v7  ;;  %4057 = vst [vmem:[%s8863_s19 + $0x1780] sm:$0xff] %v3033_v13  ;;  %v3049_v0 = vadd.f32 %v8835_v36, %v13682_v63  ;;  %v3050_v6 = vadd.f32 %v8835_v36, %v13683_v5  ;;  %v13684_v7 = vld [vmem:[#allocation751_spill] sm:$0xff]  ;;  %v13685_v13 = vld [vmem:[#allocation752_spill] sm:$0xff] }
 0x3ef   : > { %4058 = vst [vmem:[%s8863_s19 + $0x1788] sm:$0xff] %v3034_v15  ;;  %4059 = vst [vmem:[%s8863_s19 + $0x1790] sm:$0xff] %v3035_v49  ;;  %v3051_v8 = vadd.f32 %v8835_v36, %v13684_v7  ;;  %v3052_v14 = vadd.f32 %v8835_v36, %v13685_v13  ;;  %v13686_v15 = vld [vmem:[#allocation753_spill] sm:$0xff]  ;;  %v13687_v49 = vld [vmem:[#allocation754_spill] sm:$0xff] }
 0x3f0   : > { %4060 = vst [vmem:[%s8863_s19 + $0x1798] sm:$0xff] %v3036_v9  ;;  %4061 = vst [vmem:[%s8863_s19 + $0x17a0] sm:$0xff] %v3037_v17  ;;  %v3053_v16 = vadd.f32 %v8835_v36, %v13686_v15  ;;  %v3054_v22 = vadd.f32 %v8835_v36, %v13687_v49  ;;  %v13688_v9 = vld [vmem:[#allocation755_spill] sm:$0xff]  ;;  %v13689_v17 = vld [vmem:[#allocation756_spill] sm:$0xff] }
 0x3f1   : > { %4062 = vst [vmem:[%s8863_s19 + $0x17a8] sm:$0xff] %v3038_v19  ;;  %4063 = vst [vmem:[%s8863_s19 + $0x17b0] sm:$0xff] %v3039_v24  ;;  %v3055_v50 = vadd.f32 %v8835_v36, %v13688_v9  ;;  %v3056_v58 = vadd.f32 %v8835_v36, %v13689_v17  ;;  %v13690_v19 = vld [vmem:[#allocation757_spill] sm:$0xff]  ;;  %v13691_v24 = vld [vmem:[#allocation758_spill] sm:$0xff] }
 0x3f2   : > { %4064 = vst [vmem:[%s8863_s19 + $0x17b8] sm:$0xff] %v3040_v30  ;;  %4065 = vst [vmem:[%s8863_s19 + $0x17c0] sm:$0xff] %v3041_v32  ;;  %v3057_v2 = vadd.f32 %v8835_v36, %v13690_v19  ;;  %v3058_v29 = vadd.f32 %v8835_v36, %v13691_v24  ;;  %v13692_v30 = vld [vmem:[#allocation759_spill] sm:$0xff]  ;;  %v13693_v32 = vld [vmem:[#allocation760_spill] sm:$0xff] }
 0x3f3   : > { %4066 = vst [vmem:[%s8863_s19 + $0x17c8] sm:$0xff] %v3042_v38  ;;  %4067 = vst [vmem:[%s8863_s19 + $0x17d0] sm:$0xff] %v3043_v40  ;;  %v3059_v31 = vadd.f32 %v8835_v36, %v13692_v30  ;;  %v3060_v37 = vadd.f32 %v8835_v36, %v13693_v32  ;;  %v13694_v38 = vld [vmem:[#allocation761_spill] sm:$0xff]  ;;  %v13695_v40 = vld [vmem:[#allocation762_spill] sm:$0xff] }
 0x3f4   : > { %4068 = vst [vmem:[%s8863_s19 + $0x17d8] sm:$0xff] %v3044_v46  ;;  %4069 = vst [vmem:[%s8863_s19 + $0x17e0] sm:$0xff] %v3045_v48  ;;  %v3061_v39 = vadd.f32 %v8835_v36, %v13694_v38  ;;  %v3062_v45 = vadd.f32 %v8835_v36, %v13695_v40  ;;  %v13696_v46 = vld [vmem:[#allocation763_spill] sm:$0xff]  ;;  %v13697_v48 = vld [vmem:[#allocation764_spill] sm:$0xff] }
 0x3f5   : > { %4070 = vst [vmem:[%s8863_s19 + $0x17e8] sm:$0xff] %v3046_v54  ;;  %4071 = vst [vmem:[%s8863_s19 + $0x17f0] sm:$0xff] %v3047_v56  ;;  %v3063_v47 = vadd.f32 %v8835_v36, %v13696_v46  ;;  %v3064_v53 = vadd.f32 %v8835_v36, %v13697_v48  ;;  %v13698_v54 = vld [vmem:[#allocation765_spill] sm:$0xff]  ;;  %v13699_v56 = vld [vmem:[#allocation766_spill] sm:$0xff] }
 0x3f6   : > { %4072 = vst [vmem:[%s8863_s19 + $0x17f8] sm:$0xff] %v3048_v62  ;;  %4073 = vst [vmem:[%s8863_s19 + $0x1800] sm:$0xff] %v3049_v0  ;;  %v3065_v55 = vadd.f32 %v8835_v36, %v13698_v54  ;;  %v3066_v61 = vadd.f32 %v8835_v36, %v13699_v56  ;;  %v13700_v62 = vld [vmem:[#allocation767_spill] sm:$0xff]  ;;  %v13701_v0 = vld [vmem:[#allocation768_spill] sm:$0xff] }
 0x3f7   : > { %4074 = vst [vmem:[%s8863_s19 + $0x1808] sm:$0xff] %v3050_v6  ;;  %4075 = vst [vmem:[%s8863_s19 + $0x1810] sm:$0xff] %v3051_v8  ;;  %v3067_v63 = vadd.f32 %v8835_v36, %v13700_v62  ;;  %v3068_v5 = vadd.f32 %v8835_v36, %v13701_v0  ;;  %v13702_v6 = vld [vmem:[#allocation769_spill] sm:$0xff]  ;;  %v13703_v8 = vld [vmem:[#allocation770_spill] sm:$0xff] }
 0x3f8   : > { %4076 = vst [vmem:[%s8863_s19 + $0x1818] sm:$0xff] %v3052_v14  ;;  %4077 = vst [vmem:[%s8863_s19 + $0x1820] sm:$0xff] %v3053_v16  ;;  %v3069_v7 = vadd.f32 %v8835_v36, %v13702_v6  ;;  %v3070_v13 = vadd.f32 %v8835_v36, %v13703_v8  ;;  %v13704_v14 = vld [vmem:[#allocation771_spill] sm:$0xff]  ;;  %v13705_v16 = vld [vmem:[#allocation772_spill] sm:$0xff] }
 0x3f9   : > { %4078 = vst [vmem:[%s8863_s19 + $0x1828] sm:$0xff] %v3054_v22  ;;  %4079 = vst [vmem:[%s8863_s19 + $0x1830] sm:$0xff] %v3055_v50  ;;  %v3071_v15 = vadd.f32 %v8835_v36, %v13704_v14  ;;  %v3072_v49 = vadd.f32 %v8835_v36, %v13705_v16  ;;  %v13706_v22 = vld [vmem:[#allocation773_spill] sm:$0xff]  ;;  %v13707_v50 = vld [vmem:[#allocation774_spill] sm:$0xff] }
 0x3fa   : > { %4080 = vst [vmem:[%s8863_s19 + $0x1838] sm:$0xff] %v3056_v58  ;;  %4081 = vst [vmem:[%s8863_s19 + $0x1840] sm:$0xff] %v3057_v2  ;;  %v3073_v9 = vadd.f32 %v8835_v36, %v13706_v22  ;;  %v3074_v17 = vadd.f32 %v8835_v36, %v13707_v50  ;;  %v13708_v58 = vld [vmem:[#allocation775_spill] sm:$0xff]  ;;  %v13709_v2 = vld [vmem:[#allocation776_spill] sm:$0xff] }
 0x3fb   : > { %4082 = vst [vmem:[%s8863_s19 + $0x1848] sm:$0xff] %v3058_v29  ;;  %4083 = vst [vmem:[%s8863_s19 + $0x1850] sm:$0xff] %v3059_v31  ;;  %v3075_v19 = vadd.f32 %v8835_v36, %v13708_v58  ;;  %v3076_v24 = vadd.f32 %v8835_v36, %v13709_v2  ;;  %v13710_v29 = vld [vmem:[#allocation777_spill] sm:$0xff]  ;;  %v13711_v31 = vld [vmem:[#allocation778_spill] sm:$0xff] }
 0x3fc   : > { %4084 = vst [vmem:[%s8863_s19 + $0x1858] sm:$0xff] %v3060_v37  ;;  %4085 = vst [vmem:[%s8863_s19 + $0x1860] sm:$0xff] %v3061_v39  ;;  %v3077_v30 = vadd.f32 %v8835_v36, %v13710_v29  ;;  %v3078_v32 = vadd.f32 %v8835_v36, %v13711_v31  ;;  %v13712_v37 = vld [vmem:[#allocation779_spill] sm:$0xff]  ;;  %v13713_v39 = vld [vmem:[#allocation780_spill] sm:$0xff] }
 0x3fd   : > { %4086 = vst [vmem:[%s8863_s19 + $0x1868] sm:$0xff] %v3062_v45  ;;  %4087 = vst [vmem:[%s8863_s19 + $0x1870] sm:$0xff] %v3063_v47  ;;  %v3079_v38 = vadd.f32 %v8835_v36, %v13712_v37  ;;  %v3080_v40 = vadd.f32 %v8835_v36, %v13713_v39  ;;  %v13714_v45 = vld [vmem:[#allocation781_spill] sm:$0xff]  ;;  %v13715_v47 = vld [vmem:[#allocation782_spill] sm:$0xff] }
 0x3fe   : > { %4088 = vst [vmem:[%s8863_s19 + $0x1878] sm:$0xff] %v3064_v53  ;;  %4089 = vst [vmem:[%s8863_s19 + $0x1880] sm:$0xff] %v3065_v55  ;;  %v3081_v46 = vadd.f32 %v8835_v36, %v13714_v45  ;;  %v3082_v48 = vadd.f32 %v8835_v36, %v13715_v47  ;;  %v13716_v53 = vld [vmem:[#allocation783_spill] sm:$0xff]  ;;  %v13717_v55 = vld [vmem:[#allocation784_spill] sm:$0xff] }
 0x3ff   : > { %4090 = vst [vmem:[%s8863_s19 + $0x1888] sm:$0xff] %v3066_v61  ;;  %4091 = vst [vmem:[%s8863_s19 + $0x1890] sm:$0xff] %v3067_v63  ;;  %v3083_v54 = vadd.f32 %v8835_v36, %v13716_v53  ;;  %v3084_v56 = vadd.f32 %v8835_v36, %v13717_v55  ;;  %v13718_v61 = vld [vmem:[#allocation785_spill] sm:$0xff]  ;;  %v13719_v63 = vld [vmem:[#allocation786_spill] sm:$0xff] }
 0x400   : > { %4092 = vst [vmem:[%s8863_s19 + $0x1898] sm:$0xff] %v3068_v5  ;;  %4093 = vst [vmem:[%s8863_s19 + $0x18a0] sm:$0xff] %v3069_v7  ;;  %v3085_v62 = vadd.f32 %v8835_v36, %v13718_v61  ;;  %v3086_v0 = vadd.f32 %v8835_v36, %v13719_v63  ;;  %v13720_v5 = vld [vmem:[#allocation787_spill] sm:$0xff]  ;;  %v13721_v7 = vld [vmem:[#allocation788_spill] sm:$0xff] }
 0x401   : > { %4094 = vst [vmem:[%s8863_s19 + $0x18a8] sm:$0xff] %v3070_v13  ;;  %4095 = vst [vmem:[%s8863_s19 + $0x18b0] sm:$0xff] %v3071_v15  ;;  %v3087_v6 = vadd.f32 %v8835_v36, %v13720_v5  ;;  %v3088_v8 = vadd.f32 %v8835_v36, %v13721_v7  ;;  %v13722_v13 = vld [vmem:[#allocation789_spill] sm:$0xff]  ;;  %v13723_v15 = vld [vmem:[#allocation790_spill] sm:$0xff] }
 0x402   : > { %4096 = vst [vmem:[%s8863_s19 + $0x18b8] sm:$0xff] %v3072_v49  ;;  %4097 = vst [vmem:[%s8863_s19 + $0x18c0] sm:$0xff] %v3073_v9  ;;  %v3089_v14 = vadd.f32 %v8835_v36, %v13722_v13  ;;  %v3090_v16 = vadd.f32 %v8835_v36, %v13723_v15  ;;  %v13724_v49 = vld [vmem:[#allocation791_spill] sm:$0xff]  ;;  %v13725_v9 = vld [vmem:[#allocation792_spill] sm:$0xff] }
 0x403   : > { %4098 = vst [vmem:[%s8863_s19 + $0x18c8] sm:$0xff] %v3074_v17  ;;  %4099 = vst [vmem:[%s8863_s19 + $0x18d0] sm:$0xff] %v3075_v19  ;;  %v3091_v22 = vadd.f32 %v8835_v36, %v13724_v49  ;;  %v3092_v50 = vadd.f32 %v8835_v36, %v13725_v9  ;;  %v13726_v17 = vld [vmem:[#allocation793_spill] sm:$0xff]  ;;  %v13727_v19 = vld [vmem:[#allocation794_spill] sm:$0xff] }
 0x404   : > { %4100 = vst [vmem:[%s8863_s19 + $0x18d8] sm:$0xff] %v3076_v24  ;;  %4101 = vst [vmem:[%s8863_s19 + $0x18e0] sm:$0xff] %v3077_v30  ;;  %v3093_v58 = vadd.f32 %v8835_v36, %v13726_v17  ;;  %v3094_v2 = vadd.f32 %v8835_v36, %v13727_v19  ;;  %v13728_v24 = vld [vmem:[#allocation795_spill] sm:$0xff]  ;;  %v13729_v30 = vld [vmem:[#allocation796_spill] sm:$0xff] }
 0x405   : > { %4102 = vst [vmem:[%s8863_s19 + $0x18e8] sm:$0xff] %v3078_v32  ;;  %4103 = vst [vmem:[%s8863_s19 + $0x18f0] sm:$0xff] %v3079_v38  ;;  %v3095_v29 = vadd.f32 %v8835_v36, %v13728_v24  ;;  %v3096_v31 = vadd.f32 %v8835_v36, %v13729_v30  ;;  %v13730_v32 = vld [vmem:[#allocation797_spill] sm:$0xff]  ;;  %v13731_v38 = vld [vmem:[#allocation798_spill] sm:$0xff] }
 0x406   : > { %4104 = vst [vmem:[%s8863_s19 + $0x18f8] sm:$0xff] %v3080_v40  ;;  %4105 = vst [vmem:[%s8863_s19 + $0x1900] sm:$0xff] %v3081_v46  ;;  %v3097_v37 = vadd.f32 %v8835_v36, %v13730_v32  ;;  %v3098_v39 = vadd.f32 %v8835_v36, %v13731_v38  ;;  %v13732_v40 = vld [vmem:[#allocation799_spill] sm:$0xff]  ;;  %v13733_v46 = vld [vmem:[#allocation800_spill] sm:$0xff] }
 0x407   : > { %4106 = vst [vmem:[%s8863_s19 + $0x1908] sm:$0xff] %v3082_v48  ;;  %4107 = vst [vmem:[%s8863_s19 + $0x1910] sm:$0xff] %v3083_v54  ;;  %v3099_v45 = vadd.f32 %v8835_v36, %v13732_v40  ;;  %v3100_v47 = vadd.f32 %v8835_v36, %v13733_v46  ;;  %v13734_v48 = vld [vmem:[#allocation801_spill] sm:$0xff]  ;;  %v13735_v54 = vld [vmem:[#allocation802_spill] sm:$0xff] }
 0x408   : > { %4108 = vst [vmem:[%s8863_s19 + $0x1918] sm:$0xff] %v3084_v56  ;;  %4109 = vst [vmem:[%s8863_s19 + $0x1920] sm:$0xff] %v3085_v62  ;;  %v3101_v53 = vadd.f32 %v8835_v36, %v13734_v48  ;;  %v3102_v55 = vadd.f32 %v8835_v36, %v13735_v54  ;;  %v13736_v56 = vld [vmem:[#allocation803_spill] sm:$0xff]  ;;  %v13737_v62 = vld [vmem:[#allocation804_spill] sm:$0xff] }
 0x409   : > { %4110 = vst [vmem:[%s8863_s19 + $0x1928] sm:$0xff] %v3086_v0  ;;  %4111 = vst [vmem:[%s8863_s19 + $0x1930] sm:$0xff] %v3087_v6  ;;  %v3103_v61 = vadd.f32 %v8835_v36, %v13736_v56  ;;  %v3104_v63 = vadd.f32 %v8835_v36, %v13737_v62  ;;  %v13738_v0 = vld [vmem:[#allocation805_spill] sm:$0xff]  ;;  %v13739_v6 = vld [vmem:[#allocation806_spill] sm:$0xff] }
 0x40a   : > { %4112 = vst [vmem:[%s8863_s19 + $0x1938] sm:$0xff] %v3088_v8  ;;  %4113 = vst [vmem:[%s8863_s19 + $0x1940] sm:$0xff] %v3089_v14  ;;  %v3105_v5 = vadd.f32 %v8835_v36, %v13738_v0  ;;  %v3106_v7 = vadd.f32 %v8835_v36, %v13739_v6  ;;  %v13740_v8 = vld [vmem:[#allocation807_spill] sm:$0xff]  ;;  %v13741_v14 = vld [vmem:[#allocation808_spill] sm:$0xff] }
 0x40b   : > { %4114 = vst [vmem:[%s8863_s19 + $0x1948] sm:$0xff] %v3090_v16  ;;  %4115 = vst [vmem:[%s8863_s19 + $0x1950] sm:$0xff] %v3091_v22  ;;  %v3107_v13 = vadd.f32 %v8835_v36, %v13740_v8  ;;  %v3108_v15 = vadd.f32 %v8835_v36, %v13741_v14  ;;  %v13742_v16 = vld [vmem:[#allocation809_spill] sm:$0xff]  ;;  %v13743_v22 = vld [vmem:[#allocation810_spill] sm:$0xff] }
 0x40c   : > { %4116 = vst [vmem:[%s8863_s19 + $0x1958] sm:$0xff] %v3092_v50  ;;  %4117 = vst [vmem:[%s8863_s19 + $0x1960] sm:$0xff] %v3093_v58  ;;  %v3109_v49 = vadd.f32 %v8835_v36, %v13742_v16  ;;  %v3110_v9 = vadd.f32 %v8835_v36, %v13743_v22  ;;  %v13744_v50 = vld [vmem:[#allocation811_spill] sm:$0xff]  ;;  %v13745_v58 = vld [vmem:[#allocation812_spill] sm:$0xff] }
 0x40d   : > { %4118 = vst [vmem:[%s8863_s19 + $0x1968] sm:$0xff] %v3094_v2  ;;  %4119 = vst [vmem:[%s8863_s19 + $0x1970] sm:$0xff] %v3095_v29  ;;  %v3111_v17 = vadd.f32 %v8835_v36, %v13744_v50  ;;  %v3112_v19 = vadd.f32 %v8835_v36, %v13745_v58  ;;  %v13746_v2 = vld [vmem:[#allocation813_spill] sm:$0xff]  ;;  %v13747_v29 = vld [vmem:[#allocation814_spill] sm:$0xff] }
 0x40e   : > { %4120 = vst [vmem:[%s8863_s19 + $0x1978] sm:$0xff] %v3096_v31  ;;  %4121 = vst [vmem:[%s8863_s19 + $0x1980] sm:$0xff] %v3097_v37  ;;  %v3113_v24 = vadd.f32 %v8835_v36, %v13746_v2  ;;  %v3114_v30 = vadd.f32 %v8835_v36, %v13747_v29  ;;  %v13748_v31 = vld [vmem:[#allocation815_spill] sm:$0xff]  ;;  %v13749_v37 = vld [vmem:[#allocation816_spill] sm:$0xff] }
 0x40f   : > { %4122 = vst [vmem:[%s8863_s19 + $0x1988] sm:$0xff] %v3098_v39  ;;  %4123 = vst [vmem:[%s8863_s19 + $0x1990] sm:$0xff] %v3099_v45  ;;  %v3115_v32 = vadd.f32 %v8835_v36, %v13748_v31  ;;  %v3116_v38 = vadd.f32 %v8835_v36, %v13749_v37  ;;  %v13750_v39 = vld [vmem:[#allocation817_spill] sm:$0xff]  ;;  %v13751_v45 = vld [vmem:[#allocation818_spill] sm:$0xff] }
 0x410   : > { %4124 = vst [vmem:[%s8863_s19 + $0x1998] sm:$0xff] %v3100_v47  ;;  %4125 = vst [vmem:[%s8863_s19 + $0x19a0] sm:$0xff] %v3101_v53  ;;  %v3117_v40 = vadd.f32 %v8835_v36, %v13750_v39  ;;  %v3118_v46 = vadd.f32 %v8835_v36, %v13751_v45  ;;  %v13752_v47 = vld [vmem:[#allocation819_spill] sm:$0xff]  ;;  %v13753_v53 = vld [vmem:[#allocation820_spill] sm:$0xff] }
 0x411   : > { %4126 = vst [vmem:[%s8863_s19 + $0x19a8] sm:$0xff] %v3102_v55  ;;  %4127 = vst [vmem:[%s8863_s19 + $0x19b0] sm:$0xff] %v3103_v61  ;;  %v3119_v48 = vadd.f32 %v8835_v36, %v13752_v47  ;;  %v3120_v54 = vadd.f32 %v8835_v36, %v13753_v53  ;;  %v13754_v55 = vld [vmem:[#allocation821_spill] sm:$0xff]  ;;  %v13755_v61 = vld [vmem:[#allocation822_spill] sm:$0xff] }
 0x412   : > { %4128 = vst [vmem:[%s8863_s19 + $0x19b8] sm:$0xff] %v3104_v63  ;;  %4129 = vst [vmem:[%s8863_s19 + $0x19c0] sm:$0xff] %v3105_v5  ;;  %v3121_v56 = vadd.f32 %v8835_v36, %v13754_v55  ;;  %v3122_v62 = vadd.f32 %v8835_v36, %v13755_v61  ;;  %v13756_v63 = vld [vmem:[#allocation823_spill] sm:$0xff]  ;;  %v13757_v5 = vld [vmem:[#allocation824_spill] sm:$0xff] }
 0x413   : > { %4130 = vst [vmem:[%s8863_s19 + $0x19c8] sm:$0xff] %v3106_v7  ;;  %4131 = vst [vmem:[%s8863_s19 + $0x19d0] sm:$0xff] %v3107_v13  ;;  %v3123_v0 = vadd.f32 %v8835_v36, %v13756_v63  ;;  %v3124_v6 = vadd.f32 %v8835_v36, %v13757_v5  ;;  %v13758_v7 = vld [vmem:[#allocation825_spill] sm:$0xff]  ;;  %v13759_v13 = vld [vmem:[#allocation826_spill] sm:$0xff] }
 0x414   : > { %4132 = vst [vmem:[%s8863_s19 + $0x19d8] sm:$0xff] %v3108_v15  ;;  %4133 = vst [vmem:[%s8863_s19 + $0x19e0] sm:$0xff] %v3109_v49  ;;  %v3125_v8 = vadd.f32 %v8835_v36, %v13758_v7  ;;  %v3126_v14 = vadd.f32 %v8835_v36, %v13759_v13  ;;  %v13760_v15 = vld [vmem:[#allocation827_spill] sm:$0xff]  ;;  %v13761_v49 = vld [vmem:[#allocation828_spill] sm:$0xff] }
 0x415   : > { %4134 = vst [vmem:[%s8863_s19 + $0x19e8] sm:$0xff] %v3110_v9  ;;  %4135 = vst [vmem:[%s8863_s19 + $0x19f0] sm:$0xff] %v3111_v17  ;;  %v3127_v16 = vadd.f32 %v8835_v36, %v13760_v15  ;;  %v3128_v22 = vadd.f32 %v8835_v36, %v13761_v49  ;;  %v13762_v9 = vld [vmem:[#allocation829_spill] sm:$0xff]  ;;  %v13763_v17 = vld [vmem:[#allocation830_spill] sm:$0xff] }
 0x416   : > { %4136 = vst [vmem:[%s8863_s19 + $0x19f8] sm:$0xff] %v3112_v19  ;;  %4137 = vst [vmem:[%s8863_s19 + $0x1a00] sm:$0xff] %v3113_v24  ;;  %v3129_v50 = vadd.f32 %v8835_v36, %v13762_v9  ;;  %v3130_v58 = vadd.f32 %v8835_v36, %v13763_v17  ;;  %v13764_v19 = vld [vmem:[#allocation831_spill] sm:$0xff]  ;;  %v13765_v24 = vld [vmem:[#allocation832_spill] sm:$0xff] }
 0x417   : > { %4138 = vst [vmem:[%s8863_s19 + $0x1a08] sm:$0xff] %v3114_v30  ;;  %4139 = vst [vmem:[%s8863_s19 + $0x1a10] sm:$0xff] %v3115_v32  ;;  %v3131_v2 = vadd.f32 %v8835_v36, %v13764_v19  ;;  %v3132_v29 = vadd.f32 %v8835_v36, %v13765_v24  ;;  %v13766_v30 = vld [vmem:[#allocation833_spill] sm:$0xff]  ;;  %v13767_v32 = vld [vmem:[#allocation834_spill] sm:$0xff] }
 0x418   : > { %4140 = vst [vmem:[%s8863_s19 + $0x1a18] sm:$0xff] %v3116_v38  ;;  %4141 = vst [vmem:[%s8863_s19 + $0x1a20] sm:$0xff] %v3117_v40  ;;  %v3133_v31 = vadd.f32 %v8835_v36, %v13766_v30  ;;  %v3134_v37 = vadd.f32 %v8835_v36, %v13767_v32  ;;  %v13768_v38 = vld [vmem:[#allocation835_spill] sm:$0xff]  ;;  %v13769_v40 = vld [vmem:[#allocation836_spill] sm:$0xff] }
 0x419   : > { %4142 = vst [vmem:[%s8863_s19 + $0x1a28] sm:$0xff] %v3118_v46  ;;  %4143 = vst [vmem:[%s8863_s19 + $0x1a30] sm:$0xff] %v3119_v48  ;;  %v3135_v39 = vadd.f32 %v8835_v36, %v13768_v38  ;;  %v3136_v45 = vadd.f32 %v8835_v36, %v13769_v40  ;;  %v13770_v46 = vld [vmem:[#allocation837_spill] sm:$0xff]  ;;  %v13771_v48 = vld [vmem:[#allocation838_spill] sm:$0xff] }
 0x41a   : > { %4144 = vst [vmem:[%s8863_s19 + $0x1a38] sm:$0xff] %v3120_v54  ;;  %4145 = vst [vmem:[%s8863_s19 + $0x1a40] sm:$0xff] %v3121_v56  ;;  %v3137_v47 = vadd.f32 %v8835_v36, %v13770_v46  ;;  %v3138_v53 = vadd.f32 %v8835_v36, %v13771_v48  ;;  %v13772_v54 = vld [vmem:[#allocation839_spill] sm:$0xff]  ;;  %v13773_v56 = vld [vmem:[#allocation840_spill] sm:$0xff] }
 0x41b   : > { %4146 = vst [vmem:[%s8863_s19 + $0x1a48] sm:$0xff] %v3122_v62  ;;  %4147 = vst [vmem:[%s8863_s19 + $0x1a50] sm:$0xff] %v3123_v0  ;;  %v3139_v55 = vadd.f32 %v8835_v36, %v13772_v54  ;;  %v3140_v61 = vadd.f32 %v8835_v36, %v13773_v56  ;;  %v13774_v62 = vld [vmem:[#allocation841_spill] sm:$0xff]  ;;  %v13775_v0 = vld [vmem:[#allocation842_spill] sm:$0xff] }
 0x41c   : > { %4148 = vst [vmem:[%s8863_s19 + $0x1a58] sm:$0xff] %v3124_v6  ;;  %4149 = vst [vmem:[%s8863_s19 + $0x1a60] sm:$0xff] %v3125_v8  ;;  %v3141_v63 = vadd.f32 %v8835_v36, %v13774_v62  ;;  %v3142_v5 = vadd.f32 %v8835_v36, %v13775_v0  ;;  %v13776_v6 = vld [vmem:[#allocation843_spill] sm:$0xff]  ;;  %v13777_v8 = vld [vmem:[#allocation844_spill] sm:$0xff] }
 0x41d   : > { %4150 = vst [vmem:[%s8863_s19 + $0x1a68] sm:$0xff] %v3126_v14  ;;  %4151 = vst [vmem:[%s8863_s19 + $0x1a70] sm:$0xff] %v3127_v16  ;;  %v3143_v7 = vadd.f32 %v8835_v36, %v13776_v6  ;;  %v3144_v13 = vadd.f32 %v8835_v36, %v13777_v8  ;;  %v13778_v14 = vld [vmem:[#allocation845_spill] sm:$0xff]  ;;  %v13779_v16 = vld [vmem:[#allocation846_spill] sm:$0xff] }
 0x41e   : > { %4152 = vst [vmem:[%s8863_s19 + $0x1a78] sm:$0xff] %v3128_v22  ;;  %4153 = vst [vmem:[%s8863_s19 + $0x1a80] sm:$0xff] %v3129_v50  ;;  %v3145_v15 = vadd.f32 %v8835_v36, %v13778_v14  ;;  %v3146_v49 = vadd.f32 %v8835_v36, %v13779_v16  ;;  %v13780_v22 = vld [vmem:[#allocation847_spill] sm:$0xff]  ;;  %v13781_v50 = vld [vmem:[#allocation848_spill] sm:$0xff] }
 0x41f   : > { %4154 = vst [vmem:[%s8863_s19 + $0x1a88] sm:$0xff] %v3130_v58  ;;  %4155 = vst [vmem:[%s8863_s19 + $0x1a90] sm:$0xff] %v3131_v2  ;;  %v3147_v9 = vadd.f32 %v8835_v36, %v13780_v22  ;;  %v3148_v17 = vadd.f32 %v8835_v36, %v13781_v50  ;;  %v13782_v58 = vld [vmem:[#allocation849_spill] sm:$0xff]  ;;  %v13783_v2 = vld [vmem:[#allocation850_spill] sm:$0xff] }
 0x420   : > { %4156 = vst [vmem:[%s8863_s19 + $0x1a98] sm:$0xff] %v3132_v29  ;;  %4157 = vst [vmem:[%s8863_s19 + $0x1aa0] sm:$0xff] %v3133_v31  ;;  %v3149_v19 = vadd.f32 %v8835_v36, %v13782_v58  ;;  %v3150_v24 = vadd.f32 %v8835_v36, %v13783_v2  ;;  %v13784_v29 = vld [vmem:[#allocation851_spill] sm:$0xff]  ;;  %v13785_v31 = vld [vmem:[#allocation852_spill] sm:$0xff] }
 0x421   : > { %4158 = vst [vmem:[%s8863_s19 + $0x1aa8] sm:$0xff] %v3134_v37  ;;  %4159 = vst [vmem:[%s8863_s19 + $0x1ab0] sm:$0xff] %v3135_v39  ;;  %v3151_v30 = vadd.f32 %v8835_v36, %v13784_v29  ;;  %v3152_v32 = vadd.f32 %v8835_v36, %v13785_v31  ;;  %v13786_v37 = vld [vmem:[#allocation853_spill] sm:$0xff]  ;;  %v13787_v39 = vld [vmem:[#allocation854_spill] sm:$0xff] }
 0x422   : > { %4160 = vst [vmem:[%s8863_s19 + $0x1ab8] sm:$0xff] %v3136_v45  ;;  %4161 = vst [vmem:[%s8863_s19 + $0x1ac0] sm:$0xff] %v3137_v47  ;;  %v3153_v38 = vadd.f32 %v8835_v36, %v13786_v37  ;;  %v3154_v40 = vadd.f32 %v8835_v36, %v13787_v39  ;;  %v13788_v45 = vld [vmem:[#allocation855_spill] sm:$0xff]  ;;  %v13789_v47 = vld [vmem:[#allocation856_spill] sm:$0xff] }
 0x423   : > { %4162 = vst [vmem:[%s8863_s19 + $0x1ac8] sm:$0xff] %v3138_v53  ;;  %4163 = vst [vmem:[%s8863_s19 + $0x1ad0] sm:$0xff] %v3139_v55  ;;  %v3155_v46 = vadd.f32 %v8835_v36, %v13788_v45  ;;  %v3156_v48 = vadd.f32 %v8835_v36, %v13789_v47  ;;  %v13790_v53 = vld [vmem:[#allocation857_spill] sm:$0xff]  ;;  %v13791_v55 = vld [vmem:[#allocation858_spill] sm:$0xff] }
 0x424   : > { %4164 = vst [vmem:[%s8863_s19 + $0x1ad8] sm:$0xff] %v3140_v61  ;;  %4165 = vst [vmem:[%s8863_s19 + $0x1ae0] sm:$0xff] %v3141_v63  ;;  %v3157_v54 = vadd.f32 %v8835_v36, %v13790_v53  ;;  %v3158_v56 = vadd.f32 %v8835_v36, %v13791_v55  ;;  %v13792_v61 = vld [vmem:[#allocation859_spill] sm:$0xff]  ;;  %v13793_v63 = vld [vmem:[#allocation860_spill] sm:$0xff] }
 0x425   : > { %4166 = vst [vmem:[%s8863_s19 + $0x1ae8] sm:$0xff] %v3142_v5  ;;  %4167 = vst [vmem:[%s8863_s19 + $0x1af0] sm:$0xff] %v3143_v7  ;;  %v3159_v62 = vadd.f32 %v8835_v36, %v13792_v61  ;;  %v3160_v0 = vadd.f32 %v8835_v36, %v13793_v63  ;;  %v13794_v5 = vld [vmem:[#allocation861_spill] sm:$0xff]  ;;  %v13795_v7 = vld [vmem:[#allocation862_spill] sm:$0xff] }
 0x426   : > { %4168 = vst [vmem:[%s8863_s19 + $0x1af8] sm:$0xff] %v3144_v13  ;;  %4169 = vst [vmem:[%s8863_s19 + $0x1b00] sm:$0xff] %v3145_v15  ;;  %v3161_v6 = vadd.f32 %v8835_v36, %v13794_v5  ;;  %v3162_v8 = vadd.f32 %v8835_v36, %v13795_v7  ;;  %v13796_v13 = vld [vmem:[#allocation863_spill] sm:$0xff]  ;;  %v13797_v15 = vld [vmem:[#allocation864_spill] sm:$0xff] }
 0x427   : > { %4170 = vst [vmem:[%s8863_s19 + $0x1b08] sm:$0xff] %v3146_v49  ;;  %4171 = vst [vmem:[%s8863_s19 + $0x1b10] sm:$0xff] %v3147_v9  ;;  %v3163_v14 = vadd.f32 %v8835_v36, %v13796_v13  ;;  %v3164_v16 = vadd.f32 %v8835_v36, %v13797_v15  ;;  %v13798_v49 = vld [vmem:[#allocation865_spill] sm:$0xff]  ;;  %v13799_v9 = vld [vmem:[#allocation866_spill] sm:$0xff] }
 0x428   : > { %4172 = vst [vmem:[%s8863_s19 + $0x1b18] sm:$0xff] %v3148_v17  ;;  %4173 = vst [vmem:[%s8863_s19 + $0x1b20] sm:$0xff] %v3149_v19  ;;  %v3165_v22 = vadd.f32 %v8835_v36, %v13798_v49  ;;  %v3166_v50 = vadd.f32 %v8835_v36, %v13799_v9  ;;  %v13800_v17 = vld [vmem:[#allocation867_spill] sm:$0xff]  ;;  %v13801_v19 = vld [vmem:[#allocation868_spill] sm:$0xff] }
 0x429   : > { %4174 = vst [vmem:[%s8863_s19 + $0x1b28] sm:$0xff] %v3150_v24  ;;  %4175 = vst [vmem:[%s8863_s19 + $0x1b30] sm:$0xff] %v3151_v30  ;;  %v3167_v58 = vadd.f32 %v8835_v36, %v13800_v17  ;;  %v3168_v2 = vadd.f32 %v8835_v36, %v13801_v19  ;;  %v13802_v24 = vld [vmem:[#allocation869_spill] sm:$0xff]  ;;  %v13803_v30 = vld [vmem:[#allocation870_spill] sm:$0xff] }
 0x42a   : > { %4176 = vst [vmem:[%s8863_s19 + $0x1b38] sm:$0xff] %v3152_v32  ;;  %4177 = vst [vmem:[%s8863_s19 + $0x1b40] sm:$0xff] %v3153_v38  ;;  %v3169_v29 = vadd.f32 %v8835_v36, %v13802_v24  ;;  %v3170_v31 = vadd.f32 %v8835_v36, %v13803_v30  ;;  %v13804_v32 = vld [vmem:[#allocation871_spill] sm:$0xff]  ;;  %v13805_v38 = vld [vmem:[#allocation872_spill] sm:$0xff] }
 0x42b   : > { %4178 = vst [vmem:[%s8863_s19 + $0x1b48] sm:$0xff] %v3154_v40  ;;  %4179 = vst [vmem:[%s8863_s19 + $0x1b50] sm:$0xff] %v3155_v46  ;;  %v3171_v37 = vadd.f32 %v8835_v36, %v13804_v32  ;;  %v3172_v39 = vadd.f32 %v8835_v36, %v13805_v38  ;;  %v13806_v40 = vld [vmem:[#allocation873_spill] sm:$0xff]  ;;  %v13807_v46 = vld [vmem:[#allocation874_spill] sm:$0xff] }
 0x42c   : > { %4180 = vst [vmem:[%s8863_s19 + $0x1b58] sm:$0xff] %v3156_v48  ;;  %4181 = vst [vmem:[%s8863_s19 + $0x1b60] sm:$0xff] %v3157_v54  ;;  %v3173_v45 = vadd.f32 %v8835_v36, %v13806_v40  ;;  %v3174_v47 = vadd.f32 %v8835_v36, %v13807_v46  ;;  %v13808_v48 = vld [vmem:[#allocation875_spill] sm:$0xff]  ;;  %v13809_v54 = vld [vmem:[#allocation876_spill] sm:$0xff] }
 0x42d   : > { %4182 = vst [vmem:[%s8863_s19 + $0x1b68] sm:$0xff] %v3158_v56  ;;  %4183 = vst [vmem:[%s8863_s19 + $0x1b70] sm:$0xff] %v3159_v62  ;;  %v3175_v53 = vadd.f32 %v8835_v36, %v13808_v48  ;;  %v3176_v55 = vadd.f32 %v8835_v36, %v13809_v54  ;;  %v13810_v56 = vld [vmem:[#allocation877_spill] sm:$0xff]  ;;  %v13811_v62 = vld [vmem:[#allocation878_spill] sm:$0xff] }
 0x42e   : > { %4184 = vst [vmem:[%s8863_s19 + $0x1b78] sm:$0xff] %v3160_v0  ;;  %4185 = vst [vmem:[%s8863_s19 + $0x1b80] sm:$0xff] %v3161_v6  ;;  %v3177_v61 = vadd.f32 %v8835_v36, %v13810_v56  ;;  %v3178_v63 = vadd.f32 %v8835_v36, %v13811_v62  ;;  %v13812_v0 = vld [vmem:[#allocation879_spill] sm:$0xff]  ;;  %v13813_v6 = vld [vmem:[#allocation880_spill] sm:$0xff] }
 0x42f   : > { %4186 = vst [vmem:[%s8863_s19 + $0x1b88] sm:$0xff] %v3162_v8  ;;  %4187 = vst [vmem:[%s8863_s19 + $0x1b90] sm:$0xff] %v3163_v14  ;;  %v3179_v5 = vadd.f32 %v8835_v36, %v13812_v0  ;;  %v3180_v7 = vadd.f32 %v8835_v36, %v13813_v6  ;;  %v13814_v8 = vld [vmem:[#allocation881_spill] sm:$0xff]  ;;  %v13815_v14 = vld [vmem:[#allocation882_spill] sm:$0xff] }
 0x430   : > { %4188 = vst [vmem:[%s8863_s19 + $0x1b98] sm:$0xff] %v3164_v16  ;;  %4189 = vst [vmem:[%s8863_s19 + $0x1ba0] sm:$0xff] %v3165_v22  ;;  %v3181_v13 = vadd.f32 %v8835_v36, %v13814_v8  ;;  %v3182_v15 = vadd.f32 %v8835_v36, %v13815_v14  ;;  %v13816_v16 = vld [vmem:[#allocation883_spill] sm:$0xff]  ;;  %v13817_v22 = vld [vmem:[#allocation884_spill] sm:$0xff] }
 0x431   : > { %4190 = vst [vmem:[%s8863_s19 + $0x1ba8] sm:$0xff] %v3166_v50  ;;  %4191 = vst [vmem:[%s8863_s19 + $0x1bb0] sm:$0xff] %v3167_v58  ;;  %v3183_v49 = vadd.f32 %v8835_v36, %v13816_v16  ;;  %v3184_v9 = vadd.f32 %v8835_v36, %v13817_v22  ;;  %v13818_v50 = vld [vmem:[#allocation885_spill] sm:$0xff]  ;;  %v13819_v58 = vld [vmem:[#allocation886_spill] sm:$0xff] }
 0x432   : > { %4192 = vst [vmem:[%s8863_s19 + $0x1bb8] sm:$0xff] %v3168_v2  ;;  %4193 = vst [vmem:[%s8863_s19 + $0x1bc0] sm:$0xff] %v3169_v29  ;;  %v3185_v17 = vadd.f32 %v8835_v36, %v13818_v50  ;;  %v3186_v19 = vadd.f32 %v8835_v36, %v13819_v58  ;;  %v13820_v2 = vld [vmem:[#allocation887_spill] sm:$0xff]  ;;  %v13821_v29 = vld [vmem:[#allocation888_spill] sm:$0xff] }
 0x433   : > { %4194 = vst [vmem:[%s8863_s19 + $0x1bc8] sm:$0xff] %v3170_v31  ;;  %4195 = vst [vmem:[%s8863_s19 + $0x1bd0] sm:$0xff] %v3171_v37  ;;  %v3187_v24 = vadd.f32 %v8835_v36, %v13820_v2  ;;  %v3188_v30 = vadd.f32 %v8835_v36, %v13821_v29  ;;  %v13822_v31 = vld [vmem:[#allocation889_spill] sm:$0xff]  ;;  %v13823_v37 = vld [vmem:[#allocation890_spill] sm:$0xff] }
 0x434   : > { %4196 = vst [vmem:[%s8863_s19 + $0x1bd8] sm:$0xff] %v3172_v39  ;;  %4197 = vst [vmem:[%s8863_s19 + $0x1be0] sm:$0xff] %v3173_v45  ;;  %v3189_v32 = vadd.f32 %v8835_v36, %v13822_v31  ;;  %v3190_v38 = vadd.f32 %v8835_v36, %v13823_v37  ;;  %v13824_v39 = vld [vmem:[#allocation891_spill] sm:$0xff]  ;;  %v13825_v45 = vld [vmem:[#allocation892_spill] sm:$0xff] }
 0x435   : > { %4198 = vst [vmem:[%s8863_s19 + $0x1be8] sm:$0xff] %v3174_v47  ;;  %4199 = vst [vmem:[%s8863_s19 + $0x1bf0] sm:$0xff] %v3175_v53  ;;  %v3191_v40 = vadd.f32 %v8835_v36, %v13824_v39  ;;  %v3192_v46 = vadd.f32 %v8835_v36, %v13825_v45  ;;  %v13826_v47 = vld [vmem:[#allocation893_spill] sm:$0xff]  ;;  %v13827_v53 = vld [vmem:[#allocation894_spill] sm:$0xff] }
 0x436   : > { %4200 = vst [vmem:[%s8863_s19 + $0x1bf8] sm:$0xff] %v3176_v55  ;;  %4201 = vst [vmem:[%s8863_s19 + $0x1c00] sm:$0xff] %v3177_v61  ;;  %v3193_v48 = vadd.f32 %v8835_v36, %v13826_v47  ;;  %v3194_v54 = vadd.f32 %v8835_v36, %v13827_v53  ;;  %v13828_v55 = vld [vmem:[#allocation895_spill] sm:$0xff]  ;;  %v13829_v61 = vld [vmem:[#allocation896_spill] sm:$0xff] }
 0x437   : > { %4202 = vst [vmem:[%s8863_s19 + $0x1c08] sm:$0xff] %v3178_v63  ;;  %4203 = vst [vmem:[%s8863_s19 + $0x1c10] sm:$0xff] %v3179_v5  ;;  %v3195_v56 = vadd.f32 %v8835_v36, %v13828_v55  ;;  %v3196_v62 = vadd.f32 %v8835_v36, %v13829_v61  ;;  %v13830_v63 = vld [vmem:[#allocation897_spill] sm:$0xff]  ;;  %v13831_v5 = vld [vmem:[#allocation898_spill] sm:$0xff] }
 0x438   : > { %4204 = vst [vmem:[%s8863_s19 + $0x1c18] sm:$0xff] %v3180_v7  ;;  %4205 = vst [vmem:[%s8863_s19 + $0x1c20] sm:$0xff] %v3181_v13  ;;  %v3197_v0 = vadd.f32 %v8835_v36, %v13830_v63  ;;  %v3198_v6 = vadd.f32 %v8835_v36, %v13831_v5  ;;  %v13832_v7 = vld [vmem:[#allocation899_spill] sm:$0xff]  ;;  %v13833_v13 = vld [vmem:[#allocation900_spill] sm:$0xff] }
 0x439   : > { %4206 = vst [vmem:[%s8863_s19 + $0x1c28] sm:$0xff] %v3182_v15  ;;  %4207 = vst [vmem:[%s8863_s19 + $0x1c30] sm:$0xff] %v3183_v49  ;;  %v3199_v8 = vadd.f32 %v8835_v36, %v13832_v7  ;;  %v3200_v14 = vadd.f32 %v8835_v36, %v13833_v13  ;;  %v13834_v15 = vld [vmem:[#allocation901_spill] sm:$0xff]  ;;  %v13835_v49 = vld [vmem:[#allocation902_spill] sm:$0xff] }
 0x43a   : > { %4208 = vst [vmem:[%s8863_s19 + $0x1c38] sm:$0xff] %v3184_v9  ;;  %4209 = vst [vmem:[%s8863_s19 + $0x1c40] sm:$0xff] %v3185_v17  ;;  %v3201_v16 = vadd.f32 %v8835_v36, %v13834_v15  ;;  %v3202_v22 = vadd.f32 %v8835_v36, %v13835_v49  ;;  %v13836_v9 = vld [vmem:[#allocation903_spill] sm:$0xff]  ;;  %v13837_v17 = vld [vmem:[#allocation904_spill] sm:$0xff] }
 0x43b   : > { %4210 = vst [vmem:[%s8863_s19 + $0x1c48] sm:$0xff] %v3186_v19  ;;  %4211 = vst [vmem:[%s8863_s19 + $0x1c50] sm:$0xff] %v3187_v24  ;;  %v3203_v50 = vadd.f32 %v8835_v36, %v13836_v9  ;;  %v3204_v58 = vadd.f32 %v8835_v36, %v13837_v17  ;;  %v13838_v19 = vld [vmem:[#allocation905_spill] sm:$0xff]  ;;  %v13839_v24 = vld [vmem:[#allocation906_spill] sm:$0xff] }
 0x43c   : > { %4212 = vst [vmem:[%s8863_s19 + $0x1c58] sm:$0xff] %v3188_v30  ;;  %4213 = vst [vmem:[%s8863_s19 + $0x1c60] sm:$0xff] %v3189_v32  ;;  %v3205_v2 = vadd.f32 %v8835_v36, %v13838_v19  ;;  %v3206_v29 = vadd.f32 %v8835_v36, %v13839_v24  ;;  %v13840_v30 = vld [vmem:[#allocation907_spill] sm:$0xff]  ;;  %v13841_v32 = vld [vmem:[#allocation908_spill] sm:$0xff] }
 0x43d   : > { %4214 = vst [vmem:[%s8863_s19 + $0x1c68] sm:$0xff] %v3190_v38  ;;  %4215 = vst [vmem:[%s8863_s19 + $0x1c70] sm:$0xff] %v3191_v40  ;;  %v3207_v31 = vadd.f32 %v8835_v36, %v13840_v30  ;;  %v3208_v37 = vadd.f32 %v8835_v36, %v13841_v32  ;;  %v13842_v38 = vld [vmem:[#allocation909_spill] sm:$0xff]  ;;  %v13843_v40 = vld [vmem:[#allocation910_spill] sm:$0xff] }
 0x43e   : > { %4216 = vst [vmem:[%s8863_s19 + $0x1c78] sm:$0xff] %v3192_v46  ;;  %4217 = vst [vmem:[%s8863_s19 + $0x1c80] sm:$0xff] %v3193_v48  ;;  %v3209_v39 = vadd.f32 %v8835_v36, %v13842_v38  ;;  %v3210_v45 = vadd.f32 %v8835_v36, %v13843_v40  ;;  %v13844_v46 = vld [vmem:[#allocation911_spill] sm:$0xff]  ;;  %v13845_v48 = vld [vmem:[#allocation912_spill] sm:$0xff] }
 0x43f   : > { %4218 = vst [vmem:[%s8863_s19 + $0x1c88] sm:$0xff] %v3194_v54  ;;  %4219 = vst [vmem:[%s8863_s19 + $0x1c90] sm:$0xff] %v3195_v56  ;;  %v3211_v47 = vadd.f32 %v8835_v36, %v13844_v46  ;;  %v3212_v53 = vadd.f32 %v8835_v36, %v13845_v48  ;;  %v13846_v54 = vld [vmem:[#allocation913_spill] sm:$0xff]  ;;  %v13847_v56 = vld [vmem:[#allocation914_spill] sm:$0xff] }
 0x440   : > { %4220 = vst [vmem:[%s8863_s19 + $0x1c98] sm:$0xff] %v3196_v62  ;;  %4221 = vst [vmem:[%s8863_s19 + $0x1ca0] sm:$0xff] %v3197_v0  ;;  %v3213_v55 = vadd.f32 %v8835_v36, %v13846_v54  ;;  %v3214_v61 = vadd.f32 %v8835_v36, %v13847_v56  ;;  %v13848_v62 = vld [vmem:[#allocation915_spill] sm:$0xff]  ;;  %v13849_v0 = vld [vmem:[#allocation916_spill] sm:$0xff] }
 0x441   : > { %4222 = vst [vmem:[%s8863_s19 + $0x1ca8] sm:$0xff] %v3198_v6  ;;  %4223 = vst [vmem:[%s8863_s19 + $0x1cb0] sm:$0xff] %v3199_v8  ;;  %v3215_v63 = vadd.f32 %v8835_v36, %v13848_v62  ;;  %v3216_v5 = vadd.f32 %v8835_v36, %v13849_v0  ;;  %v13850_v6 = vld [vmem:[#allocation917_spill] sm:$0xff]  ;;  %v13851_v8 = vld [vmem:[#allocation918_spill] sm:$0xff] }
 0x442   : > { %4224 = vst [vmem:[%s8863_s19 + $0x1cb8] sm:$0xff] %v3200_v14  ;;  %4225 = vst [vmem:[%s8863_s19 + $0x1cc0] sm:$0xff] %v3201_v16  ;;  %v3217_v7 = vadd.f32 %v8835_v36, %v13850_v6  ;;  %v3218_v13 = vadd.f32 %v8835_v36, %v13851_v8  ;;  %v13852_v14 = vld [vmem:[#allocation919_spill] sm:$0xff]  ;;  %v13853_v16 = vld [vmem:[#allocation920_spill] sm:$0xff] }
 0x443   : > { %4226 = vst [vmem:[%s8863_s19 + $0x1cc8] sm:$0xff] %v3202_v22  ;;  %4227 = vst [vmem:[%s8863_s19 + $0x1cd0] sm:$0xff] %v3203_v50  ;;  %v3219_v15 = vadd.f32 %v8835_v36, %v13852_v14  ;;  %v3220_v49 = vadd.f32 %v8835_v36, %v13853_v16  ;;  %v13854_v22 = vld [vmem:[#allocation921_spill] sm:$0xff]  ;;  %v13855_v50 = vld [vmem:[#allocation922_spill] sm:$0xff] }
 0x444   : > { %4228 = vst [vmem:[%s8863_s19 + $0x1cd8] sm:$0xff] %v3204_v58  ;;  %4229 = vst [vmem:[%s8863_s19 + $0x1ce0] sm:$0xff] %v3205_v2  ;;  %v3221_v9 = vadd.f32 %v8835_v36, %v13854_v22  ;;  %v3222_v17 = vadd.f32 %v8835_v36, %v13855_v50  ;;  %v13856_v58 = vld [vmem:[#allocation923_spill] sm:$0xff]  ;;  %v13857_v2 = vld [vmem:[#allocation924_spill] sm:$0xff] }
 0x445   : > { %4230 = vst [vmem:[%s8863_s19 + $0x1ce8] sm:$0xff] %v3206_v29  ;;  %4231 = vst [vmem:[%s8863_s19 + $0x1cf0] sm:$0xff] %v3207_v31  ;;  %v3223_v19 = vadd.f32 %v8835_v36, %v13856_v58  ;;  %v3224_v24 = vadd.f32 %v8835_v36, %v13857_v2  ;;  %v13858_v29 = vld [vmem:[#allocation925_spill] sm:$0xff]  ;;  %v13859_v31 = vld [vmem:[#allocation926_spill] sm:$0xff] }
 0x446   : > { %4232 = vst [vmem:[%s8863_s19 + $0x1cf8] sm:$0xff] %v3208_v37  ;;  %4233 = vst [vmem:[%s8863_s19 + $0x1d00] sm:$0xff] %v3209_v39  ;;  %v3225_v30 = vadd.f32 %v8835_v36, %v13858_v29  ;;  %v3226_v32 = vadd.f32 %v8835_v36, %v13859_v31  ;;  %v13860_v37 = vld [vmem:[#allocation927_spill] sm:$0xff]  ;;  %v13861_v39 = vld [vmem:[#allocation928_spill] sm:$0xff] }
 0x447   : > { %4234 = vst [vmem:[%s8863_s19 + $0x1d08] sm:$0xff] %v3210_v45  ;;  %4235 = vst [vmem:[%s8863_s19 + $0x1d10] sm:$0xff] %v3211_v47  ;;  %v3227_v38 = vadd.f32 %v8835_v36, %v13860_v37  ;;  %v3228_v40 = vadd.f32 %v8835_v36, %v13861_v39  ;;  %v13862_v45 = vld [vmem:[#allocation929_spill] sm:$0xff]  ;;  %v13863_v47 = vld [vmem:[#allocation930_spill] sm:$0xff] }
 0x448   : > { %4236 = vst [vmem:[%s8863_s19 + $0x1d18] sm:$0xff] %v3212_v53  ;;  %4237 = vst [vmem:[%s8863_s19 + $0x1d20] sm:$0xff] %v3213_v55  ;;  %v3229_v46 = vadd.f32 %v8835_v36, %v13862_v45  ;;  %v3230_v48 = vadd.f32 %v8835_v36, %v13863_v47  ;;  %v13864_v53 = vld [vmem:[#allocation931_spill] sm:$0xff]  ;;  %v13865_v55 = vld [vmem:[#allocation932_spill] sm:$0xff] }
 0x449   : > { %4238 = vst [vmem:[%s8863_s19 + $0x1d28] sm:$0xff] %v3214_v61  ;;  %4239 = vst [vmem:[%s8863_s19 + $0x1d30] sm:$0xff] %v3215_v63  ;;  %v3231_v54 = vadd.f32 %v8835_v36, %v13864_v53  ;;  %v3232_v56 = vadd.f32 %v8835_v36, %v13865_v55  ;;  %v13866_v61 = vld [vmem:[#allocation933_spill] sm:$0xff]  ;;  %v13867_v63 = vld [vmem:[#allocation934_spill] sm:$0xff] }
 0x44a   : > { %4240 = vst [vmem:[%s8863_s19 + $0x1d38] sm:$0xff] %v3216_v5  ;;  %4241 = vst [vmem:[%s8863_s19 + $0x1d40] sm:$0xff] %v3217_v7  ;;  %v3233_v62 = vadd.f32 %v8835_v36, %v13866_v61  ;;  %v3234_v0 = vadd.f32 %v8835_v36, %v13867_v63  ;;  %v13868_v5 = vld [vmem:[#allocation935_spill] sm:$0xff]  ;;  %v13869_v7 = vld [vmem:[#allocation936_spill] sm:$0xff] }
 0x44b   : > { %4242 = vst [vmem:[%s8863_s19 + $0x1d48] sm:$0xff] %v3218_v13  ;;  %4243 = vst [vmem:[%s8863_s19 + $0x1d50] sm:$0xff] %v3219_v15  ;;  %v3235_v6 = vadd.f32 %v8835_v36, %v13868_v5  ;;  %v3236_v8 = vadd.f32 %v8835_v36, %v13869_v7  ;;  %v13870_v13 = vld [vmem:[#allocation937_spill] sm:$0xff]  ;;  %v13871_v15 = vld [vmem:[#allocation938_spill] sm:$0xff] }
 0x44c   : > { %4244 = vst [vmem:[%s8863_s19 + $0x1d58] sm:$0xff] %v3220_v49  ;;  %4245 = vst [vmem:[%s8863_s19 + $0x1d60] sm:$0xff] %v3221_v9  ;;  %v3237_v14 = vadd.f32 %v8835_v36, %v13870_v13  ;;  %v3238_v16 = vadd.f32 %v8835_v36, %v13871_v15  ;;  %v13872_v49 = vld [vmem:[#allocation939_spill] sm:$0xff]  ;;  %v13873_v9 = vld [vmem:[#allocation940_spill] sm:$0xff] }
 0x44d   : > { %4246 = vst [vmem:[%s8863_s19 + $0x1d68] sm:$0xff] %v3222_v17  ;;  %4247 = vst [vmem:[%s8863_s19 + $0x1d70] sm:$0xff] %v3223_v19  ;;  %v3239_v22 = vadd.f32 %v8835_v36, %v13872_v49  ;;  %v3240_v50 = vadd.f32 %v8835_v36, %v13873_v9  ;;  %v13874_v17 = vld [vmem:[#allocation941_spill] sm:$0xff]  ;;  %v13875_v19 = vld [vmem:[#allocation942_spill] sm:$0xff] }
 0x44e   : > { %4248 = vst [vmem:[%s8863_s19 + $0x1d78] sm:$0xff] %v3224_v24  ;;  %4249 = vst [vmem:[%s8863_s19 + $0x1d80] sm:$0xff] %v3225_v30  ;;  %v3241_v58 = vadd.f32 %v8835_v36, %v13874_v17  ;;  %v3242_v2 = vadd.f32 %v8835_v36, %v13875_v19  ;;  %v13876_v24 = vld [vmem:[#allocation943_spill] sm:$0xff]  ;;  %v13877_v30 = vld [vmem:[#allocation944_spill] sm:$0xff]  ;;  %v3263_v17 = vadd.f32 %v8835_v36, %v8686_v21 }
 0x44f   : > { %4250 = vst [vmem:[%s8863_s19 + $0x1d88] sm:$0xff] %v3226_v32  ;;  %4251 = vst [vmem:[%s8863_s19 + $0x1d90] sm:$0xff] %v3227_v38  ;;  %v3243_v29 = vadd.f32 %v8835_v36, %v13876_v24  ;;  %v3244_v31 = vadd.f32 %v8835_v36, %v13877_v30  ;;  %v13878_v32 = vld [vmem:[#allocation945_spill] sm:$0xff]  ;;  %v13879_v38 = vld [vmem:[#allocation946_spill] sm:$0xff] }
 0x450   : > { %4252 = vst [vmem:[%s8863_s19 + $0x1d98] sm:$0xff] %v3228_v40  ;;  %4253 = vst [vmem:[%s8863_s19 + $0x1da0] sm:$0xff] %v3229_v46  ;;  %v3245_v37 = vadd.f32 %v8835_v36, %v13878_v32  ;;  %v3246_v39 = vadd.f32 %v8835_v36, %v13879_v38  ;;  %v13880_v40 = vld [vmem:[#allocation947_spill] sm:$0xff]  ;;  %v13881_v46 = vld [vmem:[#allocation948_spill] sm:$0xff] }
 0x451   : > { %4254 = vst [vmem:[%s8863_s19 + $0x1da8] sm:$0xff] %v3230_v48  ;;  %4255 = vst [vmem:[%s8863_s19 + $0x1db0] sm:$0xff] %v3231_v54  ;;  %v3247_v45 = vadd.f32 %v8835_v36, %v13880_v40  ;;  %v3248_v47 = vadd.f32 %v8835_v36, %v13881_v46  ;;  %v13882_v48 = vld [vmem:[#allocation949_spill] sm:$0xff]  ;;  %v3250_v54 = vadd.f32 %v8835_v36, %v8637_v23  ;;  %v13883_v55 = vld [vmem:[#allocation950_spill] sm:$0xff] }
 0x452   : > { %4256 = vst [vmem:[%s8863_s19 + $0x1db8] sm:$0xff] %v3232_v56  ;;  %4257 = vst [vmem:[%s8863_s19 + $0x1dc0] sm:$0xff] %v3233_v62  ;;  %v3249_v53 = vadd.f32 %v8835_v36, %v13882_v48  ;;  %v3251_v56 = vadd.f32 %v8835_v36, %v13883_v55  ;;  %v13884_v61 = vld [vmem:[#allocation951_spill] sm:$0xff]  ;;  %v13885_v63 = vld [vmem:[#allocation952_spill] sm:$0xff]  ;;  %v3254_v23 = vadd.f32 %v8835_v36, %v8653_v52 }
 0x453   : > { %4258 = vst [vmem:[%s8863_s19 + $0x1dc8] sm:$0xff] %v3234_v0  ;;  %4259 = vst [vmem:[%s8863_s19 + $0x1dd0] sm:$0xff] %v3235_v6  ;;  %v3252_v62 = vadd.f32 %v8835_v36, %v13884_v61  ;;  %v3253_v0 = vadd.f32 %v8835_v36, %v13885_v63  ;;  %v13886_v5 = vld [vmem:[#allocation953_spill] sm:$0xff]  ;;  %v13887_v7 = vld [vmem:[#allocation954_spill] sm:$0xff]  ;;  %v3258_v52 = vadd.f32 %v8835_v36, %v8668_v60 }
 0x454   : > { %4260 = vst [vmem:[%s8863_s19 + $0x1dd8] sm:$0xff] %v3236_v8  ;;  %4261 = vst [vmem:[%s8863_s19 + $0x1de0] sm:$0xff] %v3237_v14  ;;  %v3255_v6 = vadd.f32 %v8835_v36, %v13886_v5  ;;  %v3256_v8 = vadd.f32 %v8835_v36, %v13887_v7  ;;  %v13888_v13 = vld [vmem:[#allocation955_spill] sm:$0xff]  ;;  %v13889_v15 = vld [vmem:[#allocation956_spill] sm:$0xff]  ;;  %v3262_v60 = vadd.f32 %v8835_v36, %v8683_v4 }
 0x455   : > { %4262 = vst [vmem:[%s8863_s19 + $0x1de8] sm:$0xff] %v3238_v16  ;;  %4263 = vst [vmem:[%s8863_s19 + $0x1df0] sm:$0xff] %v3239_v22  ;;  %v3257_v14 = vadd.f32 %v8835_v36, %v13888_v13  ;;  %v3259_v16 = vadd.f32 %v8835_v36, %v13889_v15  ;;  %v13890_v49 = vld [vmem:[#allocation957_spill] sm:$0xff]  ;;  %v13891_v9 = vld [vmem:[#allocation958_spill] sm:$0xff] }
 0x456   : > { %4264 = vst [vmem:[%s8863_s19 + $0x1df8] sm:$0xff] %v3240_v50  ;;  %4265 = vst [vmem:[%s8863_s19 + $0x1e00] sm:$0xff] %v3241_v58  ;;  %v3260_v22 = vadd.f32 %v8835_v36, %v13890_v49  ;;  %v3261_v50 = vadd.f32 %v8835_v36, %v13891_v9  ;;  %v13892_v58 = vld [vmem:[#allocation959_spill] sm:$0xff]  ;;  %v13895_v30 = vld [vmem:[#allocation962_spill] sm:$0xff] }
 0x457   : > { %4266 = vst [vmem:[%s8863_s19 + $0x1e08] sm:$0xff] %v3242_v2  ;;  %4267 = vst [vmem:[%s8863_s19 + $0x1e10] sm:$0xff] %v3243_v29  ;;  %v3264_v19 = vadd.f32 %v8835_v36, %v13892_v58  ;;  %v13893_v2 = vld [vmem:[#allocation960_spill] sm:$0xff]  ;;  %v13894_v29 = vld [vmem:[#allocation961_spill] sm:$0xff]  ;;  %v3267_v21 = vadd.f32 %v8835_v36, %v13895_v30  ;;  %v3290_v58 = vadd.f32 %v8835_v36, %v8790_v10 }
 0x458   : > { %4268 = vst [vmem:[%s8863_s19 + $0x1e18] sm:$0xff] %v3244_v31  ;;  %4269 = vst [vmem:[%s8863_s19 + $0x1e20] sm:$0xff] %v3245_v37  ;;  %v3265_v24 = vadd.f32 %v8835_v36, %v13893_v2  ;;  %v3266_v4 = vadd.f32 %v8835_v36, %v13894_v29  ;;  %v13896_v31 = vld [vmem:[#allocation963_spill] sm:$0xff]  ;;  %v13897_v37 = vld [vmem:[#allocation964_spill] sm:$0xff]  ;;  %v3294_v10 = vadd.f32 %v8835_v36, %v8802_v18 }
 0x459   : > { %4270 = vst [vmem:[%s8863_s19 + $0x1e28] sm:$0xff] %v3246_v39  ;;  %4271 = vst [vmem:[%s8863_s19 + $0x1e30] sm:$0xff] %v3247_v45  ;;  %v3268_v32 = vadd.f32 %v8835_v36, %v13896_v31  ;;  %v3269_v38 = vadd.f32 %v8835_v36, %v13897_v37  ;;  %v3270_v39 = vadd.f32 %v8835_v36, %v8715_v25  ;;  %v13898_v40 = vld [vmem:[#allocation965_spill] sm:$0xff]  ;;  %v13899_v46 = vld [vmem:[#allocation966_spill] sm:$0xff] }
 0x45a   : > { %4272 = vst [vmem:[%s8863_s19 + $0x1e38] sm:$0xff] %v3248_v47  ;;  %4273 = vst [vmem:[%s8863_s19 + $0x1e40] sm:$0xff] %v3249_v53  ;;  %v3271_v45 = vadd.f32 %v8835_v36, %v13898_v40  ;;  %v3272_v47 = vadd.f32 %v8835_v36, %v13899_v46  ;;  %v13900_v48 = vld [vmem:[#allocation967_spill] sm:$0xff]  ;;  %v3274_v25 = vadd.f32 %v8835_v36, %v8730_v12 }
 0x45b   : > { %4274 = vst [vmem:[%s8863_s19 + $0x1e48] sm:$0xff] %v3250_v54  ;;  %4275 = vst [vmem:[%s8863_s19 + $0x1e50] sm:$0xff] %v3251_v56  ;;  %v3273_v53 = vadd.f32 %v8835_v36, %v13900_v48  ;;  %v13901_v54 = vld [vmem:[#allocation968_spill] sm:$0xff]  ;;  %v13902_v56 = vld [vmem:[#allocation969_spill] sm:$0xff]  ;;  %v3297_v2 = vadd.f32 %v8835_v36, %v8811_v28  ;;  %v3299_v18 = vadd.f32 %v8835_v36, %v8817_v34 }
 0x45c   : > { %4276 = vst [vmem:[%s8863_s19 + $0x1e58] sm:$0xff] %v3252_v62  ;;  %4277 = vst [vmem:[%s8863_s19 + $0x1e60] sm:$0xff] %v3253_v0  ;;  %v3275_v55 = vadd.f32 %v8835_v36, %v13901_v54  ;;  %v3276_v61 = vadd.f32 %v8835_v36, %v13902_v56  ;;  %v13903_v62 = vld [vmem:[#allocation970_spill] sm:$0xff]  ;;  %v13904_v0 = vld [vmem:[#allocation971_spill] sm:$0xff]  ;;  %v3302_v28 = vadd.f32 %v8835_v36, %v8826_v44 }
 0x45d   : > { %4278 = vst [vmem:[%s8863_s19 + $0x1e68] sm:$0xff] %v3254_v23  ;;  %4279 = vst [vmem:[%s8863_s19 + $0x1e70] sm:$0xff] %v3255_v6  ;;  %v3277_v63 = vadd.f32 %v8835_v36, %v13903_v62  ;;  %v3278_v12 = vadd.f32 %v8835_v36, %v13904_v0  ;;  %v13905_v23 = vld [vmem:[#allocation972_spill] sm:$0xff]  ;;  %v13906_v6 = vld [vmem:[#allocation973_spill] sm:$0xff]  ;;  %v3304_v34 = vadd.f32 %v8835_v36, %v8832_v41 }
 0x45e   : > { %4280 = vst [vmem:[%s8863_s19 + $0x1e78] sm:$0xff] %v3256_v8  ;;  %4281 = vst [vmem:[%s8863_s19 + $0x1e80] sm:$0xff] %v3257_v14  ;;  %v3279_v5 = vadd.f32 %v8835_v36, %v13905_v23  ;;  %v3280_v7 = vadd.f32 %v8835_v36, %v13906_v6  ;;  %v13907_v8 = vld [vmem:[#allocation974_spill] sm:$0xff]  ;;  %v3282_v14 = vadd.f32 %v8835_v36, %v8760_v35 }
 0x45f   : > { %4282 = vst [vmem:[%s8863_s19 + $0x1e88] sm:$0xff] %v3258_v52  ;;  %4283 = vst [vmem:[%s8863_s19 + $0x1e90] sm:$0xff] %v3259_v16  ;;  %v3281_v13 = vadd.f32 %v8835_v36, %v13907_v8  ;;  %v13908_v52 = vld [vmem:[#allocation975_spill] sm:$0xff]  ;;  %v13909_v16 = vld [vmem:[#allocation976_spill] sm:$0xff]  ;;  %v3286_v35 = vadd.f32 %v8835_v36, %v8775_v57 }
 0x460   : > { %4284 = vst [vmem:[%s8863_s19 + $0x1e98] sm:$0xff] %v3260_v22  ;;  %4285 = vst [vmem:[%s8863_s19 + $0x1ea0] sm:$0xff] %v3261_v50  ;;  %v3283_v15 = vadd.f32 %v8835_v36, %v13908_v52  ;;  %v3284_v49 = vadd.f32 %v8835_v36, %v13909_v16  ;;  %v13910_v22 = vld [vmem:[#allocation977_spill] sm:$0xff]  ;;  %v3287_v50 = vadd.f32 %v8835_v36, %v8778_v26 }
 0x461   : > { %4286 = vst [vmem:[%s8863_s19 + $0x1ea8] sm:$0xff] %v3262_v60  ;;  %4287 = vst [vmem:[%s8863_s19 + $0x1eb0] sm:$0xff] %v3263_v17  ;;  %v3285_v9 = vadd.f32 %v8835_v36, %v13910_v22  ;;  %v3288_v60 = vadd.f32 %v8835_v36, %v8781_v1  ;;  %v13911_v17 = vld [vmem:[#allocation978_spill] sm:$0xff]  ;;  %v3291_v26 = vadd.f32 %v8835_v36, %v8793_v59 }
 0x462   : > { %4288 = vst [vmem:[%s8863_s19 + $0x1eb8] sm:$0xff] %v3264_v19  ;;  %4289 = vst [vmem:[%s8863_s19 + $0x1ec0] sm:$0xff] %v3265_v24  ;;  %v3289_v57 = vadd.f32 %v8835_v36, %v13911_v17  ;;  %v3292_v1 = vadd.f32 %v8835_v36, %v8796_v11  ;;  %v3293_v19 = vadd.f32 %v8835_v36, %v8799_v27 }
 0x463   : > { %4290 = vst [vmem:[%s8863_s19 + $0x1ec8] sm:$0xff] %v3266_v4  ;;  %4291 = vst [vmem:[%s8863_s19 + $0x1ed0] sm:$0xff] %v3267_v21  ;;  %v3295_v59 = vadd.f32 %v8835_v36, %v8805_v20  ;;  %v3296_v11 = vadd.f32 %v8835_v36, %v8808_v3  ;;  %v3298_v27 = vadd.f32 %v8835_v36, %v8814_v33 }
 0x464   : > { %4292 = vst [vmem:[%s8863_s19 + $0x1ed8] sm:$0xff] %v3268_v32  ;;  %4293 = vst [vmem:[%s8863_s19 + $0x1ee0] sm:$0xff] %v3269_v38  ;;  %v3300_v3 = vadd.f32 %v8835_v36, %v8820_v42  ;;  %v3301_v20 = vadd.f32 %v8835_v36, %v8823_v43  ;;  %v3303_v33 = vadd.f32 %v8835_v36, %v8829_v51 }
 0x465   : > { %4294 = vst [vmem:[%s8863_s19 + $0x1ee8] sm:$0xff] %v3270_v39  ;;  %4295 = vst [vmem:[%s8863_s19 + $0x1ef0] sm:$0xff] %v3271_v45 }
 0x466   : > { %4296 = vst [vmem:[%s8863_s19 + $0x1ef8] sm:$0xff] %v3272_v47  ;;  %4297 = vst [vmem:[%s8863_s19 + $0x1f00] sm:$0xff] %v3273_v53 }
 0x467   : > { %4298 = vst [vmem:[%s8863_s19 + $0x1f08] sm:$0xff] %v3274_v25  ;;  %4299 = vst [vmem:[%s8863_s19 + $0x1f10] sm:$0xff] %v3275_v55 }
 0x468   : > { %4300 = vst [vmem:[%s8863_s19 + $0x1f18] sm:$0xff] %v3276_v61  ;;  %4301 = vst [vmem:[%s8863_s19 + $0x1f20] sm:$0xff] %v3277_v63 }
 0x469   : > { %4302 = vst [vmem:[%s8863_s19 + $0x1f28] sm:$0xff] %v3278_v12  ;;  %4303 = vst [vmem:[%s8863_s19 + $0x1f30] sm:$0xff] %v3279_v5 }
 0x46a   : > { %4304 = vst [vmem:[%s8863_s19 + $0x1f38] sm:$0xff] %v3280_v7  ;;  %4305 = vst [vmem:[%s8863_s19 + $0x1f40] sm:$0xff] %v3281_v13 }
 0x46b   : > { %4306 = vst [vmem:[%s8863_s19 + $0x1f48] sm:$0xff] %v3282_v14  ;;  %4307 = vst [vmem:[%s8863_s19 + $0x1f50] sm:$0xff] %v3283_v15 }
 0x46c   : > { %4308 = vst [vmem:[%s8863_s19 + $0x1f58] sm:$0xff] %v3284_v49  ;;  %4309 = vst [vmem:[%s8863_s19 + $0x1f60] sm:$0xff] %v3285_v9 }
 0x46d   : > { %4310 = vst [vmem:[%s8863_s19 + $0x1f68] sm:$0xff] %v3286_v35  ;;  %4311 = vst [vmem:[%s8863_s19 + $0x1f70] sm:$0xff] %v3287_v50 }
 0x46e   : > { %4312 = vst [vmem:[%s8863_s19 + $0x1f78] sm:$0xff] %v3288_v60  ;;  %4313 = vst [vmem:[%s8863_s19 + $0x1f80] sm:$0xff] %v3289_v57 }
 0x46f   : > { %4314 = vst [vmem:[%s8863_s19 + $0x1f88] sm:$0xff] %v3290_v58  ;;  %4315 = vst [vmem:[%s8863_s19 + $0x1f90] sm:$0xff] %v3291_v26 }
 0x470   : > { %4316 = vst [vmem:[%s8863_s19 + $0x1f98] sm:$0xff] %v3292_v1  ;;  %4317 = vst [vmem:[%s8863_s19 + $0x1fa0] sm:$0xff] %v3293_v19 }
 0x471   : > { %4318 = vst [vmem:[%s8863_s19 + $0x1fa8] sm:$0xff] %v3294_v10  ;;  %4319 = vst [vmem:[%s8863_s19 + $0x1fb0] sm:$0xff] %v3295_v59 }
 0x472   : > { %4320 = vst [vmem:[%s8863_s19 + $0x1fb8] sm:$0xff] %v3296_v11  ;;  %4321 = vst [vmem:[%s8863_s19 + $0x1fc0] sm:$0xff] %v3297_v2 }
 0x473   : > { %4322 = vst [vmem:[%s8863_s19 + $0x1fc8] sm:$0xff] %v3298_v27  ;;  %4323 = vst [vmem:[%s8863_s19 + $0x1fd0] sm:$0xff] %v3299_v18 }
 0x474   : > { %4324 = vst [vmem:[%s8863_s19 + $0x1fd8] sm:$0xff] %v3300_v3  ;;  %4325 = vst [vmem:[%s8863_s19 + $0x1fe0] sm:$0xff] %v3301_v20 }
 0x475   : > { %4326 = vst [vmem:[%s8863_s19 + $0x1fe8] sm:$0xff] %v3302_v28  ;;  %4327 = vst [vmem:[%s8863_s19 + $0x1ff0] sm:$0xff] %v3303_v33 }
 0x476   : > { %4328 = vst [vmem:[%s8863_s19 + $0x1ff8] sm:$0xff] %v3304_v34 }
 0x477   : > { %4532 = shalt.err (!%p4529_p10)
}
 0x478   : > { %s4533_s12 = scalar_lea.hbm %s11898_s26, 131072  ;;  %s4537_s13 = scalar_lea.hbm %s11967_s4, 262144 }
 0x479   : > { %p4534_p0 = scmp.ne.s32.totalorder %s11898_s26, %s4533_s12  ;;  %p4538_p1 = scmp.lt.s32.totalorder %s11898_s26, %s11967_s4 }
 0x47a   : > { %p4539_p3 = scmp.lt.s32.totalorder %s4537_s13, %s4533_s12 }
 0x47b   : > { %p4535_p2 = pnand %p4534_p0, %p13912_p12 }
 0x47c   : > { %p4540_p6 = por %p4539_p3, %p4538_p1 }
 0x47d   : > { %p4536_p9 = pneg %p4535_p2 }
 0x47f   : > { %p4541_p11 = pnand %p4540_p6, %p4536_p9 }
 0x481   : > { %4544 = shalt.err (!%p4541_p11)
}
 0x482   : > { %s4589_s15 = smov 512   ;;  %s4590_s17 = smov 32  }
 0x483   : > { %4441 = dma.vmem_to_hbm [thread:$0]  (%p13912_p12), %s11900_s1, 131072, %s11898_s26, %s4330_s28, %s4589_s15, %s4589_s15, %s4590_s17  }
 0x484 PF: > { %s4359_s18 = sand.u32 1, %s4571_s21   ;;  %p13913_p13 = scmp.ne.s32.totalorder %s11973_s5, 0 }
 0x485   : > { %p13914_p4 = scmp.ge.s32.totalorder %s4583_s24, 2  ;;  %s4360_s19 = scalar_lea.sflag [#allocation7], %s4359_s18 }
 0x487   : > { %p4448_p5 = pnand %p13914_p4, %p13913_p13 }
 0x489   : > { %p4449_p7 = pneg %p4448_p5 }
 0x48b   : > { %4566 = dma.done.wait (%p4449_p7), %s4360_s19, 131072  }
 0x48c   : > { %4568 = vsyncadd (%p4449_p7), %s4360_s19, 4294836224  ;;  %p20_p8 = scmp.ge.s32.totalorder %s4650_s2, 4   ;;  %s13915_s21 = smov %s4575_s22 }
 0x48d   : > { %s13916_s22 = smov %s4579_s23  ;;  %s13917_s23 = smov %s4662_s27 }
 0x48e   : > { %s13918_s24 = smov %s4650_s2  ;;  %22 = sbr.rel (!%p20_p8) target bundleno = 9 (0x9), region = 81 }
 0x493   :  { %4365 = vsyncpa [#allocation6], 1 }
 0x494   :  { %4367 = vsyncpa [#allocation6 + $0x1], 1 }
 0x495   :  { %4368 = vsyncpa [#allocation7], 1 }
 0x496   :  { %4370 = vsyncpa [#allocation7 + $0x1], 1 }

</bundles_post_ra>
